<compile_context>
chip_gen: v7x
topology: tpu7x:2x2x1
jax: 0.10.0
libtpu: 0.0.40
codegen_flags: <defaults>
</compile_context>

<pallas_src>
import functools
import math

import jax
import jax.numpy as jnp
from jax.experimental import pallas as pl
from jax.experimental.pallas import tpu as pltpu


# ------------------------------ model config -------------------------------

IMAGE_SIZE = 16
PATCH_SIZE = 2            # -> (16/2)^2 = 64 patches (> MIN_NUM_PATCHES = 16)
NUM_CLASSES = 10
DIM = 32
DEPTH = 2
HEADS = 4
DIM_HEAD = 8
MLP_DIM = 64
CHANNELS = 3
BATCH = 2

NUM_PATCHES = (IMAGE_SIZE // PATCH_SIZE) ** 2
N_TOK = NUM_PATCHES + 1                    # sequence length incl. cls token (65)
N_PAD = ((N_TOK + 7) // 8) * 8             # 72: sublane-aligned per-batch block
PATCH_DIM = CHANNELS * PATCH_SIZE ** 2     # 12
INNER_DIM = DIM_HEAD * HEADS               # 32
# NOTE: the reference Attention uses dim**-0.5 (NOT dim_head**-0.5); keep it.
ATTN_SCALE = DIM ** (-0.5)
LANE_PAD = 128                             # lane-dense width for head output / vec slab
_INV_SQRT2 = 1.0 / math.sqrt(2.0)

# Packed vector-parameter slab layout (rows of a (VEC_ROWS, 128) f32 array).
_VROWS_PER_LAYER = 7      # ln1_g, ln1_b, out_b, ln2_g, ln2_b, ff1_b, ff2_b
VEC_ROWS = DEPTH * _VROWS_PER_LAYER + 3    # + hln_g, hln_b, head_b


# ----------------------------- fused Pallas kernel --------------------------

def _vit_forward_kernel(patches_ref, posb_ref, patch_w_ref, qkv_w_ref,
                        out_w_ref, ff1_w_ref, ff2_w_ref, head_w_ref, vecs_ref,
                        o_ref, *, batch):
    f32, bf16 = jnp.float32, jnp.bfloat16

    def mm(a, w):
        # MXU matmul: bf16 operands, f32 accumulation.
        return jnp.dot(a.astype(bf16), w.astype(bf16), preferred_element_type=f32)

    def vec(r, width):
        # Static-row slice of the packed vector-parameter slab.
        return vecs_ref[r:r + 1, 0:width]                        # (1, width) f32

    def layernorm(x, g, b):
        # LayerNorm over last dim, eps=1e-5 (PyTorch default), f32 math.
        mu = jnp.mean(x, axis=-1, keepdims=True)
        var = jnp.mean((x - mu) ** 2, axis=-1, keepdims=True)
        return (x - mu) * jax.lax.rsqrt(var + 1e-5) * g + b

    def gelu(x):
        # Exact (erf-based) GELU, matching torch nn.GELU().
        return 0.5 * x * (1.0 + jax.lax.erf(x * _INV_SQRT2))

    # ---- patch embedding; cls token / pos embedding / patch bias are folded
    # into posb -> a single matmul + add over the whole batch at once ----
    x = mm(patches_ref[...], patch_w_ref[...]) + posb_ref[...]   # (B*N_PAD, DIM)

    # ---- transformer layers (statically unrolled) ----
    for l in range(DEPTH):
        base = l * _VROWS_PER_LAYER

        # Residual(PreNorm(Attention)); QKV is bias-free; attn scale pre-folded
        # into the Q columns of qkv_w.
        y = layernorm(x, vec(base + 0, DIM), vec(base + 1, DIM))
        qkv = mm(y, qkv_w_ref[l])                                # (B*N_PAD, 3*INNER_DIM)

        out_w_l = out_w_ref[l]                                   # (INNER_DIM, DIM) f32
        w_head = [out_w_l[h * DIM_HEAD:(h + 1) * DIM_HEAD, :].astype(bf16)
                  for h in range(HEADS)]                         # hoisted: cast once/layer

        attn_parts = []
        for b in range(batch):                                   # static; 72-row aligned blocks
            blk = qkv[b * N_PAD:(b + 1) * N_PAD, :]              # (N_PAD, 3*INNER_DIM)
            kv = blk[0:N_TOK, :]                                 # keys/values: real tokens only
            acc = jnp.zeros((N_PAD, DIM), f32)
            for h in range(HEADS):                               # static head loop, all in VMEM
                q = blk[:, h * DIM_HEAD:(h + 1) * DIM_HEAD]                          # (N_PAD, Dh)
                k = kv[:, INNER_DIM + h * DIM_HEAD:INNER_DIM + (h + 1) * DIM_HEAD]   # (N_TOK, Dh)
                v = kv[:, 2 * INNER_DIM + h * DIM_HEAD:2 * INNER_DIM + (h + 1) * DIM_HEAD]
                dots = jax.lax.dot_general(
                    q.astype(bf16), k.astype(bf16),
                    (((1,), (1,)), ((), ())),
                    preferred_element_type=f32)                  # (N_PAD, N_TOK); scale folded
                e = jnp.exp(dots - jnp.max(dots, axis=-1, keepdims=True))
                attn = e * pl.reciprocal(jnp.sum(e, axis=-1, keepdims=True), approx=True)
                o_h = mm(attn, v)                                # (N_PAD, Dh)
                # Per-head slice of the output projection == concat-heads @ W.
                acc = acc + jnp.dot(o_h.astype(bf16), w_head[h],
                                    preferred_element_type=f32)
            attn_parts.append(acc)
        attn_out = (jnp.concatenate(attn_parts, axis=0) if batch > 1
                    else attn_parts[0])                          # (B*N_PAD, DIM), aligned concat
        x = x + attn_out + vec(base + 2, DIM)

        # Residual(PreNorm(FeedForward))
        y = layernorm(x, vec(base + 3, DIM), vec(base + 4, DIM))
        y = gelu(mm(y, ff1_w_ref[l]) + vec(base + 5, MLP_DIM))
        x = x + mm(y, ff2_w_ref[l]) + vec(base + 6, DIM)

    # ---- classification head on each batch's cls row (lane-dense 128 slab) ----
    hbase = DEPTH * _VROWS_PER_LAYER
    o_ref[...] = jnp.zeros_like(o_ref)
    for b in range(batch):
        cls_b = layernorm(x[b * N_PAD:b * N_PAD + 1, :],
                          vec(hbase + 0, DIM), vec(hbase + 1, DIM))   # (1, DIM)
        o_ref[b:b + 1, :] = mm(cls_b, head_w_ref[...]) + vec(hbase + 2, LANE_PAD)


# ------------------------------ parameters ---------------------------------

def init_params(key):
    """Raw f32 parameters, matching the torch module's parameterization."""
    ks = iter(jax.random.split(key, 16))

    def nrm(shape, scale=0.02):
        return scale * jax.random.normal(next(ks), shape, dtype=jnp.float32)

    return {
        "pos": jax.random.normal(next(ks), (N_TOK, DIM), dtype=jnp.float32),
        "cls": jax.random.normal(next(ks), (1, DIM), dtype=jnp.float32),
        "patch_w": nrm((PATCH_DIM, DIM)),
        "patch_b": nrm((1, DIM)),
        "ln1_g": jnp.ones((DEPTH, 1, DIM), jnp.float32),
        "ln1_b": jnp.zeros((DEPTH, 1, DIM), jnp.float32),
        "qkv_w": nrm((DEPTH, DIM, 3 * INNER_DIM)),
        "out_w": nrm((DEPTH, INNER_DIM, DIM)),
        "out_b": nrm((DEPTH, 1, DIM)),
        "ln2_g": jnp.ones((DEPTH, 1, DIM), jnp.float32),
        "ln2_b": jnp.zeros((DEPTH, 1, DIM), jnp.float32),
        "ff1_w": nrm((DEPTH, DIM, MLP_DIM)),
        "ff1_b": nrm((DEPTH, 1, MLP_DIM)),
        "ff2_w": nrm((DEPTH, MLP_DIM, DIM)),
        "ff2_b": nrm((DEPTH, 1, DIM)),
        "hln_g": jnp.ones((1, DIM), jnp.float32),
        "hln_b": jnp.zeros((1, DIM), jnp.float32),
        "head_w": nrm((DIM, NUM_CLASSES)),
        "head_b": nrm((1, NUM_CLASSES)),
    }


def prepare_kernel_params(p):
    """One-time folds + packing of the raw params into kernel-ready arrays."""
    f32, bf16 = jnp.float32, jnp.bfloat16

    # Fold cls token and the patch-embedding bias into the positional table
    # (exact in f32: the dummy zero patch row makes the bias-free emb[0] == 0).
    posb = p["pos"] + p["patch_b"]                               # (N_TOK, DIM)
    posb = posb.at[0, :].set(p["pos"][0] + p["cls"][0])
    posb = jnp.concatenate(
        [posb, jnp.zeros((N_PAD - N_TOK, DIM), f32)], axis=0)    # (N_PAD, DIM)
    posb = jnp.tile(posb, (BATCH, 1))                            # (BATCH*N_PAD, DIM)

    # Fold the attention scale into the Q columns of qkv_w (f32, pre-cast).
    qkv_w = p["qkv_w"].at[:, :, :INNER_DIM].multiply(ATTN_SCALE)

    # Pack every small vector parameter into one lane-padded f32 slab.
    def row(v, width):
        r = jnp.zeros((1, LANE_PAD), f32)
        return r.at[0, :width].set(jnp.reshape(v, (-1,)).astype(f32))

    rows = []
    for l in range(DEPTH):
        rows += [row(p["ln1_g"][l], DIM), row(p["ln1_b"][l], DIM),
                 row(p["out_b"][l], DIM),
                 row(p["ln2_g"][l], DIM), row(p["ln2_b"][l], DIM),
                 row(p["ff1_b"][l], MLP_DIM), row(p["ff2_b"][l], DIM)]
    rows += [row(p["hln_g"], DIM), row(p["hln_b"], DIM),
             row(p["head_b"], NUM_CLASSES)]
    vecs = jnp.concatenate(rows, axis=0)
    assert vecs.shape == (VEC_ROWS, LANE_PAD)

    head_w = jnp.zeros((DIM, LANE_PAD), f32).at[:, :NUM_CLASSES].set(p["head_w"])

    return {
        "posb": posb,                          # f32 (B*N_PAD, DIM)
        "patch_w": p["patch_w"].astype(bf16),  # bf16 (PATCH_DIM, DIM)
        "qkv_w": qkv_w.astype(bf16),           # bf16 (DEPTH, DIM, 3*INNER_DIM), Q pre-scaled
        "out_w": p["out_w"],                   # f32 (DEPTH, INNER_DIM, DIM): sliced per head
        "ff1_w": p["ff1_w"].astype(bf16),
        "ff2_w": p["ff2_w"].astype(bf16),
        "head_w": head_w.astype(bf16),         # bf16 (DIM, 128), zero-padded lanes
        "vecs": vecs,                          # f32 (VEC_ROWS, 128) packed vector params
    }


# ------------------------------ forward pass --------------------------------

def vit2_forward(img, kp):
    # img layout: NCHW float32.  mask=None path, dropout p=0.0.
    B, C, H, W = img.shape
    ps = PATCH_SIZE
    h, w = H // ps, W // ps
    assert kp["posb"].shape[0] == B * N_PAD, "kernel params built for a different batch size"

    # rearrange 'b c (h p1) (w p2) -> b (h w) (p1 p2 c)'  (layout plumbing only)
    x = img.reshape(B, C, h, ps, w, ps)
    x = jnp.transpose(x, (0, 2, 4, 3, 5, 1)).reshape(B, h * w, PATCH_DIM)
    # Row 0 of each batch block: zero dummy slot for the cls token (the cls /
    # pos / bias fold lives in posb).  Rows N_TOK..N_PAD-1: alignment padding.
    patches = jnp.concatenate(
        [jnp.zeros((B, 1, PATCH_DIM), jnp.float32),
         x.astype(jnp.float32),
         jnp.zeros((B, N_PAD - N_TOK, PATCH_DIM), jnp.float32)], axis=1)
    patches = patches.reshape(B * N_PAD, PATCH_DIM)              # one contiguous block

    inputs = (patches, kp["posb"], kp["patch_w"], kp["qkv_w"], kp["out_w"],
              kp["ff1_w"], kp["ff2_w"], kp["head_w"], kp["vecs"])

    def full_block(a):
        zeros = (0,) * a.ndim
        return pl.BlockSpec(a.shape, lambda i, _z=zeros: _z)     # whole array, one DMA

    # Single grid step: whole (padded) batch resident in VMEM (~0.2 MiB total).
    # TODO(synk): on v7x, benchmark a grid=(B,) "parallel" variant (one batch
    # element per TensorCore) against this merged single-step variant.
    out = pl.pallas_call(
        functools.partial(_vit_forward_kernel, batch=B),
        out_shape=jax.ShapeDtypeStruct((8, LANE_PAD), jnp.float32),
        grid=(1,),
        in_specs=[full_block(a) for a in inputs],
        out_specs=pl.BlockSpec((8, LANE_PAD), lambda i: (0, 0)),
        compiler_params=pltpu.CompilerParams(
            dimension_semantics=("arbitrary",)),
    )(*inputs)

    return out[:B, :NUM_CLASSES]                                 # (B, NUM_CLASSES)


# ------------------------- pure-JAX f32 reference ---------------------------

def vit2_reference(img, params):
    B, C, H, W = img.shape
    ps = PATCH_SIZE
    h, w = H // ps, W // ps
    x = img.reshape(B, C, h, ps, w, ps).transpose(0, 2, 4, 3, 5, 1).reshape(B, h * w, PATCH_DIM)
    x = x @ params["patch_w"] + params["patch_b"][0]
    cls = jnp.broadcast_to(params["cls"][None], (B, 1, DIM))
    x = jnp.concatenate([cls, x], axis=1) + params["pos"][None]

    def ln(t, g, b):
        m = t.mean(-1, keepdims=True)
        v = ((t - m) ** 2).mean(-1, keepdims=True)
        return (t - m) * jax.lax.rsqrt(v + 1e-5) * g + b

    for l in range(DEPTH):
        y = ln(x, params["ln1_g"][l], params["ln1_b"][l])
        qkv = y @ params["qkv_w"][l]
        q, k, v = jnp.split(qkv, 3, axis=-1)
        sh = lambda t: t.reshape(B, N_TOK, HEADS, DIM_HEAD).transpose(0, 2, 1, 3)
        q, k, v = sh(q), sh(k), sh(v)
        dots = jnp.einsum("bhid,bhjd->bhij", q, k) * ATTN_SCALE
        attn = jax.nn.softmax(dots, axis=-1)
        o = jnp.einsum("bhij,bhjd->bhid", attn, v)
        o = o.transpose(0, 2, 1, 3).reshape(B, N_TOK, INNER_DIM)
        x = x + (o @ params["out_w"][l] + params["out_b"][l])
        y = ln(x, params["ln2_g"][l], params["ln2_b"][l])
        hdn = y @ params["ff1_w"][l] + params["ff1_b"][l]
        hdn = 0.5 * hdn * (1.0 + jax.lax.erf(hdn * _INV_SQRT2))
        x = x + (hdn @ params["ff2_w"][l] + params["ff2_b"][l])

    c = ln(x[:, 0], params["hln_g"], params["hln_b"])
    return c @ params["head_w"] + params["head_b"][0]


# ----------------------------------- main -----------------------------------

if __name__ == "__main__":
    key = jax.random.PRNGKey(0)
    pkey, xkey = jax.random.split(key)
    params = init_params(pkey)
    kparams = prepare_kernel_params(params)
    img = jax.random.normal(xkey, (BATCH, CHANNELS, IMAGE_SIZE, IMAGE_SIZE),
                            dtype=jnp.float32)

    logits = jax.jit(vit2_forward)(img, kparams)
    jax.block_until_ready(logits)

    assert logits.shape == (BATCH, NUM_CLASSES)
    assert bool(jnp.all(jnp.isfinite(logits)))

    # Loose check vs a pure-JAX f32 reference (kernel uses bf16 MXU operands,
    # approx softmax reciprocal, and f32 constant folds).
    ref = vit2_reference(img, params)
    max_err = float(jnp.max(jnp.abs(logits - ref)))
    assert max_err < 5e-2, f"mismatch vs reference: {max_err}"

    print("KERNEL_OK")
</pallas_src>

<mosaic_0001>
module attributes {stable_mosaic.version = 11 : i64} {
  func.func @_vit_forward_kernel(%arg0: i32, %arg1: memref<144x12xf32, #tpu.memory_space<vmem>>, %arg2: memref<144x32xf32, #tpu.memory_space<vmem>>, %arg3: memref<12x32xbf16, #tpu.memory_space<vmem>>, %arg4: memref<2x32x96xbf16, #tpu.memory_space<vmem>>, %arg5: memref<2x32x32xf32, #tpu.memory_space<vmem>>, %arg6: memref<2x32x64xbf16, #tpu.memory_space<vmem>>, %arg7: memref<2x64x32xbf16, #tpu.memory_space<vmem>>, %arg8: memref<32x128xbf16, #tpu.memory_space<vmem>>, %arg9: memref<17x128xf32, #tpu.memory_space<vmem>>, %arg10: memref<8x128xf32, #tpu.memory_space<vmem>>) attributes {dimension_semantics = [#tpu.dimension_semantics<arbitrary>], iteration_bounds = array<i64: 1>, scalar_prefetch = 0 : i64, scratch_operands = 0 : i64, tpu.core_type = #tpu.core_type<tc>, window_params = [{pipeline_mode = #tpu.pipeline_mode<synchronous>, transform_indices = @transform_0, window_bounds = array<i64: 144, 12>}, {pipeline_mode = #tpu.pipeline_mode<synchronous>, transform_indices = @transform_1, window_bounds = array<i64: 144, 32>}, {pipeline_mode = #tpu.pipeline_mode<synchronous>, transform_indices = @transform_2, window_bounds = array<i64: 12, 32>}, {pipeline_mode = #tpu.pipeline_mode<synchronous>, transform_indices = @transform_3, window_bounds = array<i64: 2, 32, 96>}, {pipeline_mode = #tpu.pipeline_mode<synchronous>, transform_indices = @transform_4, window_bounds = array<i64: 2, 32, 32>}, {pipeline_mode = #tpu.pipeline_mode<synchronous>, transform_indices = @transform_5, window_bounds = array<i64: 2, 32, 64>}, {pipeline_mode = #tpu.pipeline_mode<synchronous>, transform_indices = @transform_6, window_bounds = array<i64: 2, 64, 32>}, {pipeline_mode = #tpu.pipeline_mode<synchronous>, transform_indices = @transform_7, window_bounds = array<i64: 32, 128>}, {pipeline_mode = #tpu.pipeline_mode<synchronous>, transform_indices = @transform_8, window_bounds = array<i64: 17, 128>}, {pipeline_mode = #tpu.pipeline_mode<synchronous>, transform_indices = @transform_9, window_bounds = array<i64: 8, 128>}]} {
    %c0 = arith.constant 0 : index
    %c0_0 = arith.constant 0 : index
    %0 = vector.load %arg1[%c0, %c0_0] : memref<144x12xf32, #tpu.memory_space<vmem>>, vector<144x12xf32>
    %c0_1 = arith.constant 0 : index
    %c0_2 = arith.constant 0 : index
    %1 = vector.load %arg3[%c0_1, %c0_2] : memref<12x32xbf16, #tpu.memory_space<vmem>>, vector<12x32xbf16>
    %2 = arith.truncf %0 : vector<144x12xf32> to vector<144x12xbf16>
    %cst = arith.constant dense<0.000000e+00> : vector<144x32xf32>
    %3 = tpu.matmul %2, %1, %cst {dimension_numbers = #tpu.dot_dimension_numbers<[1], [0], [0], [1], [0, 0, 1, 1], [], []>} : vector<144x12xbf16>, vector<12x32xbf16>, vector<144x32xf32> -> vector<144x32xf32>
    %c0_3 = arith.constant 0 : index
    %c0_4 = arith.constant 0 : index
    %4 = vector.load %arg2[%c0_3, %c0_4] : memref<144x32xf32, #tpu.memory_space<vmem>>, vector<144x32xf32>
    %5 = arith.addf %3, %4 : vector<144x32xf32>
    %c0_5 = arith.constant 0 : index
    %c0_6 = arith.constant 0 : index
    %6 = vector.load %arg9[%c0_5, %c0_6] : memref<17x128xf32, #tpu.memory_space<vmem>>, vector<1x32xf32>
    %c1 = arith.constant 1 : index
    %c0_7 = arith.constant 0 : index
    %7 = vector.load %arg9[%c1, %c0_7] : memref<17x128xf32, #tpu.memory_space<vmem>>, vector<1x32xf32>
    %cst_8 = arith.constant dense<0.000000e+00> : vector<144xf32>
    %8 = vector.multi_reduction <add>, %5, %cst_8 [1] : vector<144x32xf32> to vector<144xf32>
    %9 = vector.shape_cast %8 : vector<144xf32> to vector<144x1xf32>
    %cst_9 = arith.constant 3.200000e+01 : f32
    %10 = vector.broadcast %cst_9 : f32 to vector<144x1xf32>
    %11 = arith.divf %9, %10 : vector<144x1xf32>
    %12 = vector.broadcast %11 : vector<144x1xf32> to vector<144x32xf32>
    %13 = arith.subf %5, %12 : vector<144x32xf32>
    %14 = arith.mulf %13, %13 : vector<144x32xf32>
    %cst_10 = arith.constant dense<0.000000e+00> : vector<144xf32>
    %15 = vector.multi_reduction <add>, %14, %cst_10 [1] : vector<144x32xf32> to vector<144xf32>
    %16 = vector.shape_cast %15 : vector<144xf32> to vector<144x1xf32>
    %cst_11 = arith.constant 3.200000e+01 : f32
    %17 = vector.broadcast %cst_11 : f32 to vector<144x1xf32>
    %18 = arith.divf %16, %17 : vector<144x1xf32>
    %19 = vector.broadcast %11 : vector<144x1xf32> to vector<144x32xf32>
    %20 = arith.subf %5, %19 : vector<144x32xf32>
    %cst_12 = arith.constant 9.99999974E-6 : f32
    %21 = vector.broadcast %cst_12 : f32 to vector<144x1xf32>
    %22 = arith.addf %18, %21 : vector<144x1xf32>
    %23 = math.rsqrt %22 : vector<144x1xf32>
    %24 = vector.broadcast %23 : vector<144x1xf32> to vector<144x32xf32>
    %25 = arith.mulf %20, %24 : vector<144x32xf32>
    %26 = vector.broadcast %6 : vector<1x32xf32> to vector<144x32xf32>
    %27 = arith.mulf %25, %26 : vector<144x32xf32>
    %28 = vector.broadcast %7 : vector<1x32xf32> to vector<144x32xf32>
    %29 = arith.addf %27, %28 : vector<144x32xf32>
    %c0_13 = arith.constant 0 : index
    %c0_14 = arith.constant 0 : index
    %c0_15 = arith.constant 0 : index
    %30 = vector.load %arg4[%c0_13, %c0_14, %c0_15] : memref<2x32x96xbf16, #tpu.memory_space<vmem>>, vector<1x32x96xbf16>
    %31 = vector.shape_cast %30 : vector<1x32x96xbf16> to vector<32x96xbf16>
    %32 = arith.truncf %29 : vector<144x32xf32> to vector<144x32xbf16>
    %cst_16 = arith.constant dense<0.000000e+00> : vector<144x96xf32>
    %33 = tpu.matmul %32, %31, %cst_16 {dimension_numbers = #tpu.dot_dimension_numbers<[1], [0], [0], [1], [0, 0, 1, 1], [], []>} : vector<144x32xbf16>, vector<32x96xbf16>, vector<144x96xf32> -> vector<144x96xf32>
    %c0_17 = arith.constant 0 : index
    %c0_18 = arith.constant 0 : index
    %c0_19 = arith.constant 0 : index
    %34 = vector.load %arg5[%c0_17, %c0_18, %c0_19] : memref<2x32x32xf32, #tpu.memory_space<vmem>>, vector<1x32x32xf32>
    %35 = vector.shape_cast %34 : vector<1x32x32xf32> to vector<32x32xf32>
    %36 = vector.extract_strided_slice %35 {offsets = [0, 0], sizes = [8, 32], strides = [1, 1]} : vector<32x32xf32> to vector<8x32xf32>
    %37 = arith.truncf %36 : vector<8x32xf32> to vector<8x32xbf16>
    %38 = vector.extract_strided_slice %35 {offsets = [8, 0], sizes = [8, 32], strides = [1, 1]} : vector<32x32xf32> to vector<8x32xf32>
    %39 = arith.truncf %38 : vector<8x32xf32> to vector<8x32xbf16>
    %40 = vector.extract_strided_slice %35 {offsets = [16, 0], sizes = [8, 32], strides = [1, 1]} : vector<32x32xf32> to vector<8x32xf32>
    %41 = arith.truncf %40 : vector<8x32xf32> to vector<8x32xbf16>
    %42 = vector.extract_strided_slice %35 {offsets = [24, 0], sizes = [8, 32], strides = [1, 1]} : vector<32x32xf32> to vector<8x32xf32>
    %43 = arith.truncf %42 : vector<8x32xf32> to vector<8x32xbf16>
    %44 = vector.extract_strided_slice %33 {offsets = [0, 0], sizes = [72, 96], strides = [1, 1]} : vector<144x96xf32> to vector<72x96xf32>
    %45 = vector.extract_strided_slice %44 {offsets = [0, 0], sizes = [65, 96], strides = [1, 1]} : vector<72x96xf32> to vector<65x96xf32>
    %cst_20 = arith.constant 0.000000e+00 : f32
    %46 = vector.broadcast %cst_20 : f32 to vector<72x32xf32>
    %47 = vector.extract_strided_slice %44 {offsets = [0, 0], sizes = [72, 8], strides = [1, 1]} : vector<72x96xf32> to vector<72x8xf32>
    %48 = vector.extract_strided_slice %45 {offsets = [0, 32], sizes = [65, 8], strides = [1, 1]} : vector<65x96xf32> to vector<65x8xf32>
    %49 = vector.extract_strided_slice %45 {offsets = [0, 64], sizes = [65, 8], strides = [1, 1]} : vector<65x96xf32> to vector<65x8xf32>
    %50 = arith.truncf %47 : vector<72x8xf32> to vector<72x8xbf16>
    %51 = arith.truncf %48 : vector<65x8xf32> to vector<65x8xbf16>
    %cst_21 = arith.constant dense<0.000000e+00> : vector<72x65xf32>
    %52 = tpu.matmul %50, %51, %cst_21 {dimension_numbers = #tpu.dot_dimension_numbers<[1], [1], [0], [0], [0, 0, 1, 0], [], []>} : vector<72x8xbf16>, vector<65x8xbf16>, vector<72x65xf32> -> vector<72x65xf32>
    %cst_22 = arith.constant dense<0xFF800000> : vector<72xf32>
    %53 = vector.multi_reduction <maximumf>, %52, %cst_22 [1] : vector<72x65xf32> to vector<72xf32>
    %54 = vector.shape_cast %53 : vector<72xf32> to vector<72x1xf32>
    %55 = vector.broadcast %54 : vector<72x1xf32> to vector<72x65xf32>
    %56 = arith.subf %52, %55 : vector<72x65xf32>
    %57 = math.exp %56 : vector<72x65xf32>
    %cst_23 = arith.constant dense<0.000000e+00> : vector<72xf32>
    %58 = vector.multi_reduction <add>, %57, %cst_23 [1] : vector<72x65xf32> to vector<72xf32>
    %59 = vector.shape_cast %58 : vector<72xf32> to vector<72x1xf32>
    %60 = tpu.reciprocal %59 {approx = true} : vector<72x1xf32> -> vector<72x1xf32>
    %61 = vector.broadcast %60 : vector<72x1xf32> to vector<72x65xf32>
    %62 = arith.mulf %57, %61 : vector<72x65xf32>
    %63 = arith.truncf %62 : vector<72x65xf32> to vector<72x65xbf16>
    %64 = arith.truncf %49 : vector<65x8xf32> to vector<65x8xbf16>
    %cst_24 = arith.constant dense<0.000000e+00> : vector<72x8xf32>
    %65 = tpu.matmul %63, %64, %cst_24 {dimension_numbers = #tpu.dot_dimension_numbers<[1], [0], [0], [1], [0, 0, 1, 1], [], []>} : vector<72x65xbf16>, vector<65x8xbf16>, vector<72x8xf32> -> vector<72x8xf32>
    %66 = arith.truncf %65 : vector<72x8xf32> to vector<72x8xbf16>
    %cst_25 = arith.constant dense<0.000000e+00> : vector<72x32xf32>
    %67 = tpu.matmul %66, %37, %cst_25 {dimension_numbers = #tpu.dot_dimension_numbers<[1], [0], [0], [1], [0, 0, 1, 1], [], []>} : vector<72x8xbf16>, vector<8x32xbf16>, vector<72x32xf32> -> vector<72x32xf32>
    %68 = arith.addf %46, %67 : vector<72x32xf32>
    %69 = vector.extract_strided_slice %44 {offsets = [0, 8], sizes = [72, 8], strides = [1, 1]} : vector<72x96xf32> to vector<72x8xf32>
    %70 = vector.extract_strided_slice %45 {offsets = [0, 40], sizes = [65, 8], strides = [1, 1]} : vector<65x96xf32> to vector<65x8xf32>
    %71 = vector.extract_strided_slice %45 {offsets = [0, 72], sizes = [65, 8], strides = [1, 1]} : vector<65x96xf32> to vector<65x8xf32>
    %72 = arith.truncf %69 : vector<72x8xf32> to vector<72x8xbf16>
    %73 = arith.truncf %70 : vector<65x8xf32> to vector<65x8xbf16>
    %cst_26 = arith.constant dense<0.000000e+00> : vector<72x65xf32>
    %74 = tpu.matmul %72, %73, %cst_26 {dimension_numbers = #tpu.dot_dimension_numbers<[1], [1], [0], [0], [0, 0, 1, 0], [], []>} : vector<72x8xbf16>, vector<65x8xbf16>, vector<72x65xf32> -> vector<72x65xf32>
    %cst_27 = arith.constant dense<0xFF800000> : vector<72xf32>
    %75 = vector.multi_reduction <maximumf>, %74, %cst_27 [1] : vector<72x65xf32> to vector<72xf32>
    %76 = vector.shape_cast %75 : vector<72xf32> to vector<72x1xf32>
    %77 = vector.broadcast %76 : vector<72x1xf32> to vector<72x65xf32>
    %78 = arith.subf %74, %77 : vector<72x65xf32>
    %79 = math.exp %78 : vector<72x65xf32>
    %cst_28 = arith.constant dense<0.000000e+00> : vector<72xf32>
    %80 = vector.multi_reduction <add>, %79, %cst_28 [1] : vector<72x65xf32> to vector<72xf32>
    %81 = vector.shape_cast %80 : vector<72xf32> to vector<72x1xf32>
    %82 = tpu.reciprocal %81 {approx = true} : vector<72x1xf32> -> vector<72x1xf32>
    %83 = vector.broadcast %82 : vector<72x1xf32> to vector<72x65xf32>
    %84 = arith.mulf %79, %83 : vector<72x65xf32>
    %85 = arith.truncf %84 : vector<72x65xf32> to vector<72x65xbf16>
    %86 = arith.truncf %71 : vector<65x8xf32> to vector<65x8xbf16>
    %cst_29 = arith.constant dense<0.000000e+00> : vector<72x8xf32>
    %87 = tpu.matmul %85, %86, %cst_29 {dimension_numbers = #tpu.dot_dimension_numbers<[1], [0], [0], [1], [0, 0, 1, 1], [], []>} : vector<72x65xbf16>, vector<65x8xbf16>, vector<72x8xf32> -> vector<72x8xf32>
    %88 = arith.truncf %87 : vector<72x8xf32> to vector<72x8xbf16>
    %cst_30 = arith.constant dense<0.000000e+00> : vector<72x32xf32>
    %89 = tpu.matmul %88, %39, %cst_30 {dimension_numbers = #tpu.dot_dimension_numbers<[1], [0], [0], [1], [0, 0, 1, 1], [], []>} : vector<72x8xbf16>, vector<8x32xbf16>, vector<72x32xf32> -> vector<72x32xf32>
    %90 = arith.addf %68, %89 : vector<72x32xf32>
    %91 = vector.extract_strided_slice %44 {offsets = [0, 16], sizes = [72, 8], strides = [1, 1]} : vector<72x96xf32> to vector<72x8xf32>
    %92 = vector.extract_strided_slice %45 {offsets = [0, 48], sizes = [65, 8], strides = [1, 1]} : vector<65x96xf32> to vector<65x8xf32>
    %93 = vector.extract_strided_slice %45 {offsets = [0, 80], sizes = [65, 8], strides = [1, 1]} : vector<65x96xf32> to vector<65x8xf32>
    %94 = arith.truncf %91 : vector<72x8xf32> to vector<72x8xbf16>
    %95 = arith.truncf %92 : vector<65x8xf32> to vector<65x8xbf16>
    %cst_31 = arith.constant dense<0.000000e+00> : vector<72x65xf32>
    %96 = tpu.matmul %94, %95, %cst_31 {dimension_numbers = #tpu.dot_dimension_numbers<[1], [1], [0], [0], [0, 0, 1, 0], [], []>} : vector<72x8xbf16>, vector<65x8xbf16>, vector<72x65xf32> -> vector<72x65xf32>
    %cst_32 = arith.constant dense<0xFF800000> : vector<72xf32>
    %97 = vector.multi_reduction <maximumf>, %96, %cst_32 [1] : vector<72x65xf32> to vector<72xf32>
    %98 = vector.shape_cast %97 : vector<72xf32> to vector<72x1xf32>
    %99 = vector.broadcast %98 : vector<72x1xf32> to vector<72x65xf32>
    %100 = arith.subf %96, %99 : vector<72x65xf32>
    %101 = math.exp %100 : vector<72x65xf32>
    %cst_33 = arith.constant dense<0.000000e+00> : vector<72xf32>
    %102 = vector.multi_reduction <add>, %101, %cst_33 [1] : vector<72x65xf32> to vector<72xf32>
    %103 = vector.shape_cast %102 : vector<72xf32> to vector<72x1xf32>
    %104 = tpu.reciprocal %103 {approx = true} : vector<72x1xf32> -> vector<72x1xf32>
    %105 = vector.broadcast %104 : vector<72x1xf32> to vector<72x65xf32>
    %106 = arith.mulf %101, %105 : vector<72x65xf32>
    %107 = arith.truncf %106 : vector<72x65xf32> to vector<72x65xbf16>
    %108 = arith.truncf %93 : vector<65x8xf32> to vector<65x8xbf16>
    %cst_34 = arith.constant dense<0.000000e+00> : vector<72x8xf32>
    %109 = tpu.matmul %107, %108, %cst_34 {dimension_numbers = #tpu.dot_dimension_numbers<[1], [0], [0], [1], [0, 0, 1, 1], [], []>} : vector<72x65xbf16>, vector<65x8xbf16>, vector<72x8xf32> -> vector<72x8xf32>
    %110 = arith.truncf %109 : vector<72x8xf32> to vector<72x8xbf16>
    %cst_35 = arith.constant dense<0.000000e+00> : vector<72x32xf32>
    %111 = tpu.matmul %110, %41, %cst_35 {dimension_numbers = #tpu.dot_dimension_numbers<[1], [0], [0], [1], [0, 0, 1, 1], [], []>} : vector<72x8xbf16>, vector<8x32xbf16>, vector<72x32xf32> -> vector<72x32xf32>
    %112 = arith.addf %90, %111 : vector<72x32xf32>
    %113 = vector.extract_strided_slice %44 {offsets = [0, 24], sizes = [72, 8], strides = [1, 1]} : vector<72x96xf32> to vector<72x8xf32>
    %114 = vector.extract_strided_slice %45 {offsets = [0, 56], sizes = [65, 8], strides = [1, 1]} : vector<65x96xf32> to vector<65x8xf32>
    %115 = vector.extract_strided_slice %45 {offsets = [0, 88], sizes = [65, 8], strides = [1, 1]} : vector<65x96xf32> to vector<65x8xf32>
    %116 = arith.truncf %113 : vector<72x8xf32> to vector<72x8xbf16>
    %117 = arith.truncf %114 : vector<65x8xf32> to vector<65x8xbf16>
    %cst_36 = arith.constant dense<0.000000e+00> : vector<72x65xf32>
    %118 = tpu.matmul %116, %117, %cst_36 {dimension_numbers = #tpu.dot_dimension_numbers<[1], [1], [0], [0], [0, 0, 1, 0], [], []>} : vector<72x8xbf16>, vector<65x8xbf16>, vector<72x65xf32> -> vector<72x65xf32>
    %cst_37 = arith.constant dense<0xFF800000> : vector<72xf32>
    %119 = vector.multi_reduction <maximumf>, %118, %cst_37 [1] : vector<72x65xf32> to vector<72xf32>
    %120 = vector.shape_cast %119 : vector<72xf32> to vector<72x1xf32>
    %121 = vector.broadcast %120 : vector<72x1xf32> to vector<72x65xf32>
    %122 = arith.subf %118, %121 : vector<72x65xf32>
    %123 = math.exp %122 : vector<72x65xf32>
    %cst_38 = arith.constant dense<0.000000e+00> : vector<72xf32>
    %124 = vector.multi_reduction <add>, %123, %cst_38 [1] : vector<72x65xf32> to vector<72xf32>
    %125 = vector.shape_cast %124 : vector<72xf32> to vector<72x1xf32>
    %126 = tpu.reciprocal %125 {approx = true} : vector<72x1xf32> -> vector<72x1xf32>
    %127 = vector.broadcast %126 : vector<72x1xf32> to vector<72x65xf32>
    %128 = arith.mulf %123, %127 : vector<72x65xf32>
    %129 = arith.truncf %128 : vector<72x65xf32> to vector<72x65xbf16>
    %130 = arith.truncf %115 : vector<65x8xf32> to vector<65x8xbf16>
    %cst_39 = arith.constant dense<0.000000e+00> : vector<72x8xf32>
    %131 = tpu.matmul %129, %130, %cst_39 {dimension_numbers = #tpu.dot_dimension_numbers<[1], [0], [0], [1], [0, 0, 1, 1], [], []>} : vector<72x65xbf16>, vector<65x8xbf16>, vector<72x8xf32> -> vector<72x8xf32>
    %132 = arith.truncf %131 : vector<72x8xf32> to vector<72x8xbf16>
    %cst_40 = arith.constant dense<0.000000e+00> : vector<72x32xf32>
    %133 = tpu.matmul %132, %43, %cst_40 {dimension_numbers = #tpu.dot_dimension_numbers<[1], [0], [0], [1], [0, 0, 1, 1], [], []>} : vector<72x8xbf16>, vector<8x32xbf16>, vector<72x32xf32> -> vector<72x32xf32>
    %134 = arith.addf %112, %133 : vector<72x32xf32>
    %135 = vector.extract_strided_slice %33 {offsets = [72, 0], sizes = [72, 96], strides = [1, 1]} : vector<144x96xf32> to vector<72x96xf32>
    %136 = vector.extract_strided_slice %135 {offsets = [0, 0], sizes = [65, 96], strides = [1, 1]} : vector<72x96xf32> to vector<65x96xf32>
    %cst_41 = arith.constant 0.000000e+00 : f32
    %137 = vector.broadcast %cst_41 : f32 to vector<72x32xf32>
    %138 = vector.extract_strided_slice %135 {offsets = [0, 0], sizes = [72, 8], strides = [1, 1]} : vector<72x96xf32> to vector<72x8xf32>
    %139 = vector.extract_strided_slice %136 {offsets = [0, 32], sizes = [65, 8], strides = [1, 1]} : vector<65x96xf32> to vector<65x8xf32>
    %140 = vector.extract_strided_slice %136 {offsets = [0, 64], sizes = [65, 8], strides = [1, 1]} : vector<65x96xf32> to vector<65x8xf32>
    %141 = arith.truncf %138 : vector<72x8xf32> to vector<72x8xbf16>
    %142 = arith.truncf %139 : vector<65x8xf32> to vector<65x8xbf16>
    %cst_42 = arith.constant dense<0.000000e+00> : vector<72x65xf32>
    %143 = tpu.matmul %141, %142, %cst_42 {dimension_numbers = #tpu.dot_dimension_numbers<[1], [1], [0], [0], [0, 0, 1, 0], [], []>} : vector<72x8xbf16>, vector<65x8xbf16>, vector<72x65xf32> -> vector<72x65xf32>
    %cst_43 = arith.constant dense<0xFF800000> : vector<72xf32>
    %144 = vector.multi_reduction <maximumf>, %143, %cst_43 [1] : vector<72x65xf32> to vector<72xf32>
    %145 = vector.shape_cast %144 : vector<72xf32> to vector<72x1xf32>
    %146 = vector.broadcast %145 : vector<72x1xf32> to vector<72x65xf32>
    %147 = arith.subf %143, %146 : vector<72x65xf32>
    %148 = math.exp %147 : vector<72x65xf32>
    %cst_44 = arith.constant dense<0.000000e+00> : vector<72xf32>
    %149 = vector.multi_reduction <add>, %148, %cst_44 [1] : vector<72x65xf32> to vector<72xf32>
    %150 = vector.shape_cast %149 : vector<72xf32> to vector<72x1xf32>
    %151 = tpu.reciprocal %150 {approx = true} : vector<72x1xf32> -> vector<72x1xf32>
    %152 = vector.broadcast %151 : vector<72x1xf32> to vector<72x65xf32>
    %153 = arith.mulf %148, %152 : vector<72x65xf32>
    %154 = arith.truncf %153 : vector<72x65xf32> to vector<72x65xbf16>
    %155 = arith.truncf %140 : vector<65x8xf32> to vector<65x8xbf16>
    %cst_45 = arith.constant dense<0.000000e+00> : vector<72x8xf32>
    %156 = tpu.matmul %154, %155, %cst_45 {dimension_numbers = #tpu.dot_dimension_numbers<[1], [0], [0], [1], [0, 0, 1, 1], [], []>} : vector<72x65xbf16>, vector<65x8xbf16>, vector<72x8xf32> -> vector<72x8xf32>
    %157 = arith.truncf %156 : vector<72x8xf32> to vector<72x8xbf16>
    %cst_46 = arith.constant dense<0.000000e+00> : vector<72x32xf32>
    %158 = tpu.matmul %157, %37, %cst_46 {dimension_numbers = #tpu.dot_dimension_numbers<[1], [0], [0], [1], [0, 0, 1, 1], [], []>} : vector<72x8xbf16>, vector<8x32xbf16>, vector<72x32xf32> -> vector<72x32xf32>
    %159 = arith.addf %137, %158 : vector<72x32xf32>
    %160 = vector.extract_strided_slice %135 {offsets = [0, 8], sizes = [72, 8], strides = [1, 1]} : vector<72x96xf32> to vector<72x8xf32>
    %161 = vector.extract_strided_slice %136 {offsets = [0, 40], sizes = [65, 8], strides = [1, 1]} : vector<65x96xf32> to vector<65x8xf32>
    %162 = vector.extract_strided_slice %136 {offsets = [0, 72], sizes = [65, 8], strides = [1, 1]} : vector<65x96xf32> to vector<65x8xf32>
    %163 = arith.truncf %160 : vector<72x8xf32> to vector<72x8xbf16>
    %164 = arith.truncf %161 : vector<65x8xf32> to vector<65x8xbf16>
    %cst_47 = arith.constant dense<0.000000e+00> : vector<72x65xf32>
    %165 = tpu.matmul %163, %164, %cst_47 {dimension_numbers = #tpu.dot_dimension_numbers<[1], [1], [0], [0], [0, 0, 1, 0], [], []>} : vector<72x8xbf16>, vector<65x8xbf16>, vector<72x65xf32> -> vector<72x65xf32>
    %cst_48 = arith.constant dense<0xFF800000> : vector<72xf32>
    %166 = vector.multi_reduction <maximumf>, %165, %cst_48 [1] : vector<72x65xf32> to vector<72xf32>
    %167 = vector.shape_cast %166 : vector<72xf32> to vector<72x1xf32>
    %168 = vector.broadcast %167 : vector<72x1xf32> to vector<72x65xf32>
    %169 = arith.subf %165, %168 : vector<72x65xf32>
    %170 = math.exp %169 : vector<72x65xf32>
    %cst_49 = arith.constant dense<0.000000e+00> : vector<72xf32>
    %171 = vector.multi_reduction <add>, %170, %cst_49 [1] : vector<72x65xf32> to vector<72xf32>
    %172 = vector.shape_cast %171 : vector<72xf32> to vector<72x1xf32>
    %173 = tpu.reciprocal %172 {approx = true} : vector<72x1xf32> -> vector<72x1xf32>
    %174 = vector.broadcast %173 : vector<72x1xf32> to vector<72x65xf32>
    %175 = arith.mulf %170, %174 : vector<72x65xf32>
    %176 = arith.truncf %175 : vector<72x65xf32> to vector<72x65xbf16>
    %177 = arith.truncf %162 : vector<65x8xf32> to vector<65x8xbf16>
    %cst_50 = arith.constant dense<0.000000e+00> : vector<72x8xf32>
    %178 = tpu.matmul %176, %177, %cst_50 {dimension_numbers = #tpu.dot_dimension_numbers<[1], [0], [0], [1], [0, 0, 1, 1], [], []>} : vector<72x65xbf16>, vector<65x8xbf16>, vector<72x8xf32> -> vector<72x8xf32>
    %179 = arith.truncf %178 : vector<72x8xf32> to vector<72x8xbf16>
    %cst_51 = arith.constant dense<0.000000e+00> : vector<72x32xf32>
    %180 = tpu.matmul %179, %39, %cst_51 {dimension_numbers = #tpu.dot_dimension_numbers<[1], [0], [0], [1], [0, 0, 1, 1], [], []>} : vector<72x8xbf16>, vector<8x32xbf16>, vector<72x32xf32> -> vector<72x32xf32>
    %181 = arith.addf %159, %180 : vector<72x32xf32>
    %182 = vector.extract_strided_slice %135 {offsets = [0, 16], sizes = [72, 8], strides = [1, 1]} : vector<72x96xf32> to vector<72x8xf32>
    %183 = vector.extract_strided_slice %136 {offsets = [0, 48], sizes = [65, 8], strides = [1, 1]} : vector<65x96xf32> to vector<65x8xf32>
    %184 = vector.extract_strided_slice %136 {offsets = [0, 80], sizes = [65, 8], strides = [1, 1]} : vector<65x96xf32> to vector<65x8xf32>
    %185 = arith.truncf %182 : vector<72x8xf32> to vector<72x8xbf16>
    %186 = arith.truncf %183 : vector<65x8xf32> to vector<65x8xbf16>
    %cst_52 = arith.constant dense<0.000000e+00> : vector<72x65xf32>
    %187 = tpu.matmul %185, %186, %cst_52 {dimension_numbers = #tpu.dot_dimension_numbers<[1], [1], [0], [0], [0, 0, 1, 0], [], []>} : vector<72x8xbf16>, vector<65x8xbf16>, vector<72x65xf32> -> vector<72x65xf32>
    %cst_53 = arith.constant dense<0xFF800000> : vector<72xf32>
    %188 = vector.multi_reduction <maximumf>, %187, %cst_53 [1] : vector<72x65xf32> to vector<72xf32>
    %189 = vector.shape_cast %188 : vector<72xf32> to vector<72x1xf32>
    %190 = vector.broadcast %189 : vector<72x1xf32> to vector<72x65xf32>
    %191 = arith.subf %187, %190 : vector<72x65xf32>
    %192 = math.exp %191 : vector<72x65xf32>
    %cst_54 = arith.constant dense<0.000000e+00> : vector<72xf32>
    %193 = vector.multi_reduction <add>, %192, %cst_54 [1] : vector<72x65xf32> to vector<72xf32>
    %194 = vector.shape_cast %193 : vector<72xf32> to vector<72x1xf32>
    %195 = tpu.reciprocal %194 {approx = true} : vector<72x1xf32> -> vector<72x1xf32>
    %196 = vector.broadcast %195 : vector<72x1xf32> to vector<72x65xf32>
    %197 = arith.mulf %192, %196 : vector<72x65xf32>
    %198 = arith.truncf %197 : vector<72x65xf32> to vector<72x65xbf16>
    %199 = arith.truncf %184 : vector<65x8xf32> to vector<65x8xbf16>
    %cst_55 = arith.constant dense<0.000000e+00> : vector<72x8xf32>
    %200 = tpu.matmul %198, %199, %cst_55 {dimension_numbers = #tpu.dot_dimension_numbers<[1], [0], [0], [1], [0, 0, 1, 1], [], []>} : vector<72x65xbf16>, vector<65x8xbf16>, vector<72x8xf32> -> vector<72x8xf32>
    %201 = arith.truncf %200 : vector<72x8xf32> to vector<72x8xbf16>
    %cst_56 = arith.constant dense<0.000000e+00> : vector<72x32xf32>
    %202 = tpu.matmul %201, %41, %cst_56 {dimension_numbers = #tpu.dot_dimension_numbers<[1], [0], [0], [1], [0, 0, 1, 1], [], []>} : vector<72x8xbf16>, vector<8x32xbf16>, vector<72x32xf32> -> vector<72x32xf32>
    %203 = arith.addf %181, %202 : vector<72x32xf32>
    %204 = vector.extract_strided_slice %135 {offsets = [0, 24], sizes = [72, 8], strides = [1, 1]} : vector<72x96xf32> to vector<72x8xf32>
    %205 = vector.extract_strided_slice %136 {offsets = [0, 56], sizes = [65, 8], strides = [1, 1]} : vector<65x96xf32> to vector<65x8xf32>
    %206 = vector.extract_strided_slice %136 {offsets = [0, 88], sizes = [65, 8], strides = [1, 1]} : vector<65x96xf32> to vector<65x8xf32>
    %207 = arith.truncf %204 : vector<72x8xf32> to vector<72x8xbf16>
    %208 = arith.truncf %205 : vector<65x8xf32> to vector<65x8xbf16>
    %cst_57 = arith.constant dense<0.000000e+00> : vector<72x65xf32>
    %209 = tpu.matmul %207, %208, %cst_57 {dimension_numbers = #tpu.dot_dimension_numbers<[1], [1], [0], [0], [0, 0, 1, 0], [], []>} : vector<72x8xbf16>, vector<65x8xbf16>, vector<72x65xf32> -> vector<72x65xf32>
    %cst_58 = arith.constant dense<0xFF800000> : vector<72xf32>
    %210 = vector.multi_reduction <maximumf>, %209, %cst_58 [1] : vector<72x65xf32> to vector<72xf32>
    %211 = vector.shape_cast %210 : vector<72xf32> to vector<72x1xf32>
    %212 = vector.broadcast %211 : vector<72x1xf32> to vector<72x65xf32>
    %213 = arith.subf %209, %212 : vector<72x65xf32>
    %214 = math.exp %213 : vector<72x65xf32>
    %cst_59 = arith.constant dense<0.000000e+00> : vector<72xf32>
    %215 = vector.multi_reduction <add>, %214, %cst_59 [1] : vector<72x65xf32> to vector<72xf32>
    %216 = vector.shape_cast %215 : vector<72xf32> to vector<72x1xf32>
    %217 = tpu.reciprocal %216 {approx = true} : vector<72x1xf32> -> vector<72x1xf32>
    %218 = vector.broadcast %217 : vector<72x1xf32> to vector<72x65xf32>
    %219 = arith.mulf %214, %218 : vector<72x65xf32>
    %220 = arith.truncf %219 : vector<72x65xf32> to vector<72x65xbf16>
    %221 = arith.truncf %206 : vector<65x8xf32> to vector<65x8xbf16>
    %cst_60 = arith.constant dense<0.000000e+00> : vector<72x8xf32>
    %222 = tpu.matmul %220, %221, %cst_60 {dimension_numbers = #tpu.dot_dimension_numbers<[1], [0], [0], [1], [0, 0, 1, 1], [], []>} : vector<72x65xbf16>, vector<65x8xbf16>, vector<72x8xf32> -> vector<72x8xf32>
    %223 = arith.truncf %222 : vector<72x8xf32> to vector<72x8xbf16>
    %cst_61 = arith.constant dense<0.000000e+00> : vector<72x32xf32>
    %224 = tpu.matmul %223, %43, %cst_61 {dimension_numbers = #tpu.dot_dimension_numbers<[1], [0], [0], [1], [0, 0, 1, 1], [], []>} : vector<72x8xbf16>, vector<8x32xbf16>, vector<72x32xf32> -> vector<72x32xf32>
    %225 = arith.addf %203, %224 : vector<72x32xf32>
    %226 = tpu.concatenate %134, %225 in 0 : vector<72x32xf32>, vector<72x32xf32> -> vector<144x32xf32>
    %227 = arith.addf %5, %226 : vector<144x32xf32>
    %c2 = arith.constant 2 : index
    %c0_62 = arith.constant 0 : index
    %228 = vector.load %arg9[%c2, %c0_62] : memref<17x128xf32, #tpu.memory_space<vmem>>, vector<1x32xf32>
    %229 = vector.broadcast %228 : vector<1x32xf32> to vector<144x32xf32>
    %230 = arith.addf %227, %229 : vector<144x32xf32>
    %c3 = arith.constant 3 : index
    %c0_63 = arith.constant 0 : index
    %231 = vector.load %arg9[%c3, %c0_63] : memref<17x128xf32, #tpu.memory_space<vmem>>, vector<1x32xf32>
    %c4 = arith.constant 4 : index
    %c0_64 = arith.constant 0 : index
    %232 = vector.load %arg9[%c4, %c0_64] : memref<17x128xf32, #tpu.memory_space<vmem>>, vector<1x32xf32>
    %cst_65 = arith.constant dense<0.000000e+00> : vector<144xf32>
    %233 = vector.multi_reduction <add>, %230, %cst_65 [1] : vector<144x32xf32> to vector<144xf32>
    %234 = vector.shape_cast %233 : vector<144xf32> to vector<144x1xf32>
    %cst_66 = arith.constant 3.200000e+01 : f32
    %235 = vector.broadcast %cst_66 : f32 to vector<144x1xf32>
    %236 = arith.divf %234, %235 : vector<144x1xf32>
    %237 = vector.broadcast %236 : vector<144x1xf32> to vector<144x32xf32>
    %238 = arith.subf %230, %237 : vector<144x32xf32>
    %239 = arith.mulf %238, %238 : vector<144x32xf32>
    %cst_67 = arith.constant dense<0.000000e+00> : vector<144xf32>
    %240 = vector.multi_reduction <add>, %239, %cst_67 [1] : vector<144x32xf32> to vector<144xf32>
    %241 = vector.shape_cast %240 : vector<144xf32> to vector<144x1xf32>
    %cst_68 = arith.constant 3.200000e+01 : f32
    %242 = vector.broadcast %cst_68 : f32 to vector<144x1xf32>
    %243 = arith.divf %241, %242 : vector<144x1xf32>
    %244 = vector.broadcast %236 : vector<144x1xf32> to vector<144x32xf32>
    %245 = arith.subf %230, %244 : vector<144x32xf32>
    %cst_69 = arith.constant 9.99999974E-6 : f32
    %246 = vector.broadcast %cst_69 : f32 to vector<144x1xf32>
    %247 = arith.addf %243, %246 : vector<144x1xf32>
    %248 = math.rsqrt %247 : vector<144x1xf32>
    %249 = vector.broadcast %248 : vector<144x1xf32> to vector<144x32xf32>
    %250 = arith.mulf %245, %249 : vector<144x32xf32>
    %251 = vector.broadcast %231 : vector<1x32xf32> to vector<144x32xf32>
    %252 = arith.mulf %250, %251 : vector<144x32xf32>
    %253 = vector.broadcast %232 : vector<1x32xf32> to vector<144x32xf32>
    %254 = arith.addf %252, %253 : vector<144x32xf32>
    %c0_70 = arith.constant 0 : index
    %c0_71 = arith.constant 0 : index
    %c0_72 = arith.constant 0 : index
    %255 = vector.load %arg6[%c0_70, %c0_71, %c0_72] : memref<2x32x64xbf16, #tpu.memory_space<vmem>>, vector<1x32x64xbf16>
    %256 = vector.shape_cast %255 : vector<1x32x64xbf16> to vector<32x64xbf16>
    %257 = arith.truncf %254 : vector<144x32xf32> to vector<144x32xbf16>
    %cst_73 = arith.constant dense<0.000000e+00> : vector<144x64xf32>
    %258 = tpu.matmul %257, %256, %cst_73 {dimension_numbers = #tpu.dot_dimension_numbers<[1], [0], [0], [1], [0, 0, 1, 1], [], []>} : vector<144x32xbf16>, vector<32x64xbf16>, vector<144x64xf32> -> vector<144x64xf32>
    %c5 = arith.constant 5 : index
    %c0_74 = arith.constant 0 : index
    %259 = vector.load %arg9[%c5, %c0_74] : memref<17x128xf32, #tpu.memory_space<vmem>>, vector<1x64xf32>
    %260 = vector.broadcast %259 : vector<1x64xf32> to vector<144x64xf32>
    %261 = arith.addf %258, %260 : vector<144x64xf32>
    %cst_75 = arith.constant 5.000000e-01 : f32
    %262 = vector.broadcast %cst_75 : f32 to vector<144x64xf32>
    %263 = arith.mulf %262, %261 : vector<144x64xf32>
    %cst_76 = arith.constant 0.707106769 : f32
    %264 = vector.broadcast %cst_76 : f32 to vector<144x64xf32>
    %265 = arith.mulf %261, %264 : vector<144x64xf32>
    %266 = math.erf %265 : vector<144x64xf32>
    %cst_77 = arith.constant 1.000000e+00 : f32
    %267 = vector.broadcast %cst_77 : f32 to vector<144x64xf32>
    %268 = arith.addf %267, %266 : vector<144x64xf32>
    %269 = arith.mulf %263, %268 : vector<144x64xf32>
    %c0_78 = arith.constant 0 : index
    %c0_79 = arith.constant 0 : index
    %c0_80 = arith.constant 0 : index
    %270 = vector.load %arg7[%c0_78, %c0_79, %c0_80] : memref<2x64x32xbf16, #tpu.memory_space<vmem>>, vector<1x64x32xbf16>
    %271 = vector.shape_cast %270 : vector<1x64x32xbf16> to vector<64x32xbf16>
    %272 = arith.truncf %269 : vector<144x64xf32> to vector<144x64xbf16>
    %cst_81 = arith.constant dense<0.000000e+00> : vector<144x32xf32>
    %273 = tpu.matmul %272, %271, %cst_81 {dimension_numbers = #tpu.dot_dimension_numbers<[1], [0], [0], [1], [0, 0, 1, 1], [], []>} : vector<144x64xbf16>, vector<64x32xbf16>, vector<144x32xf32> -> vector<144x32xf32>
    %274 = arith.addf %230, %273 : vector<144x32xf32>
    %c6 = arith.constant 6 : index
    %c0_82 = arith.constant 0 : index
    %275 = vector.load %arg9[%c6, %c0_82] : memref<17x128xf32, #tpu.memory_space<vmem>>, vector<1x32xf32>
    %276 = vector.broadcast %275 : vector<1x32xf32> to vector<144x32xf32>
    %277 = arith.addf %274, %276 : vector<144x32xf32>
    %c7 = arith.constant 7 : index
    %c0_83 = arith.constant 0 : index
    %278 = vector.load %arg9[%c7, %c0_83] : memref<17x128xf32, #tpu.memory_space<vmem>>, vector<1x32xf32>
    %c8 = arith.constant 8 : index
    %c0_84 = arith.constant 0 : index
    %279 = vector.load %arg9[%c8, %c0_84] : memref<17x128xf32, #tpu.memory_space<vmem>>, vector<1x32xf32>
    %cst_85 = arith.constant dense<0.000000e+00> : vector<144xf32>
    %280 = vector.multi_reduction <add>, %277, %cst_85 [1] : vector<144x32xf32> to vector<144xf32>
    %281 = vector.shape_cast %280 : vector<144xf32> to vector<144x1xf32>
    %cst_86 = arith.constant 3.200000e+01 : f32
    %282 = vector.broadcast %cst_86 : f32 to vector<144x1xf32>
    %283 = arith.divf %281, %282 : vector<144x1xf32>
    %284 = vector.broadcast %283 : vector<144x1xf32> to vector<144x32xf32>
    %285 = arith.subf %277, %284 : vector<144x32xf32>
    %286 = arith.mulf %285, %285 : vector<144x32xf32>
    %cst_87 = arith.constant dense<0.000000e+00> : vector<144xf32>
    %287 = vector.multi_reduction <add>, %286, %cst_87 [1] : vector<144x32xf32> to vector<144xf32>
    %288 = vector.shape_cast %287 : vector<144xf32> to vector<144x1xf32>
    %cst_88 = arith.constant 3.200000e+01 : f32
    %289 = vector.broadcast %cst_88 : f32 to vector<144x1xf32>
    %290 = arith.divf %288, %289 : vector<144x1xf32>
    %291 = vector.broadcast %283 : vector<144x1xf32> to vector<144x32xf32>
    %292 = arith.subf %277, %291 : vector<144x32xf32>
    %cst_89 = arith.constant 9.99999974E-6 : f32
    %293 = vector.broadcast %cst_89 : f32 to vector<144x1xf32>
    %294 = arith.addf %290, %293 : vector<144x1xf32>
    %295 = math.rsqrt %294 : vector<144x1xf32>
    %296 = vector.broadcast %295 : vector<144x1xf32> to vector<144x32xf32>
    %297 = arith.mulf %292, %296 : vector<144x32xf32>
    %298 = vector.broadcast %278 : vector<1x32xf32> to vector<144x32xf32>
    %299 = arith.mulf %297, %298 : vector<144x32xf32>
    %300 = vector.broadcast %279 : vector<1x32xf32> to vector<144x32xf32>
    %301 = arith.addf %299, %300 : vector<144x32xf32>
    %c1_90 = arith.constant 1 : index
    %c0_91 = arith.constant 0 : index
    %c0_92 = arith.constant 0 : index
    %302 = vector.load %arg4[%c1_90, %c0_91, %c0_92] : memref<2x32x96xbf16, #tpu.memory_space<vmem>>, vector<1x32x96xbf16>
    %303 = vector.shape_cast %302 : vector<1x32x96xbf16> to vector<32x96xbf16>
    %304 = arith.truncf %301 : vector<144x32xf32> to vector<144x32xbf16>
    %cst_93 = arith.constant dense<0.000000e+00> : vector<144x96xf32>
    %305 = tpu.matmul %304, %303, %cst_93 {dimension_numbers = #tpu.dot_dimension_numbers<[1], [0], [0], [1], [0, 0, 1, 1], [], []>} : vector<144x32xbf16>, vector<32x96xbf16>, vector<144x96xf32> -> vector<144x96xf32>
    %c1_94 = arith.constant 1 : index
    %c0_95 = arith.constant 0 : index
    %c0_96 = arith.constant 0 : index
    %306 = vector.load %arg5[%c1_94, %c0_95, %c0_96] : memref<2x32x32xf32, #tpu.memory_space<vmem>>, vector<1x32x32xf32>
    %307 = vector.shape_cast %306 : vector<1x32x32xf32> to vector<32x32xf32>
    %308 = vector.extract_strided_slice %307 {offsets = [0, 0], sizes = [8, 32], strides = [1, 1]} : vector<32x32xf32> to vector<8x32xf32>
    %309 = arith.truncf %308 : vector<8x32xf32> to vector<8x32xbf16>
    %310 = vector.extract_strided_slice %307 {offsets = [8, 0], sizes = [8, 32], strides = [1, 1]} : vector<32x32xf32> to vector<8x32xf32>
    %311 = arith.truncf %310 : vector<8x32xf32> to vector<8x32xbf16>
    %312 = vector.extract_strided_slice %307 {offsets = [16, 0], sizes = [8, 32], strides = [1, 1]} : vector<32x32xf32> to vector<8x32xf32>
    %313 = arith.truncf %312 : vector<8x32xf32> to vector<8x32xbf16>
    %314 = vector.extract_strided_slice %307 {offsets = [24, 0], sizes = [8, 32], strides = [1, 1]} : vector<32x32xf32> to vector<8x32xf32>
    %315 = arith.truncf %314 : vector<8x32xf32> to vector<8x32xbf16>
    %316 = vector.extract_strided_slice %305 {offsets = [0, 0], sizes = [72, 96], strides = [1, 1]} : vector<144x96xf32> to vector<72x96xf32>
    %317 = vector.extract_strided_slice %316 {offsets = [0, 0], sizes = [65, 96], strides = [1, 1]} : vector<72x96xf32> to vector<65x96xf32>
    %cst_97 = arith.constant 0.000000e+00 : f32
    %318 = vector.broadcast %cst_97 : f32 to vector<72x32xf32>
    %319 = vector.extract_strided_slice %316 {offsets = [0, 0], sizes = [72, 8], strides = [1, 1]} : vector<72x96xf32> to vector<72x8xf32>
    %320 = vector.extract_strided_slice %317 {offsets = [0, 32], sizes = [65, 8], strides = [1, 1]} : vector<65x96xf32> to vector<65x8xf32>
    %321 = vector.extract_strided_slice %317 {offsets = [0, 64], sizes = [65, 8], strides = [1, 1]} : vector<65x96xf32> to vector<65x8xf32>
    %322 = arith.truncf %319 : vector<72x8xf32> to vector<72x8xbf16>
    %323 = arith.truncf %320 : vector<65x8xf32> to vector<65x8xbf16>
    %cst_98 = arith.constant dense<0.000000e+00> : vector<72x65xf32>
    %324 = tpu.matmul %322, %323, %cst_98 {dimension_numbers = #tpu.dot_dimension_numbers<[1], [1], [0], [0], [0, 0, 1, 0], [], []>} : vector<72x8xbf16>, vector<65x8xbf16>, vector<72x65xf32> -> vector<72x65xf32>
    %cst_99 = arith.constant dense<0xFF800000> : vector<72xf32>
    %325 = vector.multi_reduction <maximumf>, %324, %cst_99 [1] : vector<72x65xf32> to vector<72xf32>
    %326 = vector.shape_cast %325 : vector<72xf32> to vector<72x1xf32>
    %327 = vector.broadcast %326 : vector<72x1xf32> to vector<72x65xf32>
    %328 = arith.subf %324, %327 : vector<72x65xf32>
    %329 = math.exp %328 : vector<72x65xf32>
    %cst_100 = arith.constant dense<0.000000e+00> : vector<72xf32>
    %330 = vector.multi_reduction <add>, %329, %cst_100 [1] : vector<72x65xf32> to vector<72xf32>
    %331 = vector.shape_cast %330 : vector<72xf32> to vector<72x1xf32>
    %332 = tpu.reciprocal %331 {approx = true} : vector<72x1xf32> -> vector<72x1xf32>
    %333 = vector.broadcast %332 : vector<72x1xf32> to vector<72x65xf32>
    %334 = arith.mulf %329, %333 : vector<72x65xf32>
    %335 = arith.truncf %334 : vector<72x65xf32> to vector<72x65xbf16>
    %336 = arith.truncf %321 : vector<65x8xf32> to vector<65x8xbf16>
    %cst_101 = arith.constant dense<0.000000e+00> : vector<72x8xf32>
    %337 = tpu.matmul %335, %336, %cst_101 {dimension_numbers = #tpu.dot_dimension_numbers<[1], [0], [0], [1], [0, 0, 1, 1], [], []>} : vector<72x65xbf16>, vector<65x8xbf16>, vector<72x8xf32> -> vector<72x8xf32>
    %338 = arith.truncf %337 : vector<72x8xf32> to vector<72x8xbf16>
    %cst_102 = arith.constant dense<0.000000e+00> : vector<72x32xf32>
    %339 = tpu.matmul %338, %309, %cst_102 {dimension_numbers = #tpu.dot_dimension_numbers<[1], [0], [0], [1], [0, 0, 1, 1], [], []>} : vector<72x8xbf16>, vector<8x32xbf16>, vector<72x32xf32> -> vector<72x32xf32>
    %340 = arith.addf %318, %339 : vector<72x32xf32>
    %341 = vector.extract_strided_slice %316 {offsets = [0, 8], sizes = [72, 8], strides = [1, 1]} : vector<72x96xf32> to vector<72x8xf32>
    %342 = vector.extract_strided_slice %317 {offsets = [0, 40], sizes = [65, 8], strides = [1, 1]} : vector<65x96xf32> to vector<65x8xf32>
    %343 = vector.extract_strided_slice %317 {offsets = [0, 72], sizes = [65, 8], strides = [1, 1]} : vector<65x96xf32> to vector<65x8xf32>
    %344 = arith.truncf %341 : vector<72x8xf32> to vector<72x8xbf16>
    %345 = arith.truncf %342 : vector<65x8xf32> to vector<65x8xbf16>
    %cst_103 = arith.constant dense<0.000000e+00> : vector<72x65xf32>
    %346 = tpu.matmul %344, %345, %cst_103 {dimension_numbers = #tpu.dot_dimension_numbers<[1], [1], [0], [0], [0, 0, 1, 0], [], []>} : vector<72x8xbf16>, vector<65x8xbf16>, vector<72x65xf32> -> vector<72x65xf32>
    %cst_104 = arith.constant dense<0xFF800000> : vector<72xf32>
    %347 = vector.multi_reduction <maximumf>, %346, %cst_104 [1] : vector<72x65xf32> to vector<72xf32>
    %348 = vector.shape_cast %347 : vector<72xf32> to vector<72x1xf32>
    %349 = vector.broadcast %348 : vector<72x1xf32> to vector<72x65xf32>
    %350 = arith.subf %346, %349 : vector<72x65xf32>
    %351 = math.exp %350 : vector<72x65xf32>
    %cst_105 = arith.constant dense<0.000000e+00> : vector<72xf32>
    %352 = vector.multi_reduction <add>, %351, %cst_105 [1] : vector<72x65xf32> to vector<72xf32>
    %353 = vector.shape_cast %352 : vector<72xf32> to vector<72x1xf32>
    %354 = tpu.reciprocal %353 {approx = true} : vector<72x1xf32> -> vector<72x1xf32>
    %355 = vector.broadcast %354 : vector<72x1xf32> to vector<72x65xf32>
    %356 = arith.mulf %351, %355 : vector<72x65xf32>
    %357 = arith.truncf %356 : vector<72x65xf32> to vector<72x65xbf16>
    %358 = arith.truncf %343 : vector<65x8xf32> to vector<65x8xbf16>
    %cst_106 = arith.constant dense<0.000000e+00> : vector<72x8xf32>
    %359 = tpu.matmul %357, %358, %cst_106 {dimension_numbers = #tpu.dot_dimension_numbers<[1], [0], [0], [1], [0, 0, 1, 1], [], []>} : vector<72x65xbf16>, vector<65x8xbf16>, vector<72x8xf32> -> vector<72x8xf32>
    %360 = arith.truncf %359 : vector<72x8xf32> to vector<72x8xbf16>
    %cst_107 = arith.constant dense<0.000000e+00> : vector<72x32xf32>
    %361 = tpu.matmul %360, %311, %cst_107 {dimension_numbers = #tpu.dot_dimension_numbers<[1], [0], [0], [1], [0, 0, 1, 1], [], []>} : vector<72x8xbf16>, vector<8x32xbf16>, vector<72x32xf32> -> vector<72x32xf32>
    %362 = arith.addf %340, %361 : vector<72x32xf32>
    %363 = vector.extract_strided_slice %316 {offsets = [0, 16], sizes = [72, 8], strides = [1, 1]} : vector<72x96xf32> to vector<72x8xf32>
    %364 = vector.extract_strided_slice %317 {offsets = [0, 48], sizes = [65, 8], strides = [1, 1]} : vector<65x96xf32> to vector<65x8xf32>
    %365 = vector.extract_strided_slice %317 {offsets = [0, 80], sizes = [65, 8], strides = [1, 1]} : vector<65x96xf32> to vector<65x8xf32>
    %366 = arith.truncf %363 : vector<72x8xf32> to vector<72x8xbf16>
    %367 = arith.truncf %364 : vector<65x8xf32> to vector<65x8xbf16>
    %cst_108 = arith.constant dense<0.000000e+00> : vector<72x65xf32>
    %368 = tpu.matmul %366, %367, %cst_108 {dimension_numbers = #tpu.dot_dimension_numbers<[1], [1], [0], [0], [0, 0, 1, 0], [], []>} : vector<72x8xbf16>, vector<65x8xbf16>, vector<72x65xf32> -> vector<72x65xf32>
    %cst_109 = arith.constant dense<0xFF800000> : vector<72xf32>
    %369 = vector.multi_reduction <maximumf>, %368, %cst_109 [1] : vector<72x65xf32> to vector<72xf32>
    %370 = vector.shape_cast %369 : vector<72xf32> to vector<72x1xf32>
    %371 = vector.broadcast %370 : vector<72x1xf32> to vector<72x65xf32>
    %372 = arith.subf %368, %371 : vector<72x65xf32>
    %373 = math.exp %372 : vector<72x65xf32>
    %cst_110 = arith.constant dense<0.000000e+00> : vector<72xf32>
    %374 = vector.multi_reduction <add>, %373, %cst_110 [1] : vector<72x65xf32> to vector<72xf32>
    %375 = vector.shape_cast %374 : vector<72xf32> to vector<72x1xf32>
    %376 = tpu.reciprocal %375 {approx = true} : vector<72x1xf32> -> vector<72x1xf32>
    %377 = vector.broadcast %376 : vector<72x1xf32> to vector<72x65xf32>
    %378 = arith.mulf %373, %377 : vector<72x65xf32>
    %379 = arith.truncf %378 : vector<72x65xf32> to vector<72x65xbf16>
    %380 = arith.truncf %365 : vector<65x8xf32> to vector<65x8xbf16>
    %cst_111 = arith.constant dense<0.000000e+00> : vector<72x8xf32>
    %381 = tpu.matmul %379, %380, %cst_111 {dimension_numbers = #tpu.dot_dimension_numbers<[1], [0], [0], [1], [0, 0, 1, 1], [], []>} : vector<72x65xbf16>, vector<65x8xbf16>, vector<72x8xf32> -> vector<72x8xf32>
    %382 = arith.truncf %381 : vector<72x8xf32> to vector<72x8xbf16>
    %cst_112 = arith.constant dense<0.000000e+00> : vector<72x32xf32>
    %383 = tpu.matmul %382, %313, %cst_112 {dimension_numbers = #tpu.dot_dimension_numbers<[1], [0], [0], [1], [0, 0, 1, 1], [], []>} : vector<72x8xbf16>, vector<8x32xbf16>, vector<72x32xf32> -> vector<72x32xf32>
    %384 = arith.addf %362, %383 : vector<72x32xf32>
    %385 = vector.extract_strided_slice %316 {offsets = [0, 24], sizes = [72, 8], strides = [1, 1]} : vector<72x96xf32> to vector<72x8xf32>
    %386 = vector.extract_strided_slice %317 {offsets = [0, 56], sizes = [65, 8], strides = [1, 1]} : vector<65x96xf32> to vector<65x8xf32>
    %387 = vector.extract_strided_slice %317 {offsets = [0, 88], sizes = [65, 8], strides = [1, 1]} : vector<65x96xf32> to vector<65x8xf32>
    %388 = arith.truncf %385 : vector<72x8xf32> to vector<72x8xbf16>
    %389 = arith.truncf %386 : vector<65x8xf32> to vector<65x8xbf16>
    %cst_113 = arith.constant dense<0.000000e+00> : vector<72x65xf32>
    %390 = tpu.matmul %388, %389, %cst_113 {dimension_numbers = #tpu.dot_dimension_numbers<[1], [1], [0], [0], [0, 0, 1, 0], [], []>} : vector<72x8xbf16>, vector<65x8xbf16>, vector<72x65xf32> -> vector<72x65xf32>
    %cst_114 = arith.constant dense<0xFF800000> : vector<72xf32>
    %391 = vector.multi_reduction <maximumf>, %390, %cst_114 [1] : vector<72x65xf32> to vector<72xf32>
    %392 = vector.shape_cast %391 : vector<72xf32> to vector<72x1xf32>
    %393 = vector.broadcast %392 : vector<72x1xf32> to vector<72x65xf32>
    %394 = arith.subf %390, %393 : vector<72x65xf32>
    %395 = math.exp %394 : vector<72x65xf32>
    %cst_115 = arith.constant dense<0.000000e+00> : vector<72xf32>
    %396 = vector.multi_reduction <add>, %395, %cst_115 [1] : vector<72x65xf32> to vector<72xf32>
    %397 = vector.shape_cast %396 : vector<72xf32> to vector<72x1xf32>
    %398 = tpu.reciprocal %397 {approx = true} : vector<72x1xf32> -> vector<72x1xf32>
    %399 = vector.broadcast %398 : vector<72x1xf32> to vector<72x65xf32>
    %400 = arith.mulf %395, %399 : vector<72x65xf32>
    %401 = arith.truncf %400 : vector<72x65xf32> to vector<72x65xbf16>
    %402 = arith.truncf %387 : vector<65x8xf32> to vector<65x8xbf16>
    %cst_116 = arith.constant dense<0.000000e+00> : vector<72x8xf32>
    %403 = tpu.matmul %401, %402, %cst_116 {dimension_numbers = #tpu.dot_dimension_numbers<[1], [0], [0], [1], [0, 0, 1, 1], [], []>} : vector<72x65xbf16>, vector<65x8xbf16>, vector<72x8xf32> -> vector<72x8xf32>
    %404 = arith.truncf %403 : vector<72x8xf32> to vector<72x8xbf16>
    %cst_117 = arith.constant dense<0.000000e+00> : vector<72x32xf32>
    %405 = tpu.matmul %404, %315, %cst_117 {dimension_numbers = #tpu.dot_dimension_numbers<[1], [0], [0], [1], [0, 0, 1, 1], [], []>} : vector<72x8xbf16>, vector<8x32xbf16>, vector<72x32xf32> -> vector<72x32xf32>
    %406 = arith.addf %384, %405 : vector<72x32xf32>
    %407 = vector.extract_strided_slice %305 {offsets = [72, 0], sizes = [72, 96], strides = [1, 1]} : vector<144x96xf32> to vector<72x96xf32>
    %408 = vector.extract_strided_slice %407 {offsets = [0, 0], sizes = [65, 96], strides = [1, 1]} : vector<72x96xf32> to vector<65x96xf32>
    %cst_118 = arith.constant 0.000000e+00 : f32
    %409 = vector.broadcast %cst_118 : f32 to vector<72x32xf32>
    %410 = vector.extract_strided_slice %407 {offsets = [0, 0], sizes = [72, 8], strides = [1, 1]} : vector<72x96xf32> to vector<72x8xf32>
    %411 = vector.extract_strided_slice %408 {offsets = [0, 32], sizes = [65, 8], strides = [1, 1]} : vector<65x96xf32> to vector<65x8xf32>
    %412 = vector.extract_strided_slice %408 {offsets = [0, 64], sizes = [65, 8], strides = [1, 1]} : vector<65x96xf32> to vector<65x8xf32>
    %413 = arith.truncf %410 : vector<72x8xf32> to vector<72x8xbf16>
    %414 = arith.truncf %411 : vector<65x8xf32> to vector<65x8xbf16>
    %cst_119 = arith.constant dense<0.000000e+00> : vector<72x65xf32>
    %415 = tpu.matmul %413, %414, %cst_119 {dimension_numbers = #tpu.dot_dimension_numbers<[1], [1], [0], [0], [0, 0, 1, 0], [], []>} : vector<72x8xbf16>, vector<65x8xbf16>, vector<72x65xf32> -> vector<72x65xf32>
    %cst_120 = arith.constant dense<0xFF800000> : vector<72xf32>
    %416 = vector.multi_reduction <maximumf>, %415, %cst_120 [1] : vector<72x65xf32> to vector<72xf32>
    %417 = vector.shape_cast %416 : vector<72xf32> to vector<72x1xf32>
    %418 = vector.broadcast %417 : vector<72x1xf32> to vector<72x65xf32>
    %419 = arith.subf %415, %418 : vector<72x65xf32>
    %420 = math.exp %419 : vector<72x65xf32>
    %cst_121 = arith.constant dense<0.000000e+00> : vector<72xf32>
    %421 = vector.multi_reduction <add>, %420, %cst_121 [1] : vector<72x65xf32> to vector<72xf32>
    %422 = vector.shape_cast %421 : vector<72xf32> to vector<72x1xf32>
    %423 = tpu.reciprocal %422 {approx = true} : vector<72x1xf32> -> vector<72x1xf32>
    %424 = vector.broadcast %423 : vector<72x1xf32> to vector<72x65xf32>
    %425 = arith.mulf %420, %424 : vector<72x65xf32>
    %426 = arith.truncf %425 : vector<72x65xf32> to vector<72x65xbf16>
    %427 = arith.truncf %412 : vector<65x8xf32> to vector<65x8xbf16>
    %cst_122 = arith.constant dense<0.000000e+00> : vector<72x8xf32>
    %428 = tpu.matmul %426, %427, %cst_122 {dimension_numbers = #tpu.dot_dimension_numbers<[1], [0], [0], [1], [0, 0, 1, 1], [], []>} : vector<72x65xbf16>, vector<65x8xbf16>, vector<72x8xf32> -> vector<72x8xf32>
    %429 = arith.truncf %428 : vector<72x8xf32> to vector<72x8xbf16>
    %cst_123 = arith.constant dense<0.000000e+00> : vector<72x32xf32>
    %430 = tpu.matmul %429, %309, %cst_123 {dimension_numbers = #tpu.dot_dimension_numbers<[1], [0], [0], [1], [0, 0, 1, 1], [], []>} : vector<72x8xbf16>, vector<8x32xbf16>, vector<72x32xf32> -> vector<72x32xf32>
    %431 = arith.addf %409, %430 : vector<72x32xf32>
    %432 = vector.extract_strided_slice %407 {offsets = [0, 8], sizes = [72, 8], strides = [1, 1]} : vector<72x96xf32> to vector<72x8xf32>
    %433 = vector.extract_strided_slice %408 {offsets = [0, 40], sizes = [65, 8], strides = [1, 1]} : vector<65x96xf32> to vector<65x8xf32>
    %434 = vector.extract_strided_slice %408 {offsets = [0, 72], sizes = [65, 8], strides = [1, 1]} : vector<65x96xf32> to vector<65x8xf32>
    %435 = arith.truncf %432 : vector<72x8xf32> to vector<72x8xbf16>
    %436 = arith.truncf %433 : vector<65x8xf32> to vector<65x8xbf16>
    %cst_124 = arith.constant dense<0.000000e+00> : vector<72x65xf32>
    %437 = tpu.matmul %435, %436, %cst_124 {dimension_numbers = #tpu.dot_dimension_numbers<[1], [1], [0], [0], [0, 0, 1, 0], [], []>} : vector<72x8xbf16>, vector<65x8xbf16>, vector<72x65xf32> -> vector<72x65xf32>
    %cst_125 = arith.constant dense<0xFF800000> : vector<72xf32>
    %438 = vector.multi_reduction <maximumf>, %437, %cst_125 [1] : vector<72x65xf32> to vector<72xf32>
    %439 = vector.shape_cast %438 : vector<72xf32> to vector<72x1xf32>
    %440 = vector.broadcast %439 : vector<72x1xf32> to vector<72x65xf32>
    %441 = arith.subf %437, %440 : vector<72x65xf32>
    %442 = math.exp %441 : vector<72x65xf32>
    %cst_126 = arith.constant dense<0.000000e+00> : vector<72xf32>
    %443 = vector.multi_reduction <add>, %442, %cst_126 [1] : vector<72x65xf32> to vector<72xf32>
    %444 = vector.shape_cast %443 : vector<72xf32> to vector<72x1xf32>
    %445 = tpu.reciprocal %444 {approx = true} : vector<72x1xf32> -> vector<72x1xf32>
    %446 = vector.broadcast %445 : vector<72x1xf32> to vector<72x65xf32>
    %447 = arith.mulf %442, %446 : vector<72x65xf32>
    %448 = arith.truncf %447 : vector<72x65xf32> to vector<72x65xbf16>
    %449 = arith.truncf %434 : vector<65x8xf32> to vector<65x8xbf16>
    %cst_127 = arith.constant dense<0.000000e+00> : vector<72x8xf32>
    %450 = tpu.matmul %448, %449, %cst_127 {dimension_numbers = #tpu.dot_dimension_numbers<[1], [0], [0], [1], [0, 0, 1, 1], [], []>} : vector<72x65xbf16>, vector<65x8xbf16>, vector<72x8xf32> -> vector<72x8xf32>
    %451 = arith.truncf %450 : vector<72x8xf32> to vector<72x8xbf16>
    %cst_128 = arith.constant dense<0.000000e+00> : vector<72x32xf32>
    %452 = tpu.matmul %451, %311, %cst_128 {dimension_numbers = #tpu.dot_dimension_numbers<[1], [0], [0], [1], [0, 0, 1, 1], [], []>} : vector<72x8xbf16>, vector<8x32xbf16>, vector<72x32xf32> -> vector<72x32xf32>
    %453 = arith.addf %431, %452 : vector<72x32xf32>
    %454 = vector.extract_strided_slice %407 {offsets = [0, 16], sizes = [72, 8], strides = [1, 1]} : vector<72x96xf32> to vector<72x8xf32>
    %455 = vector.extract_strided_slice %408 {offsets = [0, 48], sizes = [65, 8], strides = [1, 1]} : vector<65x96xf32> to vector<65x8xf32>
    %456 = vector.extract_strided_slice %408 {offsets = [0, 80], sizes = [65, 8], strides = [1, 1]} : vector<65x96xf32> to vector<65x8xf32>
    %457 = arith.truncf %454 : vector<72x8xf32> to vector<72x8xbf16>
    %458 = arith.truncf %455 : vector<65x8xf32> to vector<65x8xbf16>
    %cst_129 = arith.constant dense<0.000000e+00> : vector<72x65xf32>
    %459 = tpu.matmul %457, %458, %cst_129 {dimension_numbers = #tpu.dot_dimension_numbers<[1], [1], [0], [0], [0, 0, 1, 0], [], []>} : vector<72x8xbf16>, vector<65x8xbf16>, vector<72x65xf32> -> vector<72x65xf32>
    %cst_130 = arith.constant dense<0xFF800000> : vector<72xf32>
    %460 = vector.multi_reduction <maximumf>, %459, %cst_130 [1] : vector<72x65xf32> to vector<72xf32>
    %461 = vector.shape_cast %460 : vector<72xf32> to vector<72x1xf32>
    %462 = vector.broadcast %461 : vector<72x1xf32> to vector<72x65xf32>
    %463 = arith.subf %459, %462 : vector<72x65xf32>
    %464 = math.exp %463 : vector<72x65xf32>
    %cst_131 = arith.constant dense<0.000000e+00> : vector<72xf32>
    %465 = vector.multi_reduction <add>, %464, %cst_131 [1] : vector<72x65xf32> to vector<72xf32>
    %466 = vector.shape_cast %465 : vector<72xf32> to vector<72x1xf32>
    %467 = tpu.reciprocal %466 {approx = true} : vector<72x1xf32> -> vector<72x1xf32>
    %468 = vector.broadcast %467 : vector<72x1xf32> to vector<72x65xf32>
    %469 = arith.mulf %464, %468 : vector<72x65xf32>
    %470 = arith.truncf %469 : vector<72x65xf32> to vector<72x65xbf16>
    %471 = arith.truncf %456 : vector<65x8xf32> to vector<65x8xbf16>
    %cst_132 = arith.constant dense<0.000000e+00> : vector<72x8xf32>
    %472 = tpu.matmul %470, %471, %cst_132 {dimension_numbers = #tpu.dot_dimension_numbers<[1], [0], [0], [1], [0, 0, 1, 1], [], []>} : vector<72x65xbf16>, vector<65x8xbf16>, vector<72x8xf32> -> vector<72x8xf32>
    %473 = arith.truncf %472 : vector<72x8xf32> to vector<72x8xbf16>
    %cst_133 = arith.constant dense<0.000000e+00> : vector<72x32xf32>
    %474 = tpu.matmul %473, %313, %cst_133 {dimension_numbers = #tpu.dot_dimension_numbers<[1], [0], [0], [1], [0, 0, 1, 1], [], []>} : vector<72x8xbf16>, vector<8x32xbf16>, vector<72x32xf32> -> vector<72x32xf32>
    %475 = arith.addf %453, %474 : vector<72x32xf32>
    %476 = vector.extract_strided_slice %407 {offsets = [0, 24], sizes = [72, 8], strides = [1, 1]} : vector<72x96xf32> to vector<72x8xf32>
    %477 = vector.extract_strided_slice %408 {offsets = [0, 56], sizes = [65, 8], strides = [1, 1]} : vector<65x96xf32> to vector<65x8xf32>
    %478 = vector.extract_strided_slice %408 {offsets = [0, 88], sizes = [65, 8], strides = [1, 1]} : vector<65x96xf32> to vector<65x8xf32>
    %479 = arith.truncf %476 : vector<72x8xf32> to vector<72x8xbf16>
    %480 = arith.truncf %477 : vector<65x8xf32> to vector<65x8xbf16>
    %cst_134 = arith.constant dense<0.000000e+00> : vector<72x65xf32>
    %481 = tpu.matmul %479, %480, %cst_134 {dimension_numbers = #tpu.dot_dimension_numbers<[1], [1], [0], [0], [0, 0, 1, 0], [], []>} : vector<72x8xbf16>, vector<65x8xbf16>, vector<72x65xf32> -> vector<72x65xf32>
    %cst_135 = arith.constant dense<0xFF800000> : vector<72xf32>
    %482 = vector.multi_reduction <maximumf>, %481, %cst_135 [1] : vector<72x65xf32> to vector<72xf32>
    %483 = vector.shape_cast %482 : vector<72xf32> to vector<72x1xf32>
    %484 = vector.broadcast %483 : vector<72x1xf32> to vector<72x65xf32>
    %485 = arith.subf %481, %484 : vector<72x65xf32>
    %486 = math.exp %485 : vector<72x65xf32>
    %cst_136 = arith.constant dense<0.000000e+00> : vector<72xf32>
    %487 = vector.multi_reduction <add>, %486, %cst_136 [1] : vector<72x65xf32> to vector<72xf32>
    %488 = vector.shape_cast %487 : vector<72xf32> to vector<72x1xf32>
    %489 = tpu.reciprocal %488 {approx = true} : vector<72x1xf32> -> vector<72x1xf32>
    %490 = vector.broadcast %489 : vector<72x1xf32> to vector<72x65xf32>
    %491 = arith.mulf %486, %490 : vector<72x65xf32>
    %492 = arith.truncf %491 : vector<72x65xf32> to vector<72x65xbf16>
    %493 = arith.truncf %478 : vector<65x8xf32> to vector<65x8xbf16>
    %cst_137 = arith.constant dense<0.000000e+00> : vector<72x8xf32>
    %494 = tpu.matmul %492, %493, %cst_137 {dimension_numbers = #tpu.dot_dimension_numbers<[1], [0], [0], [1], [0, 0, 1, 1], [], []>} : vector<72x65xbf16>, vector<65x8xbf16>, vector<72x8xf32> -> vector<72x8xf32>
    %495 = arith.truncf %494 : vector<72x8xf32> to vector<72x8xbf16>
    %cst_138 = arith.constant dense<0.000000e+00> : vector<72x32xf32>
    %496 = tpu.matmul %495, %315, %cst_138 {dimension_numbers = #tpu.dot_dimension_numbers<[1], [0], [0], [1], [0, 0, 1, 1], [], []>} : vector<72x8xbf16>, vector<8x32xbf16>, vector<72x32xf32> -> vector<72x32xf32>
    %497 = arith.addf %475, %496 : vector<72x32xf32>
    %498 = tpu.concatenate %406, %497 in 0 : vector<72x32xf32>, vector<72x32xf32> -> vector<144x32xf32>
    %499 = arith.addf %277, %498 : vector<144x32xf32>
    %c9 = arith.constant 9 : index
    %c0_139 = arith.constant 0 : index
    %500 = vector.load %arg9[%c9, %c0_139] : memref<17x128xf32, #tpu.memory_space<vmem>>, vector<1x32xf32>
    %501 = vector.broadcast %500 : vector<1x32xf32> to vector<144x32xf32>
    %502 = arith.addf %499, %501 : vector<144x32xf32>
    %c10 = arith.constant 10 : index
    %c0_140 = arith.constant 0 : index
    %503 = vector.load %arg9[%c10, %c0_140] : memref<17x128xf32, #tpu.memory_space<vmem>>, vector<1x32xf32>
    %c11 = arith.constant 11 : index
    %c0_141 = arith.constant 0 : index
    %504 = vector.load %arg9[%c11, %c0_141] : memref<17x128xf32, #tpu.memory_space<vmem>>, vector<1x32xf32>
    %cst_142 = arith.constant dense<0.000000e+00> : vector<144xf32>
    %505 = vector.multi_reduction <add>, %502, %cst_142 [1] : vector<144x32xf32> to vector<144xf32>
    %506 = vector.shape_cast %505 : vector<144xf32> to vector<144x1xf32>
    %cst_143 = arith.constant 3.200000e+01 : f32
    %507 = vector.broadcast %cst_143 : f32 to vector<144x1xf32>
    %508 = arith.divf %506, %507 : vector<144x1xf32>
    %509 = vector.broadcast %508 : vector<144x1xf32> to vector<144x32xf32>
    %510 = arith.subf %502, %509 : vector<144x32xf32>
    %511 = arith.mulf %510, %510 : vector<144x32xf32>
    %cst_144 = arith.constant dense<0.000000e+00> : vector<144xf32>
    %512 = vector.multi_reduction <add>, %511, %cst_144 [1] : vector<144x32xf32> to vector<144xf32>
    %513 = vector.shape_cast %512 : vector<144xf32> to vector<144x1xf32>
    %cst_145 = arith.constant 3.200000e+01 : f32
    %514 = vector.broadcast %cst_145 : f32 to vector<144x1xf32>
    %515 = arith.divf %513, %514 : vector<144x1xf32>
    %516 = vector.broadcast %508 : vector<144x1xf32> to vector<144x32xf32>
    %517 = arith.subf %502, %516 : vector<144x32xf32>
    %cst_146 = arith.constant 9.99999974E-6 : f32
    %518 = vector.broadcast %cst_146 : f32 to vector<144x1xf32>
    %519 = arith.addf %515, %518 : vector<144x1xf32>
    %520 = math.rsqrt %519 : vector<144x1xf32>
    %521 = vector.broadcast %520 : vector<144x1xf32> to vector<144x32xf32>
    %522 = arith.mulf %517, %521 : vector<144x32xf32>
    %523 = vector.broadcast %503 : vector<1x32xf32> to vector<144x32xf32>
    %524 = arith.mulf %522, %523 : vector<144x32xf32>
    %525 = vector.broadcast %504 : vector<1x32xf32> to vector<144x32xf32>
    %526 = arith.addf %524, %525 : vector<144x32xf32>
    %c1_147 = arith.constant 1 : index
    %c0_148 = arith.constant 0 : index
    %c0_149 = arith.constant 0 : index
    %527 = vector.load %arg6[%c1_147, %c0_148, %c0_149] : memref<2x32x64xbf16, #tpu.memory_space<vmem>>, vector<1x32x64xbf16>
    %528 = vector.shape_cast %527 : vector<1x32x64xbf16> to vector<32x64xbf16>
    %529 = arith.truncf %526 : vector<144x32xf32> to vector<144x32xbf16>
    %cst_150 = arith.constant dense<0.000000e+00> : vector<144x64xf32>
    %530 = tpu.matmul %529, %528, %cst_150 {dimension_numbers = #tpu.dot_dimension_numbers<[1], [0], [0], [1], [0, 0, 1, 1], [], []>} : vector<144x32xbf16>, vector<32x64xbf16>, vector<144x64xf32> -> vector<144x64xf32>
    %c12 = arith.constant 12 : index
    %c0_151 = arith.constant 0 : index
    %531 = vector.load %arg9[%c12, %c0_151] : memref<17x128xf32, #tpu.memory_space<vmem>>, vector<1x64xf32>
    %532 = vector.broadcast %531 : vector<1x64xf32> to vector<144x64xf32>
    %533 = arith.addf %530, %532 : vector<144x64xf32>
    %cst_152 = arith.constant 5.000000e-01 : f32
    %534 = vector.broadcast %cst_152 : f32 to vector<144x64xf32>
    %535 = arith.mulf %534, %533 : vector<144x64xf32>
    %cst_153 = arith.constant 0.707106769 : f32
    %536 = vector.broadcast %cst_153 : f32 to vector<144x64xf32>
    %537 = arith.mulf %533, %536 : vector<144x64xf32>
    %538 = math.erf %537 : vector<144x64xf32>
    %cst_154 = arith.constant 1.000000e+00 : f32
    %539 = vector.broadcast %cst_154 : f32 to vector<144x64xf32>
    %540 = arith.addf %539, %538 : vector<144x64xf32>
    %541 = arith.mulf %535, %540 : vector<144x64xf32>
    %c1_155 = arith.constant 1 : index
    %c0_156 = arith.constant 0 : index
    %c0_157 = arith.constant 0 : index
    %542 = vector.load %arg7[%c1_155, %c0_156, %c0_157] : memref<2x64x32xbf16, #tpu.memory_space<vmem>>, vector<1x64x32xbf16>
    %543 = vector.shape_cast %542 : vector<1x64x32xbf16> to vector<64x32xbf16>
    %544 = arith.truncf %541 : vector<144x64xf32> to vector<144x64xbf16>
    %cst_158 = arith.constant dense<0.000000e+00> : vector<144x32xf32>
    %545 = tpu.matmul %544, %543, %cst_158 {dimension_numbers = #tpu.dot_dimension_numbers<[1], [0], [0], [1], [0, 0, 1, 1], [], []>} : vector<144x64xbf16>, vector<64x32xbf16>, vector<144x32xf32> -> vector<144x32xf32>
    %546 = arith.addf %502, %545 : vector<144x32xf32>
    %c13 = arith.constant 13 : index
    %c0_159 = arith.constant 0 : index
    %547 = vector.load %arg9[%c13, %c0_159] : memref<17x128xf32, #tpu.memory_space<vmem>>, vector<1x32xf32>
    %548 = vector.broadcast %547 : vector<1x32xf32> to vector<144x32xf32>
    %549 = arith.addf %546, %548 : vector<144x32xf32>
    %cst_160 = arith.constant 0.000000e+00 : f32
    %550 = vector.broadcast %cst_160 : f32 to vector<8x128xf32>
    %c0_161 = arith.constant 0 : index
    %c0_162 = arith.constant 0 : index
    %551 = vector.load %arg10[%c0_161, %c0_162] : memref<8x128xf32, #tpu.memory_space<vmem>>, vector<8x128xf32>
    tpu.vector_store %arg10[%c0_161, %c0_162], %550 {strides = array<i32>} : memref<8x128xf32, #tpu.memory_space<vmem>>, vector<8x128xf32>,
    %552 = vector.extract_strided_slice %549 {offsets = [0, 0], sizes = [1, 32], strides = [1, 1]} : vector<144x32xf32> to vector<1x32xf32>
    %c14 = arith.constant 14 : index
    %c0_163 = arith.constant 0 : index
    %553 = vector.load %arg9[%c14, %c0_163] : memref<17x128xf32, #tpu.memory_space<vmem>>, vector<1x32xf32>
    %c15 = arith.constant 15 : index
    %c0_164 = arith.constant 0 : index
    %554 = vector.load %arg9[%c15, %c0_164] : memref<17x128xf32, #tpu.memory_space<vmem>>, vector<1x32xf32>
    %cst_165 = arith.constant dense<0.000000e+00> : vector<1xf32>
    %555 = vector.multi_reduction <add>, %552, %cst_165 [1] : vector<1x32xf32> to vector<1xf32>
    %556 = vector.shape_cast %555 : vector<1xf32> to vector<1x1xf32>
    %cst_166 = arith.constant 3.200000e+01 : f32
    %557 = vector.broadcast %cst_166 : f32 to vector<1x1xf32>
    %558 = arith.divf %556, %557 : vector<1x1xf32>
    %559 = vector.broadcast %558 : vector<1x1xf32> to vector<1x32xf32>
    %560 = arith.subf %552, %559 : vector<1x32xf32>
    %561 = arith.mulf %560, %560 : vector<1x32xf32>
    %cst_167 = arith.constant dense<0.000000e+00> : vector<1xf32>
    %562 = vector.multi_reduction <add>, %561, %cst_167 [1] : vector<1x32xf32> to vector<1xf32>
    %563 = vector.shape_cast %562 : vector<1xf32> to vector<1x1xf32>
    %cst_168 = arith.constant 3.200000e+01 : f32
    %564 = vector.broadcast %cst_168 : f32 to vector<1x1xf32>
    %565 = arith.divf %563, %564 : vector<1x1xf32>
    %566 = vector.broadcast %558 : vector<1x1xf32> to vector<1x32xf32>
    %567 = arith.subf %552, %566 : vector<1x32xf32>
    %cst_169 = arith.constant 9.99999974E-6 : f32
    %568 = vector.broadcast %cst_169 : f32 to vector<1x1xf32>
    %569 = arith.addf %565, %568 : vector<1x1xf32>
    %570 = math.rsqrt %569 : vector<1x1xf32>
    %571 = vector.broadcast %570 : vector<1x1xf32> to vector<1x32xf32>
    %572 = arith.mulf %567, %571 : vector<1x32xf32>
    %573 = arith.mulf %572, %553 : vector<1x32xf32>
    %574 = arith.addf %573, %554 : vector<1x32xf32>
    %c0_170 = arith.constant 0 : index
    %c0_171 = arith.constant 0 : index
    %575 = vector.load %arg8[%c0_170, %c0_171] : memref<32x128xbf16, #tpu.memory_space<vmem>>, vector<32x128xbf16>
    %576 = arith.truncf %574 : vector<1x32xf32> to vector<1x32xbf16>
    %cst_172 = arith.constant dense<0.000000e+00> : vector<1x128xf32>
    %577 = tpu.matmul %576, %575, %cst_172 {dimension_numbers = #tpu.dot_dimension_numbers<[1], [0], [0], [1], [0, 0, 1, 1], [], []>} : vector<1x32xbf16>, vector<32x128xbf16>, vector<1x128xf32> -> vector<1x128xf32>
    %c16 = arith.constant 16 : index
    %c0_173 = arith.constant 0 : index
    %578 = vector.load %arg9[%c16, %c0_173] : memref<17x128xf32, #tpu.memory_space<vmem>>, vector<1x128xf32>
    %579 = arith.addf %577, %578 : vector<1x128xf32>
    %c0_174 = arith.constant 0 : index
    %c0_175 = arith.constant 0 : index
    %580 = vector.load %arg10[%c0_174, %c0_175] : memref<8x128xf32, #tpu.memory_space<vmem>>, vector<1x128xf32>
    tpu.vector_store %arg10[%c0_174, %c0_175], %579 {strides = array<i32>} : memref<8x128xf32, #tpu.memory_space<vmem>>, vector<1x128xf32>,
    %581 = vector.extract_strided_slice %549 {offsets = [72, 0], sizes = [1, 32], strides = [1, 1]} : vector<144x32xf32> to vector<1x32xf32>
    %c14_176 = arith.constant 14 : index
    %c0_177 = arith.constant 0 : index
    %582 = vector.load %arg9[%c14_176, %c0_177] : memref<17x128xf32, #tpu.memory_space<vmem>>, vector<1x32xf32>
    %c15_178 = arith.constant 15 : index
    %c0_179 = arith.constant 0 : index
    %583 = vector.load %arg9[%c15_178, %c0_179] : memref<17x128xf32, #tpu.memory_space<vmem>>, vector<1x32xf32>
    %cst_180 = arith.constant dense<0.000000e+00> : vector<1xf32>
    %584 = vector.multi_reduction <add>, %581, %cst_180 [1] : vector<1x32xf32> to vector<1xf32>
    %585 = vector.shape_cast %584 : vector<1xf32> to vector<1x1xf32>
    %cst_181 = arith.constant 3.200000e+01 : f32
    %586 = vector.broadcast %cst_181 : f32 to vector<1x1xf32>
    %587 = arith.divf %585, %586 : vector<1x1xf32>
    %588 = vector.broadcast %587 : vector<1x1xf32> to vector<1x32xf32>
    %589 = arith.subf %581, %588 : vector<1x32xf32>
    %590 = arith.mulf %589, %589 : vector<1x32xf32>
    %cst_182 = arith.constant dense<0.000000e+00> : vector<1xf32>
    %591 = vector.multi_reduction <add>, %590, %cst_182 [1] : vector<1x32xf32> to vector<1xf32>
    %592 = vector.shape_cast %591 : vector<1xf32> to vector<1x1xf32>
    %cst_183 = arith.constant 3.200000e+01 : f32
    %593 = vector.broadcast %cst_183 : f32 to vector<1x1xf32>
    %594 = arith.divf %592, %593 : vector<1x1xf32>
    %595 = vector.broadcast %587 : vector<1x1xf32> to vector<1x32xf32>
    %596 = arith.subf %581, %595 : vector<1x32xf32>
    %cst_184 = arith.constant 9.99999974E-6 : f32
    %597 = vector.broadcast %cst_184 : f32 to vector<1x1xf32>
    %598 = arith.addf %594, %597 : vector<1x1xf32>
    %599 = math.rsqrt %598 : vector<1x1xf32>
    %600 = vector.broadcast %599 : vector<1x1xf32> to vector<1x32xf32>
    %601 = arith.mulf %596, %600 : vector<1x32xf32>
    %602 = arith.mulf %601, %582 : vector<1x32xf32>
    %603 = arith.addf %602, %583 : vector<1x32xf32>
    %c0_185 = arith.constant 0 : index
    %c0_186 = arith.constant 0 : index
    %604 = vector.load %arg8[%c0_185, %c0_186] : memref<32x128xbf16, #tpu.memory_space<vmem>>, vector<32x128xbf16>
    %605 = arith.truncf %603 : vector<1x32xf32> to vector<1x32xbf16>
    %cst_187 = arith.constant dense<0.000000e+00> : vector<1x128xf32>
    %606 = tpu.matmul %605, %604, %cst_187 {dimension_numbers = #tpu.dot_dimension_numbers<[1], [0], [0], [1], [0, 0, 1, 1], [], []>} : vector<1x32xbf16>, vector<32x128xbf16>, vector<1x128xf32> -> vector<1x128xf32>
    %c16_188 = arith.constant 16 : index
    %c0_189 = arith.constant 0 : index
    %607 = vector.load %arg9[%c16_188, %c0_189] : memref<17x128xf32, #tpu.memory_space<vmem>>, vector<1x128xf32>
    %608 = arith.addf %606, %607 : vector<1x128xf32>
    %c1_190 = arith.constant 1 : index
    %c0_191 = arith.constant 0 : index
    %609 = vector.load %arg10[%c1_190, %c0_191] : memref<8x128xf32, #tpu.memory_space<vmem>>, vector<1x128xf32>
    tpu.vector_store %arg10[%c1_190, %c0_191], %608 {strides = array<i32>} : memref<8x128xf32, #tpu.memory_space<vmem>>, vector<1x128xf32>,
    return
  }
  func.func @transform_0(%arg0: i32) -> (i32, i32) {
    %c0_i32 = arith.constant 0 : i32
    %c0_i32_0 = arith.constant 0 : i32
    %c0_i32_1 = arith.constant 0 : i32
    return %c0_i32, %c0_i32_0 : i32, i32
  }
  func.func @transform_1(%arg0: i32) -> (i32, i32) {
    %c0_i32 = arith.constant 0 : i32
    %c0_i32_0 = arith.constant 0 : i32
    %c0_i32_1 = arith.constant 0 : i32
    return %c0_i32, %c0_i32_0 : i32, i32
  }
  func.func @transform_2(%arg0: i32) -> (i32, i32) {
    %c0_i32 = arith.constant 0 : i32
    %c0_i32_0 = arith.constant 0 : i32
    %c0_i32_1 = arith.constant 0 : i32
    return %c0_i32, %c0_i32_0 : i32, i32
  }
  func.func @transform_3(%arg0: i32) -> (i32, i32, i32) {
    %c0_i32 = arith.constant 0 : i32
    %c0_i32_0 = arith.constant 0 : i32
    %c0_i32_1 = arith.constant 0 : i32
    %c0_i32_2 = arith.constant 0 : i32
    return %c0_i32, %c0_i32_0, %c0_i32_1 : i32, i32, i32
  }
  func.func @transform_4(%arg0: i32) -> (i32, i32, i32) {
    %c0_i32 = arith.constant 0 : i32
    %c0_i32_0 = arith.constant 0 : i32
    %c0_i32_1 = arith.constant 0 : i32
    %c0_i32_2 = arith.constant 0 : i32
    return %c0_i32, %c0_i32_0, %c0_i32_1 : i32, i32, i32
  }
  func.func @transform_5(%arg0: i32) -> (i32, i32, i32) {
    %c0_i32 = arith.constant 0 : i32
    %c0_i32_0 = arith.constant 0 : i32
    %c0_i32_1 = arith.constant 0 : i32
    %c0_i32_2 = arith.constant 0 : i32
    return %c0_i32, %c0_i32_0, %c0_i32_1 : i32, i32, i32
  }
  func.func @transform_6(%arg0: i32) -> (i32, i32, i32) {
    %c0_i32 = arith.constant 0 : i32
    %c0_i32_0 = arith.constant 0 : i32
    %c0_i32_1 = arith.constant 0 : i32
    %c0_i32_2 = arith.constant 0 : i32
    return %c0_i32, %c0_i32_0, %c0_i32_1 : i32, i32, i32
  }
  func.func @transform_7(%arg0: i32) -> (i32, i32) {
    %c0_i32 = arith.constant 0 : i32
    %c0_i32_0 = arith.constant 0 : i32
    %c0_i32_1 = arith.constant 0 : i32
    return %c0_i32, %c0_i32_0 : i32, i32
  }
  func.func @transform_8(%arg0: i32) -> (i32, i32) {
    %c0_i32 = arith.constant 0 : i32
    %c0_i32_0 = arith.constant 0 : i32
    %c0_i32_1 = arith.constant 0 : i32
    return %c0_i32, %c0_i32_0 : i32, i32
  }
  func.func @transform_9(%arg0: i32) -> (i32, i32) {
    %c0_i32 = arith.constant 0 : i32
    %c0_i32_0 = arith.constant 0 : i32
    %c0_i32_1 = arith.constant 0 : i32
    return %c0_i32, %c0_i32_0 : i32, i32
  }
}

</mosaic_0001>

<bundles_post_ra>
// kernel: vit2_forward.1
= control target key start
LH: loop header
LB: loop body
LE: loop exit
PB: predicated region body
PF: predicated region fallthrough
CT: control target
= control target key end

     0   :  { %vm113_vm0 = vcmask 1045504   ;;  %v17794_v0 = vmov 0.0   ;;  %vm12971_vm1 = vmmov 0   ;;  %vm85_vm2 = vcmask 97280   ;;  %s12972_s29 = smov 96   ;;  %s12973_s30 = smov 88   ;;  %s17784_s2 = inlined_call_operand.vmem [shape: bf16[12,32], index: 2, kind: input, shape index: {}]   ;;  %s17785_s0 = inlined_call_operand.vmem [shape: f32[144,12], index: 0, kind: input, shape index: {}]   ;;  %s17786_s1 = inlined_call_operand.vmem [shape: f32[144,32], index: 1, kind: input, shape index: {}]   ;;  %s17787_s3 = inlined_call_operand.vmem [shape: bf16[2,32,96], index: 3, kind: input, shape index: {}]   ;;  %s17788_s8 = inlined_call_operand.vmem [shape: f32[17,128], index: 8, kind: input, shape index: {}]   ;;  %s17789_s4 = inlined_call_operand.vmem [shape: f32[2,32,32], index: 4, kind: input, shape index: {}]   ;;  %s17790_s5 = inlined_call_operand.vmem [shape: bf16[2,32,64], index: 5, kind: input, shape index: {}]   ;;  %s17791_s6 = inlined_call_operand.vmem [shape: bf16[2,64,32], index: 6, kind: input, shape index: {}]   ;;  %s17792_s7 = inlined_call_operand.vmem [shape: bf16[32,128], index: 7, kind: input, shape index: {}]   ;;  %s17793_s9 = inlined_call_operand.vmem [shape: f32[8,128], index: 9, kind: output, shape index: {}]  }
   0x1   :  { %10525 = vmatprep.subr.bf16.mxu0 %v17794_v0  ;;  %v12153_v1 = vld [vmem:[%s17784_s2] sm:$0x3f]   ;;  %10527 = vmatprep.mubr.msk.bf16.mxu0 %vm12971_vm1, %v17794_v0  ;;  %v34_v3 = vld [vmem:[%s17785_s0 + $0x8] sm:$0xff]  ;;  %v35_v6 = vld [vmem:[%s17785_s0 + $0x10] sm:$0xff]  ;;  %vm224_vm3 = vcmask 261120   ;;  %s12974_s10 = smov 120  }
   0x2   :  { %v33_v2 = vld [vmem:[%s17785_s0] sm:$0xff]  ;;  %10563 = vmatprep.subr.bf16.mxu1 %v17794_v0  ;;  %10567 = vmatprep.mubr.msk.bf16.mxu1 %vm12971_vm1, %v17794_v0  ;;  %v115_v4 = vsel %vm113_vm0, %v12153_v1, 0  ;;  %v36_v7 = vld [vmem:[%s17785_s0 + $0x18] sm:$0xff]  ;;  %v38_v10 = vld [vmem:[%s17785_s0 + $0x28] sm:$0xff]  ;;  %vm689_vm4 = vcmask 64512   ;;  %vm792_vm5 = vcmask 531456  }
   0x3   :  { %v53_v5 = vpack.c.bf16 %v34_v3, %v33_v2  ;;  %10526 = vmatpush3.bf16.msra.mxu0 %v115_v4  ;;  %v54_v8 = vpack.c.bf16 %v36_v7, %v35_v6  ;;  %v37_v9 = vld [vmem:[%s17785_s0 + $0x20] sm:$0xff]  ;;  %v39_v12 = vld [vmem:[%s17785_s0 + $0x30] sm:$0xff]  ;;  %v40_v13 = vld [vmem:[%s17785_s0 + $0x38] sm:$0xff]  ;;  %vm926_vm6 = vcmask 1040384   ;;  %s12978_s26 = smov 80   ;;  %s12979_s27 = smov 112  }
   0x4   :  { %10603 = vmatprep.subr.bf16.mxu0 %v17794_v0  ;;  %v55_v11 = vpack.c.bf16 %v38_v10, %v37_v9  ;;  %v56_v14 = vpack.c.bf16 %v40_v13, %v39_v12  ;;  %v41_v15 = vld [vmem:[%s17785_s0 + $0x40] sm:$0xff]  ;;  %v42_v16 = vld [vmem:[%s17785_s0 + $0x48] sm:$0xff]  ;;  %v64_v27 = vld [vmem:[%s17786_s1 + $0x10] sm:$0xff]  ;;  %s12980_s28 = smov 48   ;;  %vm1359_vm7 = vcmask 1043456   ;;  %s12981_s2 = smov 72  }
   0x5   :  { %v57_v17 = vpack.c.bf16 %v42_v16, %v41_v15  ;;  %v62_v18 = vld [vmem:[%s17786_s1] sm:$0xff]  ;;  %v63_v20 = vld [vmem:[%s17786_s1 + $0x8] sm:$0xff]  ;;  %v65_v30 = vld [vmem:[%s17786_s1 + $0x18] sm:$0xff]  ;;  %s12982_s15 = smov 104   ;;  %s12983_s16 = smov 40   ;;  %vm4713_vm8 = vcmask 523264  }
   0x6   :  { %10528 = vmatmul.mubr.msk.bf16.vlgmr.msra.gmra.mrb[0].mxu0 %vm85_vm2, %v53_v5  ;;  %v66_v37 = vld [vmem:[%s17786_s1 + $0x20] sm:$0xff]  ;;  %v67_v40 = vld [vmem:[%s17786_s1 + $0x28] sm:$0xff]  ;;  %v68_v48 = vld [vmem:[%s17786_s1 + $0x30] sm:$0xff]  ;;  %vm9502_vm9 = vcmask 253952  }
   0x7   :  { %10531 = vmatprep.mubr.msk.bf16.mxu0 %vm12971_vm1, %v17794_v0  ;;  %v69_v50 = vld [vmem:[%s17786_s1 + $0x38] sm:$0xff]  ;;  %v70_v58 = vld [vmem:[%s17786_s1 + $0x40] sm:$0xff]  ;;  %v71_v60 = vld [vmem:[%s17786_s1 + $0x48] sm:$0xff] }
   0xe   :  { %10532 = vmatmul.mubr.msk.bf16.gmra.mrb[4].mxu0 %vm85_vm2, %v54_v8 }
   0xf   :  { %10535 = vmatprep.mubr.msk.bf16.mxu0 %vm12971_vm1, %v17794_v0 }
  0x16   :  { %10536 = vmatmul.mubr.msk.bf16.gmra.mrb[8].mxu0 %vm85_vm2, %v55_v11 }
  0x17   :  { %10539 = vmatprep.mubr.msk.bf16.mxu0 %vm12971_vm1, %v17794_v0 }
  0x1e   :  { %10540 = vmatmul.mubr.msk.bf16.gmra.mrb[12].mxu0 %vm85_vm2, %v56_v14 }
  0x1f   :  { %10543 = vmatprep.mubr.msk.bf16.mxu0 %vm12971_vm1, %v17794_v0 }
  0x26   :  { %10544 = vmatmul.mubr.msk.bf16.gmra.mrb[16].mxu0 %vm85_vm2, %v57_v17 }
  0x27   :  { %10547 = vmatprep.mubr.msk.bf16.mxu0 %vm12971_vm1, %v17794_v0 }
  0xd9   :  { %v151_v19 = vpop.f32.mrb[0].mxu0 }
  0xda   :  { %v13095_v21 = vadd.f32 %v151_v19, %v62_v18  ;;  %v10529_v22 = vpop.f32.mrb[1].mxu0 }
  0xdb   :  { %v154_v23 = vpop.f32.mrb[2].mxu0 }
  0xdc   :  { %v13097_v24 = vadd.f32 %v154_v23, %v63_v20  ;;  %v10530_v25 = vpop.f32.mrb[3].mxu0  ;;  %v225_v26 = vsel %vm224_vm3, %v13095_v21, 0.0 }
  0xdd   :  { %226 = vadd.xlane.f32.xlu0 %v225_v26 }
  0xde   :  { %v228_v28 = vsel %vm224_vm3, %v13097_v24, 0.0 }
  0xe1   :  { %229 = vadd.xlane.f32.xlu0 %v228_v28  ;;  %v159_v29 = vpop.f32.mrb[4].mxu0 }
  0xe2   :  { %v13109_v31 = vadd.f32 %v159_v29, %v64_v27  ;;  %v10533_v32 = vpop.f32.mrb[5].mxu0 }
  0xe3   :  { %v162_v33 = vpop.f32.mrb[6].mxu0 }
  0xe4   :  { %v13111_v34 = vadd.f32 %v162_v33, %v65_v30  ;;  %v10534_v35 = vpop.f32.mrb[7].mxu0  ;;  %v231_v36 = vsel %vm224_vm3, %v13109_v31, 0.0 }
  0xe5   :  { %232 = vadd.xlane.f32.xlu1 %v231_v36 }
  0xe6   :  { %v234_v38 = vsel %vm224_vm3, %v13111_v34, 0.0 }
  0xe9   :  { %235 = vadd.xlane.f32.xlu1 %v234_v38  ;;  %v167_v39 = vpop.f32.mrb[8].mxu0 }
  0xea   :  { %v13123_v41 = vadd.f32 %v167_v39, %v66_v37  ;;  %v10537_v42 = vpop.f32.mrb[9].mxu0 }
  0xeb   :  { %v170_v43 = vpop.f32.mrb[10].mxu0 }
  0xec   :  { %v13125_v44 = vadd.f32 %v170_v43, %v67_v40  ;;  %v10538_v45 = vpop.f32.mrb[11].mxu0  ;;  %v237_v46 = vsel %vm224_vm3, %v13123_v41, 0.0 }
  0xed   :  { %238 = vadd.xlane.f32.xlu0 %v237_v46 }
  0xee   :  { %v240_v47 = vsel %vm224_vm3, %v13125_v44, 0.0 }
  0xef   :  { %241 = vadd.xlane.f32.xlu1 %v240_v47 }
  0xf1   :  { %v175_v49 = vpop.f32.mrb[12].mxu0 }
  0xf2   :  { %v13137_v51 = vadd.f32 %v175_v49, %v68_v48  ;;  %v10541_v52 = vpop.f32.mrb[13].mxu0 }
  0xf3   :  { %v178_v53 = vpop.f32.mrb[14].mxu0 }
  0xf4   :  { %v13139_v54 = vadd.f32 %v178_v53, %v69_v50  ;;  %v10542_v55 = vpop.f32.mrb[15].mxu0  ;;  %v243_v56 = vsel %vm224_vm3, %v13137_v51, 0.0 }
  0xf5   :  { %244 = vadd.xlane.f32.xlu0 %v243_v56 }
  0xf6   :  { %v246_v57 = vsel %vm224_vm3, %v13139_v54, 0.0 }
  0xf7   :  { %247 = vadd.xlane.f32.xlu1 %v246_v57 }
  0xf9   :  { %v183_v59 = vpop.f32.mrb[16].mxu0 }
  0xfa   :  { %v13151_v61 = vadd.f32 %v183_v59, %v70_v58  ;;  %v10545_v62 = vpop.f32.mrb[17].mxu0 }
  0xfb   :  { %v186_v63 = vpop.f32.mrb[18].mxu0 }
  0xfc   :  { %v13153_v1 = vadd.f32 %v186_v63, %v71_v60  ;;  %v249_v2 = vsel %vm224_vm3, %v13151_v61, 0.0  ;;  %v10546_v3 = vpop.f32.mrb[19].mxu0  ;;  %v12154_v63 = vld [vmem:[%s17787_s3] sm:$0xff]  }
  0xfd   :  { %250 = vadd.xlane.f32.xlu0 %v249_v2  ;;  %10564 = vmatpush3.bf16.msra.mxu1 %v12154_v63  ;;  %v12155_v3 = vld [vmem:[%s17787_s3 + $0x8] sm:$0xff]  }
  0xfe   :  { %v252_v4 = vsel %vm224_vm3, %v13153_v1, 0.0  ;;  %10565 = vmatprep.subr.bf16.mxu1 %v17794_v0 }
  0xff   :  { %253 = vadd.xlane.f32.xlu1 %v252_v4  ;;  %v43_v4 = vld [vmem:[%s17785_s0 + $0x50] sm:$0xff] }
 0x101   :  { %10566 = vmatpush3.bf16.msra.mxu1 %v12155_v3 }
 0x102   :  { %10633 = vmatprep.subr.bf16.mxu1 %v17794_v0 }
 0x16a   :  { %v227_v5 = vpop.xlane.xlu0 %226 }
 0x16b   :  { %v280_v6 = vmul.f32 0.03125, %v227_v5  ;;  %v44_v5 = vld [vmem:[%s17785_s0 + $0x58] sm:$0xff] }
 0x16d   :  { %v13160_v7 = vsub.f32 %v13095_v21, %v280_v6  ;;  %v58_v6 = vpack.c.bf16 %v44_v5, %v43_v4 }
 0x16e   :  { %v230_v8 = vpop.xlane.xlu0 %229 }
 0x16f   :  { %v281_v9 = vmul.f32 0.03125, %v230_v8  ;;  %v316_v10 = vmul.f32 %v13160_v7, %v13160_v7  ;;  %10548 = vmatmul.mubr.msk.bf16.gmra.mrb[20].mxu0 %vm85_vm2, %v58_v6  ;;  %v45_v8 = vld [vmem:[%s17785_s0 + $0x60] sm:$0xff] }
 0x170   :  { %10551 = vmatprep.mubr.msk.bf16.mxu0 %vm12971_vm1, %v17794_v0 }
 0x171   :  { %v13165_v11 = vsub.f32 %v13097_v24, %v281_v9  ;;  %v334_v12 = vsel %vm224_vm3, %v316_v10, 0.0  ;;  %v46_v9 = vld [vmem:[%s17785_s0 + $0x68] sm:$0xff] }
 0x172   :  { %v233_v13 = vpop.xlane.xlu1 %232  ;;  %335 = vadd.xlane.f32.xlu0 %v334_v12  ;;  %v59_v10 = vpack.c.bf16 %v46_v9, %v45_v8  ;;  %v47_v12 = vld [vmem:[%s17785_s0 + $0x70] sm:$0xff] }
 0x173   :  { %v282_v14 = vmul.f32 0.03125, %v233_v13  ;;  %v317_v15 = vmul.f32 %v13165_v11, %v13165_v11  ;;  %v48_v13 = vld [vmem:[%s17785_s0 + $0x78] sm:$0xff] }
 0x175   :  { %v13171_v16 = vsub.f32 %v13109_v31, %v282_v14  ;;  %v337_v17 = vsel %vm224_vm3, %v317_v15, 0.0  ;;  %v60_v14 = vpack.c.bf16 %v48_v13, %v47_v12  ;;  %v49_v15 = vld [vmem:[%s17785_s0 + $0x80] sm:$0xff] }
 0x176   :  { %v236_v18 = vpop.xlane.xlu1 %235  ;;  %338 = vadd.xlane.f32.xlu1 %v337_v17  ;;  %v50_v17 = vld [vmem:[%s17785_s0 + $0x88] sm:$0xff]  ;;  %s12976_s0 = smov 56  }
 0x177   :  { %v283_v19 = vmul.f32 0.03125, %v236_v18  ;;  %v318_v20 = vmul.f32 %v13171_v16, %v13171_v16  ;;  %10552 = vmatmul.mubr.msk.bf16.gmra.mrb[24].mxu0 %vm85_vm2, %v59_v10  ;;  %v61_v18 = vpack.c.bf16 %v50_v17, %v49_v15 }
 0x178   :  { %10555 = vmatprep.mubr.msk.bf16.mxu0 %vm12971_vm1, %v17794_v0 }
 0x179   :  { %v13177_v22 = vsub.f32 %v13111_v34, %v283_v19  ;;  %v340_v23 = vsel %vm224_vm3, %v318_v20, 0.0 }
 0x17a   :  { %v239_v25 = vpop.xlane.xlu0 %238  ;;  %341 = vadd.xlane.f32.xlu0 %v340_v23 }
 0x17b   :  { %v284_v26 = vmul.f32 0.03125, %v239_v25  ;;  %v319_v27 = vmul.f32 %v13177_v22, %v13177_v22 }
 0x17c   :  { %v242_v28 = vpop.xlane.xlu1 %241 }
 0x17d   :  { %v13183_v29 = vsub.f32 %v13123_v41, %v284_v26  ;;  %v285_v30 = vmul.f32 0.03125, %v242_v28  ;;  %v343_v32 = vsel %vm224_vm3, %v319_v27, 0.0 }
 0x17e   :  { %344 = vadd.xlane.f32.xlu1 %v343_v32 }
 0x17f   :  { %v13187_v33 = vsub.f32 %v13125_v44, %v285_v30  ;;  %v320_v35 = vmul.f32 %v13183_v29, %v13183_v29  ;;  %10556 = vmatmul.mubr.msk.bf16.gmra.mrb[28].mxu0 %vm85_vm2, %v60_v14 }
 0x180   :  { %10559 = vmatprep.mubr.msk.bf16.mxu0 %vm12971_vm1, %v17794_v0 }
 0x181   :  { %v346_v36 = vsel %vm224_vm3, %v320_v35, 0.0  ;;  %v321_v37 = vmul.f32 %v13187_v33, %v13187_v33 }
 0x182   :  { %v245_v38 = vpop.xlane.xlu0 %244  ;;  %347 = vadd.xlane.f32.xlu0 %v346_v36 }
 0x183   :  { %v286_v39 = vmul.f32 0.03125, %v245_v38  ;;  %v349_v40 = vsel %vm224_vm3, %v321_v37, 0.0 }
 0x184   :  { %v248_v42 = vpop.xlane.xlu1 %247  ;;  %350 = vadd.xlane.f32.xlu1 %v349_v40 }
 0x185   :  { %v13196_v43 = vsub.f32 %v13137_v51, %v286_v39  ;;  %v287_v45 = vmul.f32 0.03125, %v248_v42 }
 0x187   :  { %v13199_v46 = vsub.f32 %v13139_v54, %v287_v45  ;;  %v322_v47 = vmul.f32 %v13196_v43, %v13196_v43  ;;  %10560 = vmatmul.mubr.msk.bf16.gmra.mrb[32].mxu0 %vm85_vm2, %v61_v18  ;;  %v13267_v45 = vld [vmem:[%s17788_s8] ss:$0 sm:$0xff] }
 0x188   :  { %10613 = vmatprep.mubr.msk.bf16.mxu0 %vm12971_vm1, %v17794_v0 }
 0x189   :  { %v352_v48 = vsel %vm224_vm3, %v322_v47, 0.0  ;;  %v323_v49 = vmul.f32 %v13199_v46, %v13199_v46 }
 0x18a   :  { %353 = vadd.xlane.f32.xlu0 %v352_v48  ;;  %v251_v50 = vpop.xlane.xlu0 %250 }
 0x18b   :  { %v288_v52 = vmul.f32 0.03125, %v251_v50  ;;  %v355_v53 = vsel %vm224_vm3, %v323_v49, 0.0 }
 0x18c   :  { %356 = vadd.xlane.f32.xlu1 %v355_v53  ;;  %v254_v55 = vpop.xlane.xlu1 %253 }
 0x18d   :  { %v13208_v56 = vsub.f32 %v13151_v61, %v288_v52  ;;  %v289_v57 = vmul.f32 0.03125, %v254_v55 }
 0x18f   :  { %v13211_v58 = vsub.f32 %v13153_v1, %v289_v57  ;;  %v324_v59 = vmul.f32 %v13208_v56, %v13208_v56 }
 0x191   :  { %v358_v60 = vsel %vm224_vm3, %v324_v59, 0.0  ;;  %v325_v62 = vmul.f32 %v13211_v58, %v13211_v58 }
 0x192   :  { %359 = vadd.xlane.f32.xlu0 %v358_v60 }
 0x193   :  { %v361_v2 = vsel %vm224_vm3, %v325_v62, 0.0 }
 0x194   :  { %362 = vadd.xlane.f32.xlu1 %v361_v2 }
 0x1ff   :  { %v336_v19 = vpop.xlane.xlu0 %335 }
 0x200   :  { %v388_v20 = vmul.f32 0.03125, %v336_v19 }
 0x202   :  { %v406_v23 = vadd.f32 1e-05, %v388_v20 }
 0x203   :  { %v339_v25 = vpop.xlane.xlu1 %338 }
 0x204   :  { %12174 = vrsqrt.f32 %v406_v23  ;;  %v389_v26 = vmul.f32 0.03125, %v339_v25 }
 0x206   :  { %v407_v27 = vadd.f32 1e-05, %v389_v26 }
 0x207   :  { %v342_v28 = vpop.xlane.xlu0 %341 }
 0x208   :  { %12176 = vrsqrt.f32 %v407_v27  ;;  %v390_v30 = vmul.f32 0.03125, %v342_v28 }
 0x20a   :  { %v408_v32 = vadd.f32 1e-05, %v390_v30 }
 0x20b   :  { %v345_v35 = vpop.xlane.xlu1 %344 }
 0x20c   :  { %12178 = vrsqrt.f32 %v408_v32  ;;  %v391_v36 = vmul.f32 0.03125, %v345_v35 }
 0x20e   :  { %v12175_v37 = vpop.eup %12174  ;;  %v409_v38 = vadd.f32 1e-05, %v391_v36 }
 0x20f   :  { %v348_v39 = vpop.xlane.xlu0 %347  ;;  %v442_v40 = vmul.f32 %v12175_v37, %v13160_v7  ;;  %v13274_v7 = vld [vmem:[%s17788_s8 + $0x1] ss:$0 sm:$0xff] }
 0x210   :  { %12180 = vrsqrt.f32 %v409_v38  ;;  %v392_v42 = vmul.f32 0.03125, %v348_v39 }
 0x211   :  { %v351_v47 = vpop.xlane.xlu1 %350  ;;  %v464_v53 = vmul.f32 %v13267_v45, %v442_v40 }
 0x212   :  { %v12177_v48 = vpop.eup %12176  ;;  %v410_v49 = vadd.f32 1e-05, %v392_v42  ;;  %v393_v50 = vmul.f32 0.03125, %v351_v47 }
 0x213   :  { %v443_v52 = vmul.f32 %v12177_v48, %v13165_v11  ;;  %v486_v62 = vadd.f32 %v13274_v7, %v464_v53 }
 0x214   :  { %12182 = vrsqrt.f32 %v410_v49  ;;  %v411_v55 = vadd.f32 1e-05, %v393_v50 }
 0x215   :  { %v465_v57 = vmul.f32 %v13267_v45, %v443_v52 }
 0x216   :  { %v12179_v59 = vpop.eup %12178  ;;  %12184 = vrsqrt.f32 %v411_v55 }
 0x217   :  { %v354_v60 = vpop.xlane.xlu0 %353  ;;  %v487_v63 = vadd.f32 %v13274_v7, %v465_v57  ;;  %v444_v11 = vmul.f32 %v12179_v59, %v13171_v16 }
 0x218   :  { %v394_v2 = vmul.f32 0.03125, %v354_v60 }
 0x219   :  { %v357_v3 = vpop.xlane.xlu1 %356  ;;  %v508_v4 = vpack.c.bf16 %v487_v63, %v486_v62  ;;  %v466_v10 = vmul.f32 %v13267_v45, %v444_v11 }
 0x21a   :  { %v12181_v5 = vpop.eup %12180  ;;  %v412_v6 = vadd.f32 1e-05, %v394_v2  ;;  %v395_v8 = vmul.f32 0.03125, %v357_v3 }
 0x21b   :  { %10568 = vmatmul.mubr.msk.bf16.vlgmr.msra.gmra.mrb[0].mxu1 %vm224_vm3, %v508_v4  ;;  %v445_v9 = vmul.f32 %v12181_v5, %v13177_v22  ;;  %v488_v15 = vadd.f32 %v13274_v7, %v466_v10 }
 0x21c   :  { %12186 = vrsqrt.f32 %v412_v6  ;;  %v413_v12 = vadd.f32 1e-05, %v395_v8  ;;  %10571 = vmatprep.mubr.msk.bf16.mxu1 %vm12971_vm1, %v17794_v0 }
 0x21d   :  { %v467_v13 = vmul.f32 %v13267_v45, %v445_v9 }
 0x21e   :  { %v12183_v16 = vpop.eup %12182  ;;  %12188 = vrsqrt.f32 %v413_v12 }
 0x21f   :  { %v360_v14 = vpop.xlane.xlu0 %359  ;;  %v489_v17 = vadd.f32 %v13274_v7, %v467_v13  ;;  %v446_v18 = vmul.f32 %v12183_v16, %v13183_v29 }
 0x220   :  { %v12185_v19 = vpop.eup %12184  ;;  %v396_v22 = vmul.f32 0.03125, %v360_v14 }
 0x221   :  { %v363_v20 = vpop.xlane.xlu1 %362  ;;  %v509_v23 = vpack.c.bf16 %v489_v17, %v488_v15  ;;  %v447_v25 = vmul.f32 %v12185_v19, %v13187_v33  ;;  %v468_v28 = vmul.f32 %v13267_v45, %v446_v18 }
 0x222   :  { %v414_v26 = vadd.f32 1e-05, %v396_v22  ;;  %v397_v27 = vmul.f32 0.03125, %v363_v20 }
 0x223   :  { %10572 = vmatmul.mubr.msk.bf16.gmra.mrb[4].mxu1 %vm224_vm3, %v509_v23  ;;  %v469_v30 = vmul.f32 %v13267_v45, %v447_v25  ;;  %v490_v36 = vadd.f32 %v13274_v7, %v468_v28 }
 0x224   :  { %12190 = vrsqrt.f32 %v414_v26  ;;  %v415_v32 = vadd.f32 1e-05, %v397_v27  ;;  %10575 = vmatprep.mubr.msk.bf16.mxu1 %vm12971_vm1, %v17794_v0 }
 0x225   :  { %v491_v29 = vadd.f32 %v13274_v7, %v469_v30 }
 0x226   :  { %v12187_v35 = vpop.eup %12186  ;;  %12192 = vrsqrt.f32 %v415_v32 }
 0x227   :  { %v448_v33 = vmul.f32 %v12187_v35, %v13196_v43  ;;  %v510_v38 = vpack.c.bf16 %v491_v29, %v490_v36 }
 0x228   :  { %v12189_v37 = vpop.eup %12188 }
 0x229   :  { %v449_v39 = vmul.f32 %v12189_v37, %v13199_v46  ;;  %v470_v40 = vmul.f32 %v13267_v45, %v448_v33 }
 0x22b   :  { %10576 = vmatmul.mubr.msk.bf16.gmra.mrb[8].mxu1 %vm224_vm3, %v510_v38  ;;  %v471_v42 = vmul.f32 %v13267_v45, %v449_v39  ;;  %v492_v49 = vadd.f32 %v13274_v7, %v470_v40 }
 0x22c   :  { %10579 = vmatprep.mubr.msk.bf16.mxu1 %vm12971_vm1, %v17794_v0 }
 0x22d   :  { %v493_v47 = vadd.f32 %v13274_v7, %v471_v42 }
 0x22e   :  { %v12191_v48 = vpop.eup %12190 }
 0x22f   :  { %v450_v43 = vmul.f32 %v12191_v48, %v13208_v56  ;;  %v511_v52 = vpack.c.bf16 %v493_v47, %v492_v49  ;;  %v72_v49 = vld [vmem:[%s17786_s1 + $0x50] sm:$0xff] }
 0x230   :  { %v12193_v50 = vpop.eup %12192 }
 0x231   :  { %v451_v46 = vmul.f32 %v12193_v50, %v13211_v58  ;;  %v472_v53 = vmul.f32 %v13267_v45, %v450_v43  ;;  %v73_v43 = vld [vmem:[%s17786_s1 + $0x58] sm:$0xff] }
 0x233   :  { %10580 = vmatmul.mubr.msk.bf16.gmra.mrb[12].mxu1 %vm224_vm3, %v511_v52  ;;  %v473_v55 = vmul.f32 %v13267_v45, %v451_v46  ;;  %v494_v59 = vadd.f32 %v13274_v7, %v472_v53  ;;  %v76_v46 = vld [vmem:[%s17786_s1 + $0x70] sm:$0xff]  ;;  %v74_v53 = vld [vmem:[%s17786_s1 + $0x60] sm:$0xff] }
 0x234   :  { %10583 = vmatprep.mubr.msk.bf16.mxu1 %vm12971_vm1, %v17794_v0 }
 0x235   :  { %v495_v57 = vadd.f32 %v13274_v7, %v473_v55 }
 0x237   :  { %v512_v60 = vpack.c.bf16 %v495_v57, %v494_v59 }
 0x23b   :  { %10584 = vmatmul.mubr.msk.bf16.gmra.mrb[16].mxu1 %vm224_vm3, %v512_v60 }
 0x23c   :  { %10587 = vmatprep.mubr.msk.bf16.mxu1 %vm12971_vm1, %v17794_v0 }
 0x242   :  { %v191_v56 = vpop.f32.mrb[20].mxu0 }
 0x243   :  { %v10549_v58 = vpop.f32.mrb[21].mxu0  ;;  %v13374_v50 = vadd.f32 %v191_v56, %v72_v49  ;;  %v78_v56 = vld [vmem:[%s17786_s1 + $0x80] sm:$0xff] }
 0x244   :  { %v194_v62 = vpop.f32.mrb[22].mxu0  ;;  %v75_v58 = vld [vmem:[%s17786_s1 + $0x68] sm:$0xff] }
 0x245   :  { %v10550_v63 = vpop.f32.mrb[23].mxu0  ;;  %v13376_v52 = vadd.f32 %v194_v62, %v73_v43  ;;  %v255_v55 = vsel %vm224_vm3, %v13374_v50, 0.0 }
 0x247   :  { %v258_v60 = vsel %vm224_vm3, %v13376_v52, 0.0 }
 0x24a   :  { %v13318_v11 = vpop.f32.mrb[24].mxu0 }
 0x24b   :  { %v10553_v2 = vpop.f32.mrb[25].mxu0  ;;  %v13389_v59 = vadd.f32 %v13318_v11, %v74_v53 }
 0x24c   :  { %v13320_v3 = vpop.f32.mrb[26].mxu0 }
 0x24d   :  { %v10554_v4 = vpop.f32.mrb[27].mxu0  ;;  %17809 = vst [vmem:[#allocation3_spill] sm:$0xff] %v13389_v59  ;;  %v13404_v11 = vadd.f32 %v13320_v3, %v75_v58  ;;  %v261_v2 = vsel %vm224_vm3, %v13389_v59, 0.0  ;;  %v79_v3 = vld [vmem:[%s17786_s1 + $0x88] sm:$0xff] }
 0x24e   :  { %v77_v4 = vld [vmem:[%s17786_s1 + $0x78] sm:$0xff]  ;;  %s12975_s1 = smov 64  }
 0x24f   :  { %17811 = vst [vmem:[#allocation5_spill] sm:$0xff] %v13404_v11 }
 0x252   :  { %v207_v5 = vpop.f32.mrb[28].mxu0 }
 0x253   :  { %v10557_v6 = vpop.f32.mrb[29].mxu0  ;;  %v13386_v57 = vadd.f32 %v207_v5, %v76_v46 }
 0x254   :  { %v13322_v8 = vpop.f32.mrb[30].mxu0 }
 0x255   :  { %v10558_v9 = vpop.f32.mrb[31].mxu0  ;;  %17808 = vst [vmem:[#allocation2_spill] sm:$0xff] %v13386_v57  ;;  %v267_v62 = vsel %vm224_vm3, %v13386_v57, 0.0  ;;  %v13414_v6 = vadd.f32 %v13322_v8, %v77_v4 }
 0x256   :  { %v264_v9 = vsel %vm224_vm3, %v13404_v11, 0.0 }
 0x257   :  { %17812 = vst [vmem:[#allocation6_spill] sm:$0xff] %v13414_v6 }
 0x25a   :  { %v215_v10 = vpop.f32.mrb[32].mxu0 }
 0x25b   :  { %v10561_v12 = vpop.f32.mrb[33].mxu0  ;;  %v13401_v63 = vadd.f32 %v215_v10, %v78_v56  ;;  %v270_v10 = vsel %vm224_vm3, %v13414_v6, 0.0 }
 0x25c   :  { %v13324_v13 = vpop.f32.mrb[34].mxu0 }
 0x25d   :  { %v10562_v16 = vpop.f32.mrb[35].mxu0  ;;  %17810 = vst [vmem:[#allocation4_spill] sm:$0xff] %v13401_v63  ;;  %v273_v5 = vsel %vm224_vm3, %v13401_v63, 0.0  ;;  %v13424_v12 = vadd.f32 %v13324_v13, %v79_v3 }
 0x25f   :  { %17813 = vst [vmem:[#allocation7_spill] sm:$0xff] %v13424_v12  ;;  %v276_v8 = vsel %vm224_vm3, %v13424_v12, 0.0 }
 0x2ee   :  { %v590_v14 = vpop.f32.mrb[0].mxu1 }
 0x2ef   :  { %v10569_v15 = vpop.f32.mrb[1].mxu1 }
 0x2f0   :  { %v593_v17 = vpop.f32.mrb[2].mxu1 }
 0x2f1   :  { %v13326_v18 = vpack.c.bf16 %v593_v17, %v590_v14  ;;  %v10570_v19 = vpop.f32.mrb[3].mxu1 }
 0x2f3   :  { %679 = vrot.lane.b32.xlu0 %v13326_v18, %s12972_s29 }
 0x2f6   :  { %v598_v22 = vpop.f32.mrb[4].mxu1 }
 0x2f7   :  { %v10573_v20 = vpop.f32.mrb[5].mxu1 }
 0x2f8   :  { %v601_v23 = vpop.f32.mrb[6].mxu1 }
 0x2f9   :  { %v13330_v25 = vpack.c.bf16 %v601_v23, %v598_v22  ;;  %v10574_v26 = vpop.f32.mrb[7].mxu1 }
 0x2fb   :  { %681 = vrot.lane.b32.xlu1 %v13330_v25, %s12972_s29 }
 0x2fe   :  { %v606_v27 = vpop.f32.mrb[8].mxu1 }
 0x2ff   :  { %v10577_v28 = vpop.f32.mrb[9].mxu1 }
 0x300   :  { %v609_v30 = vpop.f32.mrb[10].mxu1 }
 0x301   :  { %v13334_v32 = vpack.c.bf16 %v609_v30, %v606_v27  ;;  %v10578_v29 = vpop.f32.mrb[11].mxu1 }
 0x303   :  { %683 = vrot.lane.b32.xlu1 %v13334_v32, %s12972_s29 }
 0x306   :  { %v614_v35 = vpop.f32.mrb[12].mxu1 }
 0x307   :  { %v10581_v36 = vpop.f32.mrb[13].mxu1 }
 0x308   :  { %v617_v33 = vpop.f32.mrb[14].mxu1 }
 0x309   :  { %v13338_v37 = vpack.c.bf16 %v617_v33, %v614_v35  ;;  %v10582_v38 = vpop.f32.mrb[15].mxu1 }
 0x30b   :  { %685 = vrot.lane.b32.xlu1 %v13338_v37, %s12972_s29 }
 0x30e   :  { %v622_v39 = vpop.f32.mrb[16].mxu1 }
 0x30f   :  { %v13342_v40 = vpack.c.bf16 %v622_v39, %v622_v39  ;;  %1019 = vrot.lane.b32.xlu1 %v13326_v18, %s12973_s30  ;;  %v10585_v42 = vpop.f32.mrb[17].mxu1 }
 0x310   :  { %v13346_v47 = vpop.f32.mrb[18].mxu1 }
 0x311   :  { %687 = vrot.lane.b32.xlu0 %v13342_v40, %s12972_s29  ;;  %v10586_v48 = vpop.f32.mrb[19].mxu1 }
 0x313   :  { %1023 = vrot.lane.b32.xlu1 %v13334_v32, %s12973_s30 }
 0x315   :  { %1021 = vrot.lane.b32.xlu0 %v13330_v25, %s12973_s30 }
 0x317   :  { %1027 = vrot.lane.b32.xlu1 %v13342_v40, %s12973_s30 }
 0x319   :  { %1025 = vrot.lane.b32.xlu0 %v13338_v37, %s12973_s30 }
 0x31b   :  { %1011 = vrot.lane.b32.xlu1 %v13330_v25, %s12974_s10 }
 0x31d   :  { %1009 = vrot.lane.b32.xlu0 %v13326_v18, %s12974_s10 }
 0x31f   :  { %1015 = vrot.lane.b32.xlu1 %v13338_v37, %s12974_s10 }
 0x321   :  { %1013 = vrot.lane.b32.xlu0 %v13334_v32, %s12974_s10 }
 0x325   :  { %1017 = vrot.lane.b32.xlu0 %v13342_v40, %s12974_s10 }
 0x343   :  { %256 = vadd.xlane.f32.xlu1 %v255_v55 }
 0x344   :  { %259 = vadd.xlane.f32.xlu0 %v258_v60 }
 0x347   :  { %268 = vadd.xlane.f32.xlu1 %v267_v62 }
 0x348   :  { %262 = vadd.xlane.f32.xlu0 %v261_v2 }
 0x34b   :  { %274 = vadd.xlane.f32.xlu1 %v273_v5 }
 0x34c   :  { %265 = vadd.xlane.f32.xlu0 %v264_v9 }
 0x350   :  { %271 = vadd.xlane.f32.xlu0 %v270_v10 }
 0x354   :  { %277 = vadd.xlane.f32.xlu0 %v276_v8 }
 0x365   :  { %v680_v16 = vpop.permute.xlu0 %679 }
 0x366   :  { %v706_v14 = vsel %vm689_vm4, %v680_v16, 0 }
 0x367   :  { %10604 = vmatpush3.bf16.xpose.msra.mxu0 %v706_v14 }
 0x368   :  { %10605 = vmatprep.subr.bf16.mxu0 %v17794_v0 }
 0x36d   :  { %v682_v15 = vpop.permute.xlu1 %681 }
 0x36e   :  { %v709_v17 = vsel %vm689_vm4, %v682_v15, 0 }
 0x36f   :  { %10606 = vmatpush3.bf16.xpose.msra.mxu0 %v709_v17 }
 0x370   :  { %10607 = vmatprep.subr.bf16.mxu0 %v17794_v0 }
 0x375   :  { %v684_v13 = vpop.permute.xlu1 %683 }
 0x376   :  { %v712_v19 = vsel %vm689_vm4, %v684_v13, 0 }
 0x377   :  { %10608 = vmatpush3.bf16.xpose.msra.mxu0 %v712_v19 }
 0x378   :  { %10609 = vmatprep.subr.bf16.mxu0 %v17794_v0 }
 0x37d   :  { %v686_v22 = vpop.permute.xlu1 %685 }
 0x37e   :  { %v715_v20 = vsel %vm689_vm4, %v686_v22, 0 }
 0x37f   :  { %10610 = vmatpush3.bf16.xpose.msra.mxu0 %v715_v20 }
 0x380   :  { %10611 = vmatprep.subr.bf16.mxu0 %v17794_v0 }
 0x381   :  { %v1020_v27 = vpop.permute.xlu1 %1019 }
 0x382   :  { %v1045_v28 = vsel %vm689_vm4, %v1020_v27, 0 }
 0x383   :  { %v688_v23 = vpop.permute.xlu0 %687 }
 0x384   :  { %v718_v26 = vsel %vm689_vm4, %v688_v23, 0 }
 0x385   :  { %v1024_v35 = vpop.permute.xlu1 %1023 }
 0x386   :  { %v1051_v36 = vsel %vm689_vm4, %v1024_v35, 0 }
 0x387   :  { %10612 = vmatpush3.bf16.xpose.msra.mxu0 %v718_v26  ;;  %v1022_v30 = vpop.permute.xlu0 %1021 }
 0x388   :  { %10663 = vmatprep.subr.bf16.mxu0 %v17794_v0  ;;  %v1048_v29 = vsel %vm689_vm4, %v1022_v30, 0 }
 0x389   :  { %v1028_v39 = vpop.permute.xlu1 %1027 }
 0x38a   :  { %v1057_v42 = vsel %vm689_vm4, %v1028_v39, 0 }
 0x38b   :  { %v1026_v33 = vpop.permute.xlu0 %1025 }
 0x38c   :  { %v1054_v38 = vsel %vm689_vm4, %v1026_v33, 0 }
 0x38d   :  { %v1012_v49 = vpop.permute.xlu1 %1011 }
 0x38e   :  { %10614 = vmatmul.mubr.msk.bf16.vlgmr.msra.gmra.mrb[36].mxu0 %vm689_vm4, %v13326_v18 }
 0x38f   :  { %10664 = vmatpush3.bf16.xpose.msra.mxu0 %v1045_v28  ;;  %10617 = vmatprep.mubr.msk.bf16.mxu0 %vm12971_vm1, %v17794_v0  ;;  %v1010_v48 = vpop.permute.xlu0 %1009 }
 0x390   :  { %10665 = vmatprep.subr.bf16.mxu0 %v17794_v0 }
 0x391   :  { %v1016_v46 = vpop.permute.xlu1 %1015 }
 0x393   :  { %v1014_v43 = vpop.permute.xlu0 %1013 }
 0x396   :  { %10618 = vmatmul.mubr.msk.bf16.gmra.mrb[40].mxu0 %vm689_vm4, %v13330_v25 }
 0x397   :  { %10666 = vmatpush3.bf16.xpose.msra.mxu0 %v1048_v29  ;;  %10621 = vmatprep.mubr.msk.bf16.mxu0 %vm12971_vm1, %v17794_v0  ;;  %v1018_v53 = vpop.permute.xlu0 %1017 }
 0x398   :  { %10667 = vmatprep.subr.bf16.mxu0 %v17794_v0 }
 0x39e   :  { %10622 = vmatmul.mubr.msk.bf16.gmra.mrb[44].mxu0 %vm689_vm4, %v13334_v32 }
 0x39f   :  { %10668 = vmatpush3.bf16.xpose.msra.mxu0 %v1051_v36  ;;  %10625 = vmatprep.mubr.msk.bf16.mxu0 %vm12971_vm1, %v17794_v0 }
 0x3a0   :  { %10669 = vmatprep.subr.bf16.mxu0 %v17794_v0 }
 0x3a6   :  { %10626 = vmatmul.mubr.msk.bf16.gmra.mrb[48].mxu0 %vm689_vm4, %v13338_v37 }
 0x3a7   :  { %10670 = vmatpush3.bf16.xpose.msra.mxu0 %v1054_v38  ;;  %10629 = vmatprep.mubr.msk.bf16.mxu0 %vm12971_vm1, %v17794_v0 }
 0x3a8   :  { %10671 = vmatprep.subr.bf16.mxu0 %v17794_v0 }
 0x3ae   :  { %10630 = vmatmul.mubr.msk.bf16.gmra.mrb[52].mxu0 %vm689_vm4, %v13342_v40 }
 0x3af   :  { %10672 = vmatpush3.bf16.xpose.msra.mxu0 %v1057_v42  ;;  %10673 = vmatprep.mubr.msk.bf16.mxu0 %vm12971_vm1, %v17794_v0 }
 0x3b0   :  { %10723 = vmatprep.subr.bf16.mxu0 %v17794_v0 }
 0x3b6   :  { %10674 = vmatmul.mubr.msk.bf16.vlgmr.msra.gmra.mrb[56].mxu0 %vm689_vm4, %v1010_v48 }
 0x3b7   :  { %10677 = vmatprep.mubr.msk.bf16.mxu0 %vm12971_vm1, %v17794_v0 }
 0x3be   :  { %10678 = vmatmul.mubr.msk.bf16.gmra.mrb[60].mxu0 %vm689_vm4, %v1012_v49 }
 0x3bf   :  { %10681 = vmatprep.mubr.msk.bf16.mxu0 %vm12971_vm1, %v17794_v0 }
 0x3c6   :  { %10682 = vmatmul.mubr.msk.bf16.gmra.mrb[64].mxu0 %vm689_vm4, %v1014_v43 }
 0x3c7   :  { %10685 = vmatprep.mubr.msk.bf16.mxu0 %vm12971_vm1, %v17794_v0 }
 0x3ce   :  { %10686 = vmatmul.mubr.msk.bf16.gmra.mrb[68].mxu0 %vm689_vm4, %v1016_v46 }
 0x3cf   :  { %10689 = vmatprep.mubr.msk.bf16.mxu0 %vm12971_vm1, %v17794_v0 }
 0x3d0   :  { %v257_v55 = vpop.xlane.xlu1 %256 }
 0x3d1   :  { %v290_v60 = vmul.f32 0.03125, %v257_v55  ;;  %v260_v56 = vpop.xlane.xlu0 %259 }
 0x3d2   :  { %v291_v58 = vmul.f32 0.03125, %v260_v56 }
 0x3d3   :  { %v13481_v62 = vsub.f32 %v13374_v50, %v290_v60 }
 0x3d4   :  { %v13484_v2 = vsub.f32 %v13376_v52, %v291_v58  ;;  %v269_v4 = vpop.xlane.xlu1 %268 }
 0x3d5   :  { %v294_v5 = vmul.f32 0.03125, %v269_v4  ;;  %v263_v9 = vpop.xlane.xlu0 %262  ;;  %v326_v3 = vmul.f32 %v13481_v62, %v13481_v62 }
 0x3d6   :  { %v292_v10 = vmul.f32 0.03125, %v263_v9  ;;  %10690 = vmatmul.mubr.msk.bf16.gmra.mrb[72].mxu0 %vm689_vm4, %v1018_v53  ;;  %v327_v8 = vmul.f32 %v13484_v2, %v13484_v2 }
 0x3d7   :  { %v364_v16 = vsel %vm224_vm3, %v326_v3, 0.0  ;;  %10725 = vmatprep.mubr.msk.bf16.mxu0 %vm12971_vm1, %v17794_v0  ;;  %v13495_v14 = vsub.f32 %v13386_v57, %v294_v5 }
 0x3d8   :  { %v13498_v15 = vsub.f32 %v13389_v59, %v292_v10  ;;  %v275_v17 = vpop.xlane.xlu1 %274  ;;  %365 = vadd.xlane.f32.xlu0 %v364_v16  ;;  %v367_v13 = vsel %vm224_vm3, %v327_v8, 0.0 }
 0x3d9   :  { %v296_v19 = vmul.f32 0.03125, %v275_v17  ;;  %v266_v22 = vpop.xlane.xlu0 %265  ;;  %368 = vadd.xlane.f32.xlu1 %v367_v13  ;;  %v330_v30 = vmul.f32 %v13495_v14, %v13495_v14 }
 0x3da   :  { %v293_v20 = vmul.f32 0.03125, %v266_v22  ;;  %v328_v23 = vmul.f32 %v13498_v15, %v13498_v15 }
 0x3db   :  { %v13504_v26 = vsub.f32 %v13401_v63, %v296_v19  ;;  %v376_v39 = vsel %vm224_vm3, %v330_v30, 0.0 }
 0x3dc   :  { %v13507_v27 = vsub.f32 %v13404_v11, %v293_v20  ;;  %v370_v28 = vsel %vm224_vm3, %v328_v23, 0.0 }
 0x3dd   :  { %v272_v29 = vpop.xlane.xlu0 %271  ;;  %371 = vadd.xlane.f32.xlu0 %v370_v28  ;;  %v332_v42 = vmul.f32 %v13504_v26, %v13504_v26 }
 0x3de   :  { %v295_v35 = vmul.f32 0.03125, %v272_v29  ;;  %v329_v36 = vmul.f32 %v13507_v27, %v13507_v27 }
 0x3df   :  { %v382_v55 = vsel %vm224_vm3, %v332_v42, 0.0 }
 0x3e0   :  { %v13515_v33 = vsub.f32 %v13414_v6, %v295_v35  ;;  %v373_v38 = vsel %vm224_vm3, %v329_v36, 0.0 }
 0x3e1   :  { %374 = vadd.xlane.f32.xlu1 %v373_v38  ;;  %377 = vadd.xlane.f32.xlu0 %v376_v39  ;;  %v278_v48 = vpop.xlane.xlu0 %277 }
 0x3e2   :  { %v297_v49 = vmul.f32 0.03125, %v278_v48  ;;  %v331_v43 = vmul.f32 %v13515_v33, %v13515_v33 }
 0x3e4   :  { %v13524_v46 = vsub.f32 %v13424_v12, %v297_v49  ;;  %v379_v53 = vsel %vm224_vm3, %v331_v43, 0.0 }
 0x3e5   :  { %380 = vadd.xlane.f32.xlu1 %v379_v53  ;;  %383 = vadd.xlane.f32.xlu0 %v382_v55 }
 0x3e6   :  { %v333_v60 = vmul.f32 %v13524_v46, %v13524_v46 }
 0x3e8   :  { %v385_v56 = vsel %vm224_vm3, %v333_v60, 0.0 }
 0x3e9   :  { %386 = vadd.xlane.f32.xlu1 %v385_v56 }
 0x3fa   :  { %897 = vrot.lane.b32.xlu1 %v13326_v18, %s12975_s1 }
 0x3fb   :  { %899 = vrot.lane.b32.xlu0 %v13330_v25, %s12975_s1 }
 0x3fe   :  { %901 = vrot.lane.b32.xlu1 %v13334_v32, %s12975_s1 }
 0x3ff   :  { %903 = vrot.lane.b32.xlu0 %v13338_v37, %s12975_s1 }
 0x402   :  { %905 = vrot.lane.b32.xlu1 %v13342_v40, %s12975_s1 }
 0x403   :  { %1235 = vrot.lane.b32.xlu0 %v13326_v18, %s12976_s0 }
 0x461   :  { %v13543_v58 = vpop.f32.mrb[36].mxu0 }
 0x462   :  { %v10615_v4 = vpop.f32.mrb[37].mxu0  ;;  %v793_v5 = vsel %vm792_vm5, %v13543_v58, -inf }
 0x463   :  { %794 = vmax.xlane.f32.xlu1 %v793_v5  ;;  %v13547_v9 = vpop.f32.mrb[38].mxu0 }
 0x464   :  { %v10616_v3 = vpop.f32.mrb[39].mxu0  ;;  %v796_v10 = vsel %vm792_vm5, %v13547_v9, -inf }
 0x465   :  { %v366_v8 = vpop.xlane.xlu0 %365  ;;  %797 = vmax.xlane.f32.xlu0 %v796_v10 }
 0x466   :  { %v398_v16 = vmul.f32 0.03125, %v366_v8  ;;  %v369_v17 = vpop.xlane.xlu1 %368 }
 0x467   :  { %v399_v13 = vmul.f32 0.03125, %v369_v17 }
 0x468   :  { %v416_v19 = vadd.f32 1e-05, %v398_v16 }
 0x469   :  { %v417_v22 = vadd.f32 1e-05, %v399_v13  ;;  %v13551_v20 = vpop.f32.mrb[40].mxu0 }
 0x46a   :  { %12194 = vrsqrt.f32 %v416_v19  ;;  %v372_v23 = vpop.xlane.xlu0 %371  ;;  %v10619_v28 = vpop.f32.mrb[41].mxu0  ;;  %v799_v30 = vsel %vm792_vm5, %v13551_v20, -inf }
 0x46b   :  { %12196 = vrsqrt.f32 %v417_v22  ;;  %v400_v29 = vmul.f32 0.03125, %v372_v23  ;;  %800 = vmax.xlane.f32.xlu1 %v799_v30  ;;  %v13555_v35 = vpop.f32.mrb[42].mxu0 }
 0x46c   :  { %v10620_v36 = vpop.f32.mrb[43].mxu0  ;;  %v802_v38 = vsel %vm792_vm5, %v13555_v35, -inf }
 0x46d   :  { %v418_v39 = vadd.f32 1e-05, %v400_v29  ;;  %803 = vmax.xlane.f32.xlu0 %v802_v38 }
 0x46e   :  { %v375_v42 = vpop.xlane.xlu1 %374  ;;  %v378_v48 = vpop.xlane.xlu0 %377 }
 0x46f   :  { %12198 = vrsqrt.f32 %v418_v39  ;;  %v401_v49 = vmul.f32 0.03125, %v375_v42  ;;  %v402_v43 = vmul.f32 0.03125, %v378_v48 }
 0x471   :  { %v419_v53 = vadd.f32 1e-05, %v401_v49  ;;  %v420_v55 = vadd.f32 1e-05, %v402_v43  ;;  %v13559_v60 = vpop.f32.mrb[44].mxu0 }
 0x472   :  { %v381_v56 = vpop.xlane.xlu1 %380  ;;  %v384_v4 = vpop.xlane.xlu0 %383  ;;  %v805_v5 = vsel %vm792_vm5, %v13559_v60, -inf }
 0x473   :  { %12200 = vrsqrt.f32 %v419_v53  ;;  %v403_v3 = vmul.f32 0.03125, %v381_v56  ;;  %v10623_v10 = vpop.f32.mrb[45].mxu0  ;;  %806 = vmax.xlane.f32.xlu1 %v805_v5  ;;  %v404_v16 = vmul.f32 0.03125, %v384_v4 }
 0x474   :  { %v12195_v8 = vpop.eup %12194  ;;  %v13563_v17 = vpop.f32.mrb[46].mxu0  ;;  %12202 = vrsqrt.f32 %v420_v55 }
 0x475   :  { %v12197_v13 = vpop.eup %12196  ;;  %v421_v19 = vadd.f32 1e-05, %v403_v3  ;;  %v10624_v22 = vpop.f32.mrb[47].mxu0  ;;  %v808_v23 = vsel %vm792_vm5, %v13563_v17, -inf  ;;  %v452_v28 = vmul.f32 %v12195_v8, %v13481_v62  ;;  %v422_v48 = vadd.f32 1e-05, %v404_v16 }
 0x476   :  { %809 = vmax.xlane.f32.xlu0 %v808_v23  ;;  %v387_v30 = vpop.xlane.xlu1 %386  ;;  %v453_v29 = vmul.f32 %v12197_v13, %v13484_v2 }
 0x477   :  { %12204 = vrsqrt.f32 %v421_v19  ;;  %v405_v36 = vmul.f32 0.03125, %v387_v30  ;;  %v474_v38 = vmul.f32 %v13267_v45, %v452_v28  ;;  %v900_v19 = vpop.permute.xlu0 %899 }
 0x478   :  { %v475_v39 = vmul.f32 %v13267_v45, %v453_v29 }
 0x479   :  { %v12199_v42 = vpop.eup %12198  ;;  %v423_v49 = vadd.f32 1e-05, %v405_v36  ;;  %v13571_v43 = vpop.f32.mrb[48].mxu0  ;;  %v496_v53 = vadd.f32 %v13274_v7, %v474_v38 }
 0x47a   :  { %v898_v55 = vpop.permute.xlu1 %897  ;;  %v811_v62 = vsel %vm792_vm5, %v13571_v43, -inf  ;;  %v497_v56 = vadd.f32 %v13274_v7, %v475_v39  ;;  %v454_v2 = vmul.f32 %v12199_v42, %v13498_v15  ;;  %v10627_v4 = vpop.f32.mrb[49].mxu0 }
 0x47b   :  { %12206 = vrsqrt.f32 %v423_v49  ;;  %10634 = vmatpush3.bf16.msra.mxu1 %v898_v55  ;;  %812 = vmax.xlane.f32.xlu1 %v811_v62  ;;  %v13578_v5 = vpop.f32.mrb[50].mxu0  ;;  %v12977_v4 = vmov 0  }
 0x47c   :  { %10635 = vmatprep.subr.bf16.mxu1 %v17794_v0  ;;  %v513_v3 = vpack.c.bf16 %v497_v56, %v496_v53  ;;  %12208 = vrsqrt.f32 %v422_v48  ;;  %v10628_v8 = vpop.f32.mrb[51].mxu0  ;;  %v814_v16 = vsel %vm792_vm5, %v13578_v5, -inf  ;;  %v476_v13 = vmul.f32 %v13267_v45, %v454_v2  ;;  %v904_v2 = vpop.permute.xlu0 %903 }
 0x47d   :  { %v12201_v10 = vpop.eup %12200  ;;  %815 = vmax.xlane.f32.xlu0 %v814_v16 }
 0x47e   :  { %10588 = vmatmul.mubr.msk.bf16.gmra.mrb[20].mxu1 %vm224_vm3, %v513_v3  ;;  %v455_v15 = vmul.f32 %v12201_v10, %v13507_v27  ;;  %v12203_v22 = vpop.eup %12202  ;;  %v902_v23 = vpop.permute.xlu1 %901  ;;  %v498_v36 = vadd.f32 %v13274_v7, %v476_v13  ;;  %v13600_v3 = vsel %vm926_vm6, 65535, %v12977_v4 }
 0x47f   :  { %10636 = vmatpush3.bf16.msra.mxu1 %v900_v19  ;;  %10591 = vmatprep.mubr.msk.bf16.mxu1 %vm12971_vm1, %v17794_v0  ;;  %v456_v42 = vmul.f32 %v12203_v22, %v13495_v14 }
 0x480   :  { %10637 = vmatprep.subr.bf16.mxu1 %v17794_v0  ;;  %v477_v28 = vmul.f32 %v13267_v45, %v455_v15 }
 0x481   :  { %v12205_v30 = vpop.eup %12204  ;;  %v13590_v29 = vpop.f32.mrb[52].mxu0  ;;  %v478_v14 = vmul.f32 %v13267_v45, %v456_v42 }
 0x482   :  { %v10631_v38 = vpop.f32.mrb[53].mxu0  ;;  %v817_v39 = vsel %vm792_vm5, %v13590_v29, -inf  ;;  %v499_v27 = vadd.f32 %v13274_v7, %v477_v28  ;;  %v457_v48 = vmul.f32 %v12205_v30, %v13515_v33  ;;  %v906_v10 = vpop.permute.xlu1 %905 }
 0x483   :  { %10638 = vmatpush3.bf16.msra.mxu1 %v902_v23  ;;  %818 = vmax.xlane.f32.xlu1 %v817_v39  ;;  %v789_v49 = vpop.f32.mrb[54].mxu0  ;;  %v930_v13 = vand.u32 %v13600_v3, %v906_v10  ;;  %v500_v23 = vadd.f32 %v13274_v7, %v478_v14 }
 0x484   :  { %v10632_v53 = vpop.f32.mrb[55].mxu0  ;;  %v514_v55 = vpack.c.bf16 %v499_v27, %v498_v36  ;;  %10639 = vmatprep.subr.bf16.mxu1 %v17794_v0  ;;  %v479_v62 = vmul.f32 %v13267_v45, %v457_v48 }
 0x485   :  { %v12207_v56 = vpop.eup %12206 }
 0x486   :  { %10592 = vmatmul.mubr.msk.bf16.gmra.mrb[24].mxu1 %vm224_vm3, %v514_v55  ;;  %v12209_v33 = vpop.eup %12208  ;;  %v501_v8 = vadd.f32 %v13274_v7, %v479_v62  ;;  %v459_v16 = vmul.f32 %v12207_v56, %v13524_v46 }
 0x487   :  { %10640 = vmatpush3.bf16.msra.mxu1 %v904_v2  ;;  %10595 = vmatprep.mubr.msk.bf16.mxu1 %vm12971_vm1, %v17794_v0  ;;  %v458_v28 = vmul.f32 %v12209_v33, %v13504_v26 }
 0x488   :  { %10641 = vmatprep.subr.bf16.mxu1 %v17794_v0  ;;  %v515_v38 = vpack.c.bf16 %v501_v8, %v500_v23  ;;  %v481_v39 = vmul.f32 %v13267_v45, %v459_v16 }
 0x489   :  { %v13610_v19 = vpop.f32.mrb[56].mxu0  ;;  %v480_v27 = vmul.f32 %v13267_v45, %v458_v28 }
 0x48a   :  { %v10675_v15 = vpop.f32.mrb[57].mxu0  ;;  %v1131_v22 = vsel %vm792_vm5, %v13610_v19, -inf  ;;  %v503_v26 = vadd.f32 %v13274_v7, %v481_v39 }
 0x48b   :  { %10642 = vmatpush3.bf16.msra.mxu1 %v930_v13  ;;  %1132 = vmax.xlane.f32.xlu0 %v1131_v22  ;;  %v13616_v30 = vpop.f32.mrb[58].mxu0  ;;  %v502_v53 = vadd.f32 %v13274_v7, %v480_v27  ;;  %v13663_v27 = vpop.permute.xlu0 %1235 }
 0x48c   :  { %v10676_v36 = vpop.f32.mrb[59].mxu0  ;;  %v1134_v46 = vsel %vm792_vm5, %v13616_v30, -inf  ;;  %10693 = vmatprep.subr.bf16.mxu1 %v17794_v0 }
 0x48d   :  { %1135 = vmax.xlane.f32.xlu1 %v1134_v46  ;;  %v516_v56 = vpack.c.bf16 %v503_v26, %v502_v53 }
 0x48e   :  { %10596 = vmatmul.mubr.msk.bf16.gmra.mrb[28].mxu1 %vm224_vm3, %v515_v38 }
 0x48f   :  { %10599 = vmatprep.mubr.msk.bf16.mxu1 %vm12971_vm1, %v17794_v0 }
 0x491   :  { %v13627_v42 = vpop.f32.mrb[60].mxu0 }
 0x492   :  { %v10679_v48 = vpop.f32.mrb[61].mxu0  ;;  %v1137_v49 = vsel %vm792_vm5, %v13627_v42, -inf }
 0x493   :  { %1138 = vmax.xlane.f32.xlu0 %v1137_v49  ;;  %v13632_v55 = vpop.f32.mrb[62].mxu0 }
 0x494   :  { %v10680_v62 = vpop.f32.mrb[63].mxu0  ;;  %v1140_v45 = vsel %vm792_vm5, %v13632_v55, -inf }
 0x495   :  { %1141 = vmax.xlane.f32.xlu1 %v1140_v45 }
 0x496   :  { %10600 = vmatmul.mubr.msk.bf16.gmra.mrb[32].mxu1 %vm224_vm3, %v516_v56 }
 0x497   :  { %10643 = vmatprep.mubr.msk.bf16.mxu1 %vm12971_vm1, %v17794_v0 }
 0x499   :  { %v13639_v2 = vpop.f32.mrb[64].mxu0 }
 0x49a   :  { %v10683_v4 = vpop.f32.mrb[65].mxu0  ;;  %v1143_v7 = vsel %vm792_vm5, %v13639_v2, -inf }
 0x49b   :  { %1144 = vmax.xlane.f32.xlu0 %v1143_v7  ;;  %v13643_v10 = vpop.f32.mrb[66].mxu0 }
 0x49c   :  { %v10684_v14 = vpop.f32.mrb[67].mxu0  ;;  %v1146_v33 = vsel %vm792_vm5, %v13643_v10, -inf }
 0x49d   :  { %1147 = vmax.xlane.f32.xlu1 %v1146_v33 }
 0x4a1   :  { %v13647_v8 = vpop.f32.mrb[68].mxu0 }
 0x4a2   :  { %v10687_v16 = vpop.f32.mrb[69].mxu0  ;;  %v1149_v13 = vsel %vm792_vm5, %v13647_v8, -inf }
 0x4a3   :  { %1150 = vmax.xlane.f32.xlu0 %v1149_v13  ;;  %v13651_v15 = vpop.f32.mrb[70].mxu0 }
 0x4a4   :  { %v10688_v22 = vpop.f32.mrb[71].mxu0  ;;  %v1152_v23 = vsel %vm792_vm5, %v13651_v15, -inf }
 0x4a5   :  { %1153 = vmax.xlane.f32.xlu1 %v1152_v23 }
 0x4a9   :  { %v13655_v28 = vpop.f32.mrb[72].mxu0 }
 0x4aa   :  { %v10691_v36 = vpop.f32.mrb[73].mxu0  ;;  %v1155_v39 = vsel %vm792_vm5, %v13655_v28, -inf }
 0x4ab   :  { %v1128_v46 = vpop.f32.mrb[74].mxu0 }
 0x4ac   :  { %v10692_v38 = vpop.f32.mrb[75].mxu0 }
 0x4b6   :  { %1239 = vrot.lane.b32.xlu1 %v13334_v32, %s12976_s0 }
 0x4b9   :  { %1237 = vrot.lane.b32.xlu0 %v13330_v25, %s12976_s0 }
 0x4d8   :  { %1156 = vmax.xlane.f32.xlu0 %v1155_v39 }
 0x4f0   :  { %v795_v26 = vpop.xlane.xlu1 %794 }
 0x4f1   :  { %v820_v48 = vsub.f32 %v13543_v58, %v795_v26 }
 0x4f2   :  { %v798_v49 = vpop.xlane.xlu0 %797 }
 0x4f3   :  { %v829_v53 = vmul.f32 1.442695, %v820_v48  ;;  %v821_v62 = vsub.f32 %v13547_v9, %v798_v49 }
 0x4f5   :  { %12210 = vpow2.f32 %v829_v53  ;;  %v831_v45 = vmul.f32 1.442695, %v821_v62 }
 0x4f7   :  { %12212 = vpow2.f32 %v831_v45 }
 0x4f8   :  { %v801_v56 = vpop.xlane.xlu1 %800 }
 0x4f9   :  { %v822_v4 = vsub.f32 %v13551_v20, %v801_v56 }
 0x4fa   :  { %v804_v7 = vpop.xlane.xlu0 %803 }
 0x4fb   :  { %v833_v14 = vmul.f32 1.442695, %v822_v4  ;;  %v823_v33 = vsub.f32 %v13555_v35, %v804_v7 }
 0x4fd   :  { %12214 = vpow2.f32 %v833_v14  ;;  %v835_v16 = vmul.f32 1.442695, %v823_v33 }
 0x4ff   :  { %v13669_v13 = vpop.eup %12210  ;;  %12216 = vpow2.f32 %v835_v16 }
 0x500   :  { %v807_v58 = vpop.xlane.xlu1 %806  ;;  %v847_v22 = vsel %vm792_vm5, %v13669_v13, 0.0 }
 0x501   :  { %v13673_v9 = vpop.eup %12212  ;;  %v824_v23 = vsub.f32 %v13559_v60, %v807_v58  ;;  %848 = vadd.xlane.f32.xlu1 %v847_v22 }
 0x502   :  { %v850_v20 = vsel %vm792_vm5, %v13673_v9, 0.0 }
 0x503   :  { %v837_v36 = vmul.f32 1.442695, %v824_v23  ;;  %v810_v46 = vpop.xlane.xlu0 %809  ;;  %851 = vadd.xlane.f32.xlu0 %v850_v20 }
 0x504   :  { %v825_v35 = vsub.f32 %v13563_v17, %v810_v46 }
 0x505   :  { %12218 = vpow2.f32 %v837_v36 }
 0x506   :  { %v839_v38 = vmul.f32 1.442695, %v825_v35 }
 0x507   :  { %v13679_v39 = vpop.eup %12214 }
 0x508   :  { %12220 = vpow2.f32 %v839_v38  ;;  %v813_v26 = vpop.xlane.xlu1 %812  ;;  %v853_v48 = vsel %vm792_vm5, %v13679_v39, 0.0 }
 0x509   :  { %v13683_v49 = vpop.eup %12216  ;;  %v826_v60 = vsub.f32 %v13571_v43, %v813_v26  ;;  %854 = vadd.xlane.f32.xlu1 %v853_v48 }
 0x50a   :  { %v856_v53 = vsel %vm792_vm5, %v13683_v49, 0.0  ;;  %v816_v45 = vpop.xlane.xlu0 %815 }
 0x50b   :  { %v841_v62 = vmul.f32 1.442695, %v826_v60  ;;  %857 = vadd.xlane.f32.xlu0 %v856_v53  ;;  %v827_v17 = vsub.f32 %v13578_v5, %v816_v45 }
 0x50d   :  { %12222 = vpow2.f32 %v841_v62  ;;  %v843_v56 = vmul.f32 1.442695, %v827_v17 }
 0x50f   :  { %v13689_v4 = vpop.eup %12218  ;;  %12224 = vpow2.f32 %v843_v56 }
 0x510   :  { %v819_v7 = vpop.xlane.xlu1 %818  ;;  %v859_v14 = vsel %vm792_vm5, %v13689_v4, 0.0 }
 0x511   :  { %v828_v43 = vsub.f32 %v13590_v29, %v819_v7  ;;  %860 = vadd.xlane.f32.xlu1 %v859_v14 }
 0x512   :  { %v13694_v33 = vpop.eup %12220 }
 0x513   :  { %v845_v16 = vmul.f32 1.442695, %v828_v43  ;;  %v862_v58 = vsel %vm792_vm5, %v13694_v33, 0.0 }
 0x514   :  { %863 = vadd.xlane.f32.xlu0 %v862_v58 }
 0x515   :  { %12226 = vpow2.f32 %v845_v16 }
 0x517   :  { %v13698_v5 = vpop.eup %12222 }
 0x518   :  { %v1133_v22 = vpop.xlane.xlu0 %1132  ;;  %v865_v23 = vsel %vm792_vm5, %v13698_v5, 0.0 }
 0x519   :  { %v1158_v20 = vsub.f32 %v13610_v19, %v1133_v22  ;;  %866 = vadd.xlane.f32.xlu1 %v865_v23  ;;  %v13703_v36 = vpop.eup %12224 }
 0x51a   :  { %v1136_v29 = vpop.xlane.xlu1 %1135  ;;  %v868_v38 = vsel %vm792_vm5, %v13703_v36, 0.0 }
 0x51b   :  { %v1167_v46 = vmul.f32 1.442695, %v1158_v20  ;;  %v1159_v35 = vsub.f32 %v13616_v30, %v1136_v29  ;;  %869 = vadd.xlane.f32.xlu0 %v868_v38 }
 0x51d   :  { %12228 = vpow2.f32 %v1167_v46  ;;  %v1169_v26 = vmul.f32 1.442695, %v1159_v35 }
 0x51f   :  { %v13708_v48 = vpop.eup %12226  ;;  %12230 = vpow2.f32 %v1169_v26 }
 0x520   :  { %v1139_v60 = vpop.xlane.xlu0 %1138  ;;  %v871_v19 = vsel %vm792_vm5, %v13708_v48, 0.0 }
 0x521   :  { %v1160_v53 = vsub.f32 %v13627_v42, %v1139_v60  ;;  %872 = vadd.xlane.f32.xlu0 %v871_v19 }
 0x522   :  { %v1142_v62 = vpop.xlane.xlu1 %1141 }
 0x523   :  { %v1171_v45 = vmul.f32 1.442695, %v1160_v53  ;;  %v1161_v30 = vsub.f32 %v13632_v55, %v1142_v62 }
 0x525   :  { %12232 = vpow2.f32 %v1171_v45  ;;  %v1173_v17 = vmul.f32 1.442695, %v1161_v30 }
 0x527   :  { %v13714_v56 = vpop.eup %12228  ;;  %12234 = vpow2.f32 %v1173_v17 }
 0x528   :  { %v1145_v7 = vpop.xlane.xlu0 %1144  ;;  %v1185_v14 = vsel %vm792_vm5, %v13714_v56, 0.0 }
 0x529   :  { %v13718_v43 = vpop.eup %12230  ;;  %v1162_v16 = vsub.f32 %v13639_v2, %v1145_v7  ;;  %1186 = vadd.xlane.f32.xlu0 %v1185_v14 }
 0x52a   :  { %v1148_v42 = vpop.xlane.xlu1 %1147  ;;  %v1188_v55 = vsel %vm792_vm5, %v13718_v43, 0.0 }
 0x52b   :  { %v1175_v58 = vmul.f32 1.442695, %v1162_v16  ;;  %v1163_v22 = vsub.f32 %v13643_v10, %v1148_v42 }
 0x52d   :  { %12236 = vpow2.f32 %v1175_v58  ;;  %v1177_v23 = vmul.f32 1.442695, %v1163_v22  ;;  %1189 = vadd.xlane.f32.xlu0 %v1188_v55 }
 0x52f   :  { %v13724_v20 = vpop.eup %12232  ;;  %12238 = vpow2.f32 %v1177_v23 }
 0x530   :  { %v1151_v29 = vpop.xlane.xlu0 %1150  ;;  %v1191_v46 = vsel %vm792_vm5, %v13724_v20, 0.0 }
 0x531   :  { %v13728_v35 = vpop.eup %12234  ;;  %v1164_v2 = vsub.f32 %v13647_v8, %v1151_v29  ;;  %1192 = vadd.xlane.f32.xlu0 %v1191_v46 }
 0x532   :  { %v1194_v10 = vsel %vm792_vm5, %v13728_v35, 0.0  ;;  %v1154_v16 = vpop.xlane.xlu1 %1153 }
 0x533   :  { %v1179_v38 = vmul.f32 1.442695, %v1164_v2  ;;  %1195 = vadd.xlane.f32.xlu1 %v1194_v10  ;;  %v1165_v58 = vsub.f32 %v13651_v15, %v1154_v16 }
 0x534   :  { %v13755_v2 = vpop.permute.xlu0 %1237 }
 0x535   :  { %12240 = vpow2.f32 %v1179_v38  ;;  %v1181_v46 = vmul.f32 1.442695, %v1165_v58 }
 0x537   :  { %v13733_v26 = vpop.eup %12236  ;;  %12242 = vpow2.f32 %v1181_v46 }
 0x538   :  { %v1197_v60 = vsel %vm792_vm5, %v13733_v26, 0.0 }
 0x539   :  { %v13737_v19 = vpop.eup %12238  ;;  %1198 = vadd.xlane.f32.xlu0 %v1197_v60 }
 0x53a   :  { %v1200_v53 = vsel %vm792_vm5, %v13737_v19, 0.0 }
 0x53b   :  { %1201 = vadd.xlane.f32.xlu1 %v1200_v53 }
 0x53f   :  { %v13741_v8 = vpop.eup %12240 }
 0x540   :  { %v1203_v62 = vsel %vm792_vm5, %v13741_v8, 0.0 }
 0x541   :  { %1204 = vadd.xlane.f32.xlu0 %v1203_v62 }
 0x54c   :  { %1241 = vrot.lane.b32.xlu1 %v13338_v37, %s12976_s0 }
 0x551   :  { %v630_v45 = vpop.f32.mrb[20].mxu1 }
 0x552   :  { %v13748_v30 = vpack.c.bf16 %v630_v45, %v13346_v47  ;;  %v10589_v17 = vpop.f32.mrb[21].mxu1 }
 0x553   :  { %v633_v7 = vpop.f32.mrb[22].mxu1 }
 0x554   :  { %v10590_v14 = vpop.f32.mrb[23].mxu1 }
 0x557   :  { %1243 = vrot.lane.b32.xlu0 %v13342_v40, %s12976_s0 }
 0x559   :  { %v638_v42 = vpop.f32.mrb[24].mxu1 }
 0x55a   :  { %v13753_v22 = vpack.c.bf16 %v638_v42, %v633_v7  ;;  %v10593_v55 = vpop.f32.mrb[25].mxu1  ;;  %v13764_v42 = vpop.eup %12242 }
 0x55b   :  { %v641_v23 = vpop.f32.mrb[26].mxu1  ;;  %v1206_v55 = vsel %vm792_vm5, %v13764_v42, 0.0 }
 0x55c   :  { %v10594_v29 = vpop.f32.mrb[27].mxu1 }
 0x55d   :  { %v1240_v29 = vpop.permute.xlu1 %1239 }
 0x561   :  { %v646_v47 = vpop.f32.mrb[28].mxu1 }
 0x562   :  { %v13757_v10 = vpack.c.bf16 %v646_v47, %v641_v23  ;;  %v10597_v38 = vpop.f32.mrb[29].mxu1 }
 0x563   :  { %v649_v60 = vpop.f32.mrb[30].mxu1 }
 0x564   :  { %v10598_v53 = vpop.f32.mrb[31].mxu1 }
 0x565   :  { %v1157_v62 = vpop.xlane.xlu0 %1156 }
 0x566   :  { %v1166_v45 = vsub.f32 %v13655_v28, %v1157_v62 }
 0x568   :  { %v1183_v17 = vmul.f32 1.442695, %v1166_v45 }
 0x569   :  { %v654_v15 = vpop.f32.mrb[32].mxu1 }
 0x56a   :  { %12244 = vpow2.f32 %v1183_v17  ;;  %v13760_v7 = vpack.c.bf16 %v654_v15, %v649_v60  ;;  %v10601_v14 = vpop.f32.mrb[33].mxu1 }
 0x56b   :  { %v13762_v16 = vpop.f32.mrb[34].mxu1 }
 0x56c   :  { %v10602_v58 = vpop.f32.mrb[35].mxu1 }
 0x570   :  { %1207 = vadd.xlane.f32.xlu1 %v1206_v55 }
 0x574   :  { %v13768_v23 = vpop.eup %12244 }
 0x575   :  { %v1209_v28 = vsel %vm792_vm5, %v13768_v23, 0.0 }
 0x576   :  { %1210 = vadd.xlane.f32.xlu0 %v1209_v28 }
 0x581   :  { %1535 = vrot.lane.b32.xlu1 %v13326_v18, %s12978_s26 }
 0x585   :  { %1537 = vrot.lane.b32.xlu1 %v13330_v25, %s12978_s26 }
 0x589   :  { %1541 = vrot.lane.b32.xlu1 %v13338_v37, %s12978_s26 }
 0x58c   :  { %1539 = vrot.lane.b32.xlu0 %v13334_v32, %s12978_s26 }
 0x58d   :  { %1543 = vrot.lane.b32.xlu1 %v13342_v40, %s12978_s26 }
 0x58e   :  { %v849_v46 = vpop.xlane.xlu1 %848 }
 0x58f   :  { %12246 = vrcp.f32 %v849_v46 }
 0x590   :  { %1533 = vrot.lane.b32.xlu0 %v13342_v40, %s12979_s27  ;;  %v852_v47 = vpop.xlane.xlu0 %851 }
 0x591   :  { %12248 = vrcp.f32 %v852_v47  ;;  %1525 = vrot.lane.b32.xlu1 %v13326_v18, %s12979_s27 }
 0x594   :  { %1751 = vrot.lane.b32.xlu0 %v13326_v18, %s12980_s28 }
 0x595   :  { %1527 = vrot.lane.b32.xlu1 %v13330_v25, %s12979_s27 }
 0x596   :  { %v855_v38 = vpop.xlane.xlu1 %854 }
 0x597   :  { %12250 = vrcp.f32 %v855_v38 }
 0x598   :  { %1755 = vrot.lane.b32.xlu0 %v13334_v32, %s12980_s28  ;;  %v858_v60 = vpop.xlane.xlu0 %857 }
 0x599   :  { %v12247_v53 = vpop.eup %12246  ;;  %12252 = vrcp.f32 %v858_v60  ;;  %1529 = vrot.lane.b32.xlu1 %v13334_v32, %s12979_s27 }
 0x59a   :  { %v883_v45 = vmul.f32 %v12247_v53, %v13669_v13 }
 0x59b   :  { %v12249_v62 = vpop.eup %12248 }
 0x59c   :  { %v884_v17 = vmul.f32 %v12249_v62, %v13673_v9 }
 0x59d   :  { %1531 = vrot.lane.b32.xlu1 %v13338_v37, %s12979_s27 }
 0x59e   :  { %v892_v15 = vpack.c.bf16 %v884_v17, %v883_v45  ;;  %v861_v14 = vpop.xlane.xlu1 %860 }
 0x59f   :  { %12254 = vrcp.f32 %v861_v14 }
 0x5a0   :  { %10644 = vmatmul.mubr.msk.bf16.vlgmr.msra.gmra.mrb[36].mxu1 %vm792_vm5, %v892_v15 }
 0x5a1   :  { %v12251_v58 = vpop.eup %12250  ;;  %10694 = vmatpush3.bf16.msra.mxu1 %v13663_v27  ;;  %v864_v55 = vpop.xlane.xlu0 %863  ;;  %1753 = vrot.lane.b32.xlu1 %v13330_v25, %s12980_s28 }
 0x5a2   :  { %12256 = vrcp.f32 %v864_v55  ;;  %10695 = vmatprep.subr.bf16.mxu1 %v17794_v0  ;;  %10647 = vmatprep.mubr.msk.bf16.mxu1 %vm12971_vm1, %v17794_v0  ;;  %v885_v9 = vmul.f32 %v12251_v58, %v13679_v39 }
 0x5a3   :  { %v12253_v13 = vpop.eup %12252 }
 0x5a4   :  { %v886_v28 = vmul.f32 %v12253_v13, %v13683_v49 }
 0x5a5   :  { %10696 = vmatpush3.bf16.msra.mxu1 %v13755_v2 }
 0x5a6   :  { %v867_v46 = vpop.xlane.xlu1 %866  ;;  %10697 = vmatprep.subr.bf16.mxu1 %v17794_v0  ;;  %v893_v27 = vpack.c.bf16 %v886_v28, %v885_v9 }
 0x5a7   :  { %12258 = vrcp.f32 %v867_v46 }
 0x5a8   :  { %10648 = vmatmul.mubr.msk.bf16.gmra.mrb[40].mxu1 %vm792_vm5, %v893_v27  ;;  %v870_v47 = vpop.xlane.xlu0 %869 }
 0x5a9   :  { %10698 = vmatpush3.bf16.msra.mxu1 %v1240_v29  ;;  %10651 = vmatprep.mubr.msk.bf16.mxu1 %vm12971_vm1, %v17794_v0  ;;  %v12255_v38 = vpop.eup %12254  ;;  %12260 = vrcp.f32 %v870_v47 }
 0x5aa   :  { %10699 = vmatprep.subr.bf16.mxu1 %v17794_v0  ;;  %v887_v49 = vmul.f32 %v12255_v38, %v13689_v4 }
 0x5ac   :  { %v12257_v39 = vpop.eup %12256 }
 0x5ad   :  { %v888_v2 = vmul.f32 %v12257_v39, %v13694_v33 }
 0x5ae   :  { %v873_v60 = vpop.xlane.xlu0 %872 }
 0x5af   :  { %12262 = vrcp.f32 %v873_v60  ;;  %v894_v53 = vpack.c.bf16 %v888_v2, %v887_v49 }
 0x5b1   :  { %10652 = vmatmul.mubr.msk.bf16.gmra.mrb[44].mxu1 %vm792_vm5, %v894_v53  ;;  %v12259_v62 = vpop.eup %12258 }
 0x5b2   :  { %10655 = vmatprep.mubr.msk.bf16.mxu1 %vm12971_vm1, %v17794_v0  ;;  %v889_v45 = vmul.f32 %v12259_v62, %v13698_v5 }
 0x5b3   :  { %v12261_v29 = vpop.eup %12260 }
 0x5b4   :  { %v890_v17 = vmul.f32 %v12261_v29, %v13703_v36 }
 0x5b6   :  { %v895_v15 = vpack.c.bf16 %v890_v17, %v889_v45  ;;  %v1187_v4 = vpop.xlane.xlu0 %1186 }
 0x5b9   :  { %v12263_v14 = vpop.eup %12262  ;;  %10656 = vmatmul.mubr.msk.bf16.gmra.mrb[48].mxu1 %vm792_vm5, %v895_v15 }
 0x5ba   :  { %10659 = vmatprep.mubr.msk.bf16.mxu1 %vm12971_vm1, %v17794_v0  ;;  %v891_v33 = vmul.f32 %v12263_v14, %v13708_v48  ;;  %v1190_v55 = vpop.xlane.xlu0 %1189 }
 0x5bb   :  { %12264 = vrcp.f32 %v1190_v55 }
 0x5bc   :  { %v896_v58 = vpack.c.bf16 %v891_v33, %v891_v33  ;;  %12266 = vrcp.f32 %v1187_v4 }
 0x5be   :  { %v1193_v36 = vpop.xlane.xlu0 %1192 }
 0x5c0   :  { %v1196_v5 = vpop.xlane.xlu1 %1195 }
 0x5c1   :  { %10660 = vmatmul.mubr.msk.bf16.gmra.mrb[52].mxu1 %vm792_vm5, %v896_v58  ;;  %12268 = vrcp.f32 %v1196_v5 }
 0x5c2   :  { %10703 = vmatprep.mubr.msk.bf16.mxu1 %vm12971_vm1, %v17794_v0  ;;  %12270 = vrcp.f32 %v1193_v36 }
 0x5c5   :  { %v12265_v48 = vpop.eup %12264 }
 0x5c6   :  { %v1199_v9 = vpop.xlane.xlu0 %1198  ;;  %v12267_v27 = vpop.eup %12266  ;;  %v1222_v47 = vmul.f32 %v12265_v48, %v13718_v43 }
 0x5c7   :  { %v1221_v49 = vmul.f32 %v12267_v27, %v13714_v56 }
 0x5c8   :  { %v1202_v13 = vpop.xlane.xlu1 %1201 }
 0x5c9   :  { %12272 = vrcp.f32 %v1202_v13  ;;  %v1230_v2 = vpack.c.bf16 %v1222_v47, %v1221_v49 }
 0x5ca   :  { %12274 = vrcp.f32 %v1199_v9 }
 0x5cb   :  { %v12269_v60 = vpop.eup %12268 }
 0x5cc   :  { %v1242_v28 = vpop.permute.xlu1 %1241  ;;  %v12271_v53 = vpop.eup %12270  ;;  %v1224_v43 = vmul.f32 %v12269_v60, %v13728_v35 }
 0x5cd   :  { %10700 = vmatpush3.bf16.msra.mxu1 %v1242_v28  ;;  %v1223_v62 = vmul.f32 %v12271_v53, %v13724_v20  ;;  %v661_v20 = vld [vmem:[%s17789_s4] sm:$0xff] }
 0x5ce   :  { %v1205_v46 = vpop.xlane.xlu0 %1204  ;;  %10701 = vmatprep.subr.bf16.mxu1 %v17794_v0  ;;  %v665_v35 = vpack.c.bf16 %v661_v20, %v661_v20 }
 0x5cf   :  { %v1231_v29 = vpack.c.bf16 %v1224_v43, %v1223_v62  ;;  %12276 = vrcp.f32 %v1205_v46 }
 0x5d0   :  { %v13849_v4 = vsel %vm1359_vm7, %v665_v35, 0 }
 0x5d2   :  { %v1244_v38 = vpop.permute.xlu0 %1243 }
 0x5d3   :  { %v1265_v39 = vand.u32 %v1244_v38, %v13600_v3  ;;  %v12273_v45 = vpop.eup %12272 }
 0x5d4   :  { %v12275_v56 = vpop.eup %12274  ;;  %v1226_v17 = vmul.f32 %v12273_v45, %v13737_v19 }
 0x5d5   :  { %10702 = vmatpush3.bf16.msra.mxu1 %v1265_v39  ;;  %v1225_v15 = vmul.f32 %v12275_v56, %v13733_v26 }
 0x5d6   :  { %10745 = vmatprep.subr.bf16.mxu1 %v17794_v0 }
 0x5d7   :  { %v1232_v14 = vpack.c.bf16 %v1226_v17, %v1225_v15 }
 0x5d8   :  { %10704 = vmatmul.mubr.msk.bf16.vlgmr.msra.gmra.mrb[56].mxu1 %vm792_vm5, %v1230_v2 }
 0x5d9   :  { %10707 = vmatprep.mubr.msk.bf16.mxu1 %vm12971_vm1, %v17794_v0  ;;  %10746 = vmatpush3.bf16.msra.mxu1 %v13849_v4  ;;  %v12277_v33 = vpop.eup %12276 }
 0x5da   :  { %10797 = vmatprep.subr.bf16.mxu1 %v17794_v0  ;;  %v1227_v55 = vmul.f32 %v12277_v33, %v13741_v8  ;;  %v662_v8 = vld [vmem:[%s17789_s4 + $0x8] sm:$0xff] }
 0x5e0   :  { %10708 = vmatmul.mubr.msk.bf16.gmra.mrb[60].mxu1 %vm792_vm5, %v1231_v29 }
 0x5e1   :  { %10711 = vmatprep.mubr.msk.bf16.mxu1 %vm12971_vm1, %v17794_v0 }
 0x5e8   :  { %10712 = vmatmul.mubr.msk.bf16.gmra.mrb[64].mxu1 %vm792_vm5, %v1232_v14 }
 0x5e9   :  { %10715 = vmatprep.mubr.msk.bf16.mxu1 %vm12971_vm1, %v17794_v0 }
 0x5fd   :  { %v1208_v26 = vpop.xlane.xlu1 %1207 }
 0x5fe   :  { %12278 = vrcp.f32 %v1208_v26 }
 0x601   :  { %v1536_v48 = vpop.permute.xlu1 %1535 }
 0x603   :  { %v1211_v19 = vpop.xlane.xlu0 %1210 }
 0x604   :  { %12280 = vrcp.f32 %v1211_v19 }
 0x607   :  { %v13880_v49 = vpop.permute.xlu0 %1539 }
 0x608   :  { %v12279_v58 = vpop.eup %12278 }
 0x609   :  { %v1228_v5 = vmul.f32 %v12279_v58, %v13764_v42  ;;  %v666_v42 = vpack.c.bf16 %v662_v8, %v662_v8 }
 0x60b   :  { %v1233_v36 = vpack.c.bf16 %v1228_v5, %v1227_v55  ;;  %v13866_v46 = vsel %vm1359_vm7, %v666_v42, 0  ;;  %v13884_v60 = vpop.permute.xlu0 %1533 }
 0x60c   :  { %10724 = vmatpush3.bf16.msra.mxu0 %v13866_v46 }
 0x60d   :  { %10716 = vmatmul.mubr.msk.bf16.gmra.mrb[68].mxu1 %vm792_vm5, %v1233_v36  ;;  %10767 = vmatprep.subr.bf16.mxu0 %v17794_v0 }
 0x60e   :  { %v12281_v13 = vpop.eup %12280  ;;  %10719 = vmatprep.mubr.msk.bf16.mxu1 %vm12971_vm1, %v17794_v0 }
 0x60f   :  { %v1229_v9 = vmul.f32 %v12281_v13, %v13768_v23  ;;  %v13870_v23 = vpop.permute.xlu1 %1537  ;;  %v1752_v17 = vpop.permute.xlu0 %1751 }
 0x611   :  { %v1234_v28 = vpack.c.bf16 %v1229_v9, %v1229_v9 }
 0x613   :  { %v13872_v27 = vpop.permute.xlu1 %1541  ;;  %v1756_v33 = vpop.permute.xlu0 %1755 }
 0x615   :  { %10720 = vmatmul.mubr.msk.bf16.gmra.mrb[72].mxu1 %vm792_vm5, %v1234_v28 }
 0x616   :  { %10747 = vmatprep.mubr.msk.bf16.mxu1 %vm12971_vm1, %v17794_v0 }
 0x617   :  { %v13874_v47 = vpop.permute.xlu1 %1543 }
 0x61b   :  { %v13876_v38 = vpop.permute.xlu1 %1525 }
 0x61f   :  { %v13878_v39 = vpop.permute.xlu1 %1527 }
 0x623   :  { %v13882_v2 = vpop.permute.xlu1 %1529 }
 0x627   :  { %v13886_v29 = vpop.permute.xlu1 %1531 }
 0x62b   :  { %v1754_v14 = vpop.permute.xlu1 %1753 }
 0x673   :  { %v966_v53 = vpop.f32.mrb[36].mxu1 }
 0x674   :  { %v10645_v43 = vpop.f32.mrb[37].mxu1 }
 0x675   :  { %v969_v62 = vpop.f32.mrb[38].mxu1 }
 0x676   :  { %v1004_v45 = vpack.c.bf16 %v969_v62, %v966_v53  ;;  %v10646_v56 = vpop.f32.mrb[39].mxu1 }
 0x678   :  { %10748 = vmatmul.mubr.msk.bf16.vlgmr.msra.gmra.mrb[76].mxu1 %vm689_vm4, %v1004_v45 }
 0x679   :  { %10798 = vmatpush3.bf16.msra.mxu1 %v1752_v17  ;;  %10751 = vmatprep.mubr.msk.bf16.mxu1 %vm12971_vm1, %v17794_v0 }
 0x67a   :  { %10799 = vmatprep.subr.bf16.mxu1 %v17794_v0 }
 0x67b   :  { %v974_v15 = vpop.f32.mrb[40].mxu1 }
 0x67c   :  { %v10649_v20 = vpop.f32.mrb[41].mxu1 }
 0x67d   :  { %10800 = vmatpush3.bf16.msra.mxu1 %v1754_v14  ;;  %v977_v35 = vpop.f32.mrb[42].mxu1 }
 0x67e   :  { %v1005_v26 = vpack.c.bf16 %v977_v35, %v974_v15  ;;  %v10650_v19 = vpop.f32.mrb[43].mxu1  ;;  %10801 = vmatprep.subr.bf16.mxu1 %v17794_v0 }
 0x67f   :  { %v1561_v19 = vsel %vm689_vm4, %v1536_v48, 0 }
 0x680   :  { %10752 = vmatmul.mubr.msk.bf16.gmra.mrb[80].mxu1 %vm689_vm4, %v1005_v26 }
 0x681   :  { %10802 = vmatpush3.bf16.msra.mxu1 %v1756_v33  ;;  %10755 = vmatprep.mubr.msk.bf16.mxu1 %vm12971_vm1, %v17794_v0 }
 0x682   :  { %10803 = vmatprep.subr.bf16.mxu1 %v17794_v0 }
 0x684   :  { %v982_v58 = vpop.f32.mrb[44].mxu1 }
 0x685   :  { %v10653_v55 = vpop.f32.mrb[45].mxu1 }
 0x686   :  { %v985_v5 = vpop.f32.mrb[46].mxu1 }
 0x687   :  { %v1006_v36 = vpack.c.bf16 %v985_v5, %v982_v58  ;;  %v10654_v13 = vpop.f32.mrb[47].mxu1 }
 0x688   :  { %v1564_v13 = vsel %vm689_vm4, %v13870_v23, 0  ;;  %v1570_v23 = vsel %vm689_vm4, %v13872_v27, 0 }
 0x689   :  { %10756 = vmatmul.mubr.msk.bf16.gmra.mrb[84].mxu1 %vm689_vm4, %v1006_v36 }
 0x68a   :  { %10759 = vmatprep.mubr.msk.bf16.mxu1 %vm12971_vm1, %v17794_v0 }
 0x68c   :  { %v990_v9 = vpop.f32.mrb[48].mxu1 }
 0x68d   :  { %v10657_v28 = vpop.f32.mrb[49].mxu1 }
 0x68e   :  { %v993_v8 = vpop.f32.mrb[50].mxu1 }
 0x68f   :  { %v1007_v42 = vpack.c.bf16 %v993_v8, %v990_v9  ;;  %v10658_v53 = vpop.f32.mrb[51].mxu1 }
 0x690   :  { %v1567_v53 = vsel %vm689_vm4, %v13880_v49, 0 }
 0x691   :  { %10760 = vmatmul.mubr.msk.bf16.gmra.mrb[88].mxu1 %vm689_vm4, %v1007_v42 }
 0x692   :  { %10763 = vmatprep.mubr.msk.bf16.mxu1 %vm12971_vm1, %v17794_v0 }
 0x694   :  { %v998_v43 = vpop.f32.mrb[52].mxu1 }
 0x695   :  { %v10661_v62 = vpop.f32.mrb[53].mxu1  ;;  %v1008_v56 = vpack.c.bf16 %v998_v43, %v998_v43  ;;  %v1573_v43 = vsel %vm689_vm4, %v13874_v47, 0 }
 0x696   :  { %v1001_v45 = vpop.f32.mrb[54].mxu1 }
 0x697   :  { %v10662_v17 = vpop.f32.mrb[55].mxu1 }
 0x699   :  { %10764 = vmatmul.mubr.msk.bf16.gmra.mrb[92].mxu1 %vm689_vm4, %v1008_v56 }
 0x69a   :  { %10807 = vmatprep.mubr.msk.bf16.mxu1 %vm12971_vm1, %v17794_v0 }
 0x6ab   :  { %v1301_v15 = vpop.f32.mrb[56].mxu1 }
 0x6ac   :  { %v10705_v14 = vpop.f32.mrb[57].mxu1 }
 0x6ad   :  { %v1304_v20 = vpop.f32.mrb[58].mxu1 }
 0x6ae   :  { %v1339_v35 = vpack.c.bf16 %v1304_v20, %v1301_v15  ;;  %v10706_v26 = vpop.f32.mrb[59].mxu1 }
 0x6b0   :  { %10726 = vmatmul.mubr.msk.bf16.vlgmr.msra.gmra.mrb[76].mxu0 %vm689_vm4, %v1339_v35 }
 0x6b1   :  { %10768 = vmatpush3.bf16.xpose.msra.mxu0 %v1561_v19  ;;  %10729 = vmatprep.mubr.msk.bf16.mxu0 %vm12971_vm1, %v17794_v0 }
 0x6b2   :  { %10769 = vmatprep.subr.bf16.mxu0 %v17794_v0 }
 0x6b3   :  { %v1309_v33 = vpop.f32.mrb[60].mxu1 }
 0x6b4   :  { %v10709_v58 = vpop.f32.mrb[61].mxu1 }
 0x6b5   :  { %v1312_v55 = vpop.f32.mrb[62].mxu1 }
 0x6b6   :  { %v1340_v5 = vpack.c.bf16 %v1312_v55, %v1309_v33  ;;  %v10710_v36 = vpop.f32.mrb[63].mxu1 }
 0x6b8   :  { %10730 = vmatmul.mubr.msk.bf16.gmra.mrb[80].mxu0 %vm689_vm4, %v1340_v5 }
 0x6b9   :  { %10770 = vmatpush3.bf16.xpose.msra.mxu0 %v1564_v13  ;;  %10733 = vmatprep.mubr.msk.bf16.mxu0 %vm12971_vm1, %v17794_v0 }
 0x6ba   :  { %10771 = vmatprep.subr.bf16.mxu0 %v17794_v0 }
 0x6bb   :  { %v1317_v48 = vpop.f32.mrb[64].mxu1 }
 0x6bc   :  { %v10713_v9 = vpop.f32.mrb[65].mxu1 }
 0x6bd   :  { %v1320_v28 = vpop.f32.mrb[66].mxu1 }
 0x6be   :  { %v1341_v8 = vpack.c.bf16 %v1320_v28, %v1317_v48  ;;  %v10714_v42 = vpop.f32.mrb[67].mxu1 }
 0x6c0   :  { %10734 = vmatmul.mubr.msk.bf16.gmra.mrb[84].mxu0 %vm689_vm4, %v1341_v8 }
 0x6c1   :  { %10772 = vmatpush3.bf16.xpose.msra.mxu0 %v1567_v53  ;;  %10737 = vmatprep.mubr.msk.bf16.mxu0 %vm12971_vm1, %v17794_v0 }
 0x6c2   :  { %10773 = vmatprep.subr.bf16.mxu0 %v17794_v0 }
 0x6c9   :  { %10774 = vmatpush3.bf16.xpose.msra.mxu0 %v1570_v23 }
 0x6ca   :  { %10775 = vmatprep.subr.bf16.mxu0 %v17794_v0 }
 0x6d1   :  { %10776 = vmatpush3.bf16.xpose.msra.mxu0 %v1573_v43 }
 0x6d2   :  { %10827 = vmatprep.subr.bf16.mxu0 %v17794_v0 }
 0x6e0   :  { %v1325_v49 = vpop.f32.mrb[68].mxu1 }
 0x6e1   :  { %v10717_v62 = vpop.f32.mrb[69].mxu1 }
 0x6e2   :  { %v1328_v45 = vpop.f32.mrb[70].mxu1 }
 0x6e3   :  { %v1342_v56 = vpack.c.bf16 %v1328_v45, %v1325_v49  ;;  %v10718_v17 = vpop.f32.mrb[71].mxu1 }
 0x6e5   :  { %10738 = vmatmul.mubr.msk.bf16.gmra.mrb[88].mxu0 %vm689_vm4, %v1342_v56 }
 0x6e6   :  { %10741 = vmatprep.mubr.msk.bf16.mxu0 %vm12971_vm1, %v17794_v0 }
 0x6e8   :  { %v1333_v27 = vpop.f32.mrb[72].mxu1 }
 0x6e9   :  { %v10721_v15 = vpop.f32.mrb[73].mxu1  ;;  %v1343_v20 = vpack.c.bf16 %v1333_v27, %v1333_v27 }
 0x6ea   :  { %v1336_v14 = vpop.f32.mrb[74].mxu1 }
 0x6eb   :  { %v10722_v35 = vpop.f32.mrb[75].mxu1 }
 0x6ed   :  { %10742 = vmatmul.mubr.msk.bf16.gmra.mrb[92].mxu0 %vm689_vm4, %v1343_v20 }
 0x6ee   :  { %10777 = vmatprep.mubr.msk.bf16.mxu0 %vm12971_vm1, %v17794_v0 }
 0x6f5   :  { %10778 = vmatmul.mubr.msk.bf16.vlgmr.msra.gmra.mrb[96].mxu0 %vm689_vm4, %v13876_v38 }
 0x6f6   :  { %10781 = vmatprep.mubr.msk.bf16.mxu0 %vm12971_vm1, %v17794_v0 }
 0x6fd   :  { %10782 = vmatmul.mubr.msk.bf16.gmra.mrb[100].mxu0 %vm689_vm4, %v13878_v39 }
 0x6fe   :  { %10785 = vmatprep.mubr.msk.bf16.mxu0 %vm12971_vm1, %v17794_v0 }
 0x705   :  { %10786 = vmatmul.mubr.msk.bf16.gmra.mrb[104].mxu0 %vm689_vm4, %v13882_v2 }
 0x706   :  { %10789 = vmatprep.mubr.msk.bf16.mxu0 %vm12971_vm1, %v17794_v0 }
 0x70d   :  { %10790 = vmatmul.mubr.msk.bf16.gmra.mrb[108].mxu0 %vm689_vm4, %v13886_v29 }
 0x70e   :  { %10793 = vmatprep.mubr.msk.bf16.mxu0 %vm12971_vm1, %v17794_v0 }
 0x715   :  { %10794 = vmatmul.mubr.msk.bf16.gmra.mrb[112].mxu0 %vm689_vm4, %v13884_v60 }
 0x716   :  { %10829 = vmatprep.mubr.msk.bf16.mxu0 %vm12971_vm1, %v17794_v0 }
 0x74b   :  { %v1487_v47 = vpop.f32.mrb[76].mxu1 }
 0x74c   :  { %v10749_v38 = vpop.f32.mrb[77].mxu1 }
 0x74d   :  { %v1490_v39 = vpop.f32.mrb[78].mxu1 }
 0x74e   :  { %v10750_v26 = vpop.f32.mrb[79].mxu1 }
 0x753   :  { %v1495_v2 = vpop.f32.mrb[80].mxu1 }
 0x754   :  { %v10753_v19 = vpop.f32.mrb[81].mxu1 }
 0x755   :  { %v1498_v33 = vpop.f32.mrb[82].mxu1 }
 0x756   :  { %v10754_v58 = vpop.f32.mrb[83].mxu1 }
 0x75c   :  { %v1503_v55 = vpop.f32.mrb[84].mxu1 }
 0x75d   :  { %v10757_v5 = vpop.f32.mrb[85].mxu1 }
 0x75e   :  { %v1506_v29 = vpop.f32.mrb[86].mxu1 }
 0x75f   :  { %v10758_v36 = vpop.f32.mrb[87].mxu1 }
 0x764   :  { %v1511_v13 = vpop.f32.mrb[88].mxu1 }
 0x765   :  { %v10761_v48 = vpop.f32.mrb[89].mxu1 }
 0x766   :  { %v1514_v9 = vpop.f32.mrb[90].mxu1 }
 0x767   :  { %v10762_v28 = vpop.f32.mrb[91].mxu1 }
 0x76c   :  { %v1519_v60 = vpop.f32.mrb[92].mxu1 }
 0x76d   :  { %v10765_v8 = vpop.f32.mrb[93].mxu1 }
 0x76e   :  { %v1522_v42 = vpop.f32.mrb[94].mxu1 }
 0x76f   :  { %v10766_v53 = vpop.f32.mrb[95].mxu1 }
 0x783   :  { %v1397_v23 = vpop.f32.mrb[76].mxu0 }
 0x784   :  { %v13955_v43 = vadd.f32 %v1487_v47, %v1397_v23  ;;  %v10727_v49 = vpop.f32.mrb[77].mxu0 }
 0x785   :  { %v1400_v62 = vpop.f32.mrb[78].mxu0 }
 0x786   :  { %v13957_v45 = vadd.f32 %v1490_v39, %v1400_v62  ;;  %v10728_v56 = vpop.f32.mrb[79].mxu0 }
 0x78b   :  { %v1405_v17 = vpop.f32.mrb[80].mxu0 }
 0x78c   :  { %v13959_v27 = vadd.f32 %v1495_v2, %v1405_v17  ;;  %v10731_v15 = vpop.f32.mrb[81].mxu0 }
 0x78d   :  { %v1408_v14 = vpop.f32.mrb[82].mxu0 }
 0x78e   :  { %v13961_v20 = vadd.f32 %v1498_v33, %v1408_v14  ;;  %v10732_v35 = vpop.f32.mrb[83].mxu0 }
 0x793   :  { %v1413_v38 = vpop.f32.mrb[84].mxu0 }
 0x794   :  { %v13963_v26 = vadd.f32 %v1503_v55, %v1413_v38  ;;  %v10735_v19 = vpop.f32.mrb[85].mxu0 }
 0x795   :  { %v1416_v58 = vpop.f32.mrb[86].mxu0 }
 0x796   :  { %v13965_v47 = vadd.f32 %v1506_v29, %v1416_v58  ;;  %v10736_v5 = vpop.f32.mrb[87].mxu0 }
 0x7b8   :  { %v1421_v36 = vpop.f32.mrb[88].mxu0 }
 0x7b9   :  { %v13967_v39 = vadd.f32 %v1511_v13, %v1421_v36  ;;  %v10739_v48 = vpop.f32.mrb[89].mxu0 }
 0x7ba   :  { %v1424_v28 = vpop.f32.mrb[90].mxu0 }
 0x7bb   :  { %v13969_v2 = vadd.f32 %v1514_v9, %v1424_v28  ;;  %v10740_v8 = vpop.f32.mrb[91].mxu0 }
 0x7c0   :  { %v1429_v42 = vpop.f32.mrb[92].mxu0 }
 0x7c1   :  { %v13971_v33 = vadd.f32 %v1519_v60, %v1429_v42  ;;  %v10743_v53 = vpop.f32.mrb[93].mxu0 }
 0x7c2   :  { %v1432_v23 = vpop.f32.mrb[94].mxu0 }
 0x7c3   :  { %v10744_v55 = vpop.f32.mrb[95].mxu0 }
 0x7c8   :  { %v1609_v49 = vpop.f32.mrb[96].mxu0 }
 0x7c9   :  { %v10779_v62 = vpop.f32.mrb[97].mxu0  ;;  %v1647_v29 = vsel %vm792_vm5, %v1609_v49, -inf }
 0x7ca   :  { %1648 = vmax.xlane.f32.xlu1 %v1647_v29  ;;  %v1612_v56 = vpop.f32.mrb[98].mxu0 }
 0x7cb   :  { %v10780_v17 = vpop.f32.mrb[99].mxu0  ;;  %v1650_v13 = vsel %vm792_vm5, %v1612_v56, -inf }
 0x7cc   :  { %1651 = vmax.xlane.f32.xlu0 %v1650_v13 }
 0x7d0   :  { %v1617_v15 = vpop.f32.mrb[100].mxu0 }
 0x7d1   :  { %v10783_v9 = vpop.f32.mrb[101].mxu0  ;;  %v1653_v14 = vsel %vm792_vm5, %v1617_v15, -inf }
 0x7d2   :  { %1654 = vmax.xlane.f32.xlu0 %v1653_v14  ;;  %v1620_v60 = vpop.f32.mrb[102].mxu0 }
 0x7d3   :  { %v10784_v35 = vpop.f32.mrb[103].mxu0  ;;  %v1656_v38 = vsel %vm792_vm5, %v1620_v60, -inf }
 0x7d6   :  { %1657 = vmax.xlane.f32.xlu0 %v1656_v38 }
 0x7d8   :  { %v1625_v19 = vpop.f32.mrb[104].mxu0 }
 0x7d9   :  { %v10787_v58 = vpop.f32.mrb[105].mxu0  ;;  %v1659_v5 = vsel %vm792_vm5, %v1625_v19, -inf }
 0x7da   :  { %1660 = vmax.xlane.f32.xlu1 %v1659_v5  ;;  %v13978_v36 = vpop.f32.mrb[106].mxu0 }
 0x7db   :  { %v10788_v48 = vpop.f32.mrb[107].mxu0  ;;  %v1662_v28 = vsel %vm792_vm5, %v13978_v36, -inf }
 0x7dc   :  { %1663 = vmax.xlane.f32.xlu0 %v1662_v28 }
 0x7e0   :  { %v1633_v8 = vpop.f32.mrb[108].mxu0 }
 0x7e1   :  { %v10791_v42 = vpop.f32.mrb[109].mxu0  ;;  %v1665_v53 = vsel %vm792_vm5, %v1633_v8, -inf }
 0x7e2   :  { %1666 = vmax.xlane.f32.xlu1 %v1665_v53  ;;  %v13983_v23 = vpop.f32.mrb[110].mxu0 }
 0x7e3   :  { %v10792_v55 = vpop.f32.mrb[111].mxu0  ;;  %v1668_v62 = vsel %vm792_vm5, %v13983_v23, -inf }
 0x7e4   :  { %1669 = vmax.xlane.f32.xlu0 %v1668_v62 }
 0x7e8   :  { %v13987_v29 = vpop.f32.mrb[112].mxu0 }
 0x7e9   :  { %v10795_v17 = vpop.f32.mrb[113].mxu0  ;;  %v1671_v14 = vsel %vm792_vm5, %v13987_v29, -inf }
 0x7ea   :  { %v1644_v13 = vpop.f32.mrb[114].mxu0 }
 0x7eb   :  { %v10796_v9 = vpop.f32.mrb[115].mxu0 }
 0x7f3   :  { %1759 = vrot.lane.b32.xlu1 %v13342_v40, %s12980_s28 }
 0x7fa   :  { %1757 = vrot.lane.b32.xlu0 %v13338_v37, %s12980_s28 }
 0x817   :  { %1672 = vmax.xlane.f32.xlu1 %v1671_v14 }
 0x828   :  { %1971 = vrot.lane.b32.xlu1 %v13330_v25, %s12981_s2 }
 0x857   :  { %v1649_v35 = vpop.xlane.xlu1 %1648 }
 0x858   :  { %v1674_v38 = vsub.f32 %v1609_v49, %v1649_v35 }
 0x859   :  { %v1652_v58 = vpop.xlane.xlu0 %1651 }
 0x85a   :  { %v1683_v5 = vmul.f32 1.442695, %v1674_v38  ;;  %v1675_v48 = vsub.f32 %v1612_v56, %v1652_v58 }
 0x85c   :  { %12282 = vpow2.f32 %v1683_v5  ;;  %v1685_v28 = vmul.f32 1.442695, %v1675_v48 }
 0x85e   :  { %12284 = vpow2.f32 %v1685_v28 }
 0x85f   :  { %v1655_v42 = vpop.xlane.xlu0 %1654 }
 0x860   :  { %v1676_v53 = vsub.f32 %v1617_v15, %v1655_v42 }
 0x862   :  { %v1687_v55 = vmul.f32 1.442695, %v1676_v53 }
 0x863   :  { %v1658_v62 = vpop.xlane.xlu0 %1657 }
 0x864   :  { %12286 = vpow2.f32 %v1687_v55  ;;  %v1677_v17 = vsub.f32 %v1620_v60, %v1658_v62 }
 0x866   :  { %v13997_v13 = vpop.eup %12282  ;;  %v1689_v9 = vmul.f32 1.442695, %v1677_v17 }
 0x867   :  { %v1661_v14 = vpop.xlane.xlu1 %1660  ;;  %v1701_v0 = vsel %vm792_vm5, %v13997_v13, 0.0 }
 0x868   :  { %v14001_v49 = vpop.eup %12284  ;;  %12288 = vpow2.f32 %v1689_v9  ;;  %v1678_v56 = vsub.f32 %v1625_v19, %v1661_v14  ;;  %1702 = vadd.xlane.f32.xlu0 %v1701_v0  ;;  %v17814_v9 = vmov 0.0  }
 0x869   :  { %v1704_v35 = vsel %vm792_vm5, %v14001_v49, 0.0  ;;  %v1664_v38 = vpop.xlane.xlu0 %1663  ;;  %9499 = vst [vmem:[%s17793_s9] sm:$0xff] %v17814_v9 }
 0x86a   :  { %v1691_v15 = vmul.f32 1.442695, %v1678_v56  ;;  %1705 = vadd.xlane.f32.xlu1 %v1704_v35  ;;  %v1679_v35 = vsub.f32 %v13978_v36, %v1664_v38 }
 0x86c   :  { %12290 = vpow2.f32 %v1691_v15  ;;  %v1693_v15 = vmul.f32 1.442695, %v1679_v35 }
 0x86e   :  { %v14005_v60 = vpop.eup %12286 }
 0x86f   :  { %v1667_v58 = vpop.xlane.xlu1 %1666  ;;  %v1707_v5 = vsel %vm792_vm5, %v14005_v60, 0.0 }
 0x870   :  { %v1680_v48 = vsub.f32 %v1633_v8, %v1667_v58  ;;  %1708 = vadd.xlane.f32.xlu1 %v1707_v5 }
 0x871   :  { %v1670_v28 = vpop.xlane.xlu0 %1669 }
 0x872   :  { %v14009_v42 = vpop.eup %12288  ;;  %v1695_v19 = vmul.f32 1.442695, %v1680_v48  ;;  %v1681_v58 = vsub.f32 %v13983_v23, %v1670_v28 }
 0x873   :  { %v1710_v0 = vsel %vm792_vm5, %v14009_v42, 0.0  ;;  %v1760_v53 = vpop.permute.xlu1 %1759 }
 0x874   :  { %12292 = vpow2.f32 %v1695_v19  ;;  %1711 = vadd.xlane.f32.xlu1 %v1710_v0  ;;  %v1781_v8 = vand.u32 %v1760_v53, %v13600_v3  ;;  %v1697_v5 = vmul.f32 1.442695, %v1681_v58 }
 0x875   :  { %v1758_v55 = vpop.permute.xlu0 %1757  ;;  %12294 = vpow2.f32 %v1693_v15 }
 0x876   :  { %v14013_v62 = vpop.eup %12290  ;;  %10804 = vmatpush3.bf16.msra.mxu1 %v1758_v55  ;;  %12296 = vpow2.f32 %v1697_v5 }
 0x877   :  { %v1713_v17 = vsel %vm792_vm5, %v14013_v62, 0.0  ;;  %10805 = vmatprep.subr.bf16.mxu1 %v17814_v9 }
 0x878   :  { %1714 = vadd.xlane.f32.xlu1 %v1713_v17 }
 0x87a   :  { %10806 = vmatpush3.bf16.msra.mxu1 %v1781_v8 }
 0x87b   :  { %10849 = vmatprep.subr.bf16.mxu1 %v17814_v9 }
 0x87e   :  { %v14020_v14 = vpop.eup %12292  ;;  %1969 = vrot.lane.b32.xlu0 %v13326_v18, %s12981_s2 }
 0x87f   :  { %v1719_v56 = vsel %vm792_vm5, %v14020_v14, 0.0  ;;  %v14028_v48 = vpop.eup %12294 }
 0x880   :  { %1720 = vadd.xlane.f32.xlu1 %v1719_v56  ;;  %v1716_v19 = vsel %vm792_vm5, %v14028_v48, 0.0  ;;  %v14032_v0 = vpop.eup %12296 }
 0x881   :  { %v1722_v53 = vsel %vm792_vm5, %v14032_v0, 0.0 }
 0x89d   :  { %1717 = vadd.xlane.f32.xlu0 %v1716_v19 }
 0x8a1   :  { %1723 = vadd.xlane.f32.xlu0 %v1722_v53 }
 0x8a4   :  { %v1673_v55 = vpop.xlane.xlu1 %1672 }
 0x8a5   :  { %v1682_v36 = vsub.f32 %v13987_v29, %v1673_v55 }
 0x8a7   :  { %v1699_v38 = vmul.f32 1.442695, %v1682_v36 }
 0x8a8   :  { %v1972_v29 = vpop.permute.xlu1 %1971 }
 0x8a9   :  { %12298 = vpow2.f32 %v1699_v38 }
 0x8b3   :  { %v14037_v23 = vpop.eup %12298 }
 0x8b4   :  { %v1725_v28 = vsel %vm792_vm5, %v14037_v23, 0.0 }
 0x8b5   :  { %1726 = vadd.xlane.f32.xlu1 %v1725_v28 }
 0x8b7   :  { %1973 = vrot.lane.b32.xlu0 %v13334_v32, %s12981_s2 }
 0x8bb   :  { %1977 = vrot.lane.b32.xlu0 %v13342_v40, %s12981_s2 }
 0x8bf   :  { %1961 = vrot.lane.b32.xlu0 %v13330_v25, %s12982_s15 }
 0x8c3   :  { %1965 = vrot.lane.b32.xlu0 %v13338_v37, %s12982_s15 }
 0x8c6   :  { %1975 = vrot.lane.b32.xlu1 %v13338_v37, %s12981_s2 }
 0x8ca   :  { %1959 = vrot.lane.b32.xlu1 %v13326_v18, %s12982_s15 }
 0x8ce   :  { %1963 = vrot.lane.b32.xlu1 %v13334_v32, %s12982_s15 }
 0x8d2   :  { %1967 = vrot.lane.b32.xlu1 %v13342_v40, %s12982_s15 }
 0x8d6   :  { %2185 = vrot.lane.b32.xlu1 %v13326_v18, %s12983_s16 }
 0x8f5   :  { %v1703_v17 = vpop.xlane.xlu0 %1702 }
 0x8f6   :  { %12300 = vrcp.f32 %v1703_v17 }
 0x8f7   :  { %v1706_v8 = vpop.xlane.xlu1 %1705 }
 0x8f8   :  { %12302 = vrcp.f32 %v1706_v8 }
 0x8f9   :  { %v1970_v53 = vpop.permute.xlu0 %1969 }
 0x8fa   :  { %v1995_v36 = vsel %vm689_vm4, %v1970_v53, 0 }
 0x8fd   :  { %v1709_v56 = vpop.xlane.xlu1 %1708 }
 0x8fe   :  { %12304 = vrcp.f32 %v1709_v56 }
 0x900   :  { %v12301_v35 = vpop.eup %12300 }
 0x901   :  { %v1712_v15 = vpop.xlane.xlu1 %1711  ;;  %v1737_v5 = vmul.f32 %v12301_v35, %v13997_v13 }
 0x902   :  { %v12303_v58 = vpop.eup %12302  ;;  %12306 = vrcp.f32 %v1712_v15 }
 0x903   :  { %v1738_v19 = vmul.f32 %v12303_v58, %v14001_v49  ;;  %v1998_v49 = vsel %vm689_vm4, %v1972_v29, 0 }
 0x905   :  { %v1746_v55 = vpack.c.bf16 %v1738_v19, %v1737_v5  ;;  %v1715_v8 = vpop.xlane.xlu1 %1714 }
 0x906   :  { %12308 = vrcp.f32 %v1715_v8 }
 0x907   :  { %10808 = vmatmul.mubr.msk.bf16.vlgmr.msra.gmra.mrb[96].mxu1 %vm792_vm5, %v1746_v55 }
 0x908   :  { %10850 = vmatpush3.bf16.xpose.msra.mxu1 %v1995_v36  ;;  %10811 = vmatprep.mubr.msk.bf16.mxu1 %vm12971_vm1, %v17814_v9  ;;  %v12305_v18 = vpop.eup %12304 }
 0x909   :  { %10851 = vmatprep.subr.bf16.mxu1 %v17814_v9  ;;  %v1739_v28 = vmul.f32 %v12305_v18, %v14005_v60 }
 0x90c   :  { %v12307_v38 = vpop.eup %12306 }
 0x90d   :  { %v1740_v13 = vmul.f32 %v12307_v38, %v14009_v42  ;;  %v1721_v35 = vpop.xlane.xlu1 %1720 }
 0x90f   :  { %v1747_v17 = vpack.c.bf16 %v1740_v13, %v1739_v28 }
 0x910   :  { %10852 = vmatpush3.bf16.xpose.msra.mxu1 %v1998_v49  ;;  %v12309_v42 = vpop.eup %12308 }
 0x911   :  { %10812 = vmatmul.mubr.msk.bf16.gmra.mrb[100].mxu1 %vm792_vm5, %v1747_v17  ;;  %10853 = vmatprep.subr.bf16.mxu1 %v17814_v9  ;;  %v1741_v5 = vmul.f32 %v12309_v42, %v14013_v62 }
 0x912   :  { %10815 = vmatprep.mubr.msk.bf16.mxu1 %vm12971_vm1, %v17814_v9 }
 0x92a   :  { %v1718_v56 = vpop.xlane.xlu0 %1717 }
 0x92b   :  { %12310 = vrcp.f32 %v1718_v56  ;;  %v663_v56 = vld [vmem:[%s17789_s4 + $0x10] sm:$0xff] }
 0x92e   :  { %v1724_v15 = vpop.xlane.xlu0 %1723 }
 0x92f   :  { %12312 = vrcp.f32 %v1724_v15  ;;  %v667_v15 = vpack.c.bf16 %v663_v56, %v663_v56 }
 0x930   :  { %12314 = vrcp.f32 %v1721_v35 }
 0x932   :  { %v1974_v60 = vpop.permute.xlu0 %1973 }
 0x933   :  { %v2001_v29 = vsel %vm689_vm4, %v1974_v60, 0 }
 0x934   :  { %10854 = vmatpush3.bf16.xpose.msra.mxu1 %v2001_v29 }
 0x935   :  { %v12311_v58 = vpop.eup %12310  ;;  %10855 = vmatprep.subr.bf16.mxu1 %v17814_v9 }
 0x936   :  { %v1742_v19 = vmul.f32 %v12311_v58, %v14028_v48  ;;  %v1978_v49 = vpop.permute.xlu0 %1977 }
 0x938   :  { %v1748_v53 = vpack.c.bf16 %v1742_v19, %v1741_v5 }
 0x939   :  { %v12313_v55 = vpop.eup %12312 }
 0x93a   :  { %10816 = vmatmul.mubr.msk.bf16.gmra.mrb[104].mxu1 %vm792_vm5, %v1748_v53  ;;  %v12315_v36 = vpop.eup %12314  ;;  %v1744_v18 = vmul.f32 %v12313_v55, %v14032_v0  ;;  %v1962_v60 = vpop.permute.xlu0 %1961 }
 0x93b   :  { %10819 = vmatprep.mubr.msk.bf16.mxu1 %vm12971_vm1, %v17814_v9  ;;  %v1743_v38 = vmul.f32 %v12315_v36, %v14020_v14  ;;  %v2007_v14 = vsel %vm689_vm4, %v1978_v49, 0 }
 0x93d   :  { %v1749_v28 = vpack.c.bf16 %v1744_v18, %v1743_v38 }
 0x93e   :  { %v1966_v29 = vpop.permute.xlu0 %1965 }
 0x942   :  { %10820 = vmatmul.mubr.msk.bf16.gmra.mrb[108].mxu1 %vm792_vm5, %v1749_v28  ;;  %v1727_v13 = vpop.xlane.xlu1 %1726 }
 0x943   :  { %12316 = vrcp.f32 %v1727_v13  ;;  %10823 = vmatprep.mubr.msk.bf16.mxu1 %vm12971_vm1, %v17814_v9 }
 0x946   :  { %v1976_v62 = vpop.permute.xlu1 %1975 }
 0x947   :  { %v2004_v48 = vsel %vm689_vm4, %v1976_v62, 0 }
 0x948   :  { %10856 = vmatpush3.bf16.xpose.msra.mxu1 %v2004_v48 }
 0x949   :  { %10857 = vmatprep.subr.bf16.mxu1 %v17814_v9 }
 0x94a   :  { %v1960_v35 = vpop.permute.xlu1 %1959 }
 0x94d   :  { %v12317_v17 = vpop.eup %12316 }
 0x94e   :  { %v1745_v0 = vmul.f32 %v12317_v17, %v14037_v23  ;;  %v14100_v23 = vsel %vm1359_vm7, %v667_v15, 0  ;;  %v1964_v42 = vpop.permute.xlu1 %1963 }
 0x94f   :  { %10828 = vmatpush3.bf16.msra.mxu0 %v14100_v23 }
 0x950   :  { %10858 = vmatpush3.bf16.xpose.msra.mxu1 %v2007_v14  ;;  %v1750_v8 = vpack.c.bf16 %v1745_v0, %v1745_v0  ;;  %10879 = vmatprep.subr.bf16.mxu0 %v17814_v9 }
 0x951   :  { %10909 = vmatprep.subr.bf16.mxu1 %v17814_v9 }
 0x952   :  { %10824 = vmatmul.mubr.msk.bf16.gmra.mrb[112].mxu1 %vm792_vm5, %v1750_v8  ;;  %v1968_v58 = vpop.permute.xlu1 %1967 }
 0x953   :  { %10859 = vmatprep.mubr.msk.bf16.mxu1 %vm12971_vm1, %v17814_v9 }
 0x956   :  { %v2186_v18 = vpop.permute.xlu1 %2185 }
 0x95a   :  { %10860 = vmatmul.mubr.msk.bf16.vlgmr.msra.gmra.mrb[116].mxu1 %vm689_vm4, %v1960_v35 }
 0x95b   :  { %10863 = vmatprep.mubr.msk.bf16.mxu1 %vm12971_vm1, %v17814_v9 }
 0x962   :  { %10864 = vmatmul.mubr.msk.bf16.gmra.mrb[120].mxu1 %vm689_vm4, %v1962_v60 }
 0x963   :  { %10867 = vmatprep.mubr.msk.bf16.mxu1 %vm12971_vm1, %v17814_v9 }
 0x96a   :  { %10868 = vmatmul.mubr.msk.bf16.gmra.mrb[124].mxu1 %vm689_vm4, %v1964_v42 }
 0x96b   :  { %10871 = vmatprep.mubr.msk.bf16.mxu1 %vm12971_vm1, %v17814_v9 }
 0x972   :  { %10872 = vmatmul.mubr.msk.bf16.gmra.mrb[128].mxu1 %vm689_vm4, %v1966_v29 }
 0x973   :  { %10875 = vmatprep.mubr.msk.bf16.mxu1 %vm12971_vm1, %v17814_v9 }
 0x97a   :  { %10876 = vmatmul.mubr.msk.bf16.gmra.mrb[132].mxu1 %vm689_vm4, %v1968_v58 }
 0x97b   :  { %10911 = vmatprep.mubr.msk.bf16.mxu1 %vm12971_vm1, %v17814_v9 }
 0x9da   :  { %v1817_v5 = vpop.f32.mrb[96].mxu1 }
 0x9db   :  { %v10809_v19 = vpop.f32.mrb[97].mxu1 }
 0x9dc   :  { %v1820_v53 = vpop.f32.mrb[98].mxu1 }
 0x9dd   :  { %v1855_v55 = vpack.c.bf16 %v1820_v53, %v1817_v5  ;;  %v10810_v36 = vpop.f32.mrb[99].mxu1 }
 0x9df   :  { %10830 = vmatmul.mubr.msk.bf16.vlgmr.msra.gmra.mrb[116].mxu0 %vm689_vm4, %v1855_v55 }
 0x9e0   :  { %10880 = vmatpush3.bf16.msra.mxu0 %v2186_v18  ;;  %10833 = vmatprep.mubr.msk.bf16.mxu0 %vm12971_vm1, %v17814_v9 }
 0x9e1   :  { %10881 = vmatprep.subr.bf16.mxu0 %v17814_v9 }
 0x9e4   :  { %v1825_v38 = vpop.f32.mrb[100].mxu1 }
 0x9e5   :  { %v10813_v28 = vpop.f32.mrb[101].mxu1 }
 0x9e6   :  { %v1828_v13 = vpop.f32.mrb[102].mxu1 }
 0x9e7   :  { %v1856_v62 = vpack.c.bf16 %v1828_v13, %v1825_v38  ;;  %v10814_v48 = vpop.f32.mrb[103].mxu1 }
 0x9e9   :  { %10834 = vmatmul.mubr.msk.bf16.gmra.mrb[120].mxu0 %vm689_vm4, %v1856_v62 }
 0x9ea   :  { %10837 = vmatprep.mubr.msk.bf16.mxu0 %vm12971_vm1, %v17814_v9 }
 0xa0d   :  { %v1833_v49 = vpop.f32.mrb[104].mxu1 }
 0xa0e   :  { %v10817_v17 = vpop.f32.mrb[105].mxu1 }
 0xa0f   :  { %v1836_v0 = vpop.f32.mrb[106].mxu1 }
 0xa10   :  { %v1857_v14 = vpack.c.bf16 %v1836_v0, %v1833_v49  ;;  %v10818_v8 = vpop.f32.mrb[107].mxu1 }
 0xa12   :  { %10838 = vmatmul.mubr.msk.bf16.gmra.mrb[124].mxu0 %vm689_vm4, %v1857_v14 }
 0xa13   :  { %10841 = vmatprep.mubr.msk.bf16.mxu0 %vm12971_vm1, %v17814_v9 }
 0xa15   :  { %v1841_v56 = vpop.f32.mrb[108].mxu1 }
 0xa16   :  { %v10821_v35 = vpop.f32.mrb[109].mxu1 }
 0xa17   :  { %v1844_v15 = vpop.f32.mrb[110].mxu1 }
 0xa18   :  { %v1858_v60 = vpack.c.bf16 %v1844_v15, %v1841_v56  ;;  %v10822_v42 = vpop.f32.mrb[111].mxu1 }
 0xa1a   :  { %10842 = vmatmul.mubr.msk.bf16.gmra.mrb[128].mxu0 %vm689_vm4, %v1858_v60 }
 0xa1b   :  { %10845 = vmatprep.mubr.msk.bf16.mxu0 %vm12971_vm1, %v17814_v9 }
 0xa25   :  { %v1849_v29 = vpop.f32.mrb[112].mxu1 }
 0xa26   :  { %v1859_v58 = vpack.c.bf16 %v1849_v29, %v1849_v29  ;;  %v10825_v5 = vpop.f32.mrb[113].mxu1 }
 0xa27   :  { %v1852_v19 = vpop.f32.mrb[114].mxu1 }
 0xa28   :  { %v10826_v53 = vpop.f32.mrb[115].mxu1  ;;  %10846 = vmatmul.mubr.msk.bf16.gmra.mrb[132].mxu0 %vm689_vm4, %v1859_v58 }
 0xa29   :  { %10889 = vmatprep.mubr.msk.bf16.mxu0 %vm12971_vm1, %v17814_v9 }
 0xa2d   :  { %v2043_v55 = vpop.f32.mrb[116].mxu1 }
 0xa2e   :  { %v10861_v36 = vpop.f32.mrb[117].mxu1  ;;  %v2081_v18 = vsel %vm792_vm5, %v2043_v55, -inf }
 0xa2f   :  { %2082 = vmax.xlane.f32.xlu0 %v2081_v18  ;;  %v2046_v38 = vpop.f32.mrb[118].mxu1 }
 0xa30   :  { %v10862_v28 = vpop.f32.mrb[119].mxu1  ;;  %v2084_v13 = vsel %vm792_vm5, %v2046_v38, -inf }
 0xa31   :  { %2085 = vmax.xlane.f32.xlu1 %v2084_v13 }
 0xa35   :  { %v2051_v62 = vpop.f32.mrb[120].mxu1 }
 0xa36   :  { %v10865_v48 = vpop.f32.mrb[121].mxu1  ;;  %v2087_v49 = vsel %vm792_vm5, %v2051_v62, -inf }
 0xa37   :  { %2088 = vmax.xlane.f32.xlu0 %v2087_v49  ;;  %v2054_v17 = vpop.f32.mrb[122].mxu1 }
 0xa38   :  { %v10866_v0 = vpop.f32.mrb[123].mxu1  ;;  %v2090_v14 = vsel %vm792_vm5, %v2054_v17, -inf }
 0xa3b   :  { %2091 = vmax.xlane.f32.xlu0 %v2090_v14 }
 0xa3d   :  { %v14136_v8 = vpop.f32.mrb[124].mxu1 }
 0xa3e   :  { %v10869_v56 = vpop.f32.mrb[125].mxu1  ;;  %v2093_v28 = vsel %vm792_vm5, %v14136_v8, -inf }
 0xa3f   :  { %v14138_v35 = vpop.f32.mrb[126].mxu1 }
 0xa40   :  { %v10870_v15 = vpop.f32.mrb[127].mxu1  ;;  %v2096_v18 = vsel %vm792_vm5, %v14138_v35, -inf }
 0xa42   :  { %2189 = vrot.lane.b32.xlu1 %v13334_v32, %s12983_s16 }
 0xa45   :  { %v14142_v60 = vpop.f32.mrb[128].mxu1 }
 0xa46   :  { %v10873_v42 = vpop.f32.mrb[129].mxu1  ;;  %v2099_v13 = vsel %vm792_vm5, %v14142_v60, -inf }
 0xa47   :  { %v14144_v29 = vpop.f32.mrb[130].mxu1 }
 0xa48   :  { %v10874_v58 = vpop.f32.mrb[131].mxu1  ;;  %v2102_v32 = vsel %vm792_vm5, %v14144_v29, -inf }
 0xa4d   :  { %v14146_v5 = vpop.f32.mrb[132].mxu1 }
 0xa4e   :  { %v10877_v19 = vpop.f32.mrb[133].mxu1  ;;  %v2105_v48 = vsel %vm792_vm5, %v14146_v5, -inf }
 0xa4f   :  { %v2078_v53 = vpop.f32.mrb[134].mxu1 }
 0xa50   :  { %v10878_v36 = vpop.f32.mrb[135].mxu1 }
 0xa51   :  { %2187 = vrot.lane.b32.xlu0 %v13330_v25, %s12983_s16 }
 0xa66   :  { %2097 = vmax.xlane.f32.xlu1 %v2096_v18 }
 0xa6a   :  { %2103 = vmax.xlane.f32.xlu1 %v2102_v32 }
 0xa70   :  { %2094 = vmax.xlane.f32.xlu0 %v2093_v28 }
 0xa74   :  { %2100 = vmax.xlane.f32.xlu0 %v2099_v13 }
 0xa78   :  { %2106 = vmax.xlane.f32.xlu0 %v2105_v48 }
 0xa7b   :  { %2191 = vrot.lane.b32.xlu1 %v13338_v37, %s12983_s16 }
 0xa8e   :  { %2193 = vrot.lane.b32.xlu0 %v13342_v40, %s12983_s16 }
 0xab2   :  { %v1912_v25 = vpop.f32.mrb[116].mxu0 }
 0xab3   :  { %v14165_v49 = vadd.f32 %v1912_v25, %v13955_v43  ;;  %v10831_v0 = vpop.f32.mrb[117].mxu0 }
 0xab4   :  { %v1915_v14 = vpop.f32.mrb[118].mxu0 }
 0xab5   :  { %v14168_v56 = vadd.f32 %v1915_v14, %v13957_v45  ;;  %v10832_v15 = vpop.f32.mrb[119].mxu0 }
 0xabc   :  { %v2083_v42 = vpop.xlane.xlu0 %2082  ;;  %v1920_v58 = vpop.f32.mrb[120].mxu0 }
 0xabd   :  { %v2108_v19 = vsub.f32 %v2043_v55, %v2083_v42  ;;  %v14171_v53 = vadd.f32 %v1920_v58, %v13959_v27  ;;  %v10835_v37 = vpop.f32.mrb[121].mxu0 }
 0xabe   :  { %v2086_v36 = vpop.xlane.xlu1 %2085  ;;  %v1923_v18 = vpop.f32.mrb[122].mxu0 }
 0xabf   :  { %v2117_v40 = vmul.f32 1.442695, %v2108_v19  ;;  %v2109_v32 = vsub.f32 %v2046_v38, %v2086_v36  ;;  %v14174_v43 = vadd.f32 %v1923_v18, %v13961_v20  ;;  %v10836_v28 = vpop.f32.mrb[123].mxu0 }
 0xac1   :  { %12318 = vpow2.f32 %v2117_v40  ;;  %v2119_v13 = vmul.f32 1.442695, %v2109_v32 }
 0xac3   :  { %12320 = vpow2.f32 %v2119_v13 }
 0xac4   :  { %v2089_v45 = vpop.xlane.xlu0 %2088 }
 0xac5   :  { %v2110_v48 = vsub.f32 %v2051_v62, %v2089_v45  ;;  %v2190_v62 = vpop.permute.xlu1 %2189 }
 0xac7   :  { %v2121_v25 = vmul.f32 1.442695, %v2110_v48 }
 0xac8   :  { %v2092_v0 = vpop.xlane.xlu0 %2091 }
 0xac9   :  { %12322 = vpow2.f32 %v2121_v25  ;;  %v2111_v55 = vsub.f32 %v2054_v17, %v2092_v0 }
 0xacb   :  { %v14176_v27 = vpop.eup %12318  ;;  %v2123_v14 = vmul.f32 1.442695, %v2111_v55 }
 0xacc   :  { %v2188_v15 = vpop.permute.xlu0 %2187  ;;  %v2135_v38 = vsel %vm792_vm5, %v14176_v27, 0.0 }
 0xacd   :  { %v14180_v42 = vpop.eup %12320  ;;  %12324 = vpow2.f32 %v2123_v14  ;;  %2136 = vadd.xlane.f32.xlu1 %v2135_v38  ;;  %10882 = vmatpush3.bf16.msra.mxu0 %v2188_v15 }
 0xace   :  { %v2138_v20 = vsel %vm792_vm5, %v14180_v42, 0.0  ;;  %10883 = vmatprep.subr.bf16.mxu0 %v17814_v9 }
 0xacf   :  { %2139 = vadd.xlane.f32.xlu0 %v2138_v20 }
 0xad1   :  { %10884 = vmatpush3.bf16.msra.mxu0 %v2190_v62 }
 0xad2   :  { %10885 = vmatprep.subr.bf16.mxu0 %v17814_v9 }
 0xad3   :  { %v14186_v17 = vpop.eup %12322 }
 0xad4   :  { %v2141_v58 = vsel %vm792_vm5, %v14186_v17, 0.0 }
 0xad5   :  { %2142 = vadd.xlane.f32.xlu0 %v2141_v58 }
 0xad7   :  { %v14190_v19 = vpop.eup %12324 }
 0xad8   :  { %v2144_v37 = vsel %vm792_vm5, %v14190_v19, 0.0 }
 0xad9   :  { %2145 = vadd.xlane.f32.xlu0 %v2144_v37 }
 0xade   :  { %2403 = vrot.lane.b32.xlu1 %v13748_v30, %s12972_s29 }
 0xae5   :  { %v1928_v36 = vpop.f32.mrb[124].mxu0 }
 0xae6   :  { %v14197_v18 = vadd.f32 %v1928_v36, %v13963_v26  ;;  %v10839_v40 = vpop.f32.mrb[125].mxu0 }
 0xae7   :  { %v1931_v32 = vpop.f32.mrb[126].mxu0 }
 0xae8   :  { %v14200_v28 = vadd.f32 %v1931_v32, %v13965_v47  ;;  %v10840_v13 = vpop.f32.mrb[127].mxu0 }
 0xaed   :  { %v1936_v45 = vpop.f32.mrb[128].mxu0 }
 0xaee   :  { %v14203_v48 = vadd.f32 %v1936_v45, %v13967_v39  ;;  %v10843_v25 = vpop.f32.mrb[129].mxu0 }
 0xaef   :  { %v1939_v0 = vpop.f32.mrb[130].mxu0 }
 0xaf0   :  { %v14206_v55 = vadd.f32 %v1939_v0, %v13969_v2  ;;  %v10844_v14 = vpop.f32.mrb[131].mxu0 }
 0xaf3   :  { %v2098_v15 = vpop.xlane.xlu1 %2097 }
 0xaf4   :  { %v2113_v26 = vsub.f32 %v14138_v35, %v2098_v15 }
 0xaf6   :  { %v2127_v38 = vmul.f32 1.442695, %v2113_v26 }
 0xaf7   :  { %v2104_v20 = vpop.xlane.xlu1 %2103 }
 0xaf8   :  { %12326 = vpow2.f32 %v2127_v38  ;;  %v2115_v47 = vsub.f32 %v14144_v29, %v2104_v20 }
 0xafa   :  { %v2131_v62 = vmul.f32 1.442695, %v2115_v47 }
 0xafb   :  { %v2192_v58 = vpop.permute.xlu1 %2191  ;;  %v1944_v37 = vpop.f32.mrb[132].mxu0 }
 0xafc   :  { %12328 = vpow2.f32 %v2131_v62  ;;  %v14211_v39 = vadd.f32 %v1944_v37, %v13971_v33  ;;  %v10847_v36 = vpop.f32.mrb[133].mxu0  ;;  %10886 = vmatpush3.bf16.msra.mxu0 %v2192_v58 }
 0xafd   :  { %v2095_v2 = vpop.xlane.xlu0 %2094  ;;  %v1947_v40 = vpop.f32.mrb[134].mxu0  ;;  %10887 = vmatprep.subr.bf16.mxu0 %v17814_v9 }
 0xafe   :  { %v2112_v35 = vsub.f32 %v14136_v8, %v2095_v2  ;;  %v10848_v32 = vpop.f32.mrb[135].mxu0  ;;  %v14245_v2 = vpack.c.bf16 %v13762_v16, %v13762_v16 }
 0xb00   :  { %v2125_v13 = vmul.f32 1.442695, %v2112_v35 }
 0xb01   :  { %v2101_v45 = vpop.xlane.xlu0 %2100 }
 0xb02   :  { %v14215_v25 = vpop.eup %12326  ;;  %12330 = vpow2.f32 %v2125_v13  ;;  %v2114_v29 = vsub.f32 %v14142_v60, %v2101_v45 }
 0xb03   :  { %v2150_v33 = vsel %vm792_vm5, %v14215_v25, 0.0 }
 0xb04   :  { %v2129_v0 = vmul.f32 1.442695, %v2114_v29  ;;  %2151 = vadd.xlane.f32.xlu0 %v2150_v33 }
 0xb05   :  { %v2107_v14 = vpop.xlane.xlu0 %2106 }
 0xb06   :  { %v14220_v15 = vpop.eup %12328  ;;  %12332 = vpow2.f32 %v2129_v0  ;;  %v2116_v26 = vsub.f32 %v14146_v5, %v2107_v14 }
 0xb07   :  { %v2156_v8 = vsel %vm792_vm5, %v14220_v15, 0.0 }
 0xb08   :  { %v2133_v38 = vmul.f32 1.442695, %v2116_v26  ;;  %2157 = vadd.xlane.f32.xlu0 %v2156_v8 }
 0xb09   :  { %v2194_v20 = vpop.permute.xlu0 %2193 }
 0xb0a   :  { %12334 = vpow2.f32 %v2133_v38  ;;  %v2215_v60 = vand.u32 %v2194_v20, %v13600_v3 }
 0xb0c   :  { %v14226_v47 = vpop.eup %12330  ;;  %10888 = vmatpush3.bf16.msra.mxu0 %v2215_v60 }
 0xb0d   :  { %v2147_v62 = vsel %vm792_vm5, %v14226_v47, 0.0  ;;  %10931 = vmatprep.subr.bf16.mxu0 %v17814_v9 }
 0xb0e   :  { %2148 = vadd.xlane.f32.xlu1 %v2147_v62 }
 0xb10   :  { %v14231_v58 = vpop.eup %12332 }
 0xb11   :  { %v2153_v5 = vsel %vm792_vm5, %v14231_v58, 0.0 }
 0xb12   :  { %2154 = vadd.xlane.f32.xlu1 %v2153_v5 }
 0xb14   :  { %v14235_v37 = vpop.eup %12334 }
 0xb15   :  { %v2159_v36 = vsel %vm792_vm5, %v14235_v37, 0.0 }
 0xb16   :  { %2160 = vadd.xlane.f32.xlu0 %v2159_v36 }
 0xb23   :  { %2407 = vrot.lane.b32.xlu1 %v13757_v10, %s12972_s29 }
 0xb27   :  { %2409 = vrot.lane.b32.xlu1 %v13760_v7, %s12972_s29 }
 0xb2b   :  { %2411 = vrot.lane.b32.xlu1 %v14245_v2, %s12972_s29 }
 0xb2c   :  { %2405 = vrot.lane.b32.xlu0 %v13753_v22, %s12972_s29 }
 0xb2f   :  { %2738 = vrot.lane.b32.xlu1 %v13748_v30, %s12973_s30 }
 0xb30   :  { %2742 = vrot.lane.b32.xlu0 %v13757_v10, %s12973_s30 }
 0xb33   :  { %2740 = vrot.lane.b32.xlu1 %v13753_v22, %s12973_s30 }
 0xb34   :  { %2746 = vrot.lane.b32.xlu0 %v14245_v2, %s12973_s30 }
 0xb37   :  { %2744 = vrot.lane.b32.xlu1 %v13760_v7, %s12973_s30 }
 0xb38   :  { %2730 = vrot.lane.b32.xlu0 %v13753_v22, %s12974_s10 }
 0xb3b   :  { %2728 = vrot.lane.b32.xlu1 %v13748_v30, %s12974_s10 }
 0xb3c   :  { %2734 = vrot.lane.b32.xlu0 %v13760_v7, %s12974_s10 }
 0xb3f   :  { %2732 = vrot.lane.b32.xlu1 %v13757_v10, %s12974_s10 }
 0xb40   :  { %2619 = vrot.lane.b32.xlu0 %v13748_v30, %s12975_s1 }
 0xb43   :  { %2736 = vrot.lane.b32.xlu1 %v14245_v2, %s12974_s10 }
 0xb44   :  { %2623 = vrot.lane.b32.xlu0 %v13757_v10, %s12975_s1 }
 0xb47   :  { %2621 = vrot.lane.b32.xlu1 %v13753_v22, %s12975_s1 }
 0xb48   :  { %2627 = vrot.lane.b32.xlu0 %v14245_v2, %s12975_s1 }
 0xb4b   :  { %2625 = vrot.lane.b32.xlu1 %v13760_v7, %s12975_s1 }
 0xb5a   :  { %v2137_v16 = vpop.xlane.xlu1 %2136 }
 0xb5b   :  { %12336 = vrcp.f32 %v2137_v16 }
 0xb5c   :  { %v2140_v40 = vpop.xlane.xlu0 %2139 }
 0xb5d   :  { %12338 = vrcp.f32 %v2140_v40 }
 0xb5e   :  { %v2404_v0 = vpop.permute.xlu1 %2403 }
 0xb5f   :  { %v2429_v26 = vsel %vm689_vm4, %v2404_v0, 0 }
 0xb62   :  { %v2143_v35 = vpop.xlane.xlu0 %2142 }
 0xb63   :  { %12340 = vrcp.f32 %v2143_v35 }
 0xb65   :  { %v12337_v32 = vpop.eup %12336 }
 0xb66   :  { %v2146_v13 = vpop.xlane.xlu0 %2145  ;;  %v2171_v29 = vmul.f32 %v12337_v32, %v14176_v27 }
 0xb67   :  { %v12339_v45 = vpop.eup %12338  ;;  %12342 = vrcp.f32 %v2146_v13 }
 0xb68   :  { %v2172_v33 = vmul.f32 %v12339_v45, %v14180_v42 }
 0xb6a   :  { %v2180_v14 = vpack.c.bf16 %v2172_v33, %v2171_v29 }
 0xb6c   :  { %10890 = vmatmul.mubr.msk.bf16.vlgmr.msra.gmra.mrb[136].mxu0 %vm792_vm5, %v2180_v14 }
 0xb6d   :  { %10932 = vmatpush3.bf16.xpose.msra.mxu0 %v2429_v26  ;;  %10893 = vmatprep.mubr.msk.bf16.mxu0 %vm12971_vm1, %v17814_v9  ;;  %v12341_v8 = vpop.eup %12340 }
 0xb6e   :  { %10933 = vmatprep.subr.bf16.mxu0 %v17814_v9  ;;  %v2173_v20 = vmul.f32 %v12341_v8, %v14186_v17 }
 0xb71   :  { %v12343_v38 = vpop.eup %12342 }
 0xb72   :  { %v2174_v27 = vmul.f32 %v12343_v38, %v14190_v19 }
 0xb74   :  { %v2181_v60 = vpack.c.bf16 %v2174_v27, %v2173_v20 }
 0xb76   :  { %10894 = vmatmul.mubr.msk.bf16.gmra.mrb[140].mxu0 %vm792_vm5, %v2181_v60  ;;  %v664_v60 = vld [vmem:[%s17789_s4 + $0x18] sm:$0xff] }
 0xb77   :  { %10897 = vmatprep.mubr.msk.bf16.mxu0 %vm12971_vm1, %v17814_v9 }
 0xb91   :  { %v2152_v42 = vpop.xlane.xlu0 %2151 }
 0xb92   :  { %12344 = vrcp.f32 %v2152_v42  ;;  %v668_v42 = vpack.c.bf16 %v664_v60, %v664_v60 }
 0xb95   :  { %v2158_v5 = vpop.xlane.xlu0 %2157 }
 0xb9b   :  { %v2149_v62 = vpop.xlane.xlu1 %2148 }
 0xb9c   :  { %12346 = vrcp.f32 %v2149_v62  ;;  %v12345_v40 = vpop.eup %12344 }
 0xb9d   :  { %v2176_v32 = vmul.f32 %v12345_v40, %v14215_v25 }
 0xb9f   :  { %v2155_v36 = vpop.xlane.xlu1 %2154 }
 0xba0   :  { %12348 = vrcp.f32 %v2155_v36 }
 0xba1   :  { %12350 = vrcp.f32 %v2158_v5 }
 0xba3   :  { %v2161_v16 = vpop.xlane.xlu0 %2160  ;;  %v2408_v0 = vpop.permute.xlu1 %2407 }
 0xba4   :  { %12352 = vrcp.f32 %v2161_v16  ;;  %v2435_v25 = vsel %vm689_vm4, %v2408_v0, 0 }
 0xba6   :  { %v12347_v35 = vpop.eup %12346 }
 0xba7   :  { %v2406_v17 = vpop.permute.xlu0 %2405  ;;  %v2175_v19 = vmul.f32 %v12347_v35, %v14226_v47  ;;  %v2410_v38 = vpop.permute.xlu1 %2409 }
 0xba8   :  { %v2432_v13 = vsel %vm689_vm4, %v2406_v17, 0  ;;  %v2438_v27 = vsel %vm689_vm4, %v2410_v38, 0 }
 0xba9   :  { %10934 = vmatpush3.bf16.xpose.msra.mxu0 %v2432_v13  ;;  %v2182_v45 = vpack.c.bf16 %v2176_v32, %v2175_v19 }
 0xbaa   :  { %v12349_v29 = vpop.eup %12348  ;;  %10935 = vmatprep.subr.bf16.mxu0 %v17814_v9 }
 0xbab   :  { %10898 = vmatmul.mubr.msk.bf16.gmra.mrb[144].mxu0 %vm792_vm5, %v2182_v45  ;;  %v12351_v33 = vpop.eup %12350  ;;  %v2177_v14 = vmul.f32 %v12349_v29, %v14231_v58  ;;  %v2743_v35 = vpop.permute.xlu0 %2742 }
 0xbac   :  { %10901 = vmatprep.mubr.msk.bf16.mxu0 %vm12971_vm1, %v17814_v9  ;;  %v2178_v47 = vmul.f32 %v12351_v33, %v14220_v15  ;;  %v2412_v15 = vpop.permute.xlu1 %2411  ;;  %v2770_v17 = vsel %vm689_vm4, %v2743_v35, 0 }
 0xbad   :  { %v2441_v62 = vsel %vm689_vm4, %v2412_v15, 0 }
 0xbae   :  { %v2183_v26 = vpack.c.bf16 %v2178_v47, %v2177_v14  ;;  %v12353_v8 = vpop.eup %12352 }
 0xbaf   :  { %v2179_v20 = vmul.f32 %v12353_v8, %v14235_v37  ;;  %v14318_v37 = vsel %vm1359_vm7, %v668_v42, 0  ;;  %v2747_v13 = vpop.permute.xlu0 %2746 }
 0xbb0   :  { %10910 = vmatpush3.bf16.msra.mxu1 %v14318_v37  ;;  %v2739_v5 = vpop.permute.xlu1 %2738  ;;  %v2776_v45 = vsel %vm689_vm4, %v2747_v13, 0 }
 0xbb1   :  { %10936 = vmatpush3.bf16.xpose.msra.mxu0 %v2435_v25  ;;  %v2184_v58 = vpack.c.bf16 %v2179_v20, %v2179_v20  ;;  %10961 = vmatprep.subr.bf16.mxu1 %v17814_v9  ;;  %v2764_v36 = vsel %vm689_vm4, %v2739_v5, 0 }
 0xbb2   :  { %10937 = vmatprep.subr.bf16.mxu0 %v17814_v9 }
 0xbb3   :  { %10902 = vmatmul.mubr.msk.bf16.gmra.mrb[148].mxu0 %vm792_vm5, %v2183_v26  ;;  %v2731_v33 = vpop.permute.xlu0 %2730 }
 0xbb4   :  { %10905 = vmatprep.mubr.msk.bf16.mxu0 %vm12971_vm1, %v17814_v9  ;;  %v2741_v16 = vpop.permute.xlu1 %2740 }
 0xbb5   :  { %v2767_v40 = vsel %vm689_vm4, %v2741_v16, 0 }
 0xbb7   :  { %v2735_v14 = vpop.permute.xlu0 %2734 }
 0xbb8   :  { %v2745_v19 = vpop.permute.xlu1 %2744 }
 0xbb9   :  { %10938 = vmatpush3.bf16.xpose.msra.mxu0 %v2438_v27  ;;  %v2773_v32 = vsel %vm689_vm4, %v2745_v19, 0 }
 0xbba   :  { %10939 = vmatprep.subr.bf16.mxu0 %v17814_v9 }
 0xbbb   :  { %10906 = vmatmul.mubr.msk.bf16.gmra.mrb[152].mxu0 %vm792_vm5, %v2184_v58  ;;  %v2620_v20 = vpop.permute.xlu0 %2619 }
 0xbbc   :  { %10941 = vmatprep.mubr.msk.bf16.mxu0 %vm12971_vm1, %v17814_v9  ;;  %v2729_v29 = vpop.permute.xlu1 %2728 }
 0xbbf   :  { %v2624_v15 = vpop.permute.xlu0 %2623 }
 0xbc0   :  { %v2733_v0 = vpop.permute.xlu1 %2732 }
 0xbc1   :  { %10940 = vmatpush3.bf16.xpose.msra.mxu0 %v2441_v62 }
 0xbc2   :  { %10991 = vmatprep.subr.bf16.mxu0 %v17814_v9 }
 0xbc8   :  { %10942 = vmatmul.mubr.msk.bf16.vlgmr.msra.gmra.mrb[156].mxu0 %vm689_vm4, %v13748_v30 }
 0xbc9   :  { %10992 = vmatpush3.bf16.xpose.msra.mxu0 %v2764_v36  ;;  %10945 = vmatprep.mubr.msk.bf16.mxu0 %vm12971_vm1, %v17814_v9  ;;  %v2628_v36 = vpop.permute.xlu0 %2627 }
 0xbca   :  { %10993 = vmatprep.subr.bf16.mxu0 %v17814_v9 }
 0xbd0   :  { %10946 = vmatmul.mubr.msk.bf16.gmra.mrb[160].mxu0 %vm689_vm4, %v13753_v22 }
 0xbd1   :  { %10994 = vmatpush3.bf16.xpose.msra.mxu0 %v2767_v40  ;;  %10949 = vmatprep.mubr.msk.bf16.mxu0 %vm12971_vm1, %v17814_v9  ;;  %v2649_v40 = vand.u32 %v2628_v36, %v13600_v3 }
 0xbd2   :  { %10995 = vmatprep.subr.bf16.mxu0 %v17814_v9 }
 0xbd8   :  { %10950 = vmatmul.mubr.msk.bf16.gmra.mrb[164].mxu0 %vm689_vm4, %v13757_v10 }
 0xbd9   :  { %10996 = vmatpush3.bf16.xpose.msra.mxu0 %v2770_v17  ;;  %10953 = vmatprep.mubr.msk.bf16.mxu0 %vm12971_vm1, %v17814_v9 }
 0xbda   :  { %10997 = vmatprep.subr.bf16.mxu0 %v17814_v9 }
 0xbe0   :  { %10954 = vmatmul.mubr.msk.bf16.gmra.mrb[168].mxu0 %vm689_vm4, %v13760_v7 }
 0xbe1   :  { %10998 = vmatpush3.bf16.xpose.msra.mxu0 %v2773_v32  ;;  %10957 = vmatprep.mubr.msk.bf16.mxu0 %vm12971_vm1, %v17814_v9 }
 0xbe2   :  { %10999 = vmatprep.subr.bf16.mxu0 %v17814_v9 }
 0xbe8   :  { %10958 = vmatmul.mubr.msk.bf16.gmra.mrb[172].mxu0 %vm689_vm4, %v14245_v2 }
 0xbe9   :  { %11000 = vmatpush3.bf16.xpose.msra.mxu0 %v2776_v45  ;;  %11001 = vmatprep.mubr.msk.bf16.mxu0 %vm12971_vm1, %v17814_v9 }
 0xbea   :  { %11051 = vmatprep.subr.bf16.mxu0 %v17814_v9 }
 0xbf0   :  { %11002 = vmatmul.mubr.msk.bf16.vlgmr.msra.gmra.mrb[176].mxu0 %vm689_vm4, %v2729_v29 }
 0xbf1   :  { %11005 = vmatprep.mubr.msk.bf16.mxu0 %vm12971_vm1, %v17814_v9  ;;  %11052 = vmatpush3.bf16.msra.mxu0 %v13866_v46  ;;  %v2737_v46 = vpop.permute.xlu1 %2736 }
 0xbf2   :  { %11095 = vmatprep.subr.bf16.mxu0 %v17814_v9 }
 0xbf5   :  { %v2622_v27 = vpop.permute.xlu1 %2621 }
 0xbf8   :  { %11006 = vmatmul.mubr.msk.bf16.gmra.mrb[180].mxu0 %vm689_vm4, %v2731_v33 }
 0xbf9   :  { %11009 = vmatprep.mubr.msk.bf16.mxu0 %vm12971_vm1, %v17814_v9  ;;  %v2626_v16 = vpop.permute.xlu1 %2625 }
 0xc00   :  { %11010 = vmatmul.mubr.msk.bf16.gmra.mrb[184].mxu0 %vm689_vm4, %v2733_v0 }
 0xc01   :  { %11013 = vmatprep.mubr.msk.bf16.mxu0 %vm12971_vm1, %v17814_v9 }
 0xc08   :  { %11014 = vmatmul.mubr.msk.bf16.gmra.mrb[188].mxu0 %vm689_vm4, %v2735_v14 }
 0xc09   :  { %11017 = vmatprep.mubr.msk.bf16.mxu0 %vm12971_vm1, %v17814_v9 }
 0xc10   :  { %11018 = vmatmul.mubr.msk.bf16.gmra.mrb[192].mxu0 %vm689_vm4, %v2737_v46 }
 0xc11   :  { %11053 = vmatprep.mubr.msk.bf16.mxu0 %vm12971_vm1, %v17814_v9 }
 0xc3f   :  { %v2251_v47 = vpop.f32.mrb[136].mxu0 }
 0xc40   :  { %v10891_v25 = vpop.f32.mrb[137].mxu0 }
 0xc41   :  { %v2254_v26 = vpop.f32.mrb[138].mxu0 }
 0xc42   :  { %v2289_v8 = vpack.c.bf16 %v2254_v26, %v2251_v47  ;;  %v10892_v38 = vpop.f32.mrb[139].mxu0 }
 0xc44   :  { %10912 = vmatmul.mubr.msk.bf16.vlgmr.msra.gmra.mrb[136].mxu1 %vm689_vm4, %v2289_v8 }
 0xc45   :  { %10962 = vmatpush3.bf16.msra.mxu1 %v2620_v20  ;;  %10915 = vmatprep.mubr.msk.bf16.mxu1 %vm12971_vm1, %v17814_v9 }
 0xc46   :  { %10963 = vmatprep.subr.bf16.mxu1 %v17814_v9 }
 0xc49   :  { %10964 = vmatpush3.bf16.msra.mxu1 %v2622_v27  ;;  %v2259_v58 = vpop.f32.mrb[140].mxu0 }
 0xc4a   :  { %v10895_v60 = vpop.f32.mrb[141].mxu0  ;;  %10965 = vmatprep.subr.bf16.mxu1 %v17814_v9 }
 0xc4b   :  { %v2262_v42 = vpop.f32.mrb[142].mxu0 }
 0xc4c   :  { %v2290_v62 = vpack.c.bf16 %v2262_v42, %v2259_v58  ;;  %v10896_v5 = vpop.f32.mrb[143].mxu0 }
 0xc4d   :  { %10966 = vmatpush3.bf16.msra.mxu1 %v2624_v15 }
 0xc4e   :  { %10916 = vmatmul.mubr.msk.bf16.gmra.mrb[140].mxu1 %vm689_vm4, %v2290_v62  ;;  %10967 = vmatprep.subr.bf16.mxu1 %v17814_v9 }
 0xc4f   :  { %10919 = vmatprep.mubr.msk.bf16.mxu1 %vm12971_vm1, %v17814_v9 }
 0xc51   :  { %10968 = vmatpush3.bf16.msra.mxu1 %v2626_v16 }
 0xc52   :  { %10969 = vmatprep.subr.bf16.mxu1 %v17814_v9 }
 0xc55   :  { %10970 = vmatpush3.bf16.msra.mxu1 %v2649_v40 }
 0xc56   :  { %11021 = vmatprep.subr.bf16.mxu1 %v17814_v9 }
 0xc7e   :  { %v2267_v35 = vpop.f32.mrb[144].mxu0 }
 0xc7f   :  { %v10899_v17 = vpop.f32.mrb[145].mxu0 }
 0xc80   :  { %v2270_v19 = vpop.f32.mrb[146].mxu0 }
 0xc81   :  { %v2291_v32 = vpack.c.bf16 %v2270_v19, %v2267_v35  ;;  %v10900_v13 = vpop.f32.mrb[147].mxu0 }
 0xc83   :  { %10920 = vmatmul.mubr.msk.bf16.gmra.mrb[144].mxu1 %vm689_vm4, %v2291_v32 }
 0xc84   :  { %10923 = vmatprep.mubr.msk.bf16.mxu1 %vm12971_vm1, %v17814_v9 }
 0xc86   :  { %v2275_v45 = vpop.f32.mrb[148].mxu0 }
 0xc87   :  { %v10903_v29 = vpop.f32.mrb[149].mxu0 }
 0xc88   :  { %v2278_v33 = vpop.f32.mrb[150].mxu0 }
 0xc89   :  { %v2292_v0 = vpack.c.bf16 %v2278_v33, %v2275_v45  ;;  %v10904_v14 = vpop.f32.mrb[151].mxu0 }
 0xc8b   :  { %10924 = vmatmul.mubr.msk.bf16.gmra.mrb[148].mxu1 %vm689_vm4, %v2292_v0 }
 0xc8c   :  { %10927 = vmatprep.mubr.msk.bf16.mxu1 %vm12971_vm1, %v17814_v9 }
 0xc8e   :  { %v2283_v46 = vpop.f32.mrb[152].mxu0 }
 0xc8f   :  { %v10907_v47 = vpop.f32.mrb[153].mxu0  ;;  %v2293_v26 = vpack.c.bf16 %v2283_v46, %v2283_v46 }
 0xc90   :  { %v2286_v25 = vpop.f32.mrb[154].mxu0 }
 0xc91   :  { %v10908_v8 = vpop.f32.mrb[155].mxu0 }
 0xc93   :  { %10928 = vmatmul.mubr.msk.bf16.gmra.mrb[152].mxu1 %vm689_vm4, %v2293_v26 }
 0xc94   :  { %10971 = vmatprep.mubr.msk.bf16.mxu1 %vm12971_vm1, %v17814_v9 }
 0xc9b   :  { %v14391_v38 = vpop.f32.mrb[156].mxu0 }
 0xc9c   :  { %v10943_v20 = vpop.f32.mrb[157].mxu0  ;;  %v2515_v27 = vsel %vm792_vm5, %v14391_v38, -inf }
 0xc9d   :  { %2516 = vmax.xlane.f32.xlu0 %v2515_v27  ;;  %v14395_v58 = vpop.f32.mrb[158].mxu0 }
 0xc9e   :  { %v10944_v15 = vpop.f32.mrb[159].mxu0  ;;  %v2518_v60 = vsel %vm792_vm5, %v14395_v58, -inf }
 0xc9f   :  { %2519 = vmax.xlane.f32.xlu1 %v2518_v60 }
 0xca3   :  { %v14399_v42 = vpop.f32.mrb[160].mxu0 }
 0xca4   :  { %v10947_v62 = vpop.f32.mrb[161].mxu0  ;;  %v2521_v5 = vsel %vm792_vm5, %v14399_v42, -inf }
 0xca5   :  { %2522 = vmax.xlane.f32.xlu0 %v2521_v5  ;;  %v14403_v36 = vpop.f32.mrb[162].mxu0 }
 0xca6   :  { %v10948_v16 = vpop.f32.mrb[163].mxu0  ;;  %v2524_v40 = vsel %vm792_vm5, %v14403_v36, -inf }
 0xca9   :  { %2525 = vmax.xlane.f32.xlu0 %v2524_v40 }
 0xcab   :  { %v14407_v35 = vpop.f32.mrb[164].mxu0 }
 0xcac   :  { %v10951_v17 = vpop.f32.mrb[165].mxu0  ;;  %v2527_v19 = vsel %vm792_vm5, %v14407_v35, -inf }
 0xcad   :  { %2528 = vmax.xlane.f32.xlu0 %v2527_v19  ;;  %v14411_v32 = vpop.f32.mrb[166].mxu0 }
 0xcae   :  { %v10952_v13 = vpop.f32.mrb[167].mxu0  ;;  %v2530_v45 = vsel %vm792_vm5, %v14411_v32, -inf }
 0xcaf   :  { %2531 = vmax.xlane.f32.xlu1 %v2530_v45 }
 0xcb3   :  { %v14415_v29 = vpop.f32.mrb[168].mxu0 }
 0xcb4   :  { %v10955_v33 = vpop.f32.mrb[169].mxu0  ;;  %v2533_v0 = vsel %vm792_vm5, %v14415_v29, -inf }
 0xcb5   :  { %2534 = vmax.xlane.f32.xlu0 %v2533_v0  ;;  %v14419_v14 = vpop.f32.mrb[170].mxu0 }
 0xcb6   :  { %v10956_v46 = vpop.f32.mrb[171].mxu0  ;;  %v2536_v47 = vsel %vm792_vm5, %v14419_v14, -inf }
 0xcb7   :  { %2537 = vmax.xlane.f32.xlu1 %v2536_v47 }
 0xcbb   :  { %v14423_v25 = vpop.f32.mrb[172].mxu0 }
 0xcbc   :  { %v10959_v26 = vpop.f32.mrb[173].mxu0  ;;  %v2539_v8 = vsel %vm792_vm5, %v14423_v25, -inf }
 0xcbd   :  { %2540 = vmax.xlane.f32.xlu0 %v2539_v8  ;;  %v2512_v20 = vpop.f32.mrb[174].mxu0 }
 0xcbe   :  { %v10960_v27 = vpop.f32.mrb[175].mxu0 }
 0xcc3   :  { %v14427_v15 = vpop.f32.mrb[176].mxu0 }
 0xcc4   :  { %v11003_v60 = vpop.f32.mrb[177].mxu0  ;;  %v2850_v62 = vsel %vm792_vm5, %v14427_v15, -inf }
 0xcc5   :  { %2851 = vmax.xlane.f32.xlu1 %v2850_v62  ;;  %v14431_v5 = vpop.f32.mrb[178].mxu0 }
 0xcc6   :  { %v11004_v16 = vpop.f32.mrb[179].mxu0 }
 0xccb   :  { %v14433_v40 = vpop.f32.mrb[180].mxu0 }
 0xccc   :  { %v11007_v17 = vpop.f32.mrb[181].mxu0 }
 0xccd   :  { %v14435_v19 = vpop.f32.mrb[182].mxu0  ;;  %v2853_v17 = vsel %vm792_vm5, %v14431_v5, -inf }
 0xcce   :  { %v11008_v13 = vpop.f32.mrb[183].mxu0 }
 0xccf   :  { %v2859_v13 = vsel %vm792_vm5, %v14435_v19, -inf }
 0xcd3   :  { %2956 = vrot.lane.b32.xlu0 %v13753_v22, %s12976_s0  ;;  %v14439_v45 = vpop.f32.mrb[184].mxu0 }
 0xcd4   :  { %v11011_v33 = vpop.f32.mrb[185].mxu0 }
 0xcd5   :  { %v14441_v0 = vpop.f32.mrb[186].mxu0  ;;  %v2856_v33 = vsel %vm792_vm5, %v14433_v40, -inf }
 0xcd6   :  { %2954 = vrot.lane.b32.xlu1 %v13748_v30, %s12976_s0  ;;  %v11012_v46 = vpop.f32.mrb[187].mxu0 }
 0xcd7   :  { %v2865_v46 = vsel %vm792_vm5, %v14441_v0, -inf }
 0xcdb   :  { %v14445_v47 = vpop.f32.mrb[188].mxu0 }
 0xcdc   :  { %v11015_v26 = vpop.f32.mrb[189].mxu0 }
 0xcdd   :  { %v14447_v8 = vpop.f32.mrb[190].mxu0  ;;  %v2862_v26 = vsel %vm792_vm5, %v14439_v45, -inf }
 0xcde   :  { %v11016_v20 = vpop.f32.mrb[191].mxu0 }
 0xcdf   :  { %v2871_v20 = vsel %vm792_vm5, %v14447_v8, -inf }
 0xce3   :  { %v14449_v27 = vpop.f32.mrb[192].mxu0 }
 0xce4   :  { %v11019_v60 = vpop.f32.mrb[193].mxu0 }
 0xce5   :  { %v2847_v62 = vpop.f32.mrb[194].mxu0  ;;  %v2868_v60 = vsel %vm792_vm5, %v14445_v47, -inf }
 0xce6   :  { %v11020_v16 = vpop.f32.mrb[195].mxu0  ;;  %v2874_v62 = vsel %vm792_vm5, %v14449_v27, -inf }
 0xcf2   :  { %2854 = vmax.xlane.f32.xlu0 %v2853_v17 }
 0xcf6   :  { %2860 = vmax.xlane.f32.xlu0 %v2859_v13 }
 0xcfa   :  { %2857 = vmax.xlane.f32.xlu1 %v2856_v33  ;;  %2866 = vmax.xlane.f32.xlu0 %v2865_v46 }
 0xcfe   :  { %2863 = vmax.xlane.f32.xlu1 %v2862_v26  ;;  %2872 = vmax.xlane.f32.xlu0 %v2871_v20 }
 0xd02   :  { %2869 = vmax.xlane.f32.xlu1 %v2868_v60 }
 0xd06   :  { %2875 = vmax.xlane.f32.xlu1 %v2874_v62 }
 0xd17   :  { %v2346_v16 = vpop.f32.mrb[136].mxu1 }
 0xd18   :  { %v14468_v17 = vadd.f32 %v2346_v16, %v14165_v49  ;;  %v10913_v13 = vpop.f32.mrb[137].mxu1 }
 0xd19   :  { %v2349_v33 = vpop.f32.mrb[138].mxu1 }
 0xd1a   :  { %v14471_v46 = vadd.f32 %v2349_v33, %v14168_v56  ;;  %v10914_v12 = vpop.f32.mrb[139].mxu1 }
 0xd21   :  { %v2354_v26 = vpop.f32.mrb[140].mxu1 }
 0xd22   :  { %v14474_v20 = vadd.f32 %v2354_v26, %v14171_v53  ;;  %v10917_v63 = vpop.f32.mrb[141].mxu1 }
 0xd23   :  { %v2357_v60 = vpop.f32.mrb[142].mxu1 }
 0xd24   :  { %v14477_v6 = vadd.f32 %v2357_v60, %v14174_v43  ;;  %v10918_v62 = vpop.f32.mrb[143].mxu1 }
 0xd2a   :  { %v2517_v57 = vpop.xlane.xlu0 %2516 }
 0xd2b   :  { %v2542_v49 = vsub.f32 %v14391_v38, %v2517_v57 }
 0xd2c   :  { %v2520_v16 = vpop.xlane.xlu1 %2519 }
 0xd2d   :  { %v2551_v13 = vmul.f32 1.442695, %v2542_v49  ;;  %v2543_v11 = vsub.f32 %v14395_v58, %v2520_v16 }
 0xd2f   :  { %12354 = vpow2.f32 %v2551_v13  ;;  %v2553_v56 = vmul.f32 1.442695, %v2543_v11 }
 0xd31   :  { %12356 = vpow2.f32 %v2553_v56 }
 0xd32   :  { %v2523_v12 = vpop.xlane.xlu0 %2522 }
 0xd33   :  { %v2544_v53 = vsub.f32 %v14399_v42, %v2523_v12 }
 0xd35   :  { %v2555_v33 = vmul.f32 1.442695, %v2544_v53 }
 0xd36   :  { %v2526_v63 = vpop.xlane.xlu0 %2525 }
 0xd37   :  { %12358 = vpow2.f32 %v2555_v33  ;;  %v2545_v43 = vsub.f32 %v14403_v36, %v2526_v63 }
 0xd39   :  { %v14483_v26 = vpop.eup %12354  ;;  %v2557_v60 = vmul.f32 1.442695, %v2545_v43 }
 0xd3a   :  { %v2529_v62 = vpop.xlane.xlu0 %2528  ;;  %v2569_v57 = vsel %vm792_vm5, %v14483_v26, 0.0 }
 0xd3b   :  { %v14487_v38 = vpop.eup %12356  ;;  %12360 = vpow2.f32 %v2557_v60  ;;  %v2546_v11 = vsub.f32 %v14407_v35, %v2529_v62  ;;  %2570 = vadd.xlane.f32.xlu0 %v2569_v57 }
 0xd3c   :  { %v2532_v58 = vpop.xlane.xlu1 %2531  ;;  %v2572_v42 = vsel %vm792_vm5, %v14487_v38, 0.0 }
 0xd3d   :  { %v2559_v49 = vmul.f32 1.442695, %v2546_v11  ;;  %v2547_v36 = vsub.f32 %v14411_v32, %v2532_v58  ;;  %2573 = vadd.xlane.f32.xlu1 %v2572_v42 }
 0xd3f   :  { %12362 = vpow2.f32 %v2559_v49  ;;  %v2561_v16 = vmul.f32 1.442695, %v2547_v36 }
 0xd41   :  { %v14493_v13 = vpop.eup %12358  ;;  %12364 = vpow2.f32 %v2561_v16 }
 0xd42   :  { %v2535_v56 = vpop.xlane.xlu0 %2534  ;;  %v2575_v12 = vsel %vm792_vm5, %v14493_v13, 0.0 }
 0xd43   :  { %v2548_v35 = vsub.f32 %v14415_v29, %v2535_v56  ;;  %2576 = vadd.xlane.f32.xlu0 %v2575_v12 }
 0xd44   :  { %v2538_v53 = vpop.xlane.xlu1 %2537 }
 0xd45   :  { %v14498_v33 = vpop.eup %12360  ;;  %v2563_v63 = vmul.f32 1.442695, %v2548_v35  ;;  %v2549_v43 = vsub.f32 %v14419_v14, %v2538_v53 }
 0xd46   :  { %v2578_v32 = vsel %vm792_vm5, %v14498_v33, 0.0 }
 0xd47   :  { %12366 = vpow2.f32 %v2563_v63  ;;  %v2565_v60 = vmul.f32 1.442695, %v2549_v43  ;;  %2579 = vadd.xlane.f32.xlu1 %v2578_v32 }
 0xd49   :  { %v14503_v62 = vpop.eup %12362  ;;  %12368 = vpow2.f32 %v2565_v60 }
 0xd4a   :  { %v2541_v57 = vpop.xlane.xlu0 %2540  ;;  %v2581_v29 = vsel %vm792_vm5, %v14503_v62, 0.0 }
 0xd4b   :  { %v14507_v11 = vpop.eup %12364  ;;  %v2550_v58 = vsub.f32 %v14423_v25, %v2541_v57  ;;  %2582 = vadd.xlane.f32.xlu1 %v2581_v29 }
 0xd4c   :  { %v2584_v14 = vsel %vm792_vm5, %v14507_v11, 0.0 }
 0xd4d   :  { %v2567_v42 = vmul.f32 1.442695, %v2550_v58  ;;  %2585 = vadd.xlane.f32.xlu0 %v2584_v14 }
 0xd4f   :  { %12370 = vpow2.f32 %v2567_v42 }
 0xd51   :  { %v14512_v49 = vpop.eup %12366 }
 0xd52   :  { %v2852_v36 = vpop.xlane.xlu1 %2851  ;;  %v2587_v16 = vsel %vm792_vm5, %v14512_v49, 0.0 }
 0xd53   :  { %v14516_v56 = vpop.eup %12368  ;;  %v2877_v12 = vsub.f32 %v14427_v15, %v2852_v36  ;;  %2588 = vadd.xlane.f32.xlu1 %v2587_v16 }
 0xd54   :  { %v2590_v25 = vsel %vm792_vm5, %v14516_v56, 0.0 }
 0xd55   :  { %v2886_v35 = vmul.f32 1.442695, %v2877_v12  ;;  %2591 = vadd.xlane.f32.xlu0 %v2590_v25 }
 0xd56   :  { %v2362_v53 = vpop.f32.mrb[144].mxu1 }
 0xd57   :  { %12372 = vpow2.f32 %v2886_v35  ;;  %v14522_v63 = vadd.f32 %v2362_v53, %v14197_v18  ;;  %v10921_v43 = vpop.f32.mrb[145].mxu1 }
 0xd58   :  { %v2365_v32 = vpop.f32.mrb[146].mxu1 }
 0xd59   :  { %v14524_v60 = vpop.eup %12370  ;;  %v14527_v57 = vadd.f32 %v2365_v32, %v14200_v28  ;;  %v10922_v29 = vpop.f32.mrb[147].mxu1 }
 0xd5a   :  { %v2593_v15 = vsel %vm792_vm5, %v14524_v60, 0.0  ;;  %v14546_v32 = vpop.permute.xlu0 %2956 }
 0xd5b   :  { %2594 = vadd.xlane.f32.xlu1 %v2593_v15 }
 0xd5e   :  { %v2370_v58 = vpop.f32.mrb[148].mxu1 }
 0xd5f   :  { %v14532_v14 = vadd.f32 %v2370_v58, %v14203_v48  ;;  %v10925_v42 = vpop.f32.mrb[149].mxu1  ;;  %v14549_v58 = vpop.permute.xlu1 %2954 }
 0xd60   :  { %v2373_v36 = vpop.f32.mrb[150].mxu1 }
 0xd61   :  { %v14534_v18 = vpop.eup %12372  ;;  %v14537_v16 = vadd.f32 %v2373_v36, %v14206_v55  ;;  %v10926_v12 = vpop.f32.mrb[151].mxu1 }
 0xd62   :  { %v2904_v28 = vsel %vm792_vm5, %v14534_v18, 0.0 }
 0xd63   :  { %2905 = vadd.xlane.f32.xlu1 %v2904_v28 }
 0xd66   :  { %v2378_v25 = vpop.f32.mrb[152].mxu1 }
 0xd67   :  { %v14542_v35 = vadd.f32 %v2378_v25, %v14211_v39  ;;  %v10929_v53 = vpop.f32.mrb[153].mxu1 }
 0xd68   :  { %v2381_v43 = vpop.f32.mrb[154].mxu1 }
 0xd69   :  { %v10930_v48 = vpop.f32.mrb[155].mxu1 }
 0xd6b   :  { %2958 = vrot.lane.b32.xlu0 %v13757_v10, %s12976_s0 }
 0xd7f   :  { %v2855_v29 = vpop.xlane.xlu0 %2854 }
 0xd80   :  { %v2878_v55 = vsub.f32 %v14431_v5, %v2855_v29 }
 0xd82   :  { %v2888_v15 = vmul.f32 1.442695, %v2878_v55 }
 0xd83   :  { %v2861_v42 = vpop.xlane.xlu0 %2860 }
 0xd84   :  { %12374 = vpow2.f32 %v2888_v15  ;;  %v2880_v36 = vsub.f32 %v14435_v19, %v2861_v42 }
 0xd86   :  { %v2892_v25 = vmul.f32 1.442695, %v2880_v36 }
 0xd87   :  { %v2858_v39 = vpop.xlane.xlu1 %2857  ;;  %v2867_v12 = vpop.xlane.xlu0 %2866 }
 0xd88   :  { %v2879_v28 = vsub.f32 %v14433_v40, %v2858_v39  ;;  %v2882_v43 = vsub.f32 %v14441_v0, %v2867_v12 }
 0xd8a   :  { %v2890_v53 = vmul.f32 1.442695, %v2879_v28  ;;  %v2896_v29 = vmul.f32 1.442695, %v2882_v43 }
 0xd8b   :  { %v2864_v48 = vpop.xlane.xlu1 %2863  ;;  %v2873_v43 = vpop.xlane.xlu0 %2872 }
 0xd8c   :  { %12376 = vpow2.f32 %v2890_v53  ;;  %v2881_v59 = vsub.f32 %v14439_v45, %v2864_v48  ;;  %v2884_v48 = vsub.f32 %v14447_v8, %v2873_v43 }
 0xd8d   :  { %12378 = vpow2.f32 %v2892_v25 }
 0xd8e   :  { %v14555_v5 = vpop.eup %12374  ;;  %v2894_v55 = vmul.f32 1.442695, %v2881_v59 }
 0xd8f   :  { %v2870_v15 = vpop.xlane.xlu1 %2869  ;;  %v2907_v19 = vsel %vm792_vm5, %v14555_v5, 0.0 }
 0xd90   :  { %12380 = vpow2.f32 %v2894_v55  ;;  %v2883_v40 = vsub.f32 %v14445_v47, %v2870_v15  ;;  %2908 = vadd.xlane.f32.xlu1 %v2907_v19  ;;  %v2900_v15 = vmul.f32 1.442695, %v2884_v48 }
 0xd91   :  { %12382 = vpow2.f32 %v2896_v29 }
 0xd92   :  { %v2898_v42 = vmul.f32 1.442695, %v2883_v40 }
 0xd93   :  { %v2876_v29 = vpop.xlane.xlu1 %2875 }
 0xd94   :  { %12384 = vpow2.f32 %v2898_v42  ;;  %v2885_v55 = vsub.f32 %v14449_v27, %v2876_v29 }
 0xd95   :  { %12386 = vpow2.f32 %v2900_v15 }
 0xd96   :  { %v14560_v0 = vpop.eup %12376  ;;  %v2902_v19 = vmul.f32 1.442695, %v2885_v55 }
 0xd97   :  { %v2910_v45 = vsel %vm792_vm5, %v14560_v0, 0.0  ;;  %v14564_v36 = vpop.eup %12378 }
 0xd98   :  { %2911 = vadd.xlane.f32.xlu1 %v2910_v45  ;;  %v2913_v47 = vsel %vm792_vm5, %v14564_v36, 0.0 }
 0xd9a   :  { %v14566_v59 = vpop.eup %12380 }
 0xd9b   :  { %v2916_v39 = vsel %vm792_vm5, %v14566_v59, 0.0  ;;  %v14572_v12 = vpop.eup %12382 }
 0xd9c   :  { %2917 = vadd.xlane.f32.xlu0 %v2916_v39  ;;  %2914 = vadd.xlane.f32.xlu1 %v2913_v47  ;;  %v2919_v53 = vsel %vm792_vm5, %v14572_v12, 0.0 }
 0xd9e   :  { %v14574_v28 = vpop.eup %12384 }
 0xd9f   :  { %v2922_v25 = vsel %vm792_vm5, %v14574_v28, 0.0  ;;  %v14598_v27 = vpop.eup %12386 }
 0xda0   :  { %2923 = vadd.xlane.f32.xlu0 %v2922_v25  ;;  %2920 = vadd.xlane.f32.xlu1 %v2919_v53  ;;  %v2925_v25 = vsel %vm792_vm5, %v14598_v27, 0.0 }
 0xdb1   :  { %2960 = vrot.lane.b32.xlu1 %v13760_v7, %s12976_s0 }
 0xdb6   :  { %2962 = vrot.lane.b32.xlu0 %v14245_v2, %s12976_s0 }
 0xdba   :  { %3249 = vrot.lane.b32.xlu0 %v13753_v22, %s12978_s26 }
 0xdbe   :  { %3251 = vrot.lane.b32.xlu0 %v13757_v10, %s12978_s26 }
 0xdc2   :  { %3253 = vrot.lane.b32.xlu0 %v13760_v7, %s12978_s26 }
 0xdc6   :  { %3255 = vrot.lane.b32.xlu0 %v14245_v2, %s12978_s26 }
 0xdc8   :  { %v2571_v40 = vpop.xlane.xlu0 %2570 }
 0xdc9   :  { %12388 = vrcp.f32 %v2571_v40 }
 0xdca   :  { %12390 = vpow2.f32 %v2902_v19  ;;  %3239 = vrot.lane.b32.xlu0 %v13753_v22, %s12979_s27  ;;  %v2574_v42 = vpop.xlane.xlu1 %2573 }
 0xdcb   :  { %12392 = vrcp.f32 %v2574_v42 }
 0xdce   :  { %3243 = vrot.lane.b32.xlu0 %v13760_v7, %s12979_s27 }
 0xdd0   :  { %v2577_v8 = vpop.xlane.xlu0 %2576 }
 0xdd1   :  { %12394 = vrcp.f32 %v2577_v8 }
 0xdd3   :  { %v12389_v45 = vpop.eup %12388 }
 0xdd4   :  { %v14600_v39 = vpop.eup %12390  ;;  %v2580_v47 = vpop.xlane.xlu1 %2579  ;;  %v2605_v43 = vmul.f32 %v12389_v45, %v14483_v26 }
 0xdd5   :  { %v12393_v53 = vpop.eup %12392  ;;  %12396 = vrcp.f32 %v2580_v47  ;;  %2926 = vadd.xlane.f32.xlu1 %v2925_v25  ;;  %v2928_v15 = vsel %vm792_vm5, %v14600_v39, 0.0 }
 0xdd6   :  { %v2606_v48 = vmul.f32 %v12393_v53, %v14487_v38 }
 0xdd8   :  { %v2614_v29 = vpack.c.bf16 %v2606_v48, %v2605_v43  ;;  %v2583_v55 = vpop.xlane.xlu1 %2582 }
 0xdd9   :  { %2929 = vadd.xlane.f32.xlu1 %v2928_v15  ;;  %12398 = vrcp.f32 %v2583_v55 }
 0xdda   :  { %v2586_v19 = vpop.xlane.xlu0 %2585  ;;  %10972 = vmatmul.mubr.msk.bf16.vlgmr.msra.gmra.mrb[156].mxu1 %vm792_vm5, %v2614_v29 }
 0xddb   :  { %12400 = vrcp.f32 %v2586_v19  ;;  %11022 = vmatpush3.bf16.msra.mxu1 %v14549_v58  ;;  %10975 = vmatprep.mubr.msk.bf16.mxu1 %vm12971_vm1, %v17814_v9  ;;  %v12395_v26 = vpop.eup %12394 }
 0xddc   :  { %11023 = vmatprep.subr.bf16.mxu1 %v17814_v9  ;;  %v2607_v42 = vmul.f32 %v12395_v26, %v14493_v13 }
 0xddf   :  { %v12397_v38 = vpop.eup %12396  ;;  %11024 = vmatpush3.bf16.msra.mxu1 %v14546_v32 }
 0xde0   :  { %v2589_v40 = vpop.xlane.xlu1 %2588  ;;  %v2608_v8 = vmul.f32 %v12397_v38, %v14498_v33  ;;  %11025 = vmatprep.subr.bf16.mxu1 %v17814_v9 }
 0xde1   :  { %12402 = vrcp.f32 %v2589_v40 }
 0xde2   :  { %v2592_v45 = vpop.xlane.xlu0 %2591  ;;  %v2615_v47 = vpack.c.bf16 %v2608_v8, %v2607_v42 }
 0xde3   :  { %12404 = vrcp.f32 %v2592_v45  ;;  %v12399_v58 = vpop.eup %12398 }
 0xde4   :  { %10976 = vmatmul.mubr.msk.bf16.gmra.mrb[160].mxu1 %vm792_vm5, %v2615_v47  ;;  %v2609_v33 = vmul.f32 %v12399_v58, %v14503_v62 }
 0xde5   :  { %v12401_v25 = vpop.eup %12400  ;;  %10979 = vmatprep.mubr.msk.bf16.mxu1 %vm12971_vm1, %v17814_v9 }
 0xde6   :  { %v2959_v53 = vpop.permute.xlu0 %2958  ;;  %v2610_v32 = vmul.f32 %v12401_v25, %v14507_v11 }
 0xde7   :  { %11026 = vmatpush3.bf16.msra.mxu1 %v2959_v53 }
 0xde8   :  { %v2595_v13 = vpop.xlane.xlu1 %2594  ;;  %11027 = vmatprep.subr.bf16.mxu1 %v17814_v9  ;;  %v2616_v43 = vpack.c.bf16 %v2610_v32, %v2609_v33 }
 0xde9   :  { %12406 = vrcp.f32 %v2595_v13 }
 0xdea   :  { %3247 = vrot.lane.b32.xlu1 %v13748_v30, %s12978_s26 }
 0xdeb   :  { %v12403_v48 = vpop.eup %12402 }
 0xdec   :  { %10980 = vmatmul.mubr.msk.bf16.gmra.mrb[164].mxu1 %vm792_vm5, %v2616_v43  ;;  %v2611_v62 = vmul.f32 %v12403_v48, %v14512_v49 }
 0xded   :  { %v12405_v29 = vpop.eup %12404  ;;  %10983 = vmatprep.mubr.msk.bf16.mxu1 %vm12971_vm1, %v17814_v9 }
 0xdee   :  { %3237 = vrot.lane.b32.xlu1 %v13748_v30, %s12979_s27  ;;  %v2612_v11 = vmul.f32 %v12405_v29, %v14516_v56 }
 0xdf0   :  { %v2617_v55 = vpack.c.bf16 %v2612_v11, %v2611_v62  ;;  %v2906_v49 = vpop.xlane.xlu1 %2905 }
 0xdf2   :  { %3241 = vrot.lane.b32.xlu1 %v13757_v10, %s12979_s27 }
 0xdf3   :  { %v12407_v15 = vpop.eup %12406 }
 0xdf4   :  { %10984 = vmatmul.mubr.msk.bf16.gmra.mrb[168].mxu1 %vm792_vm5, %v2617_v55  ;;  %v2613_v19 = vmul.f32 %v12407_v15, %v14524_v60 }
 0xdf5   :  { %10987 = vmatprep.mubr.msk.bf16.mxu1 %vm12971_vm1, %v17814_v9 }
 0xdf6   :  { %3245 = vrot.lane.b32.xlu1 %v14245_v2, %s12979_s27  ;;  %v2618_v56 = vpack.c.bf16 %v2613_v19, %v2613_v19 }
 0xdfa   :  { %3463 = vrot.lane.b32.xlu1 %v13748_v30, %s12980_s28 }
 0xdfc   :  { %10988 = vmatmul.mubr.msk.bf16.gmra.mrb[172].mxu1 %vm792_vm5, %v2618_v56 }
 0xdfd   :  { %11031 = vmatprep.mubr.msk.bf16.mxu1 %vm12971_vm1, %v17814_v9 }
 0xe1d   :  { %v2909_v26 = vpop.xlane.xlu1 %2908 }
 0xe1e   :  { %12408 = vrcp.f32 %v2909_v26 }
 0xe1f   :  { %12410 = vrcp.f32 %v2906_v49 }
 0xe25   :  { %v2912_v38 = vpop.xlane.xlu1 %2911 }
 0xe28   :  { %v12409_v60 = vpop.eup %12408 }
 0xe29   :  { %v2918_v40 = vpop.xlane.xlu0 %2917  ;;  %v2915_v42 = vpop.xlane.xlu1 %2914  ;;  %v2941_v53 = vmul.f32 %v12409_v60, %v14555_v5 }
 0xe2a   :  { %12412 = vrcp.f32 %v2915_v42  ;;  %v12411_v25 = vpop.eup %12410 }
 0xe2b   :  { %12414 = vrcp.f32 %v2912_v38  ;;  %v2940_v13 = vmul.f32 %v12411_v25, %v14534_v18 }
 0xe2d   :  { %v2924_v8 = vpop.xlane.xlu0 %2923  ;;  %v2921_v45 = vpop.xlane.xlu1 %2920  ;;  %v2949_v33 = vpack.c.bf16 %v2941_v53, %v2940_v13 }
 0xe2e   :  { %12416 = vrcp.f32 %v2921_v45 }
 0xe2f   :  { %12418 = vrcp.f32 %v2918_v40 }
 0xe30   :  { %12420 = vrcp.f32 %v2924_v8 }
 0xe31   :  { %v2963_v47 = vpop.permute.xlu0 %2962  ;;  %v2961_v58 = vpop.permute.xlu1 %2960 }
 0xe32   :  { %11028 = vmatpush3.bf16.msra.mxu1 %v2961_v58  ;;  %v2984_v32 = vand.u32 %v2963_v47, %v13600_v3 }
 0xe33   :  { %11029 = vmatprep.subr.bf16.mxu1 %v17814_v9 }
 0xe34   :  { %v12413_v43 = vpop.eup %12412 }
 0xe35   :  { %v12415_v48 = vpop.eup %12414  ;;  %v2943_v5 = vmul.f32 %v12413_v43, %v14564_v36 }
 0xe36   :  { %11030 = vmatpush3.bf16.msra.mxu1 %v2984_v32  ;;  %v2942_v18 = vmul.f32 %v12415_v48, %v14560_v0 }
 0xe37   :  { %11073 = vmatprep.subr.bf16.mxu1 %v17814_v9 }
 0xe38   :  { %v2950_v29 = vpack.c.bf16 %v2943_v5, %v2942_v18  ;;  %v12417_v11 = vpop.eup %12416 }
 0xe39   :  { %11032 = vmatmul.mubr.msk.bf16.vlgmr.msra.gmra.mrb[176].mxu1 %vm792_vm5, %v2949_v33  ;;  %v12419_v62 = vpop.eup %12418  ;;  %v2945_v55 = vmul.f32 %v12417_v11, %v14572_v12 }
 0xe3a   :  { %11035 = vmatprep.mubr.msk.bf16.mxu1 %vm12971_vm1, %v17814_v9  ;;  %11074 = vmatpush3.bf16.msra.mxu1 %v13849_v4  ;;  %v2944_v15 = vmul.f32 %v12419_v62, %v14566_v59  ;;  %v12421_v36 = vpop.eup %12420 }
 0xe3b   :  { %11125 = vmatprep.subr.bf16.mxu1 %v17814_v9  ;;  %v2946_v49 = vmul.f32 %v12421_v36, %v14574_v28 }
 0xe3c   :  { %v2951_v19 = vpack.c.bf16 %v2945_v55, %v2944_v15 }
 0xe41   :  { %11036 = vmatmul.mubr.msk.bf16.gmra.mrb[180].mxu1 %vm792_vm5, %v2950_v29 }
 0xe42   :  { %11039 = vmatprep.mubr.msk.bf16.mxu1 %vm12971_vm1, %v17814_v9 }
 0xe49   :  { %11040 = vmatmul.mubr.msk.bf16.gmra.mrb[184].mxu1 %vm792_vm5, %v2951_v19 }
 0xe4a   :  { %11043 = vmatprep.mubr.msk.bf16.mxu1 %vm12971_vm1, %v17814_v9 }
 0xe62   :  { %v2927_v4 = vpop.xlane.xlu1 %2926 }
 0xe63   :  { %12422 = vrcp.f32 %v2927_v4 }
 0xe66   :  { %v2930_v0 = vpop.xlane.xlu1 %2929 }
 0xe67   :  { %12424 = vrcp.f32 %v2930_v0 }
 0xe6a   :  { %v3248_v42 = vpop.permute.xlu1 %3247 }
 0xe6d   :  { %v12423_v56 = vpop.eup %12422 }
 0xe6e   :  { %v2947_v26 = vmul.f32 %v12423_v56, %v14598_v27  ;;  %v14674_v8 = vpop.permute.xlu1 %3237 }
 0xe70   :  { %v2952_v12 = vpack.c.bf16 %v2947_v26, %v2946_v49 }
 0xe71   :  { %v12425_v38 = vpop.eup %12424 }
 0xe72   :  { %11044 = vmatmul.mubr.msk.bf16.gmra.mrb[188].mxu1 %vm792_vm5, %v2952_v12  ;;  %v2948_v59 = vmul.f32 %v12425_v38, %v14600_v39  ;;  %v14676_v28 = vpop.permute.xlu1 %3241 }
 0xe73   :  { %11047 = vmatprep.mubr.msk.bf16.mxu1 %vm12971_vm1, %v17814_v9 }
 0xe74   :  { %v2953_v40 = vpack.c.bf16 %v2948_v59, %v2948_v59 }
 0xe76   :  { %v14678_v27 = vpop.permute.xlu1 %3245 }
 0xe7a   :  { %11048 = vmatmul.mubr.msk.bf16.gmra.mrb[192].mxu1 %vm792_vm5, %v2953_v40  ;;  %v3464_v53 = vpop.permute.xlu1 %3463 }
 0xe7b   :  { %11075 = vmatprep.mubr.msk.bf16.mxu1 %vm12971_vm1, %v17814_v9 }
 0xead   :  { %v2685_v45 = vpop.f32.mrb[156].mxu1 }
 0xeae   :  { %v10973_v60 = vpop.f32.mrb[157].mxu1 }
 0xeaf   :  { %v2688_v47 = vpop.f32.mrb[158].mxu1  ;;  %v3273_v60 = vsel %vm689_vm4, %v3248_v42, 0 }
 0xeb0   :  { %v2723_v58 = vpack.c.bf16 %v2688_v47, %v2685_v45  ;;  %v10974_v25 = vpop.f32.mrb[159].mxu1 }
 0xeb1   :  { %v3250_v25 = vpop.permute.xlu0 %3249 }
 0xeb2   :  { %11076 = vmatmul.mubr.msk.bf16.vlgmr.msra.gmra.mrb[196].mxu1 %vm689_vm4, %v2723_v58 }
 0xeb3   :  { %11126 = vmatpush3.bf16.msra.mxu1 %v3464_v53  ;;  %11079 = vmatprep.mubr.msk.bf16.mxu1 %vm12971_vm1, %v17814_v9 }
 0xeb4   :  { %11127 = vmatprep.subr.bf16.mxu1 %v17814_v9 }
 0xeb7   :  { %v2693_v39 = vpop.f32.mrb[160].mxu1 }
 0xeb8   :  { %v10977_v32 = vpop.f32.mrb[161].mxu1 }
 0xeb9   :  { %v2696_v13 = vpop.f32.mrb[162].mxu1 }
 0xeba   :  { %v2724_v33 = vpack.c.bf16 %v2696_v13, %v2693_v39  ;;  %v10978_v43 = vpop.f32.mrb[163].mxu1  ;;  %v3276_v13 = vsel %vm689_vm4, %v3250_v25, 0 }
 0xebb   :  { %v3252_v43 = vpop.permute.xlu0 %3251 }
 0xebc   :  { %11080 = vmatmul.mubr.msk.bf16.gmra.mrb[200].mxu1 %vm689_vm4, %v2724_v33 }
 0xebd   :  { %11083 = vmatprep.mubr.msk.bf16.mxu1 %vm12971_vm1, %v17814_v9 }
 0xebf   :  { %v2701_v48 = vpop.f32.mrb[164].mxu1 }
 0xec0   :  { %v10981_v5 = vpop.f32.mrb[165].mxu1 }
 0xec1   :  { %v2704_v18 = vpop.f32.mrb[166].mxu1 }
 0xec2   :  { %v2725_v29 = vpack.c.bf16 %v2704_v18, %v2701_v48  ;;  %v10982_v11 = vpop.f32.mrb[167].mxu1 }
 0xec3   :  { %v3254_v11 = vpop.permute.xlu0 %3253 }
 0xec4   :  { %11084 = vmatmul.mubr.msk.bf16.gmra.mrb[204].mxu1 %vm689_vm4, %v2725_v29  ;;  %v3279_v29 = vsel %vm689_vm4, %v3252_v43, 0 }
 0xec5   :  { %11087 = vmatprep.mubr.msk.bf16.mxu1 %vm12971_vm1, %v17814_v9 }
 0xec7   :  { %v2709_v62 = vpop.f32.mrb[168].mxu1 }
 0xec8   :  { %v10985_v55 = vpop.f32.mrb[169].mxu1 }
 0xec9   :  { %v2712_v15 = vpop.f32.mrb[170].mxu1  ;;  %v3256_v55 = vpop.permute.xlu0 %3255 }
 0xeca   :  { %v2726_v19 = vpack.c.bf16 %v2712_v15, %v2709_v62  ;;  %v10986_v4 = vpop.f32.mrb[171].mxu1  ;;  %v3282_v62 = vsel %vm689_vm4, %v3254_v11, 0  ;;  %v3285_v15 = vsel %vm689_vm4, %v3256_v55, 0 }
 0xecc   :  { %11088 = vmatmul.mubr.msk.bf16.gmra.mrb[208].mxu1 %vm689_vm4, %v2726_v19 }
 0xecd   :  { %11091 = vmatprep.mubr.msk.bf16.mxu1 %vm12971_vm1, %v17814_v9 }
 0xecf   :  { %v2717_v0 = vpop.f32.mrb[172].mxu1 }
 0xed0   :  { %v10989_v36 = vpop.f32.mrb[173].mxu1  ;;  %v2727_v49 = vpack.c.bf16 %v2717_v0, %v2717_v0 }
 0xed1   :  { %v2720_v56 = vpop.f32.mrb[174].mxu1 }
 0xed2   :  { %v10990_v26 = vpop.f32.mrb[175].mxu1 }
 0xed4   :  { %11092 = vmatmul.mubr.msk.bf16.gmra.mrb[212].mxu1 %vm689_vm4, %v2727_v49 }
 0xed5   :  { %11135 = vmatprep.mubr.msk.bf16.mxu1 %vm12971_vm1, %v17814_v9 }
 0xf0c   :  { %v3020_v12 = vpop.f32.mrb[176].mxu1 }
 0xf0d   :  { %v11033_v38 = vpop.f32.mrb[177].mxu1 }
 0xf0e   :  { %v3023_v59 = vpop.f32.mrb[178].mxu1 }
 0xf0f   :  { %v3058_v40 = vpack.c.bf16 %v3023_v59, %v3020_v12  ;;  %v11034_v45 = vpop.f32.mrb[179].mxu1 }
 0xf11   :  { %11054 = vmatmul.mubr.msk.bf16.vlgmr.msra.gmra.mrb[196].mxu0 %vm689_vm4, %v3058_v40  ;;  %v3240_v40 = vpop.permute.xlu0 %3239 }
 0xf12   :  { %11096 = vmatpush3.bf16.xpose.msra.mxu0 %v3273_v60  ;;  %11057 = vmatprep.mubr.msk.bf16.mxu0 %vm12971_vm1, %v17814_v9 }
 0xf13   :  { %11097 = vmatprep.subr.bf16.mxu0 %v17814_v9 }
 0xf14   :  { %v3028_v47 = vpop.f32.mrb[180].mxu1 }
 0xf15   :  { %v11037_v58 = vpop.f32.mrb[181].mxu1 }
 0xf16   :  { %v3031_v53 = vpop.f32.mrb[182].mxu1 }
 0xf17   :  { %v3059_v39 = vpack.c.bf16 %v3031_v53, %v3028_v47  ;;  %v11038_v32 = vpop.f32.mrb[183].mxu1 }
 0xf19   :  { %11058 = vmatmul.mubr.msk.bf16.gmra.mrb[200].mxu0 %vm689_vm4, %v3059_v39 }
 0xf1a   :  { %11098 = vmatpush3.bf16.xpose.msra.mxu0 %v3276_v13  ;;  %11061 = vmatprep.mubr.msk.bf16.mxu0 %vm12971_vm1, %v17814_v9 }
 0xf1b   :  { %11099 = vmatprep.subr.bf16.mxu0 %v17814_v9 }
 0xf1c   :  { %v3036_v42 = vpop.f32.mrb[184].mxu1 }
 0xf1d   :  { %v11041_v33 = vpop.f32.mrb[185].mxu1 }
 0xf1e   :  { %v3039_v48 = vpop.f32.mrb[186].mxu1 }
 0xf1f   :  { %v3060_v5 = vpack.c.bf16 %v3039_v48, %v3036_v42  ;;  %v11042_v18 = vpop.f32.mrb[187].mxu1 }
 0xf21   :  { %11062 = vmatmul.mubr.msk.bf16.gmra.mrb[204].mxu0 %vm689_vm4, %v3060_v5 }
 0xf22   :  { %11100 = vmatpush3.bf16.xpose.msra.mxu0 %v3279_v29  ;;  %11065 = vmatprep.mubr.msk.bf16.mxu0 %vm12971_vm1, %v17814_v9 }
 0xf23   :  { %11101 = vmatprep.subr.bf16.mxu0 %v17814_v9 }
 0xf2a   :  { %11102 = vmatpush3.bf16.xpose.msra.mxu0 %v3282_v62 }
 0xf2b   :  { %11103 = vmatprep.subr.bf16.mxu0 %v17814_v9 }
 0xf32   :  { %11104 = vmatpush3.bf16.xpose.msra.mxu0 %v3285_v15 }
 0xf33   :  { %11155 = vmatprep.subr.bf16.mxu0 %v17814_v9 }
 0xf45   :  { %v3044_v19 = vpop.f32.mrb[188].mxu1 }
 0xf46   :  { %v11045_v4 = vpop.f32.mrb[189].mxu1 }
 0xf47   :  { %v3047_v0 = vpop.f32.mrb[190].mxu1 }
 0xf48   :  { %v3061_v36 = vpack.c.bf16 %v3047_v0, %v3044_v19  ;;  %v11046_v56 = vpop.f32.mrb[191].mxu1 }
 0xf4a   :  { %11066 = vmatmul.mubr.msk.bf16.gmra.mrb[208].mxu0 %vm689_vm4, %v3061_v36 }
 0xf4b   :  { %11069 = vmatprep.mubr.msk.bf16.mxu0 %vm12971_vm1, %v17814_v9 }
 0xf4d   :  { %v3052_v49 = vpop.f32.mrb[192].mxu1 }
 0xf4e   :  { %v11049_v26 = vpop.f32.mrb[193].mxu1  ;;  %v3062_v38 = vpack.c.bf16 %v3052_v49, %v3052_v49 }
 0xf4f   :  { %v3055_v12 = vpop.f32.mrb[194].mxu1 }
 0xf50   :  { %v11050_v59 = vpop.f32.mrb[195].mxu1 }
 0xf52   :  { %11070 = vmatmul.mubr.msk.bf16.gmra.mrb[212].mxu0 %vm689_vm4, %v3062_v38 }
 0xf53   :  { %11105 = vmatprep.mubr.msk.bf16.mxu0 %vm12971_vm1, %v17814_v9 }
 0xf5a   :  { %11106 = vmatmul.mubr.msk.bf16.vlgmr.msra.gmra.mrb[216].mxu0 %vm689_vm4, %v14674_v8  ;;  %v3244_v8 = vpop.permute.xlu0 %3243 }
 0xf5b   :  { %11109 = vmatprep.mubr.msk.bf16.mxu0 %vm12971_vm1, %v17814_v9  ;;  %11156 = vmatpush3.bf16.msra.mxu0 %v14100_v23 }
 0xf5c   :  { %11207 = vmatprep.subr.bf16.mxu0 %v17814_v9 }
 0xf62   :  { %11110 = vmatmul.mubr.msk.bf16.gmra.mrb[220].mxu0 %vm689_vm4, %v3240_v40 }
 0xf63   :  { %11113 = vmatprep.mubr.msk.bf16.mxu0 %vm12971_vm1, %v17814_v9 }
 0xf6a   :  { %11114 = vmatmul.mubr.msk.bf16.gmra.mrb[224].mxu0 %vm689_vm4, %v14676_v28 }
 0xf6b   :  { %11117 = vmatprep.mubr.msk.bf16.mxu0 %vm12971_vm1, %v17814_v9 }
 0xf72   :  { %11118 = vmatmul.mubr.msk.bf16.gmra.mrb[228].mxu0 %vm689_vm4, %v3244_v8 }
 0xf73   :  { %11121 = vmatprep.mubr.msk.bf16.mxu0 %vm12971_vm1, %v17814_v9 }
 0xf7a   :  { %11122 = vmatmul.mubr.msk.bf16.gmra.mrb[232].mxu0 %vm689_vm4, %v14678_v27 }
 0xf7b   :  { %11157 = vmatprep.mubr.msk.bf16.mxu0 %vm12971_vm1, %v17814_v9 }
 0xf85   :  { %v3199_v23 = vpop.f32.mrb[196].mxu1 }
 0xf86   :  { %v11077_v45 = vpop.f32.mrb[197].mxu1 }
 0xf87   :  { %v3202_v60 = vpop.f32.mrb[198].mxu1 }
 0xf88   :  { %v11078_v47 = vpop.f32.mrb[199].mxu1 }
 0xf8f   :  { %v3207_v28 = vpop.f32.mrb[200].mxu1 }
 0xf90   :  { %v11081_v58 = vpop.f32.mrb[201].mxu1 }
 0xf91   :  { %v3210_v25 = vpop.f32.mrb[202].mxu1 }
 0xf92   :  { %v11082_v53 = vpop.f32.mrb[203].mxu1 }
 0xf97   :  { %v3215_v39 = vpop.f32.mrb[204].mxu1 }
 0xf98   :  { %v11085_v32 = vpop.f32.mrb[205].mxu1 }
 0xf99   :  { %v3218_v13 = vpop.f32.mrb[206].mxu1 }
 0xf9a   :  { %v11086_v42 = vpop.f32.mrb[207].mxu1 }
 0xf9f   :  { %v3223_v33 = vpop.f32.mrb[208].mxu1 }
 0xfa0   :  { %v11089_v43 = vpop.f32.mrb[209].mxu1 }
 0xfa1   :  { %v3226_v48 = vpop.f32.mrb[210].mxu1 }
 0xfa2   :  { %v11090_v5 = vpop.f32.mrb[211].mxu1 }
 0xfa7   :  { %v3231_v27 = vpop.f32.mrb[212].mxu1 }
 0xfa8   :  { %v11093_v18 = vpop.f32.mrb[213].mxu1 }
 0xfa9   :  { %v3234_v29 = vpop.f32.mrb[214].mxu1 }
 0xfaa   :  { %v11094_v11 = vpop.f32.mrb[215].mxu1 }
 0xfe4   :  { %v3112_v62 = vpop.f32.mrb[196].mxu0 }
 0xfe5   :  { %v14741_v55 = vadd.f32 %v3199_v23, %v3112_v62  ;;  %v11055_v15 = vpop.f32.mrb[197].mxu0 }
 0xfe6   :  { %v3115_v19 = vpop.f32.mrb[198].mxu0 }
 0xfe7   :  { %v14743_v4 = vadd.f32 %v3202_v60, %v3115_v19  ;;  %v11056_v0 = vpop.f32.mrb[199].mxu0 }
 0xfec   :  { %v3120_v36 = vpop.f32.mrb[200].mxu0 }
 0xfed   :  { %v14745_v56 = vadd.f32 %v3207_v28, %v3120_v36  ;;  %v11059_v49 = vpop.f32.mrb[201].mxu0 }
 0xfee   :  { %v3123_v26 = vpop.f32.mrb[202].mxu0 }
 0xfef   :  { %v14747_v12 = vadd.f32 %v3210_v25, %v3123_v26  ;;  %v11060_v38 = vpop.f32.mrb[203].mxu0 }
 0xff4   :  { %v3128_v59 = vpop.f32.mrb[204].mxu0 }
 0xff5   :  { %v14749_v40 = vadd.f32 %v3215_v39, %v3128_v59  ;;  %v11063_v8 = vpop.f32.mrb[205].mxu0 }
 0xff6   :  { %v3131_v45 = vpop.f32.mrb[206].mxu0 }
 0xff7   :  { %v14751_v23 = vadd.f32 %v3218_v13, %v3131_v45  ;;  %v11064_v47 = vpop.f32.mrb[207].mxu0 }
0x101d   :  { %v3136_v58 = vpop.f32.mrb[208].mxu0 }
0x101e   :  { %v14753_v60 = vadd.f32 %v3223_v33, %v3136_v58  ;;  %v11067_v53 = vpop.f32.mrb[209].mxu0 }
0x101f   :  { %v3139_v32 = vpop.f32.mrb[210].mxu0 }
0x1020   :  { %v14755_v28 = vadd.f32 %v3226_v48, %v3139_v32  ;;  %v11068_v42 = vpop.f32.mrb[211].mxu0 }
0x1025   :  { %v3144_v43 = vpop.f32.mrb[212].mxu0 }
0x1026   :  { %v14757_v25 = vadd.f32 %v3231_v27, %v3144_v43  ;;  %v11071_v5 = vpop.f32.mrb[213].mxu0 }
0x1027   :  { %v3147_v18 = vpop.f32.mrb[214].mxu0 }
0x1028   :  { %v11072_v39 = vpop.f32.mrb[215].mxu0 }
0x102d   :  { %v3321_v29 = vpop.f32.mrb[216].mxu0 }
0x102e   :  { %v11107_v11 = vpop.f32.mrb[217].mxu0  ;;  %v3359_v13 = vsel %vm792_vm5, %v3321_v29, -inf }
0x102f   :  { %3360 = vmax.xlane.f32.xlu0 %v3359_v13  ;;  %v3324_v62 = vpop.f32.mrb[218].mxu0 }
0x1030   :  { %v11108_v15 = vpop.f32.mrb[219].mxu0  ;;  %v3362_v33 = vsel %vm792_vm5, %v3324_v62, -inf }
0x1031   :  { %3363 = vmax.xlane.f32.xlu1 %v3362_v33 }
0x1035   :  { %v3329_v19 = vpop.f32.mrb[220].mxu0 }
0x1036   :  { %v11111_v48 = vpop.f32.mrb[221].mxu0  ;;  %v3365_v0 = vsel %vm792_vm5, %v3329_v19, -inf }
0x1037   :  { %3366 = vmax.xlane.f32.xlu0 %v3365_v0  ;;  %v3332_v27 = vpop.f32.mrb[222].mxu0 }
0x1038   :  { %v11112_v36 = vpop.f32.mrb[223].mxu0  ;;  %v3368_v49 = vsel %vm792_vm5, %v3332_v27, -inf }
0x103b   :  { %3369 = vmax.xlane.f32.xlu0 %v3368_v49 }
0x103d   :  { %v14763_v26 = vpop.f32.mrb[224].mxu0 }
0x103e   :  { %v11115_v38 = vpop.f32.mrb[225].mxu0  ;;  %v3371_v11 = vsel %vm792_vm5, %v14763_v26, -inf }
0x103f   :  { %v3340_v59 = vpop.f32.mrb[226].mxu0 }
0x1040   :  { %v11116_v8 = vpop.f32.mrb[227].mxu0  ;;  %v3374_v18 = vsel %vm792_vm5, %v3340_v59, -inf }
0x1042   :  { %3467 = vrot.lane.b32.xlu1 %v13757_v10, %s12980_s28 }
0x1045   :  { %v14767_v45 = vpop.f32.mrb[228].mxu0 }
0x1046   :  { %v11119_v47 = vpop.f32.mrb[229].mxu0  ;;  %v3377_v13 = vsel %vm792_vm5, %v14767_v45, -inf }
0x1047   :  { %v3348_v58 = vpop.f32.mrb[230].mxu0 }
0x1048   :  { %v11120_v53 = vpop.f32.mrb[231].mxu0  ;;  %v3380_v39 = vsel %vm792_vm5, %v3348_v58, -inf }
0x104d   :  { %v14769_v32 = vpop.f32.mrb[232].mxu0 }
0x104e   :  { %v11123_v42 = vpop.f32.mrb[233].mxu0  ;;  %v3383_v15 = vsel %vm792_vm5, %v14769_v32, -inf }
0x104f   :  { %v3356_v43 = vpop.f32.mrb[234].mxu0 }
0x1050   :  { %v11124_v5 = vpop.f32.mrb[235].mxu0 }
0x1051   :  { %3465 = vrot.lane.b32.xlu0 %v13753_v22, %s12980_s28 }
0x1066   :  { %3375 = vmax.xlane.f32.xlu1 %v3374_v18 }
0x106a   :  { %3381 = vmax.xlane.f32.xlu1 %v3380_v39 }
0x1070   :  { %3372 = vmax.xlane.f32.xlu0 %v3371_v11 }
0x1074   :  { %3378 = vmax.xlane.f32.xlu0 %v3377_v13 }
0x1078   :  { %3384 = vmax.xlane.f32.xlu0 %v3383_v15 }
0x107b   :  { %3469 = vrot.lane.b32.xlu1 %v13760_v7, %s12980_s28 }
0x108e   :  { %3471 = vrot.lane.b32.xlu0 %v14245_v2, %s12980_s28 }
0x10bc   :  { %v3361_v33 = vpop.xlane.xlu0 %3360 }
0x10bd   :  { %v3386_v48 = vsub.f32 %v3321_v29, %v3361_v33 }
0x10be   :  { %v3364_v0 = vpop.xlane.xlu1 %3363 }
0x10bf   :  { %v3395_v36 = vmul.f32 1.442695, %v3386_v48  ;;  %v3387_v49 = vsub.f32 %v3324_v62, %v3364_v0 }
0x10c1   :  { %12426 = vpow2.f32 %v3395_v36  ;;  %v3397_v38 = vmul.f32 1.442695, %v3387_v49 }
0x10c3   :  { %12428 = vpow2.f32 %v3397_v38 }
0x10c4   :  { %v3367_v8 = vpop.xlane.xlu0 %3366 }
0x10c5   :  { %v3388_v47 = vsub.f32 %v3329_v19, %v3367_v8  ;;  %v3468_v19 = vpop.permute.xlu1 %3467 }
0x10c7   :  { %v3399_v53 = vmul.f32 1.442695, %v3388_v47 }
0x10c8   :  { %v3370_v42 = vpop.xlane.xlu0 %3369 }
0x10c9   :  { %12430 = vpow2.f32 %v3399_v53  ;;  %v3389_v43 = vsub.f32 %v3332_v27, %v3370_v42 }
0x10cb   :  { %v14785_v5 = vpop.eup %12426  ;;  %v3401_v18 = vmul.f32 1.442695, %v3389_v43 }
0x10cc   :  { %v3466_v39 = vpop.permute.xlu0 %3465  ;;  %v3413_v11 = vsel %vm792_vm5, %v14785_v5, 0.0 }
0x10cd   :  { %v14789_v29 = vpop.eup %12428  ;;  %12432 = vpow2.f32 %v3401_v18  ;;  %11128 = vmatpush3.bf16.msra.mxu1 %v3466_v39  ;;  %3414 = vadd.xlane.f32.xlu1 %v3413_v11 }
0x10ce   :  { %v3416_v62 = vsel %vm792_vm5, %v14789_v29, 0.0  ;;  %11129 = vmatprep.subr.bf16.mxu1 %v17814_v9 }
0x10cf   :  { %3417 = vadd.xlane.f32.xlu0 %v3416_v62 }
0x10d1   :  { %11130 = vmatpush3.bf16.msra.mxu1 %v3468_v19 }
0x10d2   :  { %11131 = vmatprep.subr.bf16.mxu1 %v17814_v9 }
0x10d3   :  { %v14795_v27 = vpop.eup %12430 }
0x10d4   :  { %v3419_v13 = vsel %vm792_vm5, %v14795_v27, 0.0 }
0x10d5   :  { %3420 = vadd.xlane.f32.xlu0 %v3419_v13 }
0x10d7   :  { %v14799_v15 = vpop.eup %12432 }
0x10d8   :  { %v3422_v33 = vsel %vm792_vm5, %v14799_v15, 0.0 }
0x10d9   :  { %3423 = vadd.xlane.f32.xlu0 %v3422_v33 }
0x10de   :  { %3678 = vrot.lane.b32.xlu1 %v13748_v30, %s12981_s2 }
0x10f3   :  { %v3376_v48 = vpop.xlane.xlu1 %3375 }
0x10f4   :  { %v3391_v0 = vsub.f32 %v3340_v59, %v3376_v48 }
0x10f6   :  { %v3405_v36 = vmul.f32 1.442695, %v3391_v0 }
0x10f7   :  { %v3382_v49 = vpop.xlane.xlu1 %3381 }
0x10f8   :  { %12434 = vpow2.f32 %v3405_v36  ;;  %v3393_v38 = vsub.f32 %v3348_v58, %v3382_v49 }
0x10fa   :  { %v3409_v8 = vmul.f32 1.442695, %v3393_v38 }
0x10fb   :  { %v3470_v47 = vpop.permute.xlu1 %3469 }
0x10fc   :  { %12436 = vpow2.f32 %v3409_v8  ;;  %11132 = vmatpush3.bf16.msra.mxu1 %v3470_v47 }
0x10fd   :  { %v3373_v53 = vpop.xlane.xlu0 %3372  ;;  %11133 = vmatprep.subr.bf16.mxu1 %v17814_v9 }
0x10fe   :  { %v3390_v42 = vsub.f32 %v14763_v26, %v3373_v53 }
0x1100   :  { %v3403_v43 = vmul.f32 1.442695, %v3390_v42 }
0x1101   :  { %v3379_v18 = vpop.xlane.xlu0 %3378 }
0x1102   :  { %v14807_v39 = vpop.eup %12434  ;;  %12438 = vpow2.f32 %v3403_v43  ;;  %v3392_v59 = vsub.f32 %v14767_v45, %v3379_v18 }
0x1103   :  { %v3428_v11 = vsel %vm792_vm5, %v14807_v39, 0.0 }
0x1104   :  { %v3407_v58 = vmul.f32 1.442695, %v3392_v59  ;;  %3429 = vadd.xlane.f32.xlu0 %v3428_v11 }
0x1105   :  { %v3385_v62 = vpop.xlane.xlu0 %3384 }
0x1106   :  { %v14812_v19 = vpop.eup %12436  ;;  %12440 = vpow2.f32 %v3407_v58  ;;  %v3394_v13 = vsub.f32 %v14769_v32, %v3385_v62 }
0x1107   :  { %v3434_v26 = vsel %vm792_vm5, %v14812_v19, 0.0 }
0x1108   :  { %v3411_v33 = vmul.f32 1.442695, %v3394_v13  ;;  %3435 = vadd.xlane.f32.xlu0 %v3434_v26 }
0x1109   :  { %v3472_v48 = vpop.permute.xlu0 %3471 }
0x110a   :  { %12442 = vpow2.f32 %v3411_v33  ;;  %v3493_v45 = vand.u32 %v3472_v48, %v13600_v3 }
0x110c   :  { %v12439_v0 = vpop.eup %12438  ;;  %11134 = vmatpush3.bf16.msra.mxu1 %v3493_v45 }
0x110d   :  { %v3425_v36 = vsel %vm792_vm5, %v12439_v0, 0.0  ;;  %11177 = vmatprep.subr.bf16.mxu1 %v17814_v9 }
0x110e   :  { %3426 = vadd.xlane.f32.xlu1 %v3425_v36 }
0x1110   :  { %v12441_v49 = vpop.eup %12440 }
0x1111   :  { %v3431_v38 = vsel %vm792_vm5, %v12441_v49, 0.0 }
0x1112   :  { %3432 = vadd.xlane.f32.xlu1 %v3431_v38 }
0x1114   :  { %v14821_v32 = vpop.eup %12442 }
0x1115   :  { %v3437_v8 = vsel %vm792_vm5, %v14821_v32, 0.0 }
0x1116   :  { %3438 = vadd.xlane.f32.xlu0 %v3437_v8 }
0x1123   :  { %3682 = vrot.lane.b32.xlu1 %v13757_v10, %s12981_s2 }
0x1127   :  { %3684 = vrot.lane.b32.xlu1 %v13760_v7, %s12981_s2 }
0x112b   :  { %3686 = vrot.lane.b32.xlu1 %v14245_v2, %s12981_s2 }
0x112c   :  { %3680 = vrot.lane.b32.xlu0 %v13753_v22, %s12981_s2 }
0x112f   :  { %3668 = vrot.lane.b32.xlu1 %v13748_v30, %s12982_s15 }
0x115a   :  { %v3415_v47 = vpop.xlane.xlu1 %3414 }
0x115b   :  { %12444 = vrcp.f32 %v3415_v47 }
0x115c   :  { %v3418_v53 = vpop.xlane.xlu0 %3417 }
0x115d   :  { %12446 = vrcp.f32 %v3418_v53 }
0x115e   :  { %v3679_v62 = vpop.permute.xlu1 %3678 }
0x115f   :  { %v3704_v26 = vsel %vm689_vm4, %v3679_v62, 0 }
0x1162   :  { %v3421_v42 = vpop.xlane.xlu0 %3420 }
0x1163   :  { %12448 = vrcp.f32 %v3421_v42 }
0x1165   :  { %v12445_v43 = vpop.eup %12444 }
0x1166   :  { %v3424_v18 = vpop.xlane.xlu0 %3423  ;;  %v3449_v11 = vmul.f32 %v12445_v43, %v14785_v5 }
0x1167   :  { %v12447_v59 = vpop.eup %12446  ;;  %12450 = vrcp.f32 %v3424_v18 }
0x1168   :  { %v3450_v58 = vmul.f32 %v12447_v59, %v14789_v29 }
0x116a   :  { %v3458_v13 = vpack.c.bf16 %v3450_v58, %v3449_v11 }
0x116c   :  { %11136 = vmatmul.mubr.msk.bf16.vlgmr.msra.gmra.mrb[216].mxu1 %vm792_vm5, %v3458_v13 }
0x116d   :  { %11178 = vmatpush3.bf16.xpose.msra.mxu1 %v3704_v26  ;;  %11139 = vmatprep.mubr.msk.bf16.mxu1 %vm12971_vm1, %v17814_v9  ;;  %v12449_v33 = vpop.eup %12448 }
0x116e   :  { %11179 = vmatprep.subr.bf16.mxu1 %v17814_v9  ;;  %v3451_v45 = vmul.f32 %v12449_v33, %v14795_v27 }
0x1171   :  { %v12451_v48 = vpop.eup %12450 }
0x1172   :  { %v3452_v5 = vmul.f32 %v12451_v48, %v14799_v15 }
0x1174   :  { %v3459_v36 = vpack.c.bf16 %v3452_v5, %v3451_v45 }
0x1176   :  { %11140 = vmatmul.mubr.msk.bf16.gmra.mrb[220].mxu1 %vm792_vm5, %v3459_v36 }
0x1177   :  { %11143 = vmatprep.mubr.msk.bf16.mxu1 %vm12971_vm1, %v17814_v9 }
0x1191   :  { %v3430_v29 = vpop.xlane.xlu0 %3429 }
0x1192   :  { %12452 = vrcp.f32 %v3430_v29 }
0x1195   :  { %v3436_v8 = vpop.xlane.xlu0 %3435 }
0x119b   :  { %v3427_v38 = vpop.xlane.xlu1 %3426 }
0x119c   :  { %12454 = vrcp.f32 %v3427_v38  ;;  %v12453_v42 = vpop.eup %12452 }
0x119d   :  { %v3454_v15 = vmul.f32 %v12453_v42, %v14807_v39 }
0x119f   :  { %v3433_v47 = vpop.xlane.xlu1 %3432 }
0x11a0   :  { %12456 = vrcp.f32 %v3433_v47 }
0x11a1   :  { %12458 = vrcp.f32 %v3436_v8 }
0x11a3   :  { %v3439_v53 = vpop.xlane.xlu0 %3438  ;;  %v3683_v13 = vpop.permute.xlu1 %3682 }
0x11a4   :  { %12460 = vrcp.f32 %v3439_v53  ;;  %v3710_v39 = vsel %vm689_vm4, %v3683_v13, 0 }
0x11a6   :  { %v12455_v43 = vpop.eup %12454 }
0x11a7   :  { %v3681_v27 = vpop.permute.xlu0 %3680  ;;  %v3453_v18 = vmul.f32 %v12455_v43, %v12439_v0  ;;  %v3685_v45 = vpop.permute.xlu1 %3684 }
0x11a8   :  { %v3707_v59 = vsel %vm689_vm4, %v3681_v27, 0  ;;  %v3713_v36 = vsel %vm689_vm4, %v3685_v45, 0 }
0x11a9   :  { %11180 = vmatpush3.bf16.xpose.msra.mxu1 %v3707_v59  ;;  %v3460_v11 = vpack.c.bf16 %v3454_v15, %v3453_v18 }
0x11aa   :  { %v12457_v58 = vpop.eup %12456  ;;  %11181 = vmatprep.subr.bf16.mxu1 %v17814_v9 }
0x11ab   :  { %11144 = vmatmul.mubr.msk.bf16.gmra.mrb[224].mxu1 %vm792_vm5, %v3460_v11  ;;  %v12459_v62 = vpop.eup %12458  ;;  %v3455_v26 = vmul.f32 %v12457_v58, %v12441_v49 }
0x11ac   :  { %11147 = vmatprep.mubr.msk.bf16.mxu1 %vm12971_vm1, %v17814_v9  ;;  %v3456_v0 = vmul.f32 %v12459_v62, %v14812_v19  ;;  %v3687_v19 = vpop.permute.xlu1 %3686 }
0x11ad   :  { %v3716_v29 = vsel %vm689_vm4, %v3687_v19, 0 }
0x11ae   :  { %v3461_v33 = vpack.c.bf16 %v3456_v0, %v3455_v26  ;;  %v12461_v48 = vpop.eup %12460 }
0x11af   :  { %v3457_v5 = vmul.f32 %v12461_v48, %v14821_v32 }
0x11b0   :  { %v3669_v38 = vpop.permute.xlu1 %3668 }
0x11b1   :  { %11182 = vmatpush3.bf16.xpose.msra.mxu1 %v3710_v39  ;;  %v3462_v49 = vpack.c.bf16 %v3457_v5, %v3457_v5 }
0x11b2   :  { %11183 = vmatprep.subr.bf16.mxu1 %v17814_v9 }
0x11b3   :  { %11148 = vmatmul.mubr.msk.bf16.gmra.mrb[228].mxu1 %vm792_vm5, %v3461_v33 }
0x11b4   :  { %11151 = vmatprep.mubr.msk.bf16.mxu1 %vm12971_vm1, %v17814_v9 }
0x11b9   :  { %11184 = vmatpush3.bf16.xpose.msra.mxu1 %v3713_v36 }
0x11ba   :  { %11185 = vmatprep.subr.bf16.mxu1 %v17814_v9 }
0x11bb   :  { %11152 = vmatmul.mubr.msk.bf16.gmra.mrb[232].mxu1 %vm792_vm5, %v3462_v49 }
0x11bc   :  { %11187 = vmatprep.mubr.msk.bf16.mxu1 %vm12971_vm1, %v17814_v9 }
0x11c1   :  { %11186 = vmatpush3.bf16.xpose.msra.mxu1 %v3716_v29 }
0x11c2   :  { %11237 = vmatprep.subr.bf16.mxu1 %v17814_v9 }
0x11c8   :  { %11188 = vmatmul.mubr.msk.bf16.vlgmr.msra.gmra.mrb[236].mxu1 %vm689_vm4, %v3669_v38 }
0x11c9   :  { %11191 = vmatprep.mubr.msk.bf16.mxu1 %vm12971_vm1, %v17814_v9  ;;  %11238 = vmatpush3.bf16.msra.mxu1 %v14318_v37 }
0x11ca   :  { %11299 = vmatprep.subr.bf16.mxu1 %v17814_v9 }
0x123f   :  { %v3529_v32 = vpop.f32.mrb[216].mxu1 }
0x1240   :  { %v11137_v8 = vpop.f32.mrb[217].mxu1 }
0x1241   :  { %v3532_v47 = vpop.f32.mrb[218].mxu1 }
0x1242   :  { %v3567_v53 = vpack.c.bf16 %v3532_v47, %v3529_v32  ;;  %v11138_v42 = vpop.f32.mrb[219].mxu1 }
0x1244   :  { %11158 = vmatmul.mubr.msk.bf16.vlgmr.msra.gmra.mrb[236].mxu0 %vm689_vm4, %v3567_v53 }
0x1245   :  { %11161 = vmatprep.mubr.msk.bf16.mxu0 %vm12971_vm1, %v17814_v9 }
0x1249   :  { %v3537_v43 = vpop.f32.mrb[220].mxu1 }
0x124a   :  { %v11141_v27 = vpop.f32.mrb[221].mxu1 }
0x124b   :  { %v3540_v18 = vpop.f32.mrb[222].mxu1 }
0x124c   :  { %v3568_v15 = vpack.c.bf16 %v3540_v18, %v3537_v43  ;;  %v11142_v59 = vpop.f32.mrb[223].mxu1 }
0x124e   :  { %11162 = vmatmul.mubr.msk.bf16.gmra.mrb[240].mxu0 %vm689_vm4, %v3568_v15 }
0x124f   :  { %11165 = vmatprep.mubr.msk.bf16.mxu0 %vm12971_vm1, %v17814_v9 }
0x127e   :  { %v3545_v37 = vpop.f32.mrb[224].mxu1 }
0x127f   :  { %v11145_v11 = vpop.f32.mrb[225].mxu1 }
0x1280   :  { %v3548_v58 = vpop.f32.mrb[226].mxu1 }
0x1281   :  { %v3569_v62 = vpack.c.bf16 %v3548_v58, %v3545_v37  ;;  %v11146_v13 = vpop.f32.mrb[227].mxu1 }
0x1283   :  { %11166 = vmatmul.mubr.msk.bf16.gmra.mrb[244].mxu0 %vm689_vm4, %v3569_v62 }
0x1284   :  { %11169 = vmatprep.mubr.msk.bf16.mxu0 %vm12971_vm1, %v17814_v9 }
0x1286   :  { %v3553_v26 = vpop.f32.mrb[228].mxu1 }
0x1287   :  { %v11149_v0 = vpop.f32.mrb[229].mxu1 }
0x1288   :  { %v3556_v39 = vpop.f32.mrb[230].mxu1 }
0x1289   :  { %v3570_v33 = vpack.c.bf16 %v3556_v39, %v3553_v26  ;;  %v11150_v48 = vpop.f32.mrb[231].mxu1 }
0x128b   :  { %11170 = vmatmul.mubr.msk.bf16.gmra.mrb[248].mxu0 %vm689_vm4, %v3570_v33 }
0x128c   :  { %11173 = vmatprep.mubr.msk.bf16.mxu0 %vm12971_vm1, %v17814_v9 }
0x128e   :  { %v3561_v45 = vpop.f32.mrb[232].mxu1 }
0x128f   :  { %v11153_v5 = vpop.f32.mrb[233].mxu1  ;;  %v3571_v49 = vpack.c.bf16 %v3561_v45, %v3561_v45 }
0x1290   :  { %v3564_v36 = vpop.f32.mrb[234].mxu1 }
0x1291   :  { %v11154_v19 = vpop.f32.mrb[235].mxu1 }
0x1293   :  { %11174 = vmatmul.mubr.msk.bf16.gmra.mrb[252].mxu0 %vm689_vm4, %v3571_v49 }
0x1294   :  { %11217 = vmatprep.mubr.msk.bf16.mxu0 %vm12971_vm1, %v17814_v9 }
0x129b   :  { %v3752_v29 = vpop.f32.mrb[236].mxu1 }
0x129c   :  { %v11189_v38 = vpop.f32.mrb[237].mxu1  ;;  %v3790_v32 = vsel %vm792_vm5, %v3752_v29, -inf }
0x129d   :  { %3791 = vmax.xlane.f32.xlu1 %v3790_v32  ;;  %v3755_v8 = vpop.f32.mrb[238].mxu1 }
0x129e   :  { %v11190_v47 = vpop.f32.mrb[239].mxu1  ;;  %v3793_v53 = vsel %vm792_vm5, %v3755_v8, -inf }
0x129f   :  { %3794 = vmax.xlane.f32.xlu0 %v3793_v53 }
0x12ae   :  { %3672 = vrot.lane.b32.xlu1 %v13757_v10, %s12982_s15 }
0x12b2   :  { %3674 = vrot.lane.b32.xlu1 %v13760_v7, %s12982_s15 }
0x12b5   :  { %3670 = vrot.lane.b32.xlu0 %v13753_v22, %s12982_s15 }
0x12b6   :  { %3896 = vrot.lane.b32.xlu1 %v13753_v22, %s12983_s16 }
0x12b9   :  { %3676 = vrot.lane.b32.xlu0 %v14245_v2, %s12982_s15 }
0x12ba   :  { %3898 = vrot.lane.b32.xlu1 %v13757_v10, %s12983_s16 }
0x12bd   :  { %3894 = vrot.lane.b32.xlu0 %v13748_v30, %s12983_s16 }
0x1317   :  { %v3621_v42 = vpop.f32.mrb[236].mxu0 }
0x1318   :  { %v14904_v43 = vadd.f32 %v3621_v42, %v14741_v55  ;;  %v11159_v27 = vpop.f32.mrb[237].mxu0 }
0x1319   :  { %v3624_v18 = vpop.f32.mrb[238].mxu0 }
0x131a   :  { %v14907_v15 = vadd.f32 %v3624_v18, %v14743_v4  ;;  %v11160_v59 = vpop.f32.mrb[239].mxu0 }
0x1321   :  { %v3629_v22 = vpop.f32.mrb[240].mxu0 }
0x1322   :  { %v14910_v37 = vadd.f32 %v3629_v22, %v14745_v56  ;;  %v11163_v11 = vpop.f32.mrb[241].mxu0 }
0x1323   :  { %v3632_v58 = vpop.f32.mrb[242].mxu0 }
0x1324   :  { %v14913_v10 = vadd.f32 %v3632_v58, %v14747_v12  ;;  %v11164_v30 = vpop.f32.mrb[243].mxu0 }
0x132a   :  { %v3792_v62 = vpop.xlane.xlu1 %3791 }
0x132b   :  { %v3817_v13 = vsub.f32 %v3752_v29, %v3792_v62 }
0x132c   :  { %v3795_v55 = vpop.xlane.xlu0 %3794 }
0x132d   :  { %v3826_v26 = vmul.f32 1.442695, %v3817_v13  ;;  %v3818_v0 = vsub.f32 %v3755_v8, %v3795_v55 }
0x132e   :  { %v3673_v39 = vpop.permute.xlu1 %3672 }
0x132f   :  { %12462 = vpow2.f32 %v3826_v26  ;;  %v3828_v4 = vmul.f32 1.442695, %v3818_v0 }
0x1330   :  { %v3671_v33 = vpop.permute.xlu0 %3670 }
0x1331   :  { %12464 = vpow2.f32 %v3828_v4  ;;  %11192 = vmatmul.mubr.msk.bf16.gmra.mrb[240].mxu1 %vm689_vm4, %v3671_v33 }
0x1332   :  { %11195 = vmatprep.mubr.msk.bf16.mxu1 %vm12971_vm1, %v17814_v9  ;;  %v3675_v56 = vpop.permute.xlu1 %3674 }
0x1334   :  { %v3677_v48 = vpop.permute.xlu0 %3676 }
0x1336   :  { %v3897_v5 = vpop.permute.xlu1 %3896 }
0x1338   :  { %v3895_v12 = vpop.permute.xlu0 %3894 }
0x1339   :  { %v12463_v45 = vpop.eup %12462  ;;  %11196 = vmatmul.mubr.msk.bf16.gmra.mrb[244].mxu1 %vm689_vm4, %v3673_v39  ;;  %11208 = vmatpush3.bf16.msra.mxu0 %v3895_v12 }
0x133a   :  { %v3844_v36 = vsel %vm792_vm5, %v12463_v45, 0.0  ;;  %11209 = vmatprep.subr.bf16.mxu0 %v17814_v9  ;;  %11199 = vmatprep.mubr.msk.bf16.mxu1 %vm12971_vm1, %v17814_v9  ;;  %v3899_v29 = vpop.permute.xlu1 %3898 }
0x133b   :  { %v12465_v49 = vpop.eup %12464  ;;  %3845 = vadd.xlane.f32.xlu1 %v3844_v36 }
0x133c   :  { %v3847_v19 = vsel %vm792_vm5, %v12465_v49, 0.0 }
0x133d   :  { %3848 = vadd.xlane.f32.xlu0 %v3847_v19  ;;  %11210 = vmatpush3.bf16.msra.mxu0 %v3897_v5 }
0x133e   :  { %11211 = vmatprep.subr.bf16.mxu0 %v17814_v9 }
0x1341   :  { %11200 = vmatmul.mubr.msk.bf16.gmra.mrb[248].mxu1 %vm689_vm4, %v3675_v56  ;;  %11212 = vmatpush3.bf16.msra.mxu0 %v3899_v29 }
0x1342   :  { %11203 = vmatprep.mubr.msk.bf16.mxu1 %vm12971_vm1, %v17814_v9  ;;  %11213 = vmatprep.subr.bf16.mxu0 %v17814_v9 }
0x1349   :  { %11204 = vmatmul.mubr.msk.bf16.gmra.mrb[252].mxu1 %vm689_vm4, %v3677_v48 }
0x134a   :  { %11239 = vmatprep.mubr.msk.bf16.mxu1 %vm12971_vm1, %v17814_v9 }
0x134c   :  { %3902 = vrot.lane.b32.xlu1 %v14245_v2, %s12983_s16 }
0x1353   :  { %3900 = vrot.lane.b32.xlu0 %v13760_v7, %s12983_s16 }
0x1356   :  { %v3637_v38 = vpop.f32.mrb[244].mxu0 }
0x1357   :  { %v14937_v32 = vadd.f32 %v3637_v38, %v14749_v40  ;;  %v11167_v8 = vpop.f32.mrb[245].mxu0 }
0x1358   :  { %v3640_v47 = vpop.f32.mrb[246].mxu0 }
0x1359   :  { %v14940_v53 = vadd.f32 %v3640_v47, %v14751_v23  ;;  %v11168_v42 = vpop.f32.mrb[247].mxu0 }
0x135e   :  { %v3645_v27 = vpop.f32.mrb[248].mxu0 }
0x135f   :  { %v14943_v18 = vadd.f32 %v3645_v27, %v14753_v60  ;;  %v11171_v59 = vpop.f32.mrb[249].mxu0 }
0x1360   :  { %v3648_v22 = vpop.f32.mrb[250].mxu0 }
0x1361   :  { %v14946_v2 = vadd.f32 %v3648_v22, %v14755_v28  ;;  %v11172_v7 = vpop.f32.mrb[251].mxu0 }
0x1366   :  { %v3653_v11 = vpop.f32.mrb[252].mxu0 }
0x1367   :  { %v14949_v40 = vadd.f32 %v3653_v11, %v14757_v25  ;;  %v11175_v58 = vpop.f32.mrb[253].mxu0 }
0x1368   :  { %v3656_v30 = vpop.f32.mrb[254].mxu0 }
0x1369   :  { %v11176_v62 = vpop.f32.mrb[255].mxu0 }
0x13c8   :  { %v3846_v23 = vpop.xlane.xlu1 %3845 }
0x13c9   :  { %12466 = vrcp.f32 %v3846_v23 }
0x13ca   :  { %v3849_v13 = vpop.xlane.xlu0 %3848 }
0x13cb   :  { %12468 = vrcp.f32 %v3849_v13 }
0x13cc   :  { %v3903_v55 = vpop.permute.xlu1 %3902 }
0x13cd   :  { %v3924_v28 = vand.u32 %v3903_v55, %v13600_v3 }
0x13ce   :  { %v3901_v60 = vpop.permute.xlu0 %3900 }
0x13cf   :  { %11214 = vmatpush3.bf16.msra.mxu0 %v3901_v60 }
0x13d0   :  { %11215 = vmatprep.subr.bf16.mxu0 %v17814_v9 }
0x13d3   :  { %v12467_v26 = vpop.eup %12466  ;;  %11216 = vmatpush3.bf16.msra.mxu0 %v3924_v28 }
0x13d4   :  { %11259 = vmatprep.subr.bf16.mxu0 %v17814_v9  ;;  %v3880_v0 = vmul.f32 %v12467_v26, %v12463_v45 }
0x13d5   :  { %v12469_v25 = vpop.eup %12468 }
0x13d6   :  { %v3881_v39 = vmul.f32 %v12469_v25, %v12465_v49 }
0x13d8   :  { %v3889_v4 = vpack.c.bf16 %v3881_v39, %v3880_v0 }
0x13da   :  { %11218 = vmatmul.mubr.msk.bf16.vlgmr.msra.gmra.mrb[0].mxu0 %vm792_vm5, %v3889_v4 }
0x13db   :  { %11221 = vmatprep.mubr.msk.bf16.mxu0 %vm12971_vm1, %v17814_v9 }
0x1404   :  { %v3760_v33 = vpop.f32.mrb[240].mxu1 }
0x1405   :  { %v11193_v56 = vpop.f32.mrb[241].mxu1  ;;  %v3796_v48 = vsel %vm792_vm5, %v3760_v33, -inf }
0x1406   :  { %3797 = vmax.xlane.f32.xlu0 %v3796_v48  ;;  %v3763_v12 = vpop.f32.mrb[242].mxu1 }
0x1407   :  { %v11194_v5 = vpop.f32.mrb[243].mxu1  ;;  %v3799_v36 = vsel %vm792_vm5, %v3763_v12, -inf }
0x1408   :  { %3800 = vmax.xlane.f32.xlu1 %v3799_v36 }
0x140c   :  { %v3768_v19 = vpop.f32.mrb[244].mxu1 }
0x140d   :  { %v11197_v29 = vpop.f32.mrb[245].mxu1  ;;  %v3802_v45 = vsel %vm792_vm5, %v3768_v19, -inf }
0x140e   :  { %3803 = vmax.xlane.f32.xlu0 %v3802_v45  ;;  %v3771_v49 = vpop.f32.mrb[246].mxu1 }
0x140f   :  { %v11198_v38 = vpop.f32.mrb[247].mxu1  ;;  %v3805_v8 = vsel %vm792_vm5, %v3771_v49, -inf }
0x1412   :  { %3806 = vmax.xlane.f32.xlu0 %v3805_v8 }
0x1414   :  { %v3776_v47 = vpop.f32.mrb[248].mxu1 }
0x1415   :  { %v11201_v42 = vpop.f32.mrb[249].mxu1  ;;  %v3808_v27 = vsel %vm792_vm5, %v3776_v47, -inf }
0x1416   :  { %3809 = vmax.xlane.f32.xlu0 %v3808_v27  ;;  %v3779_v59 = vpop.f32.mrb[250].mxu1 }
0x1417   :  { %v11202_v22 = vpop.f32.mrb[251].mxu1  ;;  %v3811_v7 = vsel %vm792_vm5, %v3779_v59, -inf }
0x1418   :  { %3812 = vmax.xlane.f32.xlu1 %v3811_v7 }
0x141c   :  { %v3784_v11 = vpop.f32.mrb[252].mxu1 }
0x141d   :  { %v11205_v58 = vpop.f32.mrb[253].mxu1  ;;  %v3814_v30 = vsel %vm792_vm5, %v3784_v11, -inf }
0x141e   :  { %3815 = vmax.xlane.f32.xlu0 %v3814_v30  ;;  %v3787_v62 = vpop.f32.mrb[254].mxu1 }
0x141f   :  { %v11206_v23 = vpop.f32.mrb[255].mxu1 }
0x1493   :  { %v3798_v13 = vpop.xlane.xlu0 %3797 }
0x1494   :  { %v3819_v55 = vsub.f32 %v3760_v33, %v3798_v13 }
0x1495   :  { %v3801_v60 = vpop.xlane.xlu1 %3800 }
0x1496   :  { %v3830_v28 = vmul.f32 1.442695, %v3819_v55  ;;  %v3820_v26 = vsub.f32 %v3763_v12, %v3801_v60 }
0x1498   :  { %12470 = vpow2.f32 %v3830_v28  ;;  %v3832_v25 = vmul.f32 1.442695, %v3820_v26  ;;  %v4099_v28 = vadd.f32 %v14468_v17, %v13095_v21  ;;  %v4101_v21 = vadd.f32 %v14474_v20, %v13109_v31 }
0x1499   :  { %v4102_v20 = vadd.f32 %v14477_v6, %v13111_v34  ;;  %v4104_v34 = vadd.f32 %v14527_v57, %v13125_v44  ;;  %v4106_v44 = vadd.f32 %v14537_v16, %v13139_v54 }
0x149a   :  { %12472 = vpow2.f32 %v3832_v25 }
0x149b   :  { %v3804_v0 = vpop.xlane.xlu0 %3803 }
0x149c   :  { %v3821_v39 = vsub.f32 %v3768_v19, %v3804_v0 }
0x149e   :  { %v3834_v4 = vmul.f32 1.442695, %v3821_v39 }
0x149f   :  { %v3807_v56 = vpop.xlane.xlu0 %3806 }
0x14a0   :  { %12474 = vpow2.f32 %v3834_v4  ;;  %v3822_v48 = vsub.f32 %v3771_v49, %v3807_v56  ;;  %v4100_v4 = vadd.f32 %v14471_v46, %v13097_v24  ;;  %v4103_v56 = vadd.f32 %v14522_v63, %v13123_v41 }
0x14a1   :  { %v4105_v41 = vadd.f32 %v14532_v14, %v13137_v51  ;;  %v4107_v51 = vadd.f32 %v14542_v35, %v13151_v61 }
0x14a2   :  { %v14964_v5 = vpop.eup %12470  ;;  %v3836_v36 = vmul.f32 1.442695, %v3822_v48 }
0x14a3   :  { %v3810_v29 = vpop.xlane.xlu0 %3809  ;;  %v3850_v45 = vsel %vm792_vm5, %v14964_v5, 0.0 }
0x14a4   :  { %v14968_v33 = vpop.eup %12472  ;;  %12476 = vpow2.f32 %v3836_v36  ;;  %v3823_v12 = vsub.f32 %v3776_v47, %v3810_v29  ;;  %3851 = vadd.xlane.f32.xlu1 %v3850_v45 }
0x14a5   :  { %v3813_v38 = vpop.xlane.xlu1 %3812  ;;  %v3853_v19 = vsel %vm792_vm5, %v14968_v33, 0.0 }
0x14a6   :  { %v3838_v8 = vmul.f32 1.442695, %v3823_v12  ;;  %v3824_v42 = vsub.f32 %v3779_v59, %v3813_v38  ;;  %3854 = vadd.xlane.f32.xlu0 %v3853_v19 }
0x14a8   :  { %12478 = vpow2.f32 %v3838_v8  ;;  %v3840_v49 = vmul.f32 1.442695, %v3824_v42 }
0x14aa   :  { %v14972_v27 = vpop.eup %12474  ;;  %12480 = vpow2.f32 %v3840_v49 }
0x14ab   :  { %v3816_v22 = vpop.xlane.xlu0 %3815  ;;  %v3856_v7 = vsel %vm792_vm5, %v14972_v27, 0.0 }
0x14ac   :  { %v3825_v58 = vsub.f32 %v3784_v11, %v3816_v22  ;;  %3857 = vadd.xlane.f32.xlu1 %v3856_v7  ;;  %v14988_v11 = vld [vmem:[%s17788_s8 + $0x2] ss:$0 sm:$0xff] }
0x14ad   :  { %v3960_v47 = vpop.f32.mrb[0].mxu0  ;;  %v15001_v39 = vadd.f32 %v14988_v11, %v4099_v28  ;;  %v15010_v36 = vadd.f32 %v14988_v11, %v4101_v21  ;;  %v15019_v24 = vadd.f32 %v14988_v11, %v4100_v4  ;;  %v15026_v63 = vadd.f32 %v14988_v11, %v4103_v56 }
0x14ae   :  { %v14976_v30 = vpop.eup %12476  ;;  %v3842_v62 = vmul.f32 1.442695, %v3825_v58  ;;  %v11219_v23 = vpop.f32.mrb[1].mxu0  ;;  %v15033_v45 = vadd.f32 %v14988_v11, %v4102_v20  ;;  %v15040_v12 = vadd.f32 %v14988_v11, %v4105_v41  ;;  %v15047_v38 = vadd.f32 %v14988_v11, %v4104_v34 }
0x14af   :  { %v3963_v13 = vpop.f32.mrb[2].mxu0  ;;  %v3859_v59 = vsel %vm792_vm5, %v14976_v30, 0.0  ;;  %v4142_v48 = vsel %vm224_vm3, %v15001_v39, 0.0  ;;  %v4148_v46 = vsel %vm224_vm3, %v15010_v36, 0.0  ;;  %v4145_v6 = vsel %vm224_vm3, %v15019_v24, 0.0 }
0x14b0   :  { %12482 = vpow2.f32 %v3842_v62  ;;  %v3998_v55 = vpack.c.bf16 %v3963_v13, %v3960_v47  ;;  %3860 = vadd.xlane.f32.xlu0 %v3859_v59  ;;  %v11220_v60 = vpop.f32.mrb[3].mxu0  ;;  %v4154_v14 = vsel %vm224_vm3, %v15026_v63, 0.0  ;;  %v4151_v57 = vsel %vm224_vm3, %v15033_v45, 0.0 }
0x14b1   :  { %v4160_v61 = vsel %vm224_vm3, %v15040_v12, 0.0  ;;  %v15052_v35 = vadd.f32 %v14988_v11, %v4107_v51  ;;  %v4157_v19 = vsel %vm224_vm3, %v15047_v38, 0.0  ;;  %v15057_v8 = vadd.f32 %v14988_v11, %v4106_v44 }
0x14b2   :  { %v14982_v26 = vpop.eup %12478  ;;  %11240 = vmatmul.mubr.msk.bf16.vlgmr.msra.gmra.mrb[0].mxu1 %vm689_vm4, %v3998_v55 }
0x14b3   :  { %v3862_v25 = vsel %vm792_vm5, %v14982_v26, 0.0  ;;  %11243 = vmatprep.mubr.msk.bf16.mxu1 %vm12971_vm1, %v17814_v9  ;;  %v4166_v54 = vsel %vm224_vm3, %v15052_v35, 0.0  ;;  %v4163_v16 = vsel %vm224_vm3, %v15057_v8, 0.0 }
0x14b4   :  { %v14994_v0 = vpop.eup %12480  ;;  %3863 = vadd.xlane.f32.xlu1 %v3862_v25 }
0x14b5   :  { %v3865_v17 = vsel %vm792_vm5, %v14994_v0, 0.0 }
0x14b6   :  { %3866 = vadd.xlane.f32.xlu0 %v3865_v17 }
0x14ba   :  { %v15012_v31 = vpop.eup %12482  ;;  %4143 = vadd.xlane.f32.xlu0 %v4142_v48 }
0x14bb   :  { %v3868_v29 = vsel %vm792_vm5, %v15012_v31, 0.0 }
0x14bc   :  { %3869 = vadd.xlane.f32.xlu1 %v3868_v29 }
0x14be   :  { %4149 = vadd.xlane.f32.xlu0 %v4148_v46 }
0x14c0   :  { %4146 = vadd.xlane.f32.xlu1 %v4145_v6 }
0x14c2   :  { %4155 = vadd.xlane.f32.xlu0 %v4154_v14 }
0x14c4   :  { %4152 = vadd.xlane.f32.xlu1 %v4151_v57 }
0x14c6   :  { %4161 = vadd.xlane.f32.xlu0 %v4160_v61 }
0x14c8   :  { %4158 = vadd.xlane.f32.xlu1 %v4157_v19 }
0x14ca   :  { %4167 = vadd.xlane.f32.xlu0 %v4166_v54 }
0x14cc   :  { %4164 = vadd.xlane.f32.xlu1 %v4163_v16 }
0x1531   :  { %v3852_v42 = vpop.xlane.xlu1 %3851 }
0x1532   :  { %12484 = vrcp.f32 %v3852_v42 }
0x1533   :  { %v3855_v49 = vpop.xlane.xlu0 %3854 }
0x1534   :  { %12486 = vrcp.f32 %v3855_v49 }
0x1539   :  { %v3858_v22 = vpop.xlane.xlu1 %3857 }
0x153a   :  { %12488 = vrcp.f32 %v3858_v22 }
0x153c   :  { %v12485_v7 = vpop.eup %12484 }
0x153d   :  { %v3861_v58 = vpop.xlane.xlu0 %3860  ;;  %v3882_v62 = vmul.f32 %v12485_v7, %v14964_v5 }
0x153e   :  { %v12487_v47 = vpop.eup %12486  ;;  %12490 = vrcp.f32 %v3861_v58 }
0x153f   :  { %v3883_v23 = vmul.f32 %v12487_v47, %v14968_v33 }
0x1541   :  { %v3890_v13 = vpack.c.bf16 %v3883_v23, %v3882_v62  ;;  %v3864_v59 = vpop.xlane.xlu1 %3863 }
0x1542   :  { %12492 = vrcp.f32 %v3864_v59 }
0x1543   :  { %11222 = vmatmul.mubr.msk.bf16.gmra.mrb[4].mxu0 %vm792_vm5, %v3890_v13  ;;  %v3867_v55 = vpop.xlane.xlu0 %3866 }
0x1544   :  { %12494 = vrcp.f32 %v3867_v55  ;;  %11225 = vmatprep.mubr.msk.bf16.mxu0 %vm12971_vm1, %v17814_v9  ;;  %v12489_v60 = vpop.eup %12488 }
0x1545   :  { %v3884_v17 = vmul.f32 %v12489_v60, %v14972_v27 }
0x1547   :  { %v4144_v28 = vpop.xlane.xlu0 %4143 }
0x1548   :  { %v12491_v25 = vpop.eup %12490  ;;  %v4196_v21 = vmul.f32 0.03125, %v4144_v28 }
0x1549   :  { %v3885_v5 = vmul.f32 %v12491_v25, %v14976_v30  ;;  %v3870_v4 = vpop.xlane.xlu1 %3869 }
0x154a   :  { %v15071_v33 = vsub.f32 %v15001_v39, %v4196_v21  ;;  %12496 = vrcp.f32 %v3870_v4 }
0x154b   :  { %v3891_v56 = vpack.c.bf16 %v3885_v5, %v3884_v17  ;;  %v4150_v48 = vpop.xlane.xlu0 %4149 }
0x154c   :  { %v4198_v20 = vmul.f32 0.03125, %v4150_v48  ;;  %v4232_v29 = vmul.f32 %v15071_v33, %v15071_v33  ;;  %v12493_v41 = vpop.eup %12492 }
0x154d   :  { %11226 = vmatmul.mubr.msk.bf16.gmra.mrb[8].mxu0 %vm792_vm5, %v3891_v56  ;;  %v3886_v44 = vmul.f32 %v12493_v41, %v14982_v26  ;;  %v4147_v55 = vpop.xlane.xlu1 %4146 }
0x154e   :  { %v12495_v46 = vpop.eup %12494  ;;  %v15077_v34 = vsub.f32 %v15010_v36, %v4198_v20  ;;  %v4250_v27 = vsel %vm224_vm3, %v4232_v29, 0.0  ;;  %11229 = vmatprep.mubr.msk.bf16.mxu0 %vm12971_vm1, %v17814_v9  ;;  %v4197_v28 = vmul.f32 0.03125, %v4147_v55 }
0x154f   :  { %v3887_v30 = vmul.f32 %v12495_v46, %v14994_v0  ;;  %4251 = vadd.xlane.f32.xlu0 %v4250_v27  ;;  %v4156_v6 = vpop.xlane.xlu0 %4155 }
0x1550   :  { %v4200_v51 = vmul.f32 0.03125, %v4156_v6  ;;  %v4234_v14 = vmul.f32 %v15077_v34, %v15077_v34  ;;  %v15114_v5 = vsub.f32 %v15019_v24, %v4197_v28 }
0x1551   :  { %v3892_v19 = vpack.c.bf16 %v3887_v30, %v3886_v44  ;;  %v4153_v60 = vpop.xlane.xlu1 %4152 }
0x1552   :  { %v15087_v57 = vsub.f32 %v15026_v63, %v4200_v51  ;;  %v4256_v61 = vsel %vm224_vm3, %v4234_v14, 0.0  ;;  %v4199_v48 = vmul.f32 0.03125, %v4153_v60 }
0x1553   :  { %4257 = vadd.xlane.f32.xlu0 %v4256_v61  ;;  %v4162_v54 = vpop.xlane.xlu0 %4161 }
0x1554   :  { %v12497_v16 = vpop.eup %12496  ;;  %v4202_v42 = vmul.f32 0.03125, %v4162_v54  ;;  %v4236_v0 = vmul.f32 %v15087_v57, %v15087_v57  ;;  %v15125_v30 = vsub.f32 %v15033_v45, %v4199_v48 }
0x1555   :  { %11230 = vmatmul.mubr.msk.bf16.gmra.mrb[12].mxu0 %vm792_vm5, %v3892_v19  ;;  %v3888_v22 = vmul.f32 %v12497_v16, %v15012_v31  ;;  %v4159_v4 = vpop.xlane.xlu1 %4158 }
0x1556   :  { %v15094_v49 = vsub.f32 %v15040_v12, %v4202_v42  ;;  %v4262_v26 = vsel %vm224_vm3, %v4236_v0, 0.0  ;;  %11233 = vmatprep.mubr.msk.bf16.mxu0 %vm12971_vm1, %v17814_v9  ;;  %v4201_v6 = vmul.f32 0.03125, %v4159_v4  ;;  %v4235_v19 = vmul.f32 %v15125_v30, %v15125_v30 }
0x1557   :  { %4263 = vadd.xlane.f32.xlu0 %v4262_v26  ;;  %v4168_v7 = vpop.xlane.xlu0 %4167  ;;  %v3893_v13 = vpack.c.bf16 %v3888_v22, %v3888_v22 }
0x1558   :  { %v4204_v58 = vmul.f32 0.03125, %v4168_v7  ;;  %v4238_v47 = vmul.f32 %v15094_v49, %v15094_v49  ;;  %v15135_v14 = vsub.f32 %v15047_v38, %v4201_v6  ;;  %v4259_v16 = vsel %vm224_vm3, %v4235_v19, 0.0  ;;  %v12156_v7 = vld [vmem:[%s17790_s5] sm:$0xff]  }
0x1559   :  { %11260 = vmatpush3.bf16.msra.mxu0 %v12156_v7 }
0x155a   :  { %v15103_v62 = vsub.f32 %v15052_v35, %v4204_v58  ;;  %v4268_v23 = vsel %vm224_vm3, %v4238_v47, 0.0  ;;  %v4237_v42 = vmul.f32 %v15135_v14, %v15135_v14  ;;  %11261 = vmatprep.subr.bf16.mxu0 %v17814_v9  ;;  %v12157_v58 = vld [vmem:[%s17790_s5 + $0x8] sm:$0xff]  }
0x155b   :  { %4269 = vadd.xlane.f32.xlu0 %v4268_v23 }
0x155c   :  { %v4240_v59 = vmul.f32 %v15103_v62, %v15103_v62  ;;  %v4265_v0 = vsel %vm224_vm3, %v4237_v42, 0.0 }
0x155d   :  { %11234 = vmatmul.mubr.msk.bf16.gmra.mrb[16].mxu0 %vm792_vm5, %v3893_v13 }
0x155e   :  { %v4274_v31 = vsel %vm224_vm3, %v4240_v59, 0.0  ;;  %11263 = vmatprep.mubr.msk.bf16.mxu0 %vm12971_vm1, %v17814_v9  ;;  %11262 = vmatpush3.bf16.msra.mxu0 %v12157_v58 }
0x155f   :  { %4275 = vadd.xlane.f32.xlu0 %v4274_v31  ;;  %11343 = vmatprep.subr.bf16.mxu0 %v17814_v9 }
0x1585   :  { %v4052_v25 = vpop.f32.mrb[0].mxu1 }
0x1586   :  { %v4090_v21 = vadd.f32 %v4052_v25, %v14904_v43  ;;  %v11241_v17 = vpop.f32.mrb[1].mxu1  ;;  %v4233_v43 = vmul.f32 %v15114_v5, %v15114_v5 }
0x1587   :  { %v4055_v56 = vpop.f32.mrb[2].mxu1 }
0x1588   :  { %v4108_v20 = vadd.f32 %v4090_v21, %v13153_v1  ;;  %v4091_v29 = vadd.f32 %v4055_v56, %v14907_v15  ;;  %v11242_v41 = vpop.f32.mrb[3].mxu1  ;;  %v4165_v15 = vpop.xlane.xlu1 %4164  ;;  %v4253_v61 = vsel %vm224_vm3, %v4233_v43, 0.0 }
0x1589   :  { %v4203_v44 = vmul.f32 0.03125, %v4165_v15 }
0x158a   :  { %v4109_v46 = vadd.f32 %v4091_v29, %v13374_v50  ;;  %v15120_v27 = vadd.f32 %v14988_v11, %v4108_v20 }
0x158b   :  { %v15141_v54 = vsub.f32 %v15057_v8, %v4203_v44 }
0x158c   :  { %v4169_v51 = vsel %vm224_vm3, %v15120_v27, 0.0  ;;  %v15130_v1 = vadd.f32 %v14988_v11, %v4109_v46 }
0x158d   :  { %4170 = vadd.xlane.f32.xlu1 %v4169_v51  ;;  %v4239_v26 = vmul.f32 %v15141_v54, %v15141_v54 }
0x158e   :  { %v4172_v50 = vsel %vm224_vm3, %v15130_v1, 0.0 }
0x158f   :  { %4173 = vadd.xlane.f32.xlu0 %v4172_v50  ;;  %v4271_v22 = vsel %vm224_vm3, %v4239_v26, 0.0 }
0x1591   :  { %4254 = vadd.xlane.f32.xlu1 %v4253_v61 }
0x1595   :  { %4260 = vadd.xlane.f32.xlu1 %v4259_v16 }
0x1599   :  { %4266 = vadd.xlane.f32.xlu1 %v4265_v0 }
0x159d   :  { %4272 = vadd.xlane.f32.xlu1 %v4271_v22 }
0x15dc   :  { %v4252_v47 = vpop.xlane.xlu0 %4251 }
0x15dd   :  { %v4304_v23 = vmul.f32 0.03125, %v4252_v47 }
0x15df   :  { %v4322_v55 = vadd.f32 1e-05, %v4304_v23 }
0x15e0   :  { %v4258_v25 = vpop.xlane.xlu0 %4257 }
0x15e1   :  { %12498 = vrsqrt.f32 %v4322_v55  ;;  %v4306_v4 = vmul.f32 0.03125, %v4258_v25 }
0x15e3   :  { %v4324_v46 = vadd.f32 1e-05, %v4306_v4 }
0x15e4   :  { %v4264_v43 = vpop.xlane.xlu0 %4263 }
0x15e5   :  { %v4308_v42 = vmul.f32 0.03125, %v4264_v43 }
0x15e7   :  { %v4326_v47 = vadd.f32 1e-05, %v4308_v42 }
0x15e8   :  { %v4270_v23 = vpop.xlane.xlu0 %4269 }
0x15eb   :  { %v12499_v22 = vpop.eup %12498 }
0x1616   :  { %v3968_v13 = vpop.f32.mrb[4].mxu0 }
0x1617   :  { %v11223_v59 = vpop.f32.mrb[5].mxu0 }
0x1618   :  { %v3971_v31 = vpop.f32.mrb[6].mxu0 }
0x1619   :  { %v3999_v60 = vpack.c.bf16 %v3971_v31, %v3968_v13  ;;  %v11224_v28 = vpop.f32.mrb[7].mxu0  ;;  %v4358_v31 = vmul.f32 %v12499_v22, %v15071_v33 }
0x161a   :  { %v4171_v21 = vpop.xlane.xlu1 %4170  ;;  %v15174_v28 = vld [vmem:[%s17788_s8 + $0x3] ss:$0 sm:$0xff] }
0x161b   :  { %v4205_v17 = vmul.f32 0.03125, %v4171_v21  ;;  %11244 = vmatmul.mubr.msk.bf16.gmra.mrb[4].mxu1 %vm689_vm4, %v3999_v60 }
0x161c   :  { %11247 = vmatprep.mubr.msk.bf16.mxu1 %vm12971_vm1, %v17814_v9 }
0x161d   :  { %v15162_v56 = vsub.f32 %v15120_v27, %v4205_v17 }
0x161e   :  { %v4255_v48 = vpop.xlane.xlu1 %4254 }
0x161f   :  { %v4305_v20 = vmul.f32 0.03125, %v4255_v48  ;;  %v4241_v29 = vmul.f32 %v15162_v56, %v15162_v56  ;;  %v4310_v48 = vmul.f32 0.03125, %v4270_v23 }
0x1620   :  { %v3976_v41 = vpop.f32.mrb[8].mxu0 }
0x1621   :  { %v4323_v6 = vadd.f32 1e-05, %v4305_v20  ;;  %v11227_v51 = vpop.f32.mrb[9].mxu0  ;;  %v4277_v15 = vsel %vm224_vm3, %v4241_v29, 0.0  ;;  %v4380_v20 = vmul.f32 %v15174_v28, %v4358_v31 }
0x1622   :  { %4278 = vadd.xlane.f32.xlu1 %v4277_v15  ;;  %v4261_v50 = vpop.xlane.xlu1 %4260  ;;  %v3979_v44 = vpop.f32.mrb[10].mxu0  ;;  %v4328_v15 = vadd.f32 1e-05, %v4310_v48 }
0x1623   :  { %12500 = vrsqrt.f32 %v4323_v6  ;;  %v4307_v61 = vmul.f32 0.03125, %v4261_v50  ;;  %v4000_v19 = vpack.c.bf16 %v3979_v44, %v3976_v41  ;;  %v11228_v16 = vpop.f32.mrb[11].mxu0  ;;  %v15184_v41 = vld [vmem:[%s17788_s8 + $0x4] ss:$0 sm:$0xff] }
0x1624   :  { %12502 = vrsqrt.f32 %v4324_v46  ;;  %v4402_v44 = vadd.f32 %v15184_v41, %v4380_v20 }
0x1625   :  { %v4325_v0 = vadd.f32 1e-05, %v4307_v61  ;;  %11248 = vmatmul.mubr.msk.bf16.gmra.mrb[8].mxu1 %vm689_vm4, %v4000_v19 }
0x1626   :  { %v4267_v26 = vpop.xlane.xlu1 %4266  ;;  %11251 = vmatprep.mubr.msk.bf16.mxu1 %vm12971_vm1, %v17814_v9 }
0x1627   :  { %12504 = vrsqrt.f32 %v4325_v0  ;;  %v4309_v7 = vmul.f32 0.03125, %v4267_v26 }
0x1628   :  { %v3984_v58 = vpop.f32.mrb[12].mxu0 }
0x1629   :  { %v4327_v13 = vadd.f32 1e-05, %v4309_v7  ;;  %v11231_v59 = vpop.f32.mrb[13].mxu0 }
0x162a   :  { %v4273_v55 = vpop.xlane.xlu1 %4272  ;;  %v3987_v60 = vpop.f32.mrb[14].mxu0 }
0x162b   :  { %12506 = vrsqrt.f32 %v4327_v13  ;;  %v4311_v25 = vmul.f32 0.03125, %v4273_v55  ;;  %v4001_v21 = vpack.c.bf16 %v3987_v60, %v3984_v58  ;;  %v11232_v17 = vpop.f32.mrb[15].mxu0 }
0x162c   :  { %12508 = vrsqrt.f32 %v4326_v47 }
0x162d   :  { %v12501_v4 = vpop.eup %12500  ;;  %11252 = vmatmul.mubr.msk.bf16.gmra.mrb[12].mxu1 %vm689_vm4, %v4001_v21  ;;  %v4329_v46 = vadd.f32 1e-05, %v4311_v25 }
0x162e   :  { %v4359_v33 = vmul.f32 %v12501_v4, %v15114_v5  ;;  %11255 = vmatprep.mubr.msk.bf16.mxu1 %vm12971_vm1, %v17814_v9  ;;  %v12503_v29 = vpop.eup %12502 }
0x162f   :  { %v4360_v5 = vmul.f32 %v12503_v29, %v15077_v34  ;;  %12510 = vrsqrt.f32 %v4329_v46 }
0x1630   :  { %v4381_v43 = vmul.f32 %v15174_v28, %v4359_v33  ;;  %v3992_v6 = vpop.f32.mrb[16].mxu0  ;;  %12512 = vrsqrt.f32 %v4328_v15 }
0x1631   :  { %v12505_v51 = vpop.eup %12504  ;;  %v11235_v50 = vpop.f32.mrb[17].mxu0  ;;  %v4002_v42 = vpack.c.bf16 %v3992_v6, %v3992_v6  ;;  %v4382_v58 = vmul.f32 %v15174_v28, %v4360_v5  ;;  %v12161_v6 = vld [vmem:[%s17791_s6 + $0x18] sm:$0xff]  }
0x1632   :  { %v4403_v61 = vadd.f32 %v15184_v41, %v4381_v43  ;;  %v4361_v19 = vmul.f32 %v12505_v51, %v15125_v30  ;;  %v3995_v16 = vpop.f32.mrb[18].mxu0  ;;  %v12160_v43 = vld [vmem:[%s17791_s6 + $0x10] sm:$0xff]   ;;  %v4276_v51 = vpop.xlane.xlu0 %4275 }
0x1633   :  { %v11236_v0 = vpop.f32.mrb[19].mxu0  ;;  %v4404_v23 = vadd.f32 %v15184_v41, %v4382_v58  ;;  %v4312_v15 = vmul.f32 0.03125, %v4276_v51 }
0x1634   :  { %v4424_v26 = vpack.c.bf16 %v4403_v61, %v4402_v44  ;;  %v4383_v22 = vmul.f32 %v15174_v28, %v4361_v19 }
0x1635   :  { %v12507_v7 = vpop.eup %12506  ;;  %11256 = vmatmul.mubr.msk.bf16.gmra.mrb[16].mxu1 %vm689_vm4, %v4002_v42  ;;  %v4330_v50 = vadd.f32 1e-05, %v4312_v15 }
0x1636   :  { %11264 = vmatmul.mubr.msk.bf16.vlgmr.msra.gmra.mrb[20].mxu0 %vm224_vm3, %v4424_v26  ;;  %11307 = vmatprep.mubr.msk.bf16.mxu1 %vm12971_vm1, %v17814_v9  ;;  %v12509_v34 = vpop.eup %12508  ;;  %v4405_v30 = vadd.f32 %v15184_v41, %v4383_v22  ;;  %v4363_v47 = vmul.f32 %v12507_v7, %v15135_v14 }
0x1637   :  { %11267 = vmatprep.mubr.msk.bf16.mxu0 %vm12971_vm1, %v17814_v9  ;;  %v4362_v13 = vmul.f32 %v12509_v34, %v15087_v57  ;;  %12514 = vrsqrt.f32 %v4330_v50 }
0x1638   :  { %v4425_v59 = vpack.c.bf16 %v4405_v30, %v4404_v23  ;;  %v4385_v31 = vmul.f32 %v15174_v28, %v4363_v47 }
0x1639   :  { %v12511_v55 = vpop.eup %12510  ;;  %v4384_v60 = vmul.f32 %v15174_v28, %v4362_v13 }
0x163a   :  { %v12513_v25 = vpop.eup %12512  ;;  %v4407_v21 = vadd.f32 %v15184_v41, %v4385_v31  ;;  %v4365_v14 = vmul.f32 %v12511_v55, %v15141_v54  ;;  %v12159_v54 = vld [vmem:[%s17791_s6 + $0x8] sm:$0xff]  }
0x163b   :  { %v4406_v17 = vadd.f32 %v15184_v41, %v4384_v60  ;;  %v4364_v57 = vmul.f32 %v12513_v25, %v15094_v49  ;;  %v12158_v49 = vld [vmem:[%s17791_s6] sm:$0xff]   ;;  %v17815_v31 = vld [vmem:[#allocation3_spill] sm:$0xff] }
0x163c   :  { %v4387_v48 = vmul.f32 %v15174_v28, %v4365_v14  ;;  %11300 = vmatpush3.bf16.msra.mxu1 %v12158_v49  ;;  %v4174_v49 = vpop.xlane.xlu0 %4173 }
0x163d   :  { %v4426_v4 = vpack.c.bf16 %v4407_v21, %v4406_v17  ;;  %v4386_v20 = vmul.f32 %v15174_v28, %v4364_v57  ;;  %11301 = vmatprep.subr.bf16.mxu1 %v17814_v9  ;;  %v17816_v57 = vld [vmem:[#allocation5_spill] sm:$0xff] }
0x163e   :  { %11268 = vmatmul.mubr.msk.bf16.gmra.mrb[24].mxu0 %vm224_vm3, %v4425_v59  ;;  %v4409_v33 = vadd.f32 %v15184_v41, %v4387_v48 }
0x163f   :  { %11271 = vmatprep.mubr.msk.bf16.mxu0 %vm12971_vm1, %v17814_v9  ;;  %v4408_v29 = vadd.f32 %v15184_v41, %v4386_v20 }
0x1640   :  { %11302 = vmatpush3.bf16.msra.mxu1 %v12159_v54 }
0x1641   :  { %v4427_v46 = vpack.c.bf16 %v4409_v33, %v4408_v29  ;;  %11303 = vmatprep.subr.bf16.mxu1 %v17814_v9  ;;  %v12515_v19 = vpop.eup %12514  ;;  %v17817_v33 = vld [vmem:[#allocation2_spill] sm:$0xff] }
0x1642   :  { %v4366_v16 = vmul.f32 %v12515_v19, %v15103_v62 }
0x1644   :  { %11304 = vmatpush3.bf16.msra.mxu1 %v12160_v43  ;;  %v4388_v0 = vmul.f32 %v15174_v28, %v4366_v16 }
0x1645   :  { %11305 = vmatprep.subr.bf16.mxu1 %v17814_v9 }
0x1646   :  { %11272 = vmatmul.mubr.msk.bf16.gmra.mrb[28].mxu0 %vm224_vm3, %v4426_v4  ;;  %v4410_v7 = vadd.f32 %v15184_v41, %v4388_v0 }
0x1647   :  { %11275 = vmatprep.mubr.msk.bf16.mxu0 %vm12971_vm1, %v17814_v9 }
0x1648   :  { %11306 = vmatpush3.bf16.msra.mxu1 %v12161_v6  ;;  %v4206_v6 = vmul.f32 0.03125, %v4174_v49 }
0x1649   :  { %11383 = vmatprep.subr.bf16.mxu1 %v17814_v9 }
0x164a   :  { %v15279_v16 = vsub.f32 %v15130_v1, %v4206_v6 }
0x164e   :  { %11276 = vmatmul.mubr.msk.bf16.gmra.mrb[32].mxu0 %vm224_vm3, %v4427_v46 }
0x164f   :  { %11279 = vmatprep.mubr.msk.bf16.mxu0 %vm12971_vm1, %v17814_v9 }
0x16af   :  { %v4279_v44 = vpop.xlane.xlu1 %4278 }
0x16b0   :  { %v4313_v5 = vmul.f32 0.03125, %v4279_v44  ;;  %v17818_v44 = vld [vmem:[#allocation6_spill] sm:$0xff] }
0x16b2   :  { %v4331_v61 = vadd.f32 1e-05, %v4313_v5 }
0x16b4   :  { %12516 = vrsqrt.f32 %v4331_v61 }
0x16be   :  { %v12517_v42 = vpop.eup %12516 }
0x16bf   :  { %v4367_v26 = vmul.f32 %v12517_v42, %v15162_v56  ;;  %v17819_v42 = vld [vmem:[#allocation4_spill] sm:$0xff] }
0x16c1   :  { %v4389_v22 = vmul.f32 %v15174_v28, %v4367_v26 }
0x16c3   :  { %v4411_v58 = vadd.f32 %v15184_v41, %v4389_v22  ;;  %v15290_v22 = vld [vmem:[%s17788_s8 + $0x5] ss:$0 sm:$0xff] }
0x16c5   :  { %v4428_v34 = vpack.c.bf16 %v4411_v58, %v4410_v7 }
0x16c7   :  { %11280 = vmatmul.mubr.msk.bf16.gmra.mrb[36].mxu0 %vm224_vm3, %v4428_v34 }
0x16c8   :  { %11283 = vmatprep.mubr.msk.bf16.mxu0 %vm12971_vm1, %v17814_v9 }
0x16ee   :  { %v4060_v30 = vpop.f32.mrb[4].mxu1 }
0x16ef   :  { %v4092_v62 = vadd.f32 %v4060_v30, %v14910_v37  ;;  %v11245_v47 = vpop.f32.mrb[5].mxu1 }
0x16f0   :  { %v4063_v23 = vpop.f32.mrb[6].mxu1  ;;  %v4242_v47 = vmul.f32 %v15279_v16, %v15279_v16 }
0x16f1   :  { %v4110_v13 = vadd.f32 %v4092_v62, %v13376_v52  ;;  %v4093_v56 = vadd.f32 %v4063_v23, %v14913_v10  ;;  %v11246_v59 = vpop.f32.mrb[7].mxu1 }
0x16f2   :  { %v17820_v59 = vld [vmem:[#allocation7_spill] sm:$0xff] }
0x16f3   :  { %v4111_v55 = vadd.f32 %v4093_v56, %v17815_v31  ;;  %v15252_v60 = vadd.f32 %v14988_v11, %v4110_v13 }
0x16f5   :  { %v4175_v25 = vsel %vm224_vm3, %v15252_v60, 0.0  ;;  %v15257_v21 = vadd.f32 %v14988_v11, %v4111_v55 }
0x16f6   :  { %4176 = vadd.xlane.f32.xlu1 %v4175_v25 }
0x16f7   :  { %v4178_v37 = vsel %vm224_vm3, %v15257_v21, 0.0 }
0x16f8   :  { %4179 = vadd.xlane.f32.xlu0 %v4178_v37  ;;  %v4068_v52 = vpop.f32.mrb[8].mxu1 }
0x16f9   :  { %v4094_v10 = vadd.f32 %v4068_v52, %v14937_v32  ;;  %v11249_v14 = vpop.f32.mrb[9].mxu1 }
0x16fa   :  { %v4071_v17 = vpop.f32.mrb[10].mxu1 }
0x16fb   :  { %v4112_v4 = vadd.f32 %v4094_v10, %v17816_v57  ;;  %v4095_v48 = vadd.f32 %v4071_v17, %v14940_v53  ;;  %v11250_v20 = vpop.f32.mrb[11].mxu1  ;;  %v4280_v10 = vsel %vm224_vm3, %v4242_v47, 0.0 }
0x16fd   :  { %v4113_v29 = vadd.f32 %v4095_v48, %v17817_v33  ;;  %v15266_v46 = vadd.f32 %v14988_v11, %v4112_v4 }
0x16ff   :  { %v4181_v54 = vsel %vm224_vm3, %v15266_v46, 0.0  ;;  %v15271_v43 = vadd.f32 %v14988_v11, %v4113_v29 }
0x1700   :  { %4182 = vadd.xlane.f32.xlu1 %v4181_v54  ;;  %v4076_v32 = vpop.f32.mrb[12].mxu1 }
0x1701   :  { %v4096_v51 = vadd.f32 %v4076_v32, %v14943_v18  ;;  %v11253_v15 = vpop.f32.mrb[13].mxu1  ;;  %v4184_v53 = vsel %vm224_vm3, %v15271_v43, 0.0 }
0x1702   :  { %4185 = vadd.xlane.f32.xlu0 %v4184_v53  ;;  %v4079_v50 = vpop.f32.mrb[14].mxu1 }
0x1703   :  { %v4114_v5 = vadd.f32 %v4096_v51, %v17818_v44  ;;  %v4097_v61 = vadd.f32 %v4079_v50, %v14946_v2  ;;  %v11254_v19 = vpop.f32.mrb[15].mxu1 }
0x1705   :  { %v4115_v0 = vadd.f32 %v4097_v61, %v17819_v42  ;;  %v15283_v26 = vadd.f32 %v14988_v11, %v4114_v5 }
0x1707   :  { %v4187_v18 = vsel %vm224_vm3, %v15283_v26, 0.0  ;;  %v15293_v7 = vadd.f32 %v14988_v11, %v4115_v0 }
0x1708   :  { %4188 = vadd.xlane.f32.xlu1 %v4187_v18  ;;  %v4084_v2 = vpop.f32.mrb[16].mxu1 }
0x1709   :  { %v4098_v58 = vadd.f32 %v4084_v2, %v14949_v40  ;;  %v11257_v34 = vpop.f32.mrb[17].mxu1  ;;  %v4511_v30 = vpop.f32.mrb[20].mxu0  ;;  %v4190_v62 = vsel %vm224_vm3, %v15293_v7, 0.0 }
0x170a   :  { %v4512_v23 = vadd.f32 %v15290_v22, %v4511_v30  ;;  %4191 = vadd.xlane.f32.xlu0 %v4190_v62  ;;  %v4087_v13 = vpop.f32.mrb[18].mxu1  ;;  %v11265_v56 = vpop.f32.mrb[21].mxu0 }
0x170b   :  { %v4116_v31 = vadd.f32 %v4098_v58, %v17820_v59  ;;  %v11258_v55 = vpop.f32.mrb[19].mxu1  ;;  %v4514_v25 = vpop.f32.mrb[22].mxu0 }
0x170c   :  { %v4600_v37 = vmul.f32 0.70710677, %v4512_v23  ;;  %v4515_v40 = vadd.f32 %v15290_v22, %v4514_v25  ;;  %v11266_v52 = vpop.f32.mrb[23].mxu0  ;;  %v4582_v44 = vmul.f32 0.5, %v4512_v23 }
0x170d   :  { %v15305_v14 = vadd.f32 %v14988_v11, %v4116_v31 }
0x170e   :  { %12518 = verf.f32 %v4600_v37  ;;  %v4601_v17 = vmul.f32 0.70710677, %v4515_v40  ;;  %4281 = vadd.xlane.f32.xlu0 %v4280_v10  ;;  %v4583_v5 = vmul.f32 0.5, %v4515_v40 }
0x170f   :  { %v4193_v57 = vsel %vm224_vm3, %v15305_v14, 0.0 }
0x1710   :  { %12520 = verf.f32 %v4601_v17  ;;  %4194 = vadd.xlane.f32.xlu1 %v4193_v57 }
0x1711   :  { %v4519_v4 = vpop.f32.mrb[24].mxu0 }
0x1712   :  { %v4520_v48 = vadd.f32 %v15290_v22, %v4519_v4  ;;  %v11269_v20 = vpop.f32.mrb[25].mxu0 }
0x1713   :  { %v4522_v33 = vpop.f32.mrb[26].mxu0 }
0x1714   :  { %v4602_v29 = vmul.f32 0.70710677, %v4520_v48  ;;  %v4523_v49 = vadd.f32 %v15290_v22, %v4522_v33  ;;  %v11270_v54 = vpop.f32.mrb[27].mxu0  ;;  %v4584_v31 = vmul.f32 0.5, %v4520_v48 }
0x1716   :  { %12522 = verf.f32 %v4602_v29  ;;  %v4603_v11 = vmul.f32 0.70710677, %v4523_v49  ;;  %v4585_v55 = vmul.f32 0.5, %v4523_v49 }
0x1718   :  { %v12519_v32 = vpop.eup %12518  ;;  %12524 = verf.f32 %v4603_v11 }
0x1719   :  { %v4636_v6 = vadd.f32 1.0, %v12519_v32  ;;  %v4527_v51 = vpop.f32.mrb[28].mxu0 }
0x171a   :  { %v12521_v15 = vpop.eup %12520  ;;  %v4528_v53 = vadd.f32 %v15290_v22, %v4527_v51  ;;  %v11273_v50 = vpop.f32.mrb[29].mxu0 }
0x171b   :  { %v4637_v61 = vadd.f32 1.0, %v12521_v15  ;;  %v4530_v19 = vpop.f32.mrb[30].mxu0  ;;  %v4654_v2 = vmul.f32 %v4636_v6, %v4582_v44 }
0x171c   :  { %v4604_v42 = vmul.f32 0.70710677, %v4528_v53  ;;  %v4531_v0 = vadd.f32 %v15290_v22, %v4530_v19  ;;  %v11274_v18 = vpop.f32.mrb[31].mxu0  ;;  %v4586_v48 = vmul.f32 0.5, %v4528_v53 }
0x171d   :  { %v4655_v58 = vmul.f32 %v4637_v61, %v4583_v5 }
0x171e   :  { %12526 = verf.f32 %v4604_v42  ;;  %v4605_v34 = vmul.f32 0.70710677, %v4531_v0  ;;  %v4587_v49 = vmul.f32 0.5, %v4531_v0 }
0x171f   :  { %v4680_v30 = vpack.c.bf16 %v4655_v58, %v4654_v2 }
0x1720   :  { %v12523_v62 = vpop.eup %12522  ;;  %12528 = verf.f32 %v4605_v34 }
0x1721   :  { %v4638_v47 = vadd.f32 1.0, %v12523_v62  ;;  %v4535_v13 = vpop.f32.mrb[32].mxu0  ;;  %11308 = vmatmul.mubr.msk.bf16.vlgmr.msra.gmra.mrb[20].mxu1 %vm4713_vm8, %v4680_v30 }
0x1722   :  { %v12525_v23 = vpop.eup %12524  ;;  %v4536_v56 = vadd.f32 %v15290_v22, %v4535_v13  ;;  %v11277_v59 = vpop.f32.mrb[33].mxu0  ;;  %11311 = vmatprep.mubr.msk.bf16.mxu1 %vm12971_vm1, %v17814_v9 }
0x1723   :  { %v4639_v25 = vadd.f32 1.0, %v12525_v23  ;;  %v4538_v37 = vpop.f32.mrb[34].mxu0  ;;  %v4656_v17 = vmul.f32 %v4638_v47, %v4584_v31 }
0x1724   :  { %v4606_v40 = vmul.f32 0.70710677, %v4536_v56  ;;  %v4539_v52 = vadd.f32 %v15290_v22, %v4538_v37  ;;  %v11278_v10 = vpop.f32.mrb[35].mxu0  ;;  %v4588_v5 = vmul.f32 0.5, %v4536_v56 }
0x1725   :  { %v4657_v57 = vmul.f32 %v4639_v25, %v4585_v55 }
0x1726   :  { %12530 = verf.f32 %v4606_v40  ;;  %v4607_v4 = vmul.f32 0.70710677, %v4539_v52  ;;  %v4589_v61 = vmul.f32 0.5, %v4539_v52 }
0x1727   :  { %v4681_v20 = vpack.c.bf16 %v4657_v57, %v4656_v17 }
0x1728   :  { %v12527_v33 = vpop.eup %12526  ;;  %12532 = verf.f32 %v4607_v4 }
0x1729   :  { %v4640_v29 = vadd.f32 1.0, %v12527_v33  ;;  %11312 = vmatmul.mubr.msk.bf16.gmra.mrb[24].mxu1 %vm4713_vm8, %v4681_v20 }
0x172a   :  { %v12529_v54 = vpop.eup %12528  ;;  %11315 = vmatprep.mubr.msk.bf16.mxu1 %vm12971_vm1, %v17814_v9 }
0x172b   :  { %v4641_v11 = vadd.f32 1.0, %v12529_v54  ;;  %v4658_v32 = vmul.f32 %v4640_v29, %v4586_v48 }
0x172d   :  { %v4659_v6 = vmul.f32 %v4641_v11, %v4587_v49 }
0x172f   :  { %v4682_v51 = vpack.c.bf16 %v4659_v6, %v4658_v32 }
0x1730   :  { %v12531_v15 = vpop.eup %12530 }
0x1731   :  { %v4642_v50 = vadd.f32 1.0, %v12531_v15  ;;  %11316 = vmatmul.mubr.msk.bf16.gmra.mrb[28].mxu1 %vm4713_vm8, %v4682_v51 }
0x1732   :  { %v12533_v44 = vpop.eup %12532  ;;  %11319 = vmatprep.mubr.msk.bf16.mxu1 %vm12971_vm1, %v17814_v9 }
0x1733   :  { %v4643_v19 = vadd.f32 1.0, %v12533_v44  ;;  %v4660_v42 = vmul.f32 %v4642_v50, %v4588_v5 }
0x1735   :  { %v4661_v18 = vmul.f32 %v4643_v19, %v4589_v61 }
0x1737   :  { %v4683_v2 = vpack.c.bf16 %v4661_v18, %v4660_v42 }
0x1739   :  { %11320 = vmatmul.mubr.msk.bf16.gmra.mrb[32].mxu1 %vm4713_vm8, %v4683_v2 }
0x173a   :  { %11323 = vmatprep.mubr.msk.bf16.mxu1 %vm12971_vm1, %v17814_v9 }
0x1783   :  { %v4177_v53 = vpop.xlane.xlu1 %4176 }
0x1784   :  { %v4207_v0 = vmul.f32 0.03125, %v4177_v53 }
0x1785   :  { %v4180_v58 = vpop.xlane.xlu0 %4179 }
0x1786   :  { %v15328_v34 = vsub.f32 %v15252_v60, %v4207_v0  ;;  %v4208_v30 = vmul.f32 0.03125, %v4180_v58 }
0x1788   :  { %v15331_v62 = vsub.f32 %v15257_v21, %v4208_v30  ;;  %v4243_v47 = vmul.f32 %v15328_v34, %v15328_v34 }
0x178a   :  { %v4283_v13 = vsel %vm224_vm3, %v4243_v47, 0.0  ;;  %v4244_v23 = vmul.f32 %v15331_v62, %v15331_v62 }
0x178b   :  { %4284 = vadd.xlane.f32.xlu1 %v4283_v13 }
0x178c   :  { %v4286_v56 = vsel %vm224_vm3, %v4244_v23, 0.0 }
0x178d   :  { %v4183_v59 = vpop.xlane.xlu1 %4182  ;;  %4287 = vadd.xlane.f32.xlu0 %v4286_v56 }
0x178e   :  { %v4209_v31 = vmul.f32 0.03125, %v4183_v59 }
0x178f   :  { %v4186_v55 = vpop.xlane.xlu0 %4185 }
0x1790   :  { %v15340_v25 = vsub.f32 %v15266_v46, %v4209_v31  ;;  %v4210_v37 = vmul.f32 0.03125, %v4186_v55 }
0x1792   :  { %v15343_v40 = vsub.f32 %v15271_v43, %v4210_v37  ;;  %v4245_v52 = vmul.f32 %v15340_v25, %v15340_v25 }
0x1794   :  { %v4289_v10 = vsel %vm224_vm3, %v4245_v52, 0.0  ;;  %v4246_v17 = vmul.f32 %v15343_v40, %v15343_v40 }
0x1795   :  { %v4189_v57 = vpop.xlane.xlu1 %4188  ;;  %4290 = vadd.xlane.f32.xlu1 %v4289_v10  ;;  %v15377_v10 = vld [vmem:[%s17788_s8 + $0x6] ss:$0 sm:$0xff] }
0x1796   :  { %v4211_v4 = vmul.f32 0.03125, %v4189_v57  ;;  %v4292_v20 = vsel %vm224_vm3, %v4246_v17, 0.0 }
0x1797   :  { %4293 = vadd.xlane.f32.xlu0 %v4292_v20  ;;  %v4192_v33 = vpop.xlane.xlu0 %4191 }
0x1798   :  { %v15352_v29 = vsub.f32 %v15283_v26, %v4211_v4  ;;  %v4212_v54 = vmul.f32 0.03125, %v4192_v33 }
0x179a   :  { %v15355_v48 = vsub.f32 %v15293_v7, %v4212_v54  ;;  %v4543_v49 = vpop.f32.mrb[36].mxu0  ;;  %v4247_v11 = vmul.f32 %v15352_v29, %v15352_v29 }
0x179b   :  { %v4544_v32 = vadd.f32 %v15290_v22, %v4543_v49  ;;  %v11281_v6 = vpop.f32.mrb[37].mxu0 }
0x179c   :  { %v4546_v51 = vpop.f32.mrb[38].mxu0  ;;  %v4295_v15 = vsel %vm224_vm3, %v4247_v11, 0.0  ;;  %v4248_v50 = vmul.f32 %v15355_v48, %v15355_v48 }
0x179d   :  { %v4608_v44 = vmul.f32 0.70710677, %v4544_v32  ;;  %v4547_v5 = vadd.f32 %v15290_v22, %v4546_v51  ;;  %4296 = vadd.xlane.f32.xlu1 %v4295_v15  ;;  %v4195_v61 = vpop.xlane.xlu1 %4194  ;;  %v11282_v19 = vpop.f32.mrb[39].mxu0  ;;  %v4590_v23 = vmul.f32 0.5, %v4544_v32 }
0x179e   :  { %v4213_v42 = vmul.f32 0.03125, %v4195_v61  ;;  %v4298_v18 = vsel %vm224_vm3, %v4248_v50, 0.0 }
0x179f   :  { %12534 = verf.f32 %v4608_v44  ;;  %v4609_v2 = vmul.f32 0.70710677, %v4547_v5  ;;  %4299 = vadd.xlane.f32.xlu0 %v4298_v18  ;;  %v4591_v56 = vmul.f32 0.5, %v4547_v5 }
0x17a0   :  { %v15366_v53 = vsub.f32 %v15305_v14, %v4213_v42 }
0x17a1   :  { %12536 = verf.f32 %v4609_v2 }
0x17a2   :  { %v4249_v0 = vmul.f32 %v15366_v53, %v15366_v53 }
0x17a4   :  { %v4301_v58 = vsel %vm224_vm3, %v4249_v0, 0.0 }
0x17a5   :  { %4302 = vadd.xlane.f32.xlu1 %v4301_v58 }
0x17a9   :  { %v12535_v30 = vpop.eup %12534 }
0x17aa   :  { %v4644_v47 = vadd.f32 1.0, %v12535_v30 }
0x17ab   :  { %v12537_v13 = vpop.eup %12536 }
0x17ac   :  { %v4645_v59 = vadd.f32 1.0, %v12537_v13  ;;  %v4662_v31 = vmul.f32 %v4644_v47, %v4590_v23  ;;  %v4282_v23 = vpop.xlane.xlu0 %4281 }
0x17ae   :  { %v4663_v55 = vmul.f32 %v4645_v59, %v4591_v56 }
0x17b0   :  { %v4684_v37 = vpack.c.bf16 %v4663_v55, %v4662_v31  ;;  %v4314_v55 = vmul.f32 0.03125, %v4282_v23 }
0x17b2   :  { %11324 = vmatmul.mubr.msk.bf16.gmra.mrb[36].mxu1 %vm4713_vm8, %v4684_v37 }
0x17b3   :  { %11327 = vmatprep.mubr.msk.bf16.mxu1 %vm12971_vm1, %v17814_v9 }
0x17f4   :  { %v4775_v52 = vpop.f32.mrb[20].mxu1 }
0x17f5   :  { %v4846_v17 = vadd.f32 %v4775_v52, %v15001_v39  ;;  %v11309_v57 = vpop.f32.mrb[21].mxu1 }
0x17f6   :  { %v4778_v4 = vpop.f32.mrb[22].mxu1 }
0x17f7   :  { %v15381_v20 = vadd.f32 %v15377_v10, %v4846_v17  ;;  %v4847_v33 = vadd.f32 %v4778_v4, %v15019_v24  ;;  %v11310_v54 = vpop.f32.mrb[23].mxu1  ;;  %v4332_v4 = vadd.f32 1e-05, %v4314_v55 }
0x17f9   :  { %v15385_v49 = vadd.f32 %v15377_v10, %v4847_v33  ;;  %v4889_v11 = vsel %vm224_vm3, %v15381_v20, 0.0  ;;  %12538 = vrsqrt.f32 %v4332_v4 }
0x17fa   :  { %4890 = vadd.xlane.f32.xlu0 %v4889_v11 }
0x17fb   :  { %v4892_v32 = vsel %vm224_vm3, %v15385_v49, 0.0 }
0x17fc   :  { %4893 = vadd.xlane.f32.xlu1 %v4892_v32  ;;  %v4783_v39 = vpop.f32.mrb[24].mxu1 }
0x17fd   :  { %v4848_v6 = vadd.f32 %v4783_v39, %v15010_v36  ;;  %v11313_v51 = vpop.f32.mrb[25].mxu1 }
0x17fe   :  { %v4786_v15 = vpop.f32.mrb[26].mxu1 }
0x17ff   :  { %v15393_v50 = vadd.f32 %v15377_v10, %v4848_v6  ;;  %v4849_v24 = vadd.f32 %v4786_v15, %v15033_v45  ;;  %v11314_v44 = vpop.f32.mrb[27].mxu1 }
0x1801   :  { %v15397_v5 = vadd.f32 %v15377_v10, %v4849_v24  ;;  %v4895_v61 = vsel %vm224_vm3, %v15393_v50, 0.0 }
0x1802   :  { %4896 = vadd.xlane.f32.xlu0 %v4895_v61 }
0x1803   :  { %v4898_v19 = vsel %vm224_vm3, %v15397_v5, 0.0  ;;  %v12539_v6 = vpop.eup %12538 }
0x1804   :  { %4899 = vadd.xlane.f32.xlu1 %v4898_v19  ;;  %v4791_v36 = vpop.f32.mrb[28].mxu1  ;;  %v4368_v24 = vmul.f32 %v12539_v6, %v15279_v16 }
0x1805   :  { %v4850_v42 = vadd.f32 %v4791_v36, %v15026_v63  ;;  %v11317_v18 = vpop.f32.mrb[29].mxu1 }
0x1806   :  { %v4794_v2 = vpop.f32.mrb[30].mxu1  ;;  %v4390_v18 = vmul.f32 %v15174_v28, %v4368_v24 }
0x1807   :  { %v15405_v0 = vadd.f32 %v15377_v10, %v4850_v42  ;;  %v4851_v45 = vadd.f32 %v4794_v2, %v15047_v38  ;;  %v11318_v58 = vpop.f32.mrb[31].mxu1 }
0x1808   :  { %v4412_v23 = vadd.f32 %v15184_v41, %v4390_v18 }
0x1809   :  { %v15409_v30 = vadd.f32 %v15377_v10, %v4851_v45  ;;  %v4901_v47 = vsel %vm224_vm3, %v15405_v0, 0.0 }
0x180a   :  { %4902 = vadd.xlane.f32.xlu0 %v4901_v47 }
0x180b   :  { %v4904_v13 = vsel %vm224_vm3, %v15409_v30, 0.0 }
0x180c   :  { %4905 = vadd.xlane.f32.xlu1 %v4904_v13  ;;  %v4799_v63 = vpop.f32.mrb[32].mxu1 }
0x180d   :  { %v4852_v56 = vadd.f32 %v4799_v63, %v15040_v12  ;;  %v11321_v59 = vpop.f32.mrb[33].mxu1 }
0x180e   :  { %v4802_v31 = vpop.f32.mrb[34].mxu1 }
0x180f   :  { %v15417_v38 = vadd.f32 %v15377_v10, %v4852_v56  ;;  %v4853_v37 = vadd.f32 %v4802_v31, %v15057_v8  ;;  %v11322_v52 = vpop.f32.mrb[35].mxu1 }
0x1811   :  { %v15421_v17 = vadd.f32 %v15377_v10, %v4853_v37  ;;  %v4907_v57 = vsel %vm224_vm3, %v15417_v38, 0.0 }
0x1812   :  { %4908 = vadd.xlane.f32.xlu0 %v4907_v57 }
0x1813   :  { %v4910_v12 = vsel %vm224_vm3, %v15421_v17, 0.0 }
0x1814   :  { %4911 = vadd.xlane.f32.xlu1 %v4910_v12 }
0x1818   :  { %v4285_v33 = vpop.xlane.xlu1 %4284 }
0x1819   :  { %v4315_v54 = vmul.f32 0.03125, %v4285_v33 }
0x181a   :  { %v4288_v11 = vpop.xlane.xlu0 %4287 }
0x181b   :  { %v4333_v32 = vadd.f32 1e-05, %v4315_v54  ;;  %v4316_v39 = vmul.f32 0.03125, %v4288_v11 }
0x181d   :  { %12540 = vrsqrt.f32 %v4333_v32  ;;  %v4334_v8 = vadd.f32 1e-05, %v4316_v39 }
0x181f   :  { %12542 = vrsqrt.f32 %v4334_v8 }
0x1822   :  { %v4291_v51 = vpop.xlane.xlu1 %4290 }
0x1823   :  { %v4317_v15 = vmul.f32 0.03125, %v4291_v51 }
0x1824   :  { %v4294_v44 = vpop.xlane.xlu0 %4293 }
0x1825   :  { %v4335_v61 = vadd.f32 1e-05, %v4317_v15  ;;  %v4318_v19 = vmul.f32 0.03125, %v4294_v44 }
0x1827   :  { %v12541_v36 = vpop.eup %12540  ;;  %12544 = vrsqrt.f32 %v4335_v61  ;;  %v4336_v42 = vadd.f32 1e-05, %v4318_v19 }
0x1828   :  { %v4369_v2 = vmul.f32 %v12541_v36, %v15328_v34 }
0x1829   :  { %12546 = vrsqrt.f32 %v4336_v42  ;;  %v12543_v47 = vpop.eup %12542 }
0x182a   :  { %v4391_v45 = vmul.f32 %v15174_v28, %v4369_v2  ;;  %v4297_v58 = vpop.xlane.xlu1 %4296  ;;  %v4370_v55 = vmul.f32 %v12543_v47, %v15331_v62 }
0x182b   :  { %v4319_v13 = vmul.f32 0.03125, %v4297_v58 }
0x182c   :  { %v4413_v16 = vadd.f32 %v15184_v41, %v4391_v45  ;;  %v4300_v63 = vpop.xlane.xlu0 %4299  ;;  %v4392_v52 = vmul.f32 %v15174_v28, %v4370_v55 }
0x182d   :  { %v4337_v56 = vadd.f32 1e-05, %v4319_v13  ;;  %v4320_v59 = vmul.f32 0.03125, %v4300_v63 }
0x182e   :  { %v4429_v31 = vpack.c.bf16 %v4413_v16, %v4412_v23  ;;  %v4414_v62 = vadd.f32 %v15184_v41, %v4392_v52 }
0x182f   :  { %12548 = vrsqrt.f32 %v4337_v56  ;;  %v4338_v37 = vadd.f32 1e-05, %v4320_v59 }
0x1830   :  { %11284 = vmatmul.mubr.msk.bf16.gmra.mrb[40].mxu0 %vm224_vm3, %v4429_v31 }
0x1831   :  { %v12545_v34 = vpop.eup %12544  ;;  %12550 = vrsqrt.f32 %v4338_v37  ;;  %11287 = vmatprep.mubr.msk.bf16.mxu0 %vm12971_vm1, %v17814_v9 }
0x1832   :  { %v4371_v57 = vmul.f32 %v12545_v34, %v15340_v25  ;;  %v4303_v4 = vpop.xlane.xlu1 %4302 }
0x1833   :  { %v12547_v12 = vpop.eup %12546  ;;  %v4321_v33 = vmul.f32 0.03125, %v4303_v4 }
0x1834   :  { %v4393_v54 = vmul.f32 %v15174_v28, %v4371_v57  ;;  %v4372_v39 = vmul.f32 %v12547_v12, %v15343_v40 }
0x1835   :  { %v4339_v11 = vadd.f32 1e-05, %v4321_v33 }
0x1836   :  { %v4415_v32 = vadd.f32 %v15184_v41, %v4393_v54  ;;  %v4394_v51 = vmul.f32 %v15174_v28, %v4372_v39 }
0x1837   :  { %12552 = vrsqrt.f32 %v4339_v11 }
0x1838   :  { %v4430_v8 = vpack.c.bf16 %v4415_v32, %v4414_v62  ;;  %v4416_v44 = vadd.f32 %v15184_v41, %v4394_v51 }
0x1839   :  { %v12549_v6 = vpop.eup %12548 }
0x183a   :  { %v4373_v15 = vmul.f32 %v12549_v6, %v15352_v29  ;;  %11288 = vmatmul.mubr.msk.bf16.gmra.mrb[44].mxu0 %vm224_vm3, %v4430_v8 }
0x183b   :  { %v12551_v25 = vpop.eup %12550  ;;  %11291 = vmatprep.mubr.msk.bf16.mxu0 %vm12971_vm1, %v17814_v9 }
0x183c   :  { %v4395_v24 = vmul.f32 %v15174_v28, %v4373_v15  ;;  %v4374_v40 = vmul.f32 %v12551_v25, %v15355_v48 }
0x183e   :  { %v4417_v61 = vadd.f32 %v15184_v41, %v4395_v24  ;;  %v4396_v42 = vmul.f32 %v15174_v28, %v4374_v40 }
0x1840   :  { %v4431_v19 = vpack.c.bf16 %v4417_v61, %v4416_v44  ;;  %v4418_v2 = vadd.f32 %v15184_v41, %v4396_v42 }
0x1841   :  { %v12553_v36 = vpop.eup %12552 }
0x1842   :  { %v4375_v29 = vmul.f32 %v12553_v36, %v15366_v53  ;;  %11292 = vmatmul.mubr.msk.bf16.gmra.mrb[48].mxu0 %vm224_vm3, %v4431_v19 }
0x1843   :  { %11295 = vmatprep.mubr.msk.bf16.mxu0 %vm12971_vm1, %v17814_v9 }
0x1844   :  { %v4397_v18 = vmul.f32 %v15174_v28, %v4375_v29 }
0x1846   :  { %v4419_v45 = vadd.f32 %v15184_v41, %v4397_v18 }
0x1848   :  { %v4432_v58 = vpack.c.bf16 %v4419_v45, %v4418_v2 }
0x184a   :  { %11296 = vmatmul.mubr.msk.bf16.gmra.mrb[52].mxu0 %vm224_vm3, %v4432_v58 }
0x184b   :  { %11347 = vmatprep.mubr.msk.bf16.mxu0 %vm12971_vm1, %v17814_v9 }
0x1885   :  { %v4807_v48 = vpop.f32.mrb[36].mxu1 }
0x1886   :  { %v4854_v53 = vadd.f32 %v4807_v48, %v15052_v35  ;;  %v11325_v47 = vpop.f32.mrb[37].mxu1 }
0x1887   :  { %v4891_v13 = vpop.xlane.xlu0 %4890  ;;  %v4810_v23 = vpop.f32.mrb[38].mxu1 }
0x1888   :  { %v15465_v16 = vadd.f32 %v15377_v10, %v4854_v53  ;;  %v4943_v28 = vmul.f32 0.03125, %v4891_v13  ;;  %v4855_v63 = vadd.f32 %v4810_v23, %v15120_v27  ;;  %v11326_v56 = vpop.f32.mrb[39].mxu1 }
0x1889   :  { %v4894_v41 = vpop.xlane.xlu1 %4893  ;;  %v12163_v56 = vld [vmem:[%s17787_s3 + $0x18] sm:$0xff]  }
0x188a   :  { %v15469_v59 = vsub.f32 %v15381_v20, %v4943_v28  ;;  %v15472_v31 = vadd.f32 %v15377_v10, %v4855_v63  ;;  %v4944_v55 = vmul.f32 0.03125, %v4894_v41  ;;  %v4913_v35 = vsel %vm224_vm3, %v15465_v16, 0.0  ;;  %v12162_v63 = vld [vmem:[%s17787_s3 + $0x10] sm:$0xff]  }
0x188b   :  { %4914 = vadd.xlane.f32.xlu0 %v4913_v35  ;;  %11344 = vmatpush3.bf16.msra.mxu0 %v12162_v63 }
0x188c   :  { %v15477_v37 = vsub.f32 %v15385_v49, %v4944_v55  ;;  %v4916_v34 = vsel %vm224_vm3, %v15472_v31, 0.0  ;;  %v4979_v27 = vmul.f32 %v15469_v59, %v15469_v59  ;;  %11345 = vmatprep.subr.bf16.mxu0 %v17814_v9 }
0x188d   :  { %4917 = vadd.xlane.f32.xlu1 %v4916_v34 }
0x188e   :  { %v4997_v52 = vsel %vm224_vm3, %v4979_v27, 0.0  ;;  %v4980_v57 = vmul.f32 %v15477_v37, %v15477_v37 }
0x188f   :  { %v4897_v4 = vpop.xlane.xlu0 %4896  ;;  %4998 = vadd.xlane.f32.xlu0 %v4997_v52  ;;  %11346 = vmatpush3.bf16.msra.mxu0 %v12163_v56 }
0x1890   :  { %v4945_v12 = vmul.f32 0.03125, %v4897_v4  ;;  %v5000_v33 = vsel %vm224_vm3, %v4980_v57, 0.0  ;;  %11443 = vmatprep.subr.bf16.mxu0 %v17814_v9 }
0x1891   :  { %v4900_v54 = vpop.xlane.xlu1 %4899  ;;  %5001 = vadd.xlane.f32.xlu1 %v5000_v33 }
0x1892   :  { %v15488_v11 = vsub.f32 %v15393_v50, %v4945_v12  ;;  %v4946_v62 = vmul.f32 0.03125, %v4900_v54 }
0x1894   :  { %v15491_v32 = vsub.f32 %v15397_v5, %v4946_v62  ;;  %v4981_v39 = vmul.f32 %v15488_v11, %v15488_v11 }
0x1896   :  { %v5003_v8 = vsel %vm224_vm3, %v4981_v39, 0.0  ;;  %v4982_v6 = vmul.f32 %v15491_v32, %v15491_v32 }
0x1897   :  { %v4903_v51 = vpop.xlane.xlu0 %4902  ;;  %5004 = vadd.xlane.f32.xlu0 %v5003_v8 }
0x1898   :  { %v4947_v15 = vmul.f32 0.03125, %v4903_v51  ;;  %v5006_v25 = vsel %vm224_vm3, %v4982_v6, 0.0 }
0x1899   :  { %v4906_v24 = vpop.xlane.xlu1 %4905  ;;  %5007 = vadd.xlane.f32.xlu1 %v5006_v25 }
0x189a   :  { %v15500_v44 = vsub.f32 %v15405_v0, %v4947_v15  ;;  %v4948_v61 = vmul.f32 0.03125, %v4906_v24 }
0x189c   :  { %v15503_v40 = vsub.f32 %v15409_v30, %v4948_v61  ;;  %v4983_v19 = vmul.f32 %v15500_v44, %v15500_v44 }
0x189e   :  { %v5009_v36 = vsel %vm224_vm3, %v4983_v19, 0.0  ;;  %v4984_v42 = vmul.f32 %v15503_v40, %v15503_v40 }
0x189f   :  { %v4909_v29 = vpop.xlane.xlu0 %4908  ;;  %5010 = vadd.xlane.f32.xlu0 %v5009_v36 }
0x18a0   :  { %v4949_v18 = vmul.f32 0.03125, %v4909_v29  ;;  %v5012_v2 = vsel %vm224_vm3, %v4984_v42, 0.0 }
0x18a1   :  { %v4912_v45 = vpop.xlane.xlu1 %4911  ;;  %5013 = vadd.xlane.f32.xlu1 %v5012_v2 }
0x18a2   :  { %v15512_v58 = vsub.f32 %v15417_v38, %v4949_v18  ;;  %v4950_v48 = vmul.f32 0.03125, %v4912_v45 }
0x18a4   :  { %v15515_v53 = vsub.f32 %v15421_v17, %v4950_v48  ;;  %v4985_v47 = vmul.f32 %v15512_v58, %v15512_v58 }
0x18a6   :  { %v5015_v13 = vsel %vm224_vm3, %v4985_v47, 0.0  ;;  %v4986_v23 = vmul.f32 %v15515_v53, %v15515_v53 }
0x18a7   :  { %5016 = vadd.xlane.f32.xlu0 %v5015_v13 }
0x18a8   :  { %v5018_v28 = vsel %vm224_vm3, %v4986_v23, 0.0 }
0x18a9   :  { %5019 = vadd.xlane.f32.xlu1 %v5018_v28 }
0x1903   :  { %v4551_v41 = vpop.f32.mrb[40].mxu0 }
0x1904   :  { %v4552_v55 = vadd.f32 %v15290_v22, %v4551_v41  ;;  %v11285_v35 = vpop.f32.mrb[41].mxu0 }
0x1905   :  { %v4554_v34 = vpop.f32.mrb[42].mxu0 }
0x1906   :  { %v4610_v27 = vmul.f32 0.70710677, %v4552_v55  ;;  %v4555_v52 = vadd.f32 %v15290_v22, %v4554_v34  ;;  %v11286_v57 = vpop.f32.mrb[43].mxu0  ;;  %v4592_v61 = vmul.f32 0.5, %v4552_v55 }
0x1908   :  { %12554 = verf.f32 %v4610_v27  ;;  %v4611_v4 = vmul.f32 0.70710677, %v4555_v52  ;;  %v4593_v19 = vmul.f32 0.5, %v4555_v52 }
0x190a   :  { %12556 = verf.f32 %v4611_v4 }
0x190d   :  { %v4559_v12 = vpop.f32.mrb[44].mxu0 }
0x190e   :  { %v4560_v33 = vadd.f32 %v15290_v22, %v4559_v12  ;;  %v11289_v54 = vpop.f32.mrb[45].mxu0 }
0x190f   :  { %v4562_v62 = vpop.f32.mrb[46].mxu0 }
0x1910   :  { %v4612_v39 = vmul.f32 0.70710677, %v4560_v33  ;;  %v4563_v8 = vadd.f32 %v15290_v22, %v4562_v62  ;;  %v11290_v6 = vpop.f32.mrb[47].mxu0 }
0x1911   :  { %v4594_v6 = vmul.f32 0.5, %v4560_v33 }
0x1912   :  { %v12555_v51 = vpop.eup %12554  ;;  %12558 = verf.f32 %v4612_v39  ;;  %v4613_v15 = vmul.f32 0.70710677, %v4563_v8 }
0x1913   :  { %v4646_v25 = vadd.f32 1.0, %v12555_v51 }
0x1914   :  { %v12557_v24 = vpop.eup %12556  ;;  %12560 = verf.f32 %v4613_v15 }
0x1915   :  { %v4647_v36 = vadd.f32 1.0, %v12557_v24  ;;  %v4567_v42 = vpop.f32.mrb[48].mxu0  ;;  %v4664_v2 = vmul.f32 %v4646_v25, %v4592_v61  ;;  %v4595_v24 = vmul.f32 0.5, %v4563_v8 }
0x1916   :  { %v4568_v29 = vadd.f32 %v15290_v22, %v4567_v42  ;;  %v11293_v18 = vpop.f32.mrb[49].mxu0 }
0x1917   :  { %v4665_v45 = vmul.f32 %v4647_v36, %v4593_v19  ;;  %v4570_v48 = vpop.f32.mrb[50].mxu0 }
0x1918   :  { %v4614_v47 = vmul.f32 0.70710677, %v4568_v29  ;;  %v4571_v13 = vadd.f32 %v15290_v22, %v4570_v48  ;;  %v4915_v23 = vpop.xlane.xlu0 %4914  ;;  %v11294_v28 = vpop.f32.mrb[51].mxu0 }
0x1919   :  { %v4685_v63 = vpack.c.bf16 %v4665_v45, %v4664_v2  ;;  %v4951_v56 = vmul.f32 0.03125, %v4915_v23 }
0x191a   :  { %12562 = verf.f32 %v4614_v47  ;;  %v4615_v41 = vmul.f32 0.70710677, %v4571_v13  ;;  %v4918_v35 = vpop.xlane.xlu1 %4917 }
0x191b   :  { %v15538_v55 = vsub.f32 %v15465_v16, %v4951_v56  ;;  %v4952_v34 = vmul.f32 0.03125, %v4918_v35  ;;  %11328 = vmatmul.mubr.msk.bf16.gmra.mrb[40].mxu1 %vm4713_vm8, %v4685_v63 }
0x191c   :  { %v12559_v27 = vpop.eup %12558  ;;  %12564 = verf.f32 %v4615_v41  ;;  %v4999_v52 = vpop.xlane.xlu0 %4998  ;;  %11331 = vmatprep.mubr.msk.bf16.mxu1 %vm12971_vm1, %v17814_v9 }
0x191d   :  { %v4648_v57 = vadd.f32 1.0, %v12559_v27  ;;  %v15544_v4 = vsub.f32 %v15472_v31, %v4952_v34  ;;  %v5051_v12 = vmul.f32 0.03125, %v4999_v52  ;;  %v4575_v54 = vpop.f32.mrb[52].mxu0  ;;  %v4987_v62 = vmul.f32 %v15538_v55, %v15538_v55 }
0x191e   :  { %v12561_v39 = vpop.eup %12560  ;;  %v4576_v51 = vadd.f32 %v15290_v22, %v4575_v54  ;;  %v5002_v15 = vpop.xlane.xlu1 %5001  ;;  %v4596_v52 = vmul.f32 0.5, %v4568_v29 }
0x191f   :  { %v11297_v25 = vpop.f32.mrb[53].mxu0  ;;  %v4649_v61 = vadd.f32 1.0, %v12561_v39  ;;  %v5069_v19 = vadd.f32 1e-05, %v5051_v12  ;;  %v5052_v36 = vmul.f32 0.03125, %v5002_v15  ;;  %v4666_v18 = vmul.f32 %v4648_v57, %v4594_v6 }
0x1920   :  { %v4578_v42 = vpop.f32.mrb[54].mxu0  ;;  %v4616_v2 = vmul.f32 0.70710677, %v4576_v51  ;;  %v5021_v48 = vsel %vm224_vm3, %v4987_v62, 0.0  ;;  %v4988_v33 = vmul.f32 %v15544_v4, %v15544_v4  ;;  %v4597_v12 = vmul.f32 0.5, %v4571_v13 }
0x1921   :  { %v4579_v45 = vadd.f32 %v15290_v22, %v4578_v42  ;;  %v11298_v47 = vpop.f32.mrb[55].mxu0  ;;  %v4667_v23 = vmul.f32 %v4649_v61, %v4595_v24  ;;  %12566 = vrsqrt.f32 %v5069_v19  ;;  %v5070_v28 = vadd.f32 1e-05, %v5052_v36  ;;  %5022 = vadd.xlane.f32.xlu0 %v5021_v48  ;;  %v15560_v19 = vld [vmem:[%s17788_s8 + $0x7] ss:$0 sm:$0xff] }
0x1922   :  { %12568 = verf.f32 %v4616_v2  ;;  %v5024_v56 = vsel %vm224_vm3, %v4988_v33, 0.0  ;;  %v15567_v47 = vld [vmem:[%s17788_s8 + $0x8] ss:$0 sm:$0xff] }
0x1923   :  { %v4617_v8 = vmul.f32 0.70710677, %v4579_v45  ;;  %v4686_v63 = vpack.c.bf16 %v4667_v23, %v4666_v18  ;;  %12570 = vrsqrt.f32 %v5070_v28  ;;  %5025 = vadd.xlane.f32.xlu1 %v5024_v56  ;;  %v4598_v28 = vmul.f32 0.5, %v4576_v51 }
0x1924   :  { %v12563_v41 = vpop.eup %12562  ;;  %v5005_v22 = vpop.xlane.xlu0 %5004 }
0x1925   :  { %12572 = verf.f32 %v4617_v8  ;;  %v4650_v35 = vadd.f32 1.0, %v12563_v41  ;;  %v5053_v34 = vmul.f32 0.03125, %v5005_v22  ;;  %11332 = vmatmul.mubr.msk.bf16.gmra.mrb[44].mxu1 %vm4713_vm8, %v4686_v63 }
0x1926   :  { %v12565_v27 = vpop.eup %12564  ;;  %v5008_v57 = vpop.xlane.xlu1 %5007  ;;  %11335 = vmatprep.mubr.msk.bf16.mxu1 %vm12971_vm1, %v17814_v9 }
0x1927   :  { %v4651_v54 = vadd.f32 1.0, %v12565_v27  ;;  %v5071_v62 = vadd.f32 1e-05, %v5053_v34  ;;  %v5054_v39 = vmul.f32 0.03125, %v5008_v57  ;;  %v4668_v6 = vmul.f32 %v4650_v35, %v4596_v52 }
0x1929   :  { %v4669_v15 = vmul.f32 %v4651_v54, %v4597_v12  ;;  %12574 = vrsqrt.f32 %v5071_v62  ;;  %v5072_v25 = vadd.f32 1e-05, %v5054_v39 }
0x192b   :  { %v12567_v24 = vpop.eup %12566  ;;  %v4687_v61 = vpack.c.bf16 %v4669_v15, %v4668_v6  ;;  %12576 = vrsqrt.f32 %v5072_v25 }
0x192c   :  { %v12569_v29 = vpop.eup %12568  ;;  %v5105_v36 = vmul.f32 %v12567_v24, %v15469_v59  ;;  %v5011_v42 = vpop.xlane.xlu0 %5010  ;;  %v4599_v59 = vmul.f32 0.5, %v4579_v45 }
0x192d   :  { %v12571_v13 = vpop.eup %12570  ;;  %v4652_v18 = vadd.f32 1.0, %v12569_v29  ;;  %v5055_v2 = vmul.f32 0.03125, %v5011_v42  ;;  %11336 = vmatmul.mubr.msk.bf16.gmra.mrb[48].mxu1 %vm4713_vm8, %v4687_v61 }
0x192e   :  { %v5127_v23 = vmul.f32 %v15560_v19, %v5105_v36  ;;  %v5106_v33 = vmul.f32 %v12571_v13, %v15477_v37  ;;  %v5014_v8 = vpop.xlane.xlu1 %5013  ;;  %11339 = vmatprep.mubr.msk.bf16.mxu1 %vm12971_vm1, %v17814_v9 }
0x192f   :  { %v12573_v48 = vpop.eup %12572  ;;  %v5073_v56 = vadd.f32 1e-05, %v5055_v2  ;;  %v5056_v41 = vmul.f32 0.03125, %v5014_v8  ;;  %v4670_v35 = vmul.f32 %v4652_v18, %v4598_v28 }
0x1930   :  { %v4653_v63 = vadd.f32 1.0, %v12573_v48  ;;  %v5128_v22 = vmul.f32 %v15560_v19, %v5106_v33  ;;  %v5149_v52 = vadd.f32 %v15567_v47, %v5127_v23 }
0x1931   :  { %12578 = vrsqrt.f32 %v5073_v56  ;;  %v5074_v27 = vadd.f32 1e-05, %v5056_v41 }
0x1932   :  { %v4671_v34 = vmul.f32 %v4653_v63, %v4599_v59  ;;  %v5150_v51 = vadd.f32 %v15567_v47, %v5128_v22 }
0x1933   :  { %v12575_v57 = vpop.eup %12574  ;;  %12580 = vrsqrt.f32 %v5074_v27 }
0x1934   :  { %v4688_v37 = vpack.c.bf16 %v4671_v34, %v4670_v35  ;;  %v5172_v12 = vpack.c.bf16 %v5150_v51, %v5149_v52  ;;  %v5107_v54 = vmul.f32 %v12575_v57, %v15488_v11  ;;  %v5017_v45 = vpop.xlane.xlu0 %5016 }
0x1935   :  { %v12577_v62 = vpop.eup %12576  ;;  %v5057_v39 = vmul.f32 0.03125, %v5017_v45 }
0x1936   :  { %11340 = vmatmul.mubr.msk.bf16.gmra.mrb[52].mxu1 %vm4713_vm8, %v4688_v37  ;;  %v5129_v6 = vmul.f32 %v15560_v19, %v5107_v54  ;;  %v5108_v15 = vmul.f32 %v12577_v62, %v15491_v32  ;;  %11348 = vmatmul.mubr.msk.bf16.vlgmr.msra.gmra.mrb[56].mxu0 %vm224_vm3, %v5172_v12  ;;  %v5020_v25 = vpop.xlane.xlu1 %5019 }
0x1937   :  { %11393 = vmatprep.mubr.msk.bf16.mxu1 %vm12971_vm1, %v17814_v9  ;;  %v5075_v24 = vadd.f32 1e-05, %v5057_v39  ;;  %v5058_v61 = vmul.f32 0.03125, %v5020_v25  ;;  %11351 = vmatprep.mubr.msk.bf16.mxu0 %vm12971_vm1, %v17814_v9 }
0x1938   :  { %v5130_v11 = vmul.f32 %v15560_v19, %v5108_v15  ;;  %v5151_v36 = vadd.f32 %v15567_v47, %v5129_v6 }
0x1939   :  { %12582 = vrsqrt.f32 %v5075_v24  ;;  %v5076_v29 = vadd.f32 1e-05, %v5058_v61 }
0x193a   :  { %v5152_v42 = vadd.f32 %v15567_v47, %v5130_v11 }
0x193b   :  { %v12579_v32 = vpop.eup %12578  ;;  %12584 = vrsqrt.f32 %v5076_v29 }
0x193c   :  { %v5173_v13 = vpack.c.bf16 %v5152_v42, %v5151_v36  ;;  %v5109_v18 = vmul.f32 %v12579_v32, %v15500_v44 }
0x193d   :  { %v12581_v2 = vpop.eup %12580 }
0x193e   :  { %v5131_v48 = vmul.f32 %v15560_v19, %v5109_v18  ;;  %v5110_v23 = vmul.f32 %v12581_v2, %v15503_v40  ;;  %11352 = vmatmul.mubr.msk.bf16.gmra.mrb[60].mxu0 %vm224_vm3, %v5173_v13 }
0x193f   :  { %11355 = vmatprep.mubr.msk.bf16.mxu0 %vm12971_vm1, %v17814_v9 }
0x1940   :  { %v5132_v28 = vmul.f32 %v15560_v19, %v5110_v23  ;;  %v5153_v33 = vadd.f32 %v15567_v47, %v5131_v48 }
0x1942   :  { %v5154_v8 = vadd.f32 %v15567_v47, %v5132_v28 }
0x1943   :  { %v12583_v59 = vpop.eup %12582 }
0x1944   :  { %v5174_v63 = vpack.c.bf16 %v5154_v8, %v5153_v33  ;;  %v5111_v44 = vmul.f32 %v12583_v59, %v15512_v58 }
0x1945   :  { %v12585_v56 = vpop.eup %12584 }
0x1946   :  { %v5133_v41 = vmul.f32 %v15560_v19, %v5111_v44  ;;  %v5112_v40 = vmul.f32 %v12585_v56, %v15515_v53  ;;  %11356 = vmatmul.mubr.msk.bf16.gmra.mrb[64].mxu0 %vm224_vm3, %v5174_v63 }
0x1947   :  { %11359 = vmatprep.mubr.msk.bf16.mxu0 %vm12971_vm1, %v17814_v9 }
0x1948   :  { %v5134_v22 = vmul.f32 %v15560_v19, %v5112_v40  ;;  %v5155_v35 = vadd.f32 %v15567_v47, %v5133_v41 }
0x194a   :  { %v5156_v34 = vadd.f32 %v15567_v47, %v5134_v22 }
0x194c   :  { %v5175_v27 = vpack.c.bf16 %v5156_v34, %v5155_v35 }
0x194e   :  { %11360 = vmatmul.mubr.msk.bf16.gmra.mrb[68].mxu0 %vm224_vm3, %v5175_v27 }
0x194f   :  { %11363 = vmatprep.mubr.msk.bf16.mxu0 %vm12971_vm1, %v17814_v9 }
0x19ae   :  { %v5023_v58 = vpop.xlane.xlu0 %5022 }
0x19af   :  { %v5059_v52 = vmul.f32 0.03125, %v5023_v58 }
0x19b0   :  { %v5026_v51 = vpop.xlane.xlu1 %5025 }
0x19b1   :  { %v5077_v53 = vadd.f32 1e-05, %v5059_v52  ;;  %v5060_v57 = vmul.f32 0.03125, %v5026_v51 }
0x19b3   :  { %12586 = vrsqrt.f32 %v5077_v53  ;;  %v5078_v37 = vadd.f32 1e-05, %v5060_v57 }
0x19b5   :  { %12588 = vrsqrt.f32 %v5078_v37 }
0x19bd   :  { %v12587_v12 = vpop.eup %12586 }
0x19be   :  { %v5113_v54 = vmul.f32 %v12587_v12, %v15538_v55 }
0x19bf   :  { %v12589_v45 = vpop.eup %12588 }
0x19c0   :  { %v5135_v62 = vmul.f32 %v15560_v19, %v5113_v54  ;;  %v5114_v39 = vmul.f32 %v12589_v45, %v15544_v4 }
0x19c2   :  { %v5136_v6 = vmul.f32 %v15560_v19, %v5114_v39  ;;  %v5157_v15 = vadd.f32 %v15567_v47, %v5135_v62 }
0x19c4   :  { %v5158_v25 = vadd.f32 %v15567_v47, %v5136_v6 }
0x19c6   :  { %v5176_v24 = vpack.c.bf16 %v5158_v25, %v5157_v15 }
0x19c8   :  { %11364 = vmatmul.mubr.msk.bf16.gmra.mrb[72].mxu0 %vm224_vm3, %v5176_v24 }
0x19c9   :  { %11367 = vmatprep.mubr.msk.bf16.mxu0 %vm12971_vm1, %v17814_v9 }
0x19ee   :  { %v4815_v61 = vpop.f32.mrb[40].mxu1 }
0x19ef   :  { %v4856_v55 = vadd.f32 %v4815_v61, %v15130_v1  ;;  %v11329_v11 = vpop.f32.mrb[41].mxu1 }
0x19f0   :  { %v4818_v29 = vpop.f32.mrb[42].mxu1 }
0x19f1   :  { %v15620_v36 = vadd.f32 %v15377_v10, %v4856_v55  ;;  %v4857_v4 = vadd.f32 %v4818_v29, %v15252_v60  ;;  %v11330_v42 = vpop.f32.mrb[43].mxu1 }
0x19f3   :  { %v15624_v32 = vadd.f32 %v15377_v10, %v4857_v4  ;;  %v4919_v13 = vsel %vm224_vm3, %v15620_v36, 0.0 }
0x19f4   :  { %4920 = vadd.xlane.f32.xlu0 %v4919_v13 }
0x19f5   :  { %v4922_v18 = vsel %vm224_vm3, %v15624_v32, 0.0 }
0x19f6   :  { %4923 = vadd.xlane.f32.xlu1 %v4922_v18 }
0x19f8   :  { %v4823_v1 = vpop.f32.mrb[44].mxu1 }
0x19f9   :  { %v4858_v2 = vadd.f32 %v4823_v1, %v15257_v21  ;;  %v11333_v48 = vpop.f32.mrb[45].mxu1 }
0x19fa   :  { %v4826_v23 = vpop.f32.mrb[46].mxu1 }
0x19fb   :  { %v15632_v28 = vadd.f32 %v15377_v10, %v4858_v2  ;;  %v4859_v60 = vadd.f32 %v4826_v23, %v15266_v46  ;;  %v11334_v33 = vpop.f32.mrb[47].mxu1 }
0x19fd   :  { %17821 = vst [vmem:[#allocation3_spill] sm:$0xff] %v15632_v28  ;;  %v15636_v8 = vadd.f32 %v15377_v10, %v4859_v60  ;;  %v4925_v59 = vsel %vm224_vm3, %v15632_v28, 0.0 }
0x19fe   :  { %4926 = vadd.xlane.f32.xlu0 %v4925_v59 }
0x19ff   :  { %17822 = vst [vmem:[#allocation5_spill] sm:$0xff] %v15636_v8  ;;  %v4928_v63 = vsel %vm224_vm3, %v15636_v8, 0.0 }
0x1a00   :  { %4929 = vadd.xlane.f32.xlu1 %v4928_v63  ;;  %v4831_v21 = vpop.f32.mrb[48].mxu1 }
0x1a01   :  { %v4860_v44 = vadd.f32 %v4831_v21, %v15271_v43  ;;  %v11337_v56 = vpop.f32.mrb[49].mxu1 }
0x1a02   :  { %v4834_v41 = vpop.f32.mrb[50].mxu1 }
0x1a03   :  { %v15644_v40 = vadd.f32 %v15377_v10, %v4860_v44  ;;  %v4861_v46 = vadd.f32 %v4834_v41, %v15283_v26  ;;  %v11338_v22 = vpop.f32.mrb[51].mxu1 }
0x1a05   :  { %17823 = vst [vmem:[#allocation2_spill] sm:$0xff] %v15644_v40  ;;  %v15648_v35 = vadd.f32 %v15377_v10, %v4861_v46  ;;  %v4931_v34 = vsel %vm224_vm3, %v15644_v40, 0.0 }
0x1a06   :  { %4932 = vadd.xlane.f32.xlu0 %v4931_v34 }
0x1a07   :  { %17824 = vst [vmem:[#allocation6_spill] sm:$0xff] %v15648_v35  ;;  %v4934_v27 = vsel %vm224_vm3, %v15648_v35, 0.0 }
0x1a08   :  { %4935 = vadd.xlane.f32.xlu1 %v4934_v27 }
0x1a09   :  { %v4839_v43 = vpop.f32.mrb[52].mxu1  ;;  %v5254_v53 = vpop.f32.mrb[56].mxu0 }
0x1a0a   :  { %v4862_v58 = vadd.f32 %v4839_v43, %v15293_v7  ;;  %v11341_v52 = vpop.f32.mrb[53].mxu1  ;;  %v11349_v57 = vpop.f32.mrb[57].mxu0 }
0x1a0b   :  { %v4842_v51 = vpop.f32.mrb[54].mxu1  ;;  %v5257_v54 = vpop.f32.mrb[58].mxu0 }
0x1a0c   :  { %v15656_v26 = vadd.f32 %v15377_v10, %v4862_v58  ;;  %v4863_v37 = vadd.f32 %v4842_v51, %v15305_v14  ;;  %v11342_v12 = vpop.f32.mrb[55].mxu1  ;;  %v15659_v45 = vpack.c.bf16 %v5257_v54, %v5254_v53  ;;  %v11350_v62 = vpop.f32.mrb[59].mxu0 }
0x1a0e   :  { %17825 = vst [vmem:[#allocation4_spill] sm:$0xff] %v15656_v26  ;;  %v15662_v39 = vadd.f32 %v15377_v10, %v4863_v37  ;;  %v4937_v7 = vsel %vm224_vm3, %v15656_v26, 0.0 }
0x1a0f   :  { %4938 = vadd.xlane.f32.xlu0 %v4937_v7 }
0x1a10   :  { %17826 = vst [vmem:[#allocation7_spill] sm:$0xff] %v15662_v39  ;;  %v4940_v6 = vsel %vm224_vm3, %v15662_v39, 0.0 }
0x1a11   :  { %4941 = vadd.xlane.f32.xlu1 %v4940_v6  ;;  %v5262_v15 = vpop.f32.mrb[60].mxu0 }
0x1a12   :  { %v11353_v25 = vpop.f32.mrb[61].mxu0 }
0x1a13   :  { %v5265_v24 = vpop.f32.mrb[62].mxu0 }
0x1a14   :  { %v15668_v14 = vpack.c.bf16 %v5265_v24, %v5262_v15  ;;  %v11354_v61 = vpop.f32.mrb[63].mxu0 }
0x1a19   :  { %v5270_v55 = vpop.f32.mrb[64].mxu0 }
0x1a1a   :  { %v11357_v11 = vpop.f32.mrb[65].mxu0 }
0x1a1b   :  { %v5273_v29 = vpop.f32.mrb[66].mxu0 }
0x1a1c   :  { %v15670_v4 = vpack.c.bf16 %v5273_v29, %v5270_v55  ;;  %v11358_v10 = vpop.f32.mrb[67].mxu0 }
0x1a21   :  { %v5278_v42 = vpop.f32.mrb[68].mxu0 }
0x1a22   :  { %5346 = vrot.lane.b32.xlu1 %v15668_v14, %s12972_s29  ;;  %v11361_v13 = vpop.f32.mrb[69].mxu0 }
0x1a23   :  { %v5281_v18 = vpop.f32.mrb[70].mxu0 }
0x1a24   :  { %v15674_v1 = vpack.c.bf16 %v5281_v18, %v5278_v42  ;;  %v11362_v2 = vpop.f32.mrb[71].mxu0 }
0x1a25   :  { %5344 = vrot.lane.b32.xlu0 %v15659_v45, %s12972_s29 }
0x1a26   :  { %5350 = vrot.lane.b32.xlu1 %v15674_v1, %s12972_s29 }
0x1a29   :  { %5348 = vrot.lane.b32.xlu0 %v15670_v4, %s12972_s29 }
0x1a81   :  { %v4921_v48 = vpop.xlane.xlu0 %4920 }
0x1a82   :  { %v4953_v23 = vmul.f32 0.03125, %v4921_v48 }
0x1a83   :  { %v4924_v60 = vpop.xlane.xlu1 %4923 }
0x1a84   :  { %v15683_v33 = vsub.f32 %v15620_v36, %v4953_v23  ;;  %v4954_v59 = vmul.f32 0.03125, %v4924_v60 }
0x1a86   :  { %v15686_v63 = vsub.f32 %v15624_v32, %v4954_v59  ;;  %v4989_v21 = vmul.f32 %v15683_v33, %v15683_v33 }
0x1a88   :  { %v5027_v44 = vsel %vm224_vm3, %v4989_v21, 0.0  ;;  %v4990_v56 = vmul.f32 %v15686_v63, %v15686_v63 }
0x1a89   :  { %5028 = vadd.xlane.f32.xlu1 %v5027_v44 }
0x1a8a   :  { %v5030_v41 = vsel %vm224_vm3, %v4990_v56, 0.0 }
0x1a8b   :  { %v4927_v46 = vpop.xlane.xlu0 %4926  ;;  %5031 = vadd.xlane.f32.xlu0 %v5030_v41 }
0x1a8c   :  { %v4955_v22 = vmul.f32 0.03125, %v4927_v46 }
0x1a8d   :  { %v4930_v34 = vpop.xlane.xlu1 %4929 }
0x1a8e   :  { %v15695_v27 = vsub.f32 %v15632_v28, %v4955_v22  ;;  %v4956_v43 = vmul.f32 0.03125, %v4930_v34 }
0x1a90   :  { %v15698_v58 = vsub.f32 %v15636_v8, %v4956_v43  ;;  %v4991_v52 = vmul.f32 %v15695_v27, %v15695_v27 }
0x1a92   :  { %v5033_v53 = vsel %vm224_vm3, %v4991_v52, 0.0  ;;  %v4992_v51 = vmul.f32 %v15698_v58, %v15698_v58 }
0x1a93   :  { %v4933_v57 = vpop.xlane.xlu0 %4932  ;;  %5034 = vadd.xlane.f32.xlu1 %v5033_v53 }
0x1a94   :  { %v4957_v37 = vmul.f32 0.03125, %v4933_v57  ;;  %v5036_v7 = vsel %vm224_vm3, %v4992_v51, 0.0 }
0x1a95   :  { %v4936_v12 = vpop.xlane.xlu1 %4935 }
0x1a96   :  { %v15706_v54 = vsub.f32 %v15644_v40, %v4957_v37  ;;  %v4958_v62 = vmul.f32 0.03125, %v4936_v12 }
0x1a97   :  { %5037 = vadd.xlane.f32.xlu1 %v5036_v7 }
0x1a98   :  { %v15710_v6 = vsub.f32 %v15648_v35, %v4958_v62  ;;  %v4993_v15 = vmul.f32 %v15706_v54, %v15706_v54 }
0x1a9a   :  { %v5039_v25 = vsel %vm224_vm3, %v4993_v15, 0.0  ;;  %v4994_v24 = vmul.f32 %v15710_v6, %v15710_v6 }
0x1a9b   :  { %5040 = vadd.xlane.f32.xlu0 %v5039_v25  ;;  %v5286_v55 = vpop.f32.mrb[72].mxu0 }
0x1a9c   :  { %v4939_v61 = vpop.xlane.xlu0 %4938  ;;  %v5042_v29 = vsel %vm224_vm3, %v4994_v24, 0.0  ;;  %v11365_v10 = vpop.f32.mrb[73].mxu0  ;;  %v15736_v43 = vpack.c.bf16 %v5286_v55, %v5286_v55 }
0x1a9d   :  { %v4959_v11 = vmul.f32 0.03125, %v4939_v61  ;;  %5043 = vadd.xlane.f32.xlu1 %v5042_v29  ;;  %v15721_v18 = vpop.f32.mrb[74].mxu0 }
0x1a9e   :  { %v4942_v42 = vpop.xlane.xlu1 %4941  ;;  %v11366_v48 = vpop.f32.mrb[75].mxu0 }
0x1a9f   :  { %v15719_v13 = vsub.f32 %v15656_v26, %v4959_v11  ;;  %v4960_v2 = vmul.f32 0.03125, %v4942_v42 }
0x1aa0   :  { %v5345_v23 = vpop.permute.xlu0 %5344 }
0x1aa1   :  { %v15724_v60 = vsub.f32 %v15662_v39, %v4960_v2  ;;  %v5370_v59 = vsel %vm689_vm4, %v5345_v23, 0  ;;  %v4995_v21 = vmul.f32 %v15719_v13, %v15719_v13 }
0x1aa2   :  { %11384 = vmatpush3.bf16.xpose.msra.mxu1 %v5370_v59  ;;  %v5347_v41 = vpop.permute.xlu1 %5346 }
0x1aa3   :  { %v5045_v44 = vsel %vm224_vm3, %v4995_v21, 0.0  ;;  %v4996_v56 = vmul.f32 %v15724_v60, %v15724_v60  ;;  %11385 = vmatprep.subr.bf16.mxu1 %v17814_v9  ;;  %v5373_v22 = vsel %vm689_vm4, %v5347_v41, 0 }
0x1aa4   :  { %5046 = vadd.xlane.f32.xlu1 %v5045_v44  ;;  %v5349_v34 = vpop.permute.xlu0 %5348 }
0x1aa5   :  { %v5048_v46 = vsel %vm224_vm3, %v4996_v56, 0.0  ;;  %v5376_v52 = vsel %vm689_vm4, %v5349_v34, 0 }
0x1aa6   :  { %v5351_v53 = vpop.permute.xlu1 %5350 }
0x1aa7   :  { %v5379_v51 = vsel %vm689_vm4, %v5351_v53, 0 }
0x1aa8   :  { %5049 = vadd.xlane.f32.xlu1 %v5048_v46 }
0x1aaa   :  { %11386 = vmatpush3.bf16.xpose.msra.mxu1 %v5373_v22 }
0x1aab   :  { %11387 = vmatprep.subr.bf16.mxu1 %v17814_v9 }
0x1ab1   :  { %5352 = vrot.lane.b32.xlu0 %v15736_v43, %s12972_s29 }
0x1ab2   :  { %11388 = vmatpush3.bf16.xpose.msra.mxu1 %v5376_v52 }
0x1ab3   :  { %11389 = vmatprep.subr.bf16.mxu1 %v17814_v9 }
0x1ab5   :  { %5681 = vrot.lane.b32.xlu0 %v15668_v14, %s12973_s30 }
0x1ab9   :  { %5679 = vrot.lane.b32.xlu1 %v15659_v45, %s12973_s30  ;;  %5683 = vrot.lane.b32.xlu0 %v15670_v4, %s12973_s30 }
0x1aba   :  { %11390 = vmatpush3.bf16.xpose.msra.mxu1 %v5379_v51 }
0x1abb   :  { %11391 = vmatprep.subr.bf16.mxu1 %v17814_v9 }
0x1abd   :  { %5687 = vrot.lane.b32.xlu1 %v15736_v43, %s12973_s30  ;;  %5685 = vrot.lane.b32.xlu0 %v15674_v1, %s12973_s30 }
0x1ac1   :  { %5671 = vrot.lane.b32.xlu1 %v15668_v14, %s12974_s10  ;;  %5669 = vrot.lane.b32.xlu0 %v15659_v45, %s12974_s10 }
0x1ac5   :  { %5675 = vrot.lane.b32.xlu1 %v15674_v1, %s12974_s10  ;;  %5673 = vrot.lane.b32.xlu0 %v15670_v4, %s12974_s10 }
0x1ac9   :  { %5560 = vrot.lane.b32.xlu1 %v15659_v45, %s12975_s1  ;;  %5677 = vrot.lane.b32.xlu0 %v15736_v43, %s12974_s10 }
0x1acd   :  { %5564 = vrot.lane.b32.xlu1 %v15670_v4, %s12975_s1  ;;  %5562 = vrot.lane.b32.xlu0 %v15668_v14, %s12975_s1 }
0x1ad1   :  { %5568 = vrot.lane.b32.xlu1 %v15736_v43, %s12975_s1  ;;  %5566 = vrot.lane.b32.xlu0 %v15674_v1, %s12975_s1 }
0x1ad5   :  { %5895 = vrot.lane.b32.xlu0 %v15659_v45, %s12976_s0 }
0x1b16   :  { %v5029_v57 = vpop.xlane.xlu1 %5028 }
0x1b17   :  { %v5061_v37 = vmul.f32 0.03125, %v5029_v57 }
0x1b18   :  { %v5032_v12 = vpop.xlane.xlu0 %5031 }
0x1b19   :  { %v5079_v62 = vadd.f32 1e-05, %v5061_v37  ;;  %v5062_v7 = vmul.f32 0.03125, %v5032_v12 }
0x1b1b   :  { %12590 = vrsqrt.f32 %v5079_v62  ;;  %v5080_v15 = vadd.f32 1e-05, %v5062_v7 }
0x1b1d   :  { %12592 = vrsqrt.f32 %v5080_v15 }
0x1b20   :  { %v5035_v25 = vpop.xlane.xlu1 %5034 }
0x1b21   :  { %v5063_v24 = vmul.f32 0.03125, %v5035_v25 }
0x1b23   :  { %v5081_v61 = vadd.f32 1e-05, %v5063_v24 }
0x1b24   :  { %v5038_v55 = vpop.xlane.xlu1 %5037 }
0x1b25   :  { %v12591_v11 = vpop.eup %12590  ;;  %12594 = vrsqrt.f32 %v5081_v61  ;;  %v5064_v29 = vmul.f32 0.03125, %v5038_v55 }
0x1b26   :  { %v5115_v10 = vmul.f32 %v12591_v11, %v15683_v33 }
0x1b27   :  { %v12593_v42 = vpop.eup %12592  ;;  %v5082_v2 = vadd.f32 1e-05, %v5064_v29 }
0x1b28   :  { %v5137_v48 = vmul.f32 %v15560_v19, %v5115_v10  ;;  %v5116_v23 = vmul.f32 %v12593_v42, %v15686_v63  ;;  %v5041_v59 = vpop.xlane.xlu0 %5040 }
0x1b29   :  { %12596 = vrsqrt.f32 %v5082_v2  ;;  %v5065_v21 = vmul.f32 0.03125, %v5041_v59 }
0x1b2a   :  { %v5138_v44 = vmul.f32 %v15560_v19, %v5116_v23  ;;  %v5044_v56 = vpop.xlane.xlu1 %5043  ;;  %v5159_v22 = vadd.f32 %v15567_v47, %v5137_v48 }
0x1b2b   :  { %v5083_v41 = vadd.f32 1e-05, %v5065_v21  ;;  %v5066_v46 = vmul.f32 0.03125, %v5044_v56 }
0x1b2c   :  { %v5160_v34 = vadd.f32 %v15567_v47, %v5138_v44  ;;  %v5353_v52 = vpop.permute.xlu0 %5352 }
0x1b2d   :  { %12598 = vrsqrt.f32 %v5083_v41  ;;  %v5084_v33 = vadd.f32 1e-05, %v5066_v46  ;;  %v5382_v53 = vsel %vm689_vm4, %v5353_v52, 0 }
0x1b2e   :  { %v5177_v51 = vpack.c.bf16 %v5160_v34, %v5159_v22  ;;  %11392 = vmatpush3.bf16.xpose.msra.mxu1 %v5382_v53 }
0x1b2f   :  { %v12595_v63 = vpop.eup %12594  ;;  %12600 = vrsqrt.f32 %v5084_v33  ;;  %11413 = vmatprep.subr.bf16.mxu1 %v17814_v9 }
0x1b30   :  { %v5117_v57 = vmul.f32 %v12595_v63, %v15695_v27  ;;  %11368 = vmatmul.mubr.msk.bf16.gmra.mrb[76].mxu0 %vm224_vm3, %v5177_v51  ;;  %v5682_v12 = vpop.permute.xlu0 %5681 }
0x1b31   :  { %v5047_v37 = vpop.xlane.xlu1 %5046  ;;  %11371 = vmatprep.mubr.msk.bf16.mxu0 %vm12971_vm1, %v17814_v9  ;;  %v5708_v51 = vsel %vm689_vm4, %v5682_v12, 0 }
0x1b32   :  { %v5067_v62 = vmul.f32 0.03125, %v5047_v37  ;;  %v5139_v25 = vmul.f32 %v15560_v19, %v5117_v57 }
0x1b33   :  { %v12597_v7 = vpop.eup %12596 }
0x1b34   :  { %v5085_v15 = vadd.f32 1e-05, %v5067_v62  ;;  %v5118_v24 = vmul.f32 %v12597_v7, %v15698_v58  ;;  %v5684_v55 = vpop.permute.xlu0 %5683  ;;  %v5161_v42 = vadd.f32 %v15567_v47, %v5139_v25 }
0x1b35   :  { %v5050_v61 = vpop.xlane.xlu1 %5049  ;;  %11394 = vmatmul.mubr.msk.bf16.vlgmr.msra.gmra.mrb[56].mxu1 %vm689_vm4, %v15659_v45 }
0x1b36   :  { %12602 = vrsqrt.f32 %v5085_v15  ;;  %v5068_v11 = vmul.f32 0.03125, %v5050_v61  ;;  %v5140_v27 = vmul.f32 %v15560_v19, %v5118_v24  ;;  %11397 = vmatprep.mubr.msk.bf16.mxu1 %vm12971_vm1, %v17814_v9  ;;  %v5711_v61 = vsel %vm689_vm4, %v5684_v55, 0 }
0x1b37   :  { %v12599_v29 = vpop.eup %12598 }
0x1b38   :  { %v5086_v10 = vadd.f32 1e-05, %v5068_v11  ;;  %v5162_v2 = vadd.f32 %v15567_v47, %v5140_v27  ;;  %v5119_v58 = vmul.f32 %v12599_v29, %v15706_v54  ;;  %v5686_v23 = vpop.permute.xlu0 %5685 }
0x1b39   :  { %v5680_v48 = vpop.permute.xlu1 %5679  ;;  %v12601_v59 = vpop.eup %12600  ;;  %v5714_v55 = vsel %vm689_vm4, %v5686_v23, 0 }
0x1b3a   :  { %12604 = vrsqrt.f32 %v5086_v10  ;;  %v5705_v21 = vsel %vm689_vm4, %v5680_v48, 0  ;;  %v5178_v44 = vpack.c.bf16 %v5162_v2, %v5161_v42  ;;  %v5120_v56 = vmul.f32 %v12601_v59, %v15710_v6 }
0x1b3b   :  { %11444 = vmatpush3.bf16.xpose.msra.mxu0 %v5705_v21  ;;  %v5141_v41 = vmul.f32 %v15560_v19, %v5119_v58 }
0x1b3c   :  { %11445 = vmatprep.subr.bf16.mxu0 %v17814_v9  ;;  %v5142_v46 = vmul.f32 %v15560_v19, %v5120_v56  ;;  %11372 = vmatmul.mubr.msk.bf16.gmra.mrb[80].mxu0 %vm224_vm3, %v5178_v44  ;;  %v5670_v54 = vpop.permute.xlu0 %5669 }
0x1b3d   :  { %v5688_v22 = vpop.permute.xlu1 %5687  ;;  %11398 = vmatmul.mubr.msk.bf16.gmra.mrb[60].mxu1 %vm689_vm4, %v15668_v14  ;;  %11375 = vmatprep.mubr.msk.bf16.mxu0 %vm12971_vm1, %v17814_v9  ;;  %v5163_v52 = vadd.f32 %v15567_v47, %v5141_v41 }
0x1b3e   :  { %v5164_v34 = vadd.f32 %v15567_v47, %v5142_v46  ;;  %11401 = vmatprep.mubr.msk.bf16.mxu1 %vm12971_vm1, %v17814_v9  ;;  %v5717_v42 = vsel %vm689_vm4, %v5688_v22, 0 }
0x1b40   :  { %v12603_v6 = vpop.eup %12602  ;;  %v5674_v63 = vpop.permute.xlu0 %5673  ;;  %v5179_v57 = vpack.c.bf16 %v5164_v34, %v5163_v52 }
0x1b41   :  { %v5121_v33 = vmul.f32 %v12603_v6, %v15719_v13  ;;  %v5672_v53 = vpop.permute.xlu1 %5671 }
0x1b43   :  { %11446 = vmatpush3.bf16.xpose.msra.mxu0 %v5708_v51  ;;  %v5143_v62 = vmul.f32 %v15560_v19, %v5121_v33 }
0x1b44   :  { %v12605_v37 = vpop.eup %12604  ;;  %11447 = vmatprep.subr.bf16.mxu0 %v17814_v9  ;;  %11376 = vmatmul.mubr.msk.bf16.gmra.mrb[84].mxu0 %vm224_vm3, %v5179_v57  ;;  %v5678_v12 = vpop.permute.xlu0 %5677 }
0x1b45   :  { %v5122_v7 = vmul.f32 %v12605_v37, %v15724_v60  ;;  %v5676_v15 = vpop.permute.xlu1 %5675  ;;  %11402 = vmatmul.mubr.msk.bf16.gmra.mrb[64].mxu1 %vm689_vm4, %v15670_v4  ;;  %11379 = vmatprep.mubr.msk.bf16.mxu0 %vm12971_vm1, %v17814_v9  ;;  %v5165_v25 = vadd.f32 %v15567_v47, %v5143_v62 }
0x1b46   :  { %11405 = vmatprep.mubr.msk.bf16.mxu1 %vm12971_vm1, %v17814_v9 }
0x1b47   :  { %v5144_v13 = vmul.f32 %v15560_v19, %v5122_v7 }
0x1b48   :  { %v5563_v19 = vpop.permute.xlu0 %5562 }
0x1b49   :  { %v5166_v24 = vadd.f32 %v15567_v47, %v5144_v13  ;;  %v5561_v60 = vpop.permute.xlu1 %5560 }
0x1b4a   :  { %11414 = vmatpush3.bf16.msra.mxu1 %v5561_v60 }
0x1b4b   :  { %v5180_v11 = vpack.c.bf16 %v5166_v24, %v5165_v25  ;;  %11448 = vmatpush3.bf16.xpose.msra.mxu0 %v5711_v61  ;;  %11415 = vmatprep.subr.bf16.mxu1 %v17814_v9 }
0x1b4c   :  { %11449 = vmatprep.subr.bf16.mxu0 %v17814_v9  ;;  %v5567_v27 = vpop.permute.xlu0 %5566 }
0x1b4d   :  { %11380 = vmatmul.mubr.msk.bf16.gmra.mrb[88].mxu0 %vm224_vm3, %v5180_v11  ;;  %11406 = vmatmul.mubr.msk.bf16.gmra.mrb[68].mxu1 %vm689_vm4, %v15674_v1  ;;  %v5565_v47 = vpop.permute.xlu1 %5564 }
0x1b4e   :  { %11453 = vmatprep.mubr.msk.bf16.mxu0 %vm12971_vm1, %v17814_v9  ;;  %11416 = vmatpush3.bf16.msra.mxu1 %v5563_v19 }
0x1b4f   :  { %11409 = vmatprep.mubr.msk.bf16.mxu1 %vm12971_vm1, %v17814_v9  ;;  %11417 = vmatprep.subr.bf16.mxu1 %v17814_v9 }
0x1b51   :  { %v5569_v29 = vpop.permute.xlu1 %5568 }
0x1b52   :  { %11418 = vmatpush3.bf16.msra.mxu1 %v5565_v47  ;;  %v5590_v10 = vand.u32 %v5569_v29, %v13600_v3 }
0x1b53   :  { %11450 = vmatpush3.bf16.xpose.msra.mxu0 %v5714_v55  ;;  %11419 = vmatprep.subr.bf16.mxu1 %v17814_v9 }
0x1b54   :  { %11451 = vmatprep.subr.bf16.mxu0 %v17814_v9 }
0x1b55   :  { %11410 = vmatmul.mubr.msk.bf16.gmra.mrb[72].mxu1 %vm689_vm4, %v15736_v43 }
0x1b56   :  { %11420 = vmatpush3.bf16.msra.mxu1 %v5567_v27  ;;  %11423 = vmatprep.mubr.msk.bf16.mxu1 %vm12971_vm1, %v17814_v9 }
0x1b57   :  { %11421 = vmatprep.subr.bf16.mxu1 %v17814_v9 }
0x1b5a   :  { %11422 = vmatpush3.bf16.msra.mxu1 %v5590_v10 }
0x1b5b   :  { %11452 = vmatpush3.bf16.xpose.msra.mxu0 %v5717_v42  ;;  %11473 = vmatprep.subr.bf16.mxu1 %v17814_v9 }
0x1b5c   :  { %11503 = vmatprep.subr.bf16.mxu0 %v17814_v9 }
0x1b62   :  { %11454 = vmatmul.mubr.msk.bf16.vlgmr.msra.gmra.mrb[92].mxu0 %vm689_vm4, %v5670_v54 }
0x1b63   :  { %11457 = vmatprep.mubr.msk.bf16.mxu0 %vm12971_vm1, %v17814_v9 }
0x1b6a   :  { %11458 = vmatmul.mubr.msk.bf16.gmra.mrb[96].mxu0 %vm689_vm4, %v5672_v53 }
0x1b6b   :  { %11461 = vmatprep.mubr.msk.bf16.mxu0 %vm12971_vm1, %v17814_v9 }
0x1b72   :  { %11462 = vmatmul.mubr.msk.bf16.gmra.mrb[100].mxu0 %vm689_vm4, %v5674_v63 }
0x1b73   :  { %11465 = vmatprep.mubr.msk.bf16.mxu0 %vm12971_vm1, %v17814_v9 }
0x1b7a   :  { %11466 = vmatmul.mubr.msk.bf16.gmra.mrb[104].mxu0 %vm689_vm4, %v5676_v15 }
0x1b7b   :  { %11469 = vmatprep.mubr.msk.bf16.mxu0 %vm12971_vm1, %v17814_v9 }
0x1b82   :  { %11470 = vmatmul.mubr.msk.bf16.gmra.mrb[108].mxu0 %vm689_vm4, %v5678_v12 }
0x1b83   :  { %11505 = vmatprep.mubr.msk.bf16.mxu0 %vm12971_vm1, %v17814_v9 }
0x1c03   :  { %v5294_v2 = vpop.f32.mrb[76].mxu0 }
0x1c04   :  { %v15866_v58 = vpack.c.bf16 %v5294_v2, %v15721_v18  ;;  %v11369_v48 = vpop.f32.mrb[77].mxu0 }
0x1c05   :  { %v5297_v23 = vpop.f32.mrb[78].mxu0 }
0x1c06   :  { %v11370_v59 = vpop.f32.mrb[79].mxu0 }
0x1c08   :  { %v15868_v21 = vpop.f32.mrb[56].mxu1 }
0x1c09   :  { %v11395_v44 = vpop.f32.mrb[57].mxu1  ;;  %v5456_v56 = vsel %vm792_vm5, %v15868_v21, -inf }
0x1c0a   :  { %5457 = vmax.xlane.f32.xlu1 %v5456_v56  ;;  %v15872_v41 = vpop.f32.mrb[58].mxu1 }
0x1c0b   :  { %v11396_v46 = vpop.f32.mrb[59].mxu1 }
0x1c0f   :  { %v5302_v22 = vpop.f32.mrb[80].mxu0 }
0x1c10   :  { %v15874_v54 = vpack.c.bf16 %v5302_v22, %v5297_v23  ;;  %v11373_v34 = vpop.f32.mrb[81].mxu0  ;;  %v15876_v6 = vpop.f32.mrb[60].mxu1 }
0x1c11   :  { %v5305_v18 = vpop.f32.mrb[82].mxu0  ;;  %v11399_v52 = vpop.f32.mrb[61].mxu1  ;;  %v5459_v34 = vsel %vm792_vm5, %v15872_v41, -inf }
0x1c12   :  { %v11374_v33 = vpop.f32.mrb[83].mxu0  ;;  %v15878_v53 = vpop.f32.mrb[62].mxu1 }
0x1c13   :  { %v11400_v51 = vpop.f32.mrb[63].mxu1  ;;  %v5462_v33 = vsel %vm792_vm5, %v15876_v6, -inf }
0x1c17   :  { %v5310_v63 = vpop.f32.mrb[84].mxu0 }
0x1c18   :  { %v15880_v57 = vpack.c.bf16 %v5310_v63, %v5305_v18  ;;  %v11377_v37 = vpop.f32.mrb[85].mxu0  ;;  %v15882_v62 = vpop.f32.mrb[64].mxu1 }
0x1c19   :  { %v5313_v7 = vpop.f32.mrb[86].mxu0  ;;  %v11403_v15 = vpop.f32.mrb[65].mxu1 }
0x1c1a   :  { %v11378_v13 = vpop.f32.mrb[87].mxu0  ;;  %v15884_v12 = vpop.f32.mrb[66].mxu1  ;;  %v5468_v15 = vsel %vm792_vm5, %v15882_v62, -inf }
0x1c1b   :  { %v11404_v25 = vpop.f32.mrb[67].mxu1 }
0x1c20   :  { %v5318_v24 = vpop.f32.mrb[88].mxu0  ;;  %v15888_v11 = vpop.f32.mrb[68].mxu1 }
0x1c21   :  { %v15886_v60 = vpack.c.bf16 %v5318_v24, %v5313_v7  ;;  %v11381_v61 = vpop.f32.mrb[89].mxu0  ;;  %v11407_v47 = vpop.f32.mrb[69].mxu1  ;;  %v5465_v24 = vsel %vm792_vm5, %v15878_v53, -inf }
0x1c22   :  { %v15890_v19 = vpop.f32.mrb[90].mxu0  ;;  %v15892_v27 = vpop.f32.mrb[70].mxu1 }
0x1c23   :  { %v11382_v55 = vpop.f32.mrb[91].mxu0  ;;  %v11408_v29 = vpop.f32.mrb[71].mxu1 }
0x1c28   :  { %v15894_v10 = vpop.f32.mrb[72].mxu1 }
0x1c29   :  { %v11411_v42 = vpop.f32.mrb[73].mxu1 }
0x1c2a   :  { %v5453_v2 = vpop.f32.mrb[74].mxu1  ;;  %v5474_v42 = vsel %vm792_vm5, %v15888_v11, -inf }
0x1c2b   :  { %v11412_v48 = vpop.f32.mrb[75].mxu1 }
0x1c35   :  { %v15896_v23 = vpop.f32.mrb[92].mxu0 }
0x1c36   :  { %v11455_v59 = vpop.f32.mrb[93].mxu0  ;;  %v5791_v44 = vsel %vm792_vm5, %v15896_v23, -inf }
0x1c37   :  { %5792 = vmax.xlane.f32.xlu0 %v5791_v44  ;;  %v15900_v56 = vpop.f32.mrb[94].mxu0  ;;  %v5471_v59 = vsel %vm792_vm5, %v15884_v12, -inf }
0x1c38   :  { %v11456_v46 = vpop.f32.mrb[95].mxu0  ;;  %v5794_v22 = vsel %vm792_vm5, %v15900_v56, -inf }
0x1c39   :  { %5795 = vmax.xlane.f32.xlu1 %v5794_v22 }
0x1c3b   :  { %5460 = vmax.xlane.f32.xlu0 %v5459_v34 }
0x1c3d   :  { %v15906_v18 = vpop.f32.mrb[96].mxu0 }
0x1c3e   :  { %v11459_v52 = vpop.f32.mrb[97].mxu0  ;;  %v5797_v7 = vsel %vm792_vm5, %v15906_v18, -inf }
0x1c3f   :  { %5463 = vmax.xlane.f32.xlu0 %v5462_v33  ;;  %v15910_v51 = vpop.f32.mrb[98].mxu0  ;;  %v5480_v52 = vsel %vm792_vm5, %v15894_v10, -inf }
0x1c40   :  { %v11460_v63 = vpop.f32.mrb[99].mxu0  ;;  %v5800_v37 = vsel %vm792_vm5, %v15910_v51, -inf }
0x1c41   :  { %5801 = vmax.xlane.f32.xlu1 %v5800_v37  ;;  %v5477_v37 = vsel %vm792_vm5, %v15892_v27, -inf }
0x1c43   :  { %5798 = vmax.xlane.f32.xlu0 %v5797_v7 }
0x1c45   :  { %5469 = vmax.xlane.f32.xlu1 %v5468_v15  ;;  %v15918_v13 = vpop.f32.mrb[100].mxu0 }
0x1c46   :  { %v11463_v25 = vpop.f32.mrb[101].mxu0  ;;  %v5803_v29 = vsel %vm792_vm5, %v15918_v13, -inf }
0x1c47   :  { %5466 = vmax.xlane.f32.xlu0 %v5465_v24  ;;  %v15922_v61 = vpop.f32.mrb[102].mxu0 }
0x1c48   :  { %v11464_v47 = vpop.f32.mrb[103].mxu0  ;;  %v5806_v55 = vsel %vm792_vm5, %v15922_v61, -inf }
0x1c49   :  { %5807 = vmax.xlane.f32.xlu1 %v5806_v55 }
0x1c4b   :  { %5804 = vmax.xlane.f32.xlu0 %v5803_v29 }
0x1c4d   :  { %5475 = vmax.xlane.f32.xlu1 %v5474_v42  ;;  %v15930_v2 = vpop.f32.mrb[104].mxu0 }
0x1c4e   :  { %v11467_v48 = vpop.f32.mrb[105].mxu0  ;;  %v5809_v34 = vsel %vm792_vm5, %v15930_v2, -inf }
0x1c4f   :  { %5472 = vmax.xlane.f32.xlu0 %v5471_v59  ;;  %v15934_v44 = vpop.f32.mrb[106].mxu0  ;;  %v15957_v48 = vpop.permute.xlu0 %5895 }
0x1c50   :  { %v11468_v46 = vpop.f32.mrb[107].mxu0  ;;  %v5812_v22 = vsel %vm792_vm5, %v15934_v44, -inf }
0x1c51   :  { %5813 = vmax.xlane.f32.xlu1 %v5812_v22 }
0x1c53   :  { %5810 = vmax.xlane.f32.xlu0 %v5809_v34 }
0x1c55   :  { %5481 = vmax.xlane.f32.xlu1 %v5480_v52  ;;  %v15942_v33 = vpop.f32.mrb[108].mxu0 }
0x1c56   :  { %v11471_v63 = vpop.f32.mrb[109].mxu0  ;;  %v5815_v25 = vsel %vm792_vm5, %v15942_v33, -inf }
0x1c57   :  { %5478 = vmax.xlane.f32.xlu0 %v5477_v37  ;;  %v5788_v7 = vpop.f32.mrb[110].mxu0 }
0x1c58   :  { %v11472_v15 = vpop.f32.mrb[111].mxu0 }
0x1c66   :  { %5899 = vrot.lane.b32.xlu1 %v15670_v4, %s12976_s0 }
0x1c6d   :  { %5897 = vrot.lane.b32.xlu0 %v15668_v14, %s12976_s0 }
0x1c8c   :  { %5816 = vmax.xlane.f32.xlu0 %v5815_v25 }
0x1c97   :  { %v5458_v24 = vpop.xlane.xlu1 %5457 }
0x1c98   :  { %v5483_v47 = vsub.f32 %v15868_v21, %v5458_v24 }
0x1c9a   :  { %v5492_v55 = vmul.f32 1.442695, %v5483_v47 }
0x1c9c   :  { %12606 = vpow2.f32 %v5492_v55 }
0x1ca6   :  { %v15953_v29 = vpop.eup %12606 }
0x1ca7   :  { %v5510_v42 = vsel %vm792_vm5, %v15953_v29, 0.0 }
0x1ca8   :  { %5511 = vadd.xlane.f32.xlu1 %v5510_v42 }
0x1cc4   :  { %v5793_v59 = vpop.xlane.xlu0 %5792 }
0x1cc5   :  { %v5818_v46 = vsub.f32 %v15896_v23, %v5793_v59 }
0x1cc6   :  { %v5796_v22 = vpop.xlane.xlu1 %5795 }
0x1cc7   :  { %v5827_v34 = vmul.f32 1.442695, %v5818_v46  ;;  %v5819_v52 = vsub.f32 %v15900_v56, %v5796_v22 }
0x1cc8   :  { %v5461_v63 = vpop.xlane.xlu0 %5460 }
0x1cc9   :  { %12608 = vpow2.f32 %v5827_v34  ;;  %v5484_v21 = vsub.f32 %v15872_v41, %v5461_v63  ;;  %v5829_v37 = vmul.f32 1.442695, %v5819_v52 }
0x1ccb   :  { %v5494_v7 = vmul.f32 1.442695, %v5484_v21 }
0x1ccc   :  { %v5464_v15 = vpop.xlane.xlu0 %5463 }
0x1ccd   :  { %12610 = vpow2.f32 %v5494_v7  ;;  %v5485_v25 = vsub.f32 %v15876_v6, %v5464_v15 }
0x1cce   :  { %v5802_v24 = vpop.xlane.xlu1 %5801  ;;  %12612 = vpow2.f32 %v5829_v37 }
0x1ccf   :  { %v5496_v47 = vmul.f32 1.442695, %v5485_v25  ;;  %v5821_v55 = vsub.f32 %v15910_v51, %v5802_v24 }
0x1cd0   :  { %v5799_v23 = vpop.xlane.xlu0 %5798 }
0x1cd1   :  { %12614 = vpow2.f32 %v5496_v47  ;;  %v5833_v42 = vmul.f32 1.442695, %v5821_v55  ;;  %v5820_v56 = vsub.f32 %v15906_v18, %v5799_v23 }
0x1cd2   :  { %v5470_v59 = vpop.xlane.xlu1 %5469 }
0x1cd3   :  { %v15965_v46 = vpop.eup %12608  ;;  %12616 = vpow2.f32 %v5833_v42  ;;  %v5831_v41 = vmul.f32 1.442695, %v5820_v56  ;;  %v5487_v22 = vsub.f32 %v15882_v62, %v5470_v59 }
0x1cd4   :  { %v5467_v34 = vpop.xlane.xlu0 %5466  ;;  %v5845_v6 = vsel %vm792_vm5, %v15965_v46, 0.0 }
0x1cd5   :  { %12618 = vpow2.f32 %v5831_v41  ;;  %v5500_v52 = vmul.f32 1.442695, %v5487_v22  ;;  %v5486_v51 = vsub.f32 %v15878_v53, %v5467_v34  ;;  %5846 = vadd.xlane.f32.xlu0 %v5845_v6 }
0x1cd6   :  { %v5808_v63 = vpop.xlane.xlu1 %5807 }
0x1cd7   :  { %v15971_v21 = vpop.eup %12610  ;;  %12620 = vpow2.f32 %v5500_v52  ;;  %v5498_v18 = vmul.f32 1.442695, %v5486_v51  ;;  %v5823_v37 = vsub.f32 %v15922_v61, %v5808_v63 }
0x1cd8   :  { %v5805_v7 = vpop.xlane.xlu0 %5804  ;;  %v5513_v62 = vsel %vm792_vm5, %v15971_v21, 0.0  ;;  %v15976_v15 = vpop.eup %12612 }
0x1cd9   :  { %12622 = vpow2.f32 %v5498_v18  ;;  %v5837_v25 = vmul.f32 1.442695, %v5823_v37  ;;  %v5822_v24 = vsub.f32 %v15918_v13, %v5805_v7  ;;  %5514 = vadd.xlane.f32.xlu0 %v5513_v62  ;;  %v5848_v56 = vsel %vm792_vm5, %v15976_v15, 0.0 }
0x1cda   :  { %v5476_v53 = vpop.xlane.xlu1 %5475 }
0x1cdb   :  { %v15979_v47 = vpop.eup %12614  ;;  %12624 = vpow2.f32 %v5837_v25  ;;  %v5835_v55 = vmul.f32 1.442695, %v5822_v24  ;;  %v5489_v23 = vsub.f32 %v15888_v11, %v5476_v53 }
0x1cdc   :  { %v5473_v42 = vpop.xlane.xlu0 %5472  ;;  %v5516_v61 = vsel %vm792_vm5, %v15979_v47, 0.0 }
0x1cdd   :  { %v15986_v59 = vpop.eup %12616  ;;  %12626 = vpow2.f32 %v5835_v55  ;;  %v5504_v41 = vmul.f32 1.442695, %v5489_v23  ;;  %v5488_v13 = vsub.f32 %v15884_v12, %v5473_v42  ;;  %5517 = vadd.xlane.f32.xlu1 %v5516_v61  ;;  %5849 = vadd.xlane.f32.xlu0 %v5848_v56 }
0x1cde   :  { %v5814_v22 = vpop.xlane.xlu1 %5813  ;;  %v5854_v52 = vsel %vm792_vm5, %v15986_v59, 0.0 }
0x1cdf   :  { %v15989_v34 = vpop.eup %12618  ;;  %12628 = vpow2.f32 %v5504_v41  ;;  %v5502_v11 = vmul.f32 1.442695, %v5488_v13 }
0x1ce0   :  { %v5811_v6 = vpop.xlane.xlu0 %5810  ;;  %v5851_v51 = vsel %vm792_vm5, %v15989_v34, 0.0 }
0x1ce1   :  { %v15995_v63 = vpop.eup %12620  ;;  %12630 = vpow2.f32 %v5502_v11  ;;  %v5824_v18 = vsub.f32 %v15930_v2, %v5811_v6  ;;  %5855 = vadd.xlane.f32.xlu1 %v5854_v52  ;;  %5852 = vadd.xlane.f32.xlu0 %v5851_v51 }
0x1ce2   :  { %v5482_v12 = vpop.xlane.xlu1 %5481  ;;  %v5522_v24 = vsel %vm792_vm5, %v15995_v63, 0.0 }
0x1ce3   :  { %v15998_v37 = vpop.eup %12622  ;;  %v5839_v7 = vmul.f32 1.442695, %v5824_v18  ;;  %v5491_v62 = vsub.f32 %v15894_v10, %v5482_v12 }
0x1ce4   :  { %v5479_v25 = vpop.xlane.xlu0 %5478  ;;  %v5519_v53 = vsel %vm792_vm5, %v15998_v37, 0.0 }
0x1ce5   :  { %v16005_v55 = vpop.eup %12624  ;;  %12632 = vpow2.f32 %v5839_v7  ;;  %v5490_v2 = vsub.f32 %v15892_v27, %v5479_v25  ;;  %5523 = vadd.xlane.f32.xlu1 %v5522_v24  ;;  %5520 = vadd.xlane.f32.xlu0 %v5519_v53  ;;  %v5508_v42 = vmul.f32 1.442695, %v5491_v62  ;;  %v5825_v62 = vsub.f32 %v15934_v44, %v5814_v22 }
0x1ce6   :  { %v5860_v10 = vsel %vm792_vm5, %v16005_v55, 0.0 }
0x1ce7   :  { %v16008_v23 = vpop.eup %12626  ;;  %v5506_v61 = vmul.f32 1.442695, %v5490_v2  ;;  %v5841_v25 = vmul.f32 1.442695, %v5825_v62 }
0x1ce8   :  { %v5857_v56 = vsel %vm792_vm5, %v16008_v23, 0.0  ;;  %v5898_v24 = vpop.permute.xlu0 %5897 }
0x1ce9   :  { %v16014_v41 = vpop.eup %12628  ;;  %12634 = vpow2.f32 %v5506_v61  ;;  %5861 = vadd.xlane.f32.xlu1 %v5860_v10  ;;  %5858 = vadd.xlane.f32.xlu0 %v5857_v56 }
0x1cea   :  { %12636 = vpow2.f32 %v5508_v42  ;;  %v5528_v27 = vsel %vm792_vm5, %v16014_v41, 0.0 }
0x1ceb   :  { %v16016_v13 = vpop.eup %12630  ;;  %12638 = vpow2.f32 %v5841_v25 }
0x1cec   :  { %v5525_v11 = vsel %vm792_vm5, %v16016_v13, 0.0 }
0x1ced   :  { %5529 = vadd.xlane.f32.xlu1 %v5528_v27  ;;  %5526 = vadd.xlane.f32.xlu0 %v5525_v11 }
0x1cef   :  { %v16022_v6 = vpop.eup %12632 }
0x1cf0   :  { %v5863_v52 = vsel %vm792_vm5, %v16022_v6, 0.0 }
0x1cf1   :  { %5864 = vadd.xlane.f32.xlu0 %v5863_v52 }
0x1cf3   :  { %v16026_v51 = vpop.eup %12634 }
0x1cf4   :  { %v5531_v18 = vsel %vm792_vm5, %v16026_v51, 0.0  ;;  %v16030_v12 = vpop.eup %12636 }
0x1cf5   :  { %5532 = vadd.xlane.f32.xlu0 %v5531_v18  ;;  %v5534_v7 = vsel %vm792_vm5, %v16030_v12, 0.0  ;;  %v16040_v61 = vpop.eup %12638 }
0x1cf6   :  { %v5866_v10 = vsel %vm792_vm5, %v16040_v61, 0.0 }
0x1cf9   :  { %5535 = vadd.xlane.f32.xlu0 %v5534_v7 }
0x1cfe   :  { %5901 = vrot.lane.b32.xlu1 %v15674_v1, %s12976_s0 }
0x1d0f   :  { %5903 = vrot.lane.b32.xlu0 %v15736_v43, %s12976_s0 }
0x1d19   :  { %v5817_v53 = vpop.xlane.xlu0 %5816 }
0x1d1a   :  { %v5826_v2 = vsub.f32 %v15942_v33, %v5817_v53  ;;  %v5900_v33 = vpop.permute.xlu1 %5899 }
0x1d1c   :  { %v5843_v42 = vmul.f32 1.442695, %v5826_v2 }
0x1d1e   :  { %12640 = vpow2.f32 %v5843_v42 }
0x1d22   :  { %5867 = vadd.xlane.f32.xlu1 %v5866_v10 }
0x1d28   :  { %v16044_v56 = vpop.eup %12640 }
0x1d29   :  { %v5869_v44 = vsel %vm792_vm5, %v16044_v56, 0.0 }
0x1d2e   :  { %5870 = vadd.xlane.f32.xlu0 %v5869_v44 }
0x1d33   :  { %6194 = vrot.lane.b32.xlu1 %v15659_v45, %s12978_s26 }
0x1d35   :  { %v5512_v22 = vpop.xlane.xlu1 %5511 }
0x1d36   :  { %12642 = vrcp.f32 %v5512_v22 }
0x1d37   :  { %6196 = vrot.lane.b32.xlu1 %v15668_v14, %s12978_s26 }
0x1d3b   :  { %6200 = vrot.lane.b32.xlu1 %v15674_v1, %s12978_s26 }
0x1d3f   :  { %6202 = vrot.lane.b32.xlu1 %v15736_v43, %s12978_s26 }
0x1d40   :  { %v12643_v25 = vpop.eup %12642 }
0x1d41   :  { %v5546_v2 = vmul.f32 %v12643_v25, %v15953_v29 }
0x1d43   :  { %6184 = vrot.lane.b32.xlu1 %v15659_v45, %s12979_s27 }
0x1d44   :  { %6198 = vrot.lane.b32.xlu0 %v15670_v4, %s12978_s26 }
0x1d47   :  { %6186 = vrot.lane.b32.xlu1 %v15668_v14, %s12979_s27 }
0x1d48   :  { %6192 = vrot.lane.b32.xlu0 %v15736_v43, %s12979_s27 }
0x1d4b   :  { %6188 = vrot.lane.b32.xlu1 %v15670_v4, %s12979_s27 }
0x1d4c   :  { %6410 = vrot.lane.b32.xlu0 %v15659_v45, %s12980_s28 }
0x1d4f   :  { %6190 = vrot.lane.b32.xlu1 %v15674_v1, %s12979_s27 }
0x1d50   :  { %6414 = vrot.lane.b32.xlu0 %v15670_v4, %s12980_s28 }
0x1d53   :  { %6412 = vrot.lane.b32.xlu1 %v15668_v14, %s12980_s28 }
0x1d62   :  { %v16074_v27 = vpop.xlane.xlu0 %5846 }
0x1d66   :  { %v5515_v11 = vpop.xlane.xlu0 %5514 }
0x1d67   :  { %12644 = vrcp.f32 %v5515_v11 }
0x1d6a   :  { %v5518_v52 = vpop.xlane.xlu1 %5517  ;;  %v5850_v18 = vpop.xlane.xlu0 %5849 }
0x1d6b   :  { %12646 = vrcp.f32 %v5518_v52 }
0x1d6e   :  { %v16076_v7 = vpop.xlane.xlu1 %5855  ;;  %v5853_v62 = vpop.xlane.xlu0 %5852 }
0x1d71   :  { %v12645_v53 = vpop.eup %12644 }
0x1d72   :  { %v5547_v42 = vmul.f32 %v12645_v53, %v15971_v21  ;;  %v5524_v10 = vpop.xlane.xlu1 %5523  ;;  %v5521_v44 = vpop.xlane.xlu0 %5520 }
0x1d73   :  { %12648 = vrcp.f32 %v5521_v44 }
0x1d74   :  { %v5555_v39 = vpack.c.bf16 %v5547_v42, %v5546_v2  ;;  %12650 = vrcp.f32 %v5524_v10 }
0x1d75   :  { %v12647_v21 = vpop.eup %12646 }
0x1d76   :  { %11424 = vmatmul.mubr.msk.bf16.vlgmr.msra.gmra.mrb[76].mxu1 %vm792_vm5, %v5555_v39  ;;  %v5859_v22 = vpop.xlane.xlu0 %5858  ;;  %v5862_v11 = vpop.xlane.xlu1 %5861  ;;  %v5548_v39 = vmul.f32 %v12647_v21, %v15979_v47 }
0x1d77   :  { %11474 = vmatpush3.bf16.msra.mxu1 %v15957_v48  ;;  %11427 = vmatprep.mubr.msk.bf16.mxu1 %vm12971_vm1, %v17814_v9 }
0x1d78   :  { %11475 = vmatprep.subr.bf16.mxu1 %v17814_v9 }
0x1d7a   :  { %v5527_v29 = vpop.xlane.xlu0 %5526  ;;  %v5530_v52 = vpop.xlane.xlu1 %5529 }
0x1d7b   :  { %11476 = vmatpush3.bf16.msra.mxu1 %v5898_v24  ;;  %12652 = vrcp.f32 %v5527_v29 }
0x1d7c   :  { %11477 = vmatprep.subr.bf16.mxu1 %v17814_v9  ;;  %12654 = vrcp.f32 %v5530_v52 }
0x1d7d   :  { %v12649_v25 = vpop.eup %12648 }
0x1d7e   :  { %v16086_v53 = vpop.xlane.xlu0 %5864  ;;  %v5549_v48 = vmul.f32 %v12649_v25, %v15998_v37  ;;  %v5902_v10 = vpop.permute.xlu1 %5901 }
0x1d7f   :  { %11478 = vmatpush3.bf16.msra.mxu1 %v5900_v33  ;;  %v12651_v24 = vpop.eup %12650 }
0x1d80   :  { %11479 = vmatprep.subr.bf16.mxu1 %v17814_v9  ;;  %v5556_v2 = vpack.c.bf16 %v5549_v48, %v5548_v39  ;;  %v5550_v37 = vmul.f32 %v12651_v24, %v15995_v63 }
0x1d82   :  { %v5533_v42 = vpop.xlane.xlu0 %5532  ;;  %11428 = vmatmul.mubr.msk.bf16.gmra.mrb[80].mxu1 %vm792_vm5, %v5556_v2 }
0x1d83   :  { %12656 = vrcp.f32 %v5533_v42  ;;  %11480 = vmatpush3.bf16.msra.mxu1 %v5902_v10  ;;  %11431 = vmatprep.mubr.msk.bf16.mxu1 %vm12971_vm1, %v17814_v9 }
0x1d84   :  { %11481 = vmatprep.subr.bf16.mxu1 %v17814_v9 }
0x1d85   :  { %v12653_v47 = vpop.eup %12652 }
0x1d86   :  { %v5536_v44 = vpop.xlane.xlu0 %5535  ;;  %v5551_v33 = vmul.f32 %v12653_v47, %v16016_v13  ;;  %v12655_v52 = vpop.eup %12654 }
0x1d87   :  { %12658 = vrcp.f32 %v5536_v44  ;;  %v5552_v48 = vmul.f32 %v12655_v52, %v16014_v41 }
0x1d88   :  { %v5557_v29 = vpack.c.bf16 %v5551_v33, %v5550_v37  ;;  %12660 = vrcp.f32 %v5850_v18 }
0x1d89   :  { %12662 = vrcp.f32 %v16074_v27 }
0x1d8a   :  { %v5904_v21 = vpop.permute.xlu0 %5903  ;;  %11432 = vmatmul.mubr.msk.bf16.gmra.mrb[84].mxu1 %vm792_vm5, %v5557_v29  ;;  %12664 = vrcp.f32 %v16076_v7 }
0x1d8b   :  { %v5925_v25 = vand.u32 %v5904_v21, %v13600_v3  ;;  %11435 = vmatprep.mubr.msk.bf16.mxu1 %vm12971_vm1, %v17814_v9  ;;  %12666 = vrcp.f32 %v5853_v62 }
0x1d8c   :  { %12668 = vrcp.f32 %v5862_v11 }
0x1d8d   :  { %v12657_v39 = vpop.eup %12656  ;;  %11482 = vmatpush3.bf16.msra.mxu1 %v5925_v25  ;;  %12670 = vrcp.f32 %v5859_v22  ;;  %v9852_v25 = vld [vmem:[%s17789_s4 + $0x20] sm:$0xff] }
0x1d8e   :  { %v5553_v2 = vmul.f32 %v12657_v39, %v16026_v51  ;;  %11525 = vmatprep.subr.bf16.mxu1 %v17814_v9  ;;  %12672 = vrcp.f32 %v16086_v53 }
0x1d90   :  { %v5558_v63 = vpack.c.bf16 %v5553_v2, %v5552_v48  ;;  %v5330_v48 = vpack.c.bf16 %v9852_v25, %v9852_v25 }
0x1d91   :  { %v12659_v13 = vpop.eup %12658 }
0x1d92   :  { %11436 = vmatmul.mubr.msk.bf16.gmra.mrb[88].mxu1 %vm792_vm5, %v5558_v63  ;;  %v5554_v42 = vmul.f32 %v12659_v13, %v16030_v12  ;;  %v12661_v10 = vpop.eup %12660 }
0x1d93   :  { %11439 = vmatprep.mubr.msk.bf16.mxu1 %vm12971_vm1, %v17814_v9  ;;  %v12663_v51 = vpop.eup %12662  ;;  %v5882_v27 = vmul.f32 %v12661_v10, %v15976_v15 }
0x1d94   :  { %v5559_v41 = vpack.c.bf16 %v5554_v42, %v5554_v42  ;;  %v5881_v18 = vmul.f32 %v12663_v51, %v15965_v46  ;;  %v12665_v24 = vpop.eup %12664 }
0x1d95   :  { %v12667_v12 = vpop.eup %12666  ;;  %v5884_v7 = vmul.f32 %v12665_v24, %v15986_v59 }
0x1d96   :  { %v5890_v47 = vpack.c.bf16 %v5882_v27, %v5881_v18  ;;  %v5883_v62 = vmul.f32 %v12667_v12, %v15989_v34  ;;  %v12669_v44 = vpop.eup %12668 }
0x1d97   :  { %v12671_v33 = vpop.eup %12670  ;;  %v5886_v46 = vmul.f32 %v12669_v44, %v16005_v55 }
0x1d98   :  { %v5891_v37 = vpack.c.bf16 %v5884_v7, %v5883_v62  ;;  %v5885_v15 = vmul.f32 %v12671_v33, %v16008_v23  ;;  %v12673_v59 = vpop.eup %12672 }
0x1d99   :  { %v5887_v29 = vmul.f32 %v12673_v59, %v16022_v6  ;;  %v16140_v6 = vsel %vm1359_vm7, %v5330_v48, 0 }
0x1d9a   :  { %11440 = vmatmul.mubr.msk.bf16.gmra.mrb[92].mxu1 %vm792_vm5, %v5559_v41  ;;  %v5892_v11 = vpack.c.bf16 %v5886_v46, %v5885_v15 }
0x1d9b   :  { %11483 = vmatprep.mubr.msk.bf16.mxu1 %vm12971_vm1, %v17814_v9 }
0x1da2   :  { %11484 = vmatmul.mubr.msk.bf16.vlgmr.msra.gmra.mrb[96].mxu1 %vm792_vm5, %v5890_v47 }
0x1da3   :  { %11487 = vmatprep.mubr.msk.bf16.mxu1 %vm12971_vm1, %v17814_v9  ;;  %11526 = vmatpush3.bf16.msra.mxu1 %v16140_v6 }
0x1da4   :  { %11577 = vmatprep.subr.bf16.mxu1 %v17814_v9 }
0x1daa   :  { %11488 = vmatmul.mubr.msk.bf16.gmra.mrb[100].mxu1 %vm792_vm5, %v5891_v37 }
0x1dab   :  { %11491 = vmatprep.mubr.msk.bf16.mxu1 %vm12971_vm1, %v17814_v9 }
0x1daf   :  { %v5868_v22 = vpop.xlane.xlu1 %5867 }
0x1db0   :  { %12674 = vrcp.f32 %v5868_v22 }
0x1db2   :  { %11492 = vmatmul.mubr.msk.bf16.gmra.mrb[104].mxu1 %vm792_vm5, %v5892_v11 }
0x1db3   :  { %11495 = vmatprep.mubr.msk.bf16.mxu1 %vm12971_vm1, %v17814_v9  ;;  %v6195_v63 = vpop.permute.xlu1 %6194 }
0x1db7   :  { %v16154_v13 = vpop.permute.xlu1 %6196 }
0x1dba   :  { %v12675_v34 = vpop.eup %12674 }
0x1dbb   :  { %v5888_v21 = vmul.f32 %v12675_v34, %v16040_v61  ;;  %v5871_v52 = vpop.xlane.xlu0 %5870  ;;  %v9853_v61 = vld [vmem:[%s17789_s4 + $0x28] sm:$0xff]  ;;  %v16156_v42 = vpop.permute.xlu1 %6200 }
0x1dbc   :  { %12676 = vrcp.f32 %v5871_v52 }
0x1dbd   :  { %v5893_v55 = vpack.c.bf16 %v5888_v21, %v5887_v29 }
0x1dbf   :  { %11496 = vmatmul.mubr.msk.bf16.gmra.mrb[108].mxu1 %vm792_vm5, %v5893_v55  ;;  %v16158_v41 = vpop.permute.xlu1 %6202  ;;  %v16164_v27 = vpop.permute.xlu0 %6198 }
0x1dc0   :  { %11499 = vmatprep.mubr.msk.bf16.mxu1 %vm12971_vm1, %v17814_v9 }
0x1dc3   :  { %v16160_v10 = vpop.permute.xlu1 %6184  ;;  %v16168_v24 = vpop.permute.xlu0 %6192 }
0x1dc6   :  { %v12677_v23 = vpop.eup %12676 }
0x1dc7   :  { %v5889_v53 = vmul.f32 %v12677_v23, %v16044_v56  ;;  %v5331_v56 = vpack.c.bf16 %v9853_v61, %v9853_v61  ;;  %v16162_v51 = vpop.permute.xlu1 %6186  ;;  %v6411_v33 = vpop.permute.xlu0 %6410 }
0x1dc9   :  { %v5894_v39 = vpack.c.bf16 %v5889_v53, %v5889_v53  ;;  %v16150_v2 = vsel %vm1359_vm7, %v5331_v56, 0 }
0x1dca   :  { %11504 = vmatpush3.bf16.msra.mxu0 %v16150_v2 }
0x1dcb   :  { %11500 = vmatmul.mubr.msk.bf16.gmra.mrb[112].mxu1 %vm792_vm5, %v5894_v39  ;;  %11547 = vmatprep.subr.bf16.mxu0 %v17814_v9  ;;  %v16166_v18 = vpop.permute.xlu1 %6188  ;;  %v6415_v15 = vpop.permute.xlu0 %6414 }
0x1dcc   :  { %11527 = vmatprep.mubr.msk.bf16.mxu1 %vm12971_vm1, %v17814_v9 }
0x1dcf   :  { %v16170_v62 = vpop.permute.xlu1 %6190 }
0x1dd3   :  { %v6413_v46 = vpop.permute.xlu1 %6412 }
0x1e49   :  { %v5626_v47 = vpop.f32.mrb[76].mxu1 }
0x1e4a   :  { %v11425_v12 = vpop.f32.mrb[77].mxu1 }
0x1e4b   :  { %v5629_v7 = vpop.f32.mrb[78].mxu1 }
0x1e4c   :  { %v5664_v44 = vpack.c.bf16 %v5629_v7, %v5626_v47  ;;  %v11426_v37 = vpop.f32.mrb[79].mxu1 }
0x1e4e   :  { %11528 = vmatmul.mubr.msk.bf16.vlgmr.msra.gmra.mrb[116].mxu1 %vm689_vm4, %v5664_v44 }
0x1e4f   :  { %11578 = vmatpush3.bf16.msra.mxu1 %v6411_v33  ;;  %11531 = vmatprep.mubr.msk.bf16.mxu1 %vm12971_vm1, %v17814_v9 }
0x1e50   :  { %11579 = vmatprep.subr.bf16.mxu1 %v17814_v9 }
0x1e53   :  { %11580 = vmatpush3.bf16.msra.mxu1 %v6413_v46 }
0x1e54   :  { %11581 = vmatprep.subr.bf16.mxu1 %v17814_v9 }
0x1e55   :  { %v5634_v22 = vpop.f32.mrb[80].mxu1 }
0x1e56   :  { %v11429_v11 = vpop.f32.mrb[81].mxu1 }
0x1e57   :  { %11582 = vmatpush3.bf16.msra.mxu1 %v6415_v15  ;;  %v5637_v59 = vpop.f32.mrb[82].mxu1 }
0x1e58   :  { %11583 = vmatprep.subr.bf16.mxu1 %v17814_v9  ;;  %v5665_v34 = vpack.c.bf16 %v5637_v59, %v5634_v22  ;;  %v11430_v29 = vpop.f32.mrb[83].mxu1  ;;  %v6220_v59 = vsel %vm689_vm4, %v6195_v63, 0 }
0x1e5a   :  { %11532 = vmatmul.mubr.msk.bf16.gmra.mrb[120].mxu1 %vm689_vm4, %v5665_v34 }
0x1e5b   :  { %11535 = vmatprep.mubr.msk.bf16.mxu1 %vm12971_vm1, %v17814_v9 }
0x1e5d   :  { %v5642_v21 = vpop.f32.mrb[84].mxu1 }
0x1e5e   :  { %v11433_v52 = vpop.f32.mrb[85].mxu1 }
0x1e5f   :  { %v5645_v55 = vpop.f32.mrb[86].mxu1 }
0x1e60   :  { %v5666_v23 = vpack.c.bf16 %v5645_v55, %v5642_v21  ;;  %v11434_v53 = vpop.f32.mrb[87].mxu1 }
0x1e62   :  { %11536 = vmatmul.mubr.msk.bf16.gmra.mrb[124].mxu1 %vm689_vm4, %v5666_v23  ;;  %v6223_v23 = vsel %vm689_vm4, %v16154_v13, 0 }
0x1e63   :  { %11539 = vmatprep.mubr.msk.bf16.mxu1 %vm12971_vm1, %v17814_v9 }
0x1e65   :  { %v5650_v25 = vpop.f32.mrb[88].mxu1 }
0x1e66   :  { %v11437_v39 = vpop.f32.mrb[89].mxu1 }
0x1e67   :  { %v5653_v48 = vpop.f32.mrb[90].mxu1 }
0x1e68   :  { %v5667_v61 = vpack.c.bf16 %v5653_v48, %v5650_v25  ;;  %v11438_v56 = vpop.f32.mrb[91].mxu1 }
0x1e69   :  { %v6229_v56 = vsel %vm689_vm4, %v16156_v42, 0 }
0x1e6a   :  { %11540 = vmatmul.mubr.msk.bf16.gmra.mrb[128].mxu1 %vm689_vm4, %v5667_v61  ;;  %v6226_v61 = vsel %vm689_vm4, %v16164_v27, 0  ;;  %v6232_v27 = vsel %vm689_vm4, %v16158_v41, 0 }
0x1e6b   :  { %11543 = vmatprep.mubr.msk.bf16.mxu1 %vm12971_vm1, %v17814_v9 }
0x1e6d   :  { %v5658_v47 = vpop.f32.mrb[92].mxu1 }
0x1e6e   :  { %v11441_v12 = vpop.f32.mrb[93].mxu1  ;;  %v5668_v44 = vpack.c.bf16 %v5658_v47, %v5658_v47 }
0x1e6f   :  { %v5661_v7 = vpop.f32.mrb[94].mxu1 }
0x1e70   :  { %v11442_v37 = vpop.f32.mrb[95].mxu1 }
0x1e72   :  { %11544 = vmatmul.mubr.msk.bf16.gmra.mrb[132].mxu1 %vm689_vm4, %v5668_v44 }
0x1e73   :  { %11587 = vmatprep.mubr.msk.bf16.mxu1 %vm12971_vm1, %v17814_v9 }
0x1e75   :  { %v5961_v33 = vpop.f32.mrb[96].mxu1 }
0x1e76   :  { %v11485_v46 = vpop.f32.mrb[97].mxu1 }
0x1e77   :  { %v5964_v15 = vpop.f32.mrb[98].mxu1 }
0x1e78   :  { %v5999_v22 = vpack.c.bf16 %v5964_v15, %v5961_v33  ;;  %v11486_v11 = vpop.f32.mrb[99].mxu1 }
0x1e7a   :  { %11506 = vmatmul.mubr.msk.bf16.vlgmr.msra.gmra.mrb[112].mxu0 %vm689_vm4, %v5999_v22 }
0x1e7b   :  { %11548 = vmatpush3.bf16.xpose.msra.mxu0 %v6220_v59  ;;  %11509 = vmatprep.mubr.msk.bf16.mxu0 %vm12971_vm1, %v17814_v9 }
0x1e7c   :  { %11549 = vmatprep.subr.bf16.mxu0 %v17814_v9 }
0x1e7d   :  { %v5969_v34 = vpop.f32.mrb[100].mxu1 }
0x1e7e   :  { %v11489_v29 = vpop.f32.mrb[101].mxu1 }
0x1e7f   :  { %v5972_v21 = vpop.f32.mrb[102].mxu1 }
0x1e80   :  { %v6000_v52 = vpack.c.bf16 %v5972_v21, %v5969_v34  ;;  %v11490_v55 = vpop.f32.mrb[103].mxu1 }
0x1e82   :  { %11510 = vmatmul.mubr.msk.bf16.gmra.mrb[116].mxu0 %vm689_vm4, %v6000_v52 }
0x1e83   :  { %11550 = vmatpush3.bf16.xpose.msra.mxu0 %v6223_v23  ;;  %11513 = vmatprep.mubr.msk.bf16.mxu0 %vm12971_vm1, %v17814_v9 }
0x1e84   :  { %11551 = vmatprep.subr.bf16.mxu0 %v17814_v9 }
0x1e85   :  { %v5977_v63 = vpop.f32.mrb[104].mxu1 }
0x1e86   :  { %v11493_v53 = vpop.f32.mrb[105].mxu1 }
0x1e87   :  { %v5980_v25 = vpop.f32.mrb[106].mxu1 }
0x1e88   :  { %v6001_v39 = vpack.c.bf16 %v5980_v25, %v5977_v63  ;;  %v11494_v48 = vpop.f32.mrb[107].mxu1 }
0x1e8a   :  { %11514 = vmatmul.mubr.msk.bf16.gmra.mrb[120].mxu0 %vm689_vm4, %v6001_v39 }
0x1e8b   :  { %11552 = vmatpush3.bf16.xpose.msra.mxu0 %v6226_v61  ;;  %11517 = vmatprep.mubr.msk.bf16.mxu0 %vm12971_vm1, %v17814_v9 }
0x1e8c   :  { %11553 = vmatprep.subr.bf16.mxu0 %v17814_v9 }
0x1e92   :  { %v5985_v13 = vpop.f32.mrb[108].mxu1 }
0x1e93   :  { %v11497_v47 = vpop.f32.mrb[109].mxu1  ;;  %11554 = vmatpush3.bf16.xpose.msra.mxu0 %v6229_v56 }
0x1e94   :  { %v5988_v12 = vpop.f32.mrb[110].mxu1  ;;  %11555 = vmatprep.subr.bf16.mxu0 %v17814_v9 }
0x1e95   :  { %v6002_v7 = vpack.c.bf16 %v5988_v12, %v5985_v13  ;;  %v11498_v44 = vpop.f32.mrb[111].mxu1 }
0x1e97   :  { %11518 = vmatmul.mubr.msk.bf16.gmra.mrb[124].mxu0 %vm689_vm4, %v6002_v7 }
0x1e98   :  { %11521 = vmatprep.mubr.msk.bf16.mxu0 %vm12971_vm1, %v17814_v9 }
0x1e9b   :  { %11556 = vmatpush3.bf16.xpose.msra.mxu0 %v6232_v27 }
0x1e9c   :  { %11607 = vmatprep.subr.bf16.mxu0 %v17814_v9 }
0x1e9e   :  { %v5993_v37 = vpop.f32.mrb[112].mxu1 }
0x1e9f   :  { %v6003_v42 = vpack.c.bf16 %v5993_v37, %v5993_v37  ;;  %v11501_v33 = vpop.f32.mrb[113].mxu1 }
0x1ea0   :  { %v5996_v46 = vpop.f32.mrb[114].mxu1 }
0x1ea1   :  { %v11502_v15 = vpop.f32.mrb[115].mxu1  ;;  %11522 = vmatmul.mubr.msk.bf16.gmra.mrb[128].mxu0 %vm689_vm4, %v6003_v42 }
0x1ea2   :  { %11557 = vmatprep.mubr.msk.bf16.mxu0 %vm12971_vm1, %v17814_v9 }
0x1ea9   :  { %11558 = vmatmul.mubr.msk.bf16.vlgmr.msra.gmra.mrb[132].mxu0 %vm689_vm4, %v16160_v10 }
0x1eaa   :  { %11561 = vmatprep.mubr.msk.bf16.mxu0 %vm12971_vm1, %v17814_v9 }
0x1eb1   :  { %11562 = vmatmul.mubr.msk.bf16.gmra.mrb[136].mxu0 %vm689_vm4, %v16162_v51 }
0x1eb2   :  { %11565 = vmatprep.mubr.msk.bf16.mxu0 %vm12971_vm1, %v17814_v9 }
0x1eb9   :  { %11566 = vmatmul.mubr.msk.bf16.gmra.mrb[140].mxu0 %vm689_vm4, %v16166_v18 }
0x1eba   :  { %11569 = vmatprep.mubr.msk.bf16.mxu0 %vm12971_vm1, %v17814_v9 }
0x1ec1   :  { %11570 = vmatmul.mubr.msk.bf16.gmra.mrb[144].mxu0 %vm689_vm4, %v16170_v62 }
0x1ec2   :  { %11573 = vmatprep.mubr.msk.bf16.mxu0 %vm12971_vm1, %v17814_v9 }
0x1ec9   :  { %11574 = vmatmul.mubr.msk.bf16.gmra.mrb[148].mxu0 %vm689_vm4, %v16168_v24 }
0x1eca   :  { %11609 = vmatprep.mubr.msk.bf16.mxu0 %vm12971_vm1, %v17814_v9 }
0x1f21   :  { %v6146_v41 = vpop.f32.mrb[116].mxu1 }
0x1f22   :  { %v11529_v10 = vpop.f32.mrb[117].mxu1 }
0x1f23   :  { %v6149_v51 = vpop.f32.mrb[118].mxu1 }
0x1f24   :  { %v11530_v22 = vpop.f32.mrb[119].mxu1 }
0x1f2d   :  { %v6154_v18 = vpop.f32.mrb[120].mxu1 }
0x1f2e   :  { %v11533_v11 = vpop.f32.mrb[121].mxu1 }
0x1f2f   :  { %v6157_v59 = vpop.f32.mrb[122].mxu1 }
0x1f30   :  { %v11534_v34 = vpop.f32.mrb[123].mxu1 }
0x1f35   :  { %v6162_v29 = vpop.f32.mrb[124].mxu1 }
0x1f36   :  { %v11537_v21 = vpop.f32.mrb[125].mxu1 }
0x1f37   :  { %v6165_v62 = vpop.f32.mrb[126].mxu1 }
0x1f38   :  { %v11538_v52 = vpop.f32.mrb[127].mxu1 }
0x1f3d   :  { %v6170_v55 = vpop.f32.mrb[128].mxu1 }
0x1f3e   :  { %v11541_v23 = vpop.f32.mrb[129].mxu1 }
0x1f3f   :  { %v6173_v63 = vpop.f32.mrb[130].mxu1 }
0x1f40   :  { %v11542_v53 = vpop.f32.mrb[131].mxu1 }
0x1f45   :  { %v6178_v24 = vpop.f32.mrb[132].mxu1 }
0x1f46   :  { %v11545_v25 = vpop.f32.mrb[133].mxu1 }
0x1f47   :  { %v6181_v39 = vpop.f32.mrb[134].mxu1 }
0x1f48   :  { %v11546_v48 = vpop.f32.mrb[135].mxu1 }
0x1f4d   :  { %v6056_v61 = vpop.f32.mrb[112].mxu0 }
0x1f4e   :  { %v16239_v13 = vadd.f32 %v6146_v41, %v6056_v61  ;;  %v11507_v56 = vpop.f32.mrb[113].mxu0 }
0x1f4f   :  { %v6059_v47 = vpop.f32.mrb[114].mxu0 }
0x1f50   :  { %v16241_v12 = vadd.f32 %v6149_v51, %v6059_v47  ;;  %v11508_v7 = vpop.f32.mrb[115].mxu0 }
0x1f55   :  { %v6064_v44 = vpop.f32.mrb[116].mxu0 }
0x1f56   :  { %v16243_v27 = vadd.f32 %v6154_v18, %v6064_v44  ;;  %v11511_v37 = vpop.f32.mrb[117].mxu0 }
0x1f57   :  { %v6067_v42 = vpop.f32.mrb[118].mxu0 }
0x1f58   :  { %v16245_v33 = vadd.f32 %v6157_v59, %v6067_v42  ;;  %v11512_v46 = vpop.f32.mrb[119].mxu0 }
0x1f5d   :  { %v6072_v15 = vpop.f32.mrb[120].mxu0 }
0x1f5e   :  { %v16247_v10 = vadd.f32 %v6162_v29, %v6072_v15  ;;  %v11515_v22 = vpop.f32.mrb[121].mxu0 }
0x1f5f   :  { %v6075_v11 = vpop.f32.mrb[122].mxu0 }
0x1f60   :  { %v16249_v41 = vadd.f32 %v6165_v62, %v6075_v11  ;;  %v11516_v34 = vpop.f32.mrb[123].mxu0 }
0x1f6a   :  { %v6080_v21 = vpop.f32.mrb[124].mxu0 }
0x1f6b   :  { %v16251_v51 = vadd.f32 %v6170_v55, %v6080_v21  ;;  %v11519_v52 = vpop.f32.mrb[125].mxu0 }
0x1f6c   :  { %v6083_v23 = vpop.f32.mrb[126].mxu0 }
0x1f6d   :  { %v16253_v18 = vadd.f32 %v6173_v63, %v6083_v23  ;;  %v11520_v53 = vpop.f32.mrb[127].mxu0 }
0x1f74   :  { %v6088_v25 = vpop.f32.mrb[128].mxu0 }
0x1f75   :  { %v16255_v59 = vadd.f32 %v6178_v24, %v6088_v25  ;;  %v11523_v39 = vpop.f32.mrb[129].mxu0 }
0x1f76   :  { %v6091_v48 = vpop.f32.mrb[130].mxu0 }
0x1f77   :  { %v11524_v29 = vpop.f32.mrb[131].mxu0 }
0x1f7c   :  { %v6268_v61 = vpop.f32.mrb[132].mxu0 }
0x1f7d   :  { %v11559_v56 = vpop.f32.mrb[133].mxu0  ;;  %v6306_v62 = vsel %vm792_vm5, %v6268_v61, -inf }
0x1f7e   :  { %6307 = vmax.xlane.f32.xlu1 %v6306_v62  ;;  %v6271_v47 = vpop.f32.mrb[134].mxu0 }
0x1f7f   :  { %v11560_v7 = vpop.f32.mrb[135].mxu0  ;;  %v6309_v55 = vsel %vm792_vm5, %v6271_v47, -inf }
0x1f80   :  { %6310 = vmax.xlane.f32.xlu0 %v6309_v55 }
0x1f84   :  { %v6276_v44 = vpop.f32.mrb[136].mxu0 }
0x1f85   :  { %v11563_v63 = vpop.f32.mrb[137].mxu0  ;;  %v6312_v37 = vsel %vm792_vm5, %v6276_v44, -inf }
0x1f86   :  { %6313 = vmax.xlane.f32.xlu0 %v6312_v37  ;;  %v6279_v24 = vpop.f32.mrb[138].mxu0 }
0x1f87   :  { %v11564_v42 = vpop.f32.mrb[139].mxu0  ;;  %v6315_v46 = vsel %vm792_vm5, %v6279_v24, -inf }
0x1f8a   :  { %6316 = vmax.xlane.f32.xlu0 %v6315_v46 }
0x1f8c   :  { %v6284_v15 = vpop.f32.mrb[140].mxu0 }
0x1f8d   :  { %v11567_v22 = vpop.f32.mrb[141].mxu0  ;;  %v6318_v11 = vsel %vm792_vm5, %v6284_v15, -inf }
0x1f8e   :  { %6319 = vmax.xlane.f32.xlu1 %v6318_v11  ;;  %v16262_v34 = vpop.f32.mrb[142].mxu0 }
0x1f8f   :  { %v11568_v21 = vpop.f32.mrb[143].mxu0  ;;  %v6321_v52 = vsel %vm792_vm5, %v16262_v34, -inf }
0x1f90   :  { %6322 = vmax.xlane.f32.xlu0 %v6321_v52 }
0x1f94   :  { %v6292_v23 = vpop.f32.mrb[144].mxu0 }
0x1f95   :  { %v11571_v53 = vpop.f32.mrb[145].mxu0  ;;  %v6324_v25 = vsel %vm792_vm5, %v6292_v23, -inf }
0x1f96   :  { %6325 = vmax.xlane.f32.xlu1 %v6324_v25  ;;  %v16267_v39 = vpop.f32.mrb[146].mxu0 }
0x1f97   :  { %v11572_v48 = vpop.f32.mrb[147].mxu0  ;;  %v6327_v29 = vsel %vm792_vm5, %v16267_v39, -inf }
0x1f98   :  { %6328 = vmax.xlane.f32.xlu0 %v6327_v29 }
0x1f9c   :  { %v16271_v56 = vpop.f32.mrb[148].mxu0 }
0x1f9d   :  { %v11575_v62 = vpop.f32.mrb[149].mxu0  ;;  %v6330_v63 = vsel %vm792_vm5, %v16271_v56, -inf }
0x1f9e   :  { %v6303_v7 = vpop.f32.mrb[150].mxu0 }
0x1f9f   :  { %v11576_v55 = vpop.f32.mrb[151].mxu0 }
0x1fa7   :  { %6418 = vrot.lane.b32.xlu1 %v15736_v43, %s12980_s28 }
0x1fae   :  { %6416 = vrot.lane.b32.xlu0 %v15674_v1, %s12980_s28 }
0x1fcb   :  { %6331 = vmax.xlane.f32.xlu1 %v6330_v63 }
0x1fdc   :  { %6630 = vrot.lane.b32.xlu1 %v15668_v14, %s12981_s2 }
0x200b   :  { %v6308_v37 = vpop.xlane.xlu1 %6307 }
0x200c   :  { %v6333_v42 = vsub.f32 %v6268_v61, %v6308_v37 }
0x200d   :  { %v6311_v46 = vpop.xlane.xlu0 %6310 }
0x200e   :  { %v6342_v22 = vmul.f32 1.442695, %v6333_v42  ;;  %v6334_v11 = vsub.f32 %v6271_v47, %v6311_v46 }
0x2010   :  { %12678 = vpow2.f32 %v6342_v22  ;;  %v6344_v21 = vmul.f32 1.442695, %v6334_v11 }
0x2012   :  { %12680 = vpow2.f32 %v6344_v21 }
0x2013   :  { %v6314_v52 = vpop.xlane.xlu0 %6313 }
0x2014   :  { %v6335_v53 = vsub.f32 %v6276_v44, %v6314_v52 }
0x2016   :  { %v6346_v25 = vmul.f32 1.442695, %v6335_v53 }
0x2017   :  { %v6317_v48 = vpop.xlane.xlu0 %6316 }
0x2018   :  { %12682 = vpow2.f32 %v6346_v25  ;;  %v6336_v29 = vsub.f32 %v6279_v24, %v6317_v48 }
0x201a   :  { %v16281_v62 = vpop.eup %12678  ;;  %v6348_v7 = vmul.f32 1.442695, %v6336_v29 }
0x201b   :  { %v6320_v55 = vpop.xlane.xlu1 %6319  ;;  %v6360_v63 = vsel %vm792_vm5, %v16281_v62, 0.0 }
0x201c   :  { %v16285_v61 = vpop.eup %12680  ;;  %12684 = vpow2.f32 %v6348_v7  ;;  %v6337_v47 = vsub.f32 %v6284_v15, %v6320_v55  ;;  %6361 = vadd.xlane.f32.xlu0 %v6360_v63 }
0x201d   :  { %v6363_v37 = vsel %vm792_vm5, %v16285_v61, 0.0  ;;  %v6323_v42 = vpop.xlane.xlu0 %6322 }
0x201e   :  { %v6350_v44 = vmul.f32 1.442695, %v6337_v47  ;;  %6364 = vadd.xlane.f32.xlu1 %v6363_v37  ;;  %v6338_v47 = vsub.f32 %v16262_v34, %v6323_v42 }
0x2020   :  { %12686 = vpow2.f32 %v6350_v44  ;;  %v6352_v37 = vmul.f32 1.442695, %v6338_v47 }
0x2022   :  { %v16289_v24 = vpop.eup %12682 }
0x2023   :  { %v6326_v46 = vpop.xlane.xlu1 %6325  ;;  %v6366_v22 = vsel %vm792_vm5, %v16289_v24, 0.0 }
0x2024   :  { %v6339_v11 = vsub.f32 %v6292_v23, %v6326_v46  ;;  %6367 = vadd.xlane.f32.xlu1 %v6366_v22 }
0x2025   :  { %v6329_v21 = vpop.xlane.xlu0 %6328 }
0x2026   :  { %v16293_v52 = vpop.eup %12684  ;;  %v6354_v15 = vmul.f32 1.442695, %v6339_v11  ;;  %v6340_v44 = vsub.f32 %v16267_v39, %v6329_v21 }
0x2027   :  { %v6369_v53 = vsel %vm792_vm5, %v16293_v52, 0.0  ;;  %v6419_v25 = vpop.permute.xlu1 %6418 }
0x2028   :  { %12688 = vpow2.f32 %v6354_v15  ;;  %6370 = vadd.xlane.f32.xlu1 %v6369_v53  ;;  %v6440_v23 = vand.u32 %v6419_v25, %v13600_v3  ;;  %v6356_v46 = vmul.f32 1.442695, %v6340_v44 }
0x2029   :  { %v6417_v48 = vpop.permute.xlu0 %6416  ;;  %12690 = vpow2.f32 %v6352_v37 }
0x202a   :  { %v16297_v29 = vpop.eup %12686  ;;  %11584 = vmatpush3.bf16.msra.mxu1 %v6417_v48  ;;  %12692 = vpow2.f32 %v6356_v46 }
0x202b   :  { %v6372_v7 = vsel %vm792_vm5, %v16297_v29, 0.0  ;;  %11585 = vmatprep.subr.bf16.mxu1 %v17814_v9 }
0x202c   :  { %6373 = vadd.xlane.f32.xlu1 %v6372_v7 }
0x202e   :  { %11586 = vmatpush3.bf16.msra.mxu1 %v6440_v23 }
0x202f   :  { %11629 = vmatprep.subr.bf16.mxu1 %v17814_v9 }
0x2032   :  { %v16304_v55 = vpop.eup %12688  ;;  %6628 = vrot.lane.b32.xlu0 %v15659_v45, %s12981_s2 }
0x2033   :  { %v6378_v63 = vsel %vm792_vm5, %v16304_v55, 0.0  ;;  %v16312_v22 = vpop.eup %12690 }
0x2034   :  { %6379 = vadd.xlane.f32.xlu1 %v6378_v63  ;;  %v6375_v11 = vsel %vm792_vm5, %v16312_v22, 0.0  ;;  %v16316_v15 = vpop.eup %12692 }
0x2035   :  { %v6381_v53 = vsel %vm792_vm5, %v16316_v15, 0.0 }
0x2051   :  { %6376 = vadd.xlane.f32.xlu0 %v6375_v11 }
0x2055   :  { %6382 = vadd.xlane.f32.xlu0 %v6381_v53 }
0x2058   :  { %v6332_v25 = vpop.xlane.xlu1 %6331 }
0x2059   :  { %v6341_v34 = vsub.f32 %v16271_v56, %v6332_v25 }
0x205b   :  { %v6358_v42 = vmul.f32 1.442695, %v6341_v34 }
0x205c   :  { %v6631_v56 = vpop.permute.xlu1 %6630 }
0x205d   :  { %12694 = vpow2.f32 %v6358_v42 }
0x2067   :  { %v16321_v39 = vpop.eup %12694 }
0x2068   :  { %v6384_v21 = vsel %vm792_vm5, %v16321_v39, 0.0 }
0x2069   :  { %6385 = vadd.xlane.f32.xlu1 %v6384_v21 }
0x206b   :  { %6632 = vrot.lane.b32.xlu0 %v15670_v4, %s12981_s2 }
0x206f   :  { %6636 = vrot.lane.b32.xlu0 %v15736_v43, %s12981_s2 }
0x2073   :  { %6620 = vrot.lane.b32.xlu0 %v15668_v14, %s12982_s15 }
0x2077   :  { %6624 = vrot.lane.b32.xlu0 %v15674_v1, %s12982_s15 }
0x207a   :  { %6634 = vrot.lane.b32.xlu1 %v15674_v1, %s12981_s2 }
0x207e   :  { %6618 = vrot.lane.b32.xlu1 %v15659_v45, %s12982_s15 }
0x2082   :  { %6622 = vrot.lane.b32.xlu1 %v15670_v4, %s12982_s15 }
0x2086   :  { %6626 = vrot.lane.b32.xlu1 %v15736_v43, %s12982_s15 }
0x208a   :  { %6844 = vrot.lane.b32.xlu1 %v15659_v45, %s12983_s16 }
0x20a9   :  { %v6362_v48 = vpop.xlane.xlu0 %6361 }
0x20aa   :  { %12696 = vrcp.f32 %v6362_v48 }
0x20ab   :  { %v6365_v7 = vpop.xlane.xlu1 %6364 }
0x20ac   :  { %12698 = vrcp.f32 %v6365_v7 }
0x20ad   :  { %v6629_v11 = vpop.permute.xlu0 %6628 }
0x20ae   :  { %v6654_v25 = vsel %vm689_vm4, %v6629_v11, 0 }
0x20b1   :  { %v6368_v23 = vpop.xlane.xlu1 %6367 }
0x20b2   :  { %12700 = vrcp.f32 %v6368_v23 }
0x20b4   :  { %v12697_v63 = vpop.eup %12696 }
0x20b5   :  { %v6371_v47 = vpop.xlane.xlu1 %6370  ;;  %v6396_v44 = vmul.f32 %v12697_v63, %v16281_v62 }
0x20b6   :  { %v12699_v37 = vpop.eup %12698  ;;  %12702 = vrcp.f32 %v6371_v47 }
0x20b7   :  { %v6397_v46 = vmul.f32 %v12699_v37, %v16285_v61  ;;  %v6657_v61 = vsel %vm689_vm4, %v6631_v56, 0 }
0x20b9   :  { %v6405_v53 = vpack.c.bf16 %v6397_v46, %v6396_v44  ;;  %v6374_v48 = vpop.xlane.xlu1 %6373 }
0x20ba   :  { %12704 = vrcp.f32 %v6374_v48 }
0x20bb   :  { %11588 = vmatmul.mubr.msk.bf16.vlgmr.msra.gmra.mrb[136].mxu1 %vm792_vm5, %v6405_v53 }
0x20bc   :  { %11630 = vmatpush3.bf16.xpose.msra.mxu1 %v6654_v25  ;;  %11591 = vmatprep.mubr.msk.bf16.mxu1 %vm12971_vm1, %v17814_v9  ;;  %v12701_v45 = vpop.eup %12700 }
0x20bd   :  { %11631 = vmatprep.subr.bf16.mxu1 %v17814_v9  ;;  %v6398_v42 = vmul.f32 %v12701_v45, %v16289_v24 }
0x20c0   :  { %v12703_v34 = vpop.eup %12702 }
0x20c1   :  { %v6399_v62 = vmul.f32 %v12703_v34, %v16293_v52  ;;  %v6380_v23 = vpop.xlane.xlu1 %6379 }
0x20c3   :  { %v6406_v21 = vpack.c.bf16 %v6399_v62, %v6398_v42 }
0x20c4   :  { %11632 = vmatpush3.bf16.xpose.msra.mxu1 %v6657_v61  ;;  %v12705_v52 = vpop.eup %12704 }
0x20c5   :  { %11592 = vmatmul.mubr.msk.bf16.gmra.mrb[140].mxu1 %vm792_vm5, %v6406_v21  ;;  %11633 = vmatprep.subr.bf16.mxu1 %v17814_v9  ;;  %v6400_v37 = vmul.f32 %v12705_v52, %v16297_v29 }
0x20c6   :  { %11595 = vmatprep.mubr.msk.bf16.mxu1 %vm12971_vm1, %v17814_v9 }
0x20de   :  { %v6377_v7 = vpop.xlane.xlu0 %6376 }
0x20df   :  { %12706 = vrcp.f32 %v6377_v7  ;;  %v9854_v7 = vld [vmem:[%s17789_s4 + $0x30] sm:$0xff] }
0x20e2   :  { %v6383_v63 = vpop.xlane.xlu0 %6382 }
0x20e3   :  { %12708 = vrcp.f32 %v6383_v63 }
0x20e4   :  { %12710 = vrcp.f32 %v6380_v23  ;;  %v5332_v23 = vpack.c.bf16 %v9854_v7, %v9854_v7 }
0x20e6   :  { %v6633_v24 = vpop.permute.xlu0 %6632 }
0x20e7   :  { %v6660_v56 = vsel %vm689_vm4, %v6633_v24, 0 }
0x20e8   :  { %11634 = vmatpush3.bf16.xpose.msra.mxu1 %v6660_v56 }
0x20e9   :  { %v12707_v47 = vpop.eup %12706  ;;  %11635 = vmatprep.subr.bf16.mxu1 %v17814_v9 }
0x20ea   :  { %v6401_v44 = vmul.f32 %v12707_v47, %v16312_v22  ;;  %v6637_v62 = vpop.permute.xlu0 %6636 }
0x20ec   :  { %v6407_v46 = vpack.c.bf16 %v6401_v44, %v6400_v37 }
0x20ed   :  { %v12709_v11 = vpop.eup %12708 }
0x20ee   :  { %11596 = vmatmul.mubr.msk.bf16.gmra.mrb[144].mxu1 %vm792_vm5, %v6407_v46  ;;  %v12711_v53 = vpop.eup %12710  ;;  %v6403_v25 = vmul.f32 %v12709_v11, %v16316_v15  ;;  %v6621_v63 = vpop.permute.xlu0 %6620 }
0x20ef   :  { %11599 = vmatprep.mubr.msk.bf16.mxu1 %vm12971_vm1, %v17814_v9  ;;  %v6402_v45 = vmul.f32 %v12711_v53, %v16304_v55  ;;  %v6666_v55 = vsel %vm689_vm4, %v6637_v62, 0 }
0x20f1   :  { %v6408_v34 = vpack.c.bf16 %v6403_v25, %v6402_v45 }
0x20f2   :  { %v6625_v52 = vpop.permute.xlu0 %6624 }
0x20f6   :  { %11600 = vmatmul.mubr.msk.bf16.gmra.mrb[148].mxu1 %vm792_vm5, %v6408_v34  ;;  %v6386_v42 = vpop.xlane.xlu1 %6385 }
0x20f7   :  { %12712 = vrcp.f32 %v6386_v42  ;;  %11603 = vmatprep.mubr.msk.bf16.mxu1 %vm12971_vm1, %v17814_v9 }
0x20fa   :  { %v6635_v29 = vpop.permute.xlu1 %6634 }
0x20fb   :  { %v6663_v22 = vsel %vm689_vm4, %v6635_v29, 0 }
0x20fc   :  { %11636 = vmatpush3.bf16.xpose.msra.mxu1 %v6663_v22 }
0x20fd   :  { %11637 = vmatprep.subr.bf16.mxu1 %v17814_v9 }
0x20fe   :  { %v6619_v48 = vpop.permute.xlu1 %6618 }
0x2101   :  { %v12713_v61 = vpop.eup %12712 }
0x2102   :  { %v6404_v15 = vmul.f32 %v12713_v61, %v16321_v39  ;;  %v16384_v39 = vsel %vm1359_vm7, %v5332_v23, 0  ;;  %v6623_v24 = vpop.permute.xlu1 %6622 }
0x2103   :  { %11608 = vmatpush3.bf16.msra.mxu0 %v16384_v39 }
0x2104   :  { %v6409_v21 = vpack.c.bf16 %v6404_v15, %v6404_v15  ;;  %11638 = vmatpush3.bf16.xpose.msra.mxu1 %v6666_v55  ;;  %11659 = vmatprep.subr.bf16.mxu0 %v17814_v9 }
0x2105   :  { %11689 = vmatprep.subr.bf16.mxu1 %v17814_v9 }
0x2106   :  { %11604 = vmatmul.mubr.msk.bf16.gmra.mrb[152].mxu1 %vm792_vm5, %v6409_v21  ;;  %v6627_v56 = vpop.permute.xlu1 %6626 }
0x2107   :  { %11639 = vmatprep.mubr.msk.bf16.mxu1 %vm12971_vm1, %v17814_v9 }
0x210a   :  { %v6845_v53 = vpop.permute.xlu1 %6844 }
0x210e   :  { %11640 = vmatmul.mubr.msk.bf16.vlgmr.msra.gmra.mrb[156].mxu1 %vm689_vm4, %v6619_v48 }
0x210f   :  { %11643 = vmatprep.mubr.msk.bf16.mxu1 %vm12971_vm1, %v17814_v9 }
0x2116   :  { %11644 = vmatmul.mubr.msk.bf16.gmra.mrb[160].mxu1 %vm689_vm4, %v6621_v63 }
0x2117   :  { %11647 = vmatprep.mubr.msk.bf16.mxu1 %vm12971_vm1, %v17814_v9 }
0x211e   :  { %11648 = vmatmul.mubr.msk.bf16.gmra.mrb[164].mxu1 %vm689_vm4, %v6623_v24 }
0x211f   :  { %11651 = vmatprep.mubr.msk.bf16.mxu1 %vm12971_vm1, %v17814_v9 }
0x2126   :  { %11652 = vmatmul.mubr.msk.bf16.gmra.mrb[168].mxu1 %vm689_vm4, %v6625_v52 }
0x2127   :  { %11655 = vmatprep.mubr.msk.bf16.mxu1 %vm12971_vm1, %v17814_v9 }
0x212e   :  { %11656 = vmatmul.mubr.msk.bf16.gmra.mrb[172].mxu1 %vm689_vm4, %v6627_v56 }
0x212f   :  { %11691 = vmatprep.mubr.msk.bf16.mxu1 %vm12971_vm1, %v17814_v9 }
0x218e   :  { %v6476_v47 = vpop.f32.mrb[136].mxu1 }
0x218f   :  { %v11589_v37 = vpop.f32.mrb[137].mxu1 }
0x2190   :  { %v6479_v44 = vpop.f32.mrb[138].mxu1 }
0x2191   :  { %v6514_v46 = vpack.c.bf16 %v6479_v44, %v6476_v47  ;;  %v11590_v11 = vpop.f32.mrb[139].mxu1 }
0x2193   :  { %11610 = vmatmul.mubr.msk.bf16.vlgmr.msra.gmra.mrb[152].mxu0 %vm689_vm4, %v6514_v46 }
0x2194   :  { %11660 = vmatpush3.bf16.msra.mxu0 %v6845_v53  ;;  %11613 = vmatprep.mubr.msk.bf16.mxu0 %vm12971_vm1, %v17814_v9 }
0x2195   :  { %11661 = vmatprep.subr.bf16.mxu0 %v17814_v9 }
0x2198   :  { %v6484_v25 = vpop.f32.mrb[140].mxu1 }
0x2199   :  { %v11593_v45 = vpop.f32.mrb[141].mxu1 }
0x219a   :  { %v6487_v34 = vpop.f32.mrb[142].mxu1 }
0x219b   :  { %v6515_v42 = vpack.c.bf16 %v6487_v34, %v6484_v25  ;;  %v11594_v29 = vpop.f32.mrb[143].mxu1 }
0x219d   :  { %11614 = vmatmul.mubr.msk.bf16.gmra.mrb[156].mxu0 %vm689_vm4, %v6515_v42 }
0x219e   :  { %11617 = vmatprep.mubr.msk.bf16.mxu0 %vm12971_vm1, %v17814_v9 }
0x21c1   :  { %v6492_v22 = vpop.f32.mrb[144].mxu1 }
0x21c2   :  { %v11597_v62 = vpop.f32.mrb[145].mxu1 }
0x21c3   :  { %v6495_v61 = vpop.f32.mrb[146].mxu1 }
0x21c4   :  { %v6516_v15 = vpack.c.bf16 %v6495_v61, %v6492_v22  ;;  %v11598_v55 = vpop.f32.mrb[147].mxu1 }
0x21c6   :  { %11618 = vmatmul.mubr.msk.bf16.gmra.mrb[160].mxu0 %vm689_vm4, %v6516_v15 }
0x21c7   :  { %11621 = vmatprep.mubr.msk.bf16.mxu0 %vm12971_vm1, %v17814_v9 }
0x21c9   :  { %v6500_v21 = vpop.f32.mrb[148].mxu1 }
0x21ca   :  { %v11601_v48 = vpop.f32.mrb[149].mxu1 }
0x21cb   :  { %v6503_v7 = vpop.f32.mrb[150].mxu1 }
0x21cc   :  { %v6517_v23 = vpack.c.bf16 %v6503_v7, %v6500_v21  ;;  %v11602_v63 = vpop.f32.mrb[151].mxu1 }
0x21ce   :  { %11622 = vmatmul.mubr.msk.bf16.gmra.mrb[164].mxu0 %vm689_vm4, %v6517_v23 }
0x21cf   :  { %11625 = vmatprep.mubr.msk.bf16.mxu0 %vm12971_vm1, %v17814_v9 }
0x21d9   :  { %v6508_v24 = vpop.f32.mrb[152].mxu1 }
0x21da   :  { %v6518_v52 = vpack.c.bf16 %v6508_v24, %v6508_v24  ;;  %v11605_v56 = vpop.f32.mrb[153].mxu1 }
0x21db   :  { %v6511_v47 = vpop.f32.mrb[154].mxu1 }
0x21dc   :  { %v11606_v37 = vpop.f32.mrb[155].mxu1  ;;  %11626 = vmatmul.mubr.msk.bf16.gmra.mrb[168].mxu0 %vm689_vm4, %v6518_v52 }
0x21dd   :  { %11669 = vmatprep.mubr.msk.bf16.mxu0 %vm12971_vm1, %v17814_v9 }
0x21e1   :  { %v6702_v44 = vpop.f32.mrb[156].mxu1 }
0x21e2   :  { %v11641_v46 = vpop.f32.mrb[157].mxu1  ;;  %v6740_v11 = vsel %vm792_vm5, %v6702_v44, -inf }
0x21e3   :  { %6741 = vmax.xlane.f32.xlu0 %v6740_v11  ;;  %v6705_v53 = vpop.f32.mrb[158].mxu1 }
0x21e4   :  { %v11642_v25 = vpop.f32.mrb[159].mxu1  ;;  %v6743_v45 = vsel %vm792_vm5, %v6705_v53, -inf }
0x21e5   :  { %6744 = vmax.xlane.f32.xlu1 %v6743_v45 }
0x21e9   :  { %v6710_v34 = vpop.f32.mrb[160].mxu1 }
0x21ea   :  { %v11645_v42 = vpop.f32.mrb[161].mxu1  ;;  %v6746_v29 = vsel %vm792_vm5, %v6710_v34, -inf }
0x21eb   :  { %6747 = vmax.xlane.f32.xlu0 %v6746_v29  ;;  %v6713_v22 = vpop.f32.mrb[162].mxu1 }
0x21ec   :  { %v11646_v62 = vpop.f32.mrb[163].mxu1  ;;  %v6749_v61 = vsel %vm792_vm5, %v6713_v22, -inf }
0x21ef   :  { %6750 = vmax.xlane.f32.xlu0 %v6749_v61 }
0x21f1   :  { %v16420_v15 = vpop.f32.mrb[164].mxu1 }
0x21f2   :  { %v11649_v55 = vpop.f32.mrb[165].mxu1  ;;  %v6752_v11 = vsel %vm792_vm5, %v16420_v15, -inf }
0x21f3   :  { %v16422_v21 = vpop.f32.mrb[166].mxu1 }
0x21f4   :  { %v11650_v48 = vpop.f32.mrb[167].mxu1  ;;  %v6755_v46 = vsel %vm792_vm5, %v16422_v21, -inf }
0x21f6   :  { %6848 = vrot.lane.b32.xlu1 %v15670_v4, %s12983_s16 }
0x21f9   :  { %v16426_v7 = vpop.f32.mrb[168].mxu1 }
0x21fa   :  { %v11653_v23 = vpop.f32.mrb[169].mxu1  ;;  %v6758_v25 = vsel %vm792_vm5, %v16426_v7, -inf }
0x21fb   :  { %v16428_v63 = vpop.f32.mrb[170].mxu1 }
0x21fc   :  { %v11654_v24 = vpop.f32.mrb[171].mxu1  ;;  %v6761_v4 = vsel %vm792_vm5, %v16428_v63, -inf }
0x2201   :  { %v16430_v52 = vpop.f32.mrb[172].mxu1 }
0x2202   :  { %v11657_v56 = vpop.f32.mrb[173].mxu1  ;;  %v6764_v45 = vsel %vm792_vm5, %v16430_v52, -inf }
0x2203   :  { %v6737_v47 = vpop.f32.mrb[174].mxu1 }
0x2204   :  { %v11658_v37 = vpop.f32.mrb[175].mxu1 }
0x2205   :  { %6846 = vrot.lane.b32.xlu0 %v15668_v14, %s12983_s16 }
0x221a   :  { %6756 = vmax.xlane.f32.xlu1 %v6755_v46 }
0x221e   :  { %6762 = vmax.xlane.f32.xlu1 %v6761_v4 }
0x2224   :  { %6753 = vmax.xlane.f32.xlu0 %v6752_v11 }
0x2228   :  { %6759 = vmax.xlane.f32.xlu0 %v6758_v25 }
0x222c   :  { %6765 = vmax.xlane.f32.xlu0 %v6764_v45 }
0x222f   :  { %6850 = vrot.lane.b32.xlu1 %v15674_v1, %s12983_s16 }
0x2242   :  { %6852 = vrot.lane.b32.xlu0 %v15736_v43, %s12983_s16 }
0x2266   :  { %v6571_v14 = vpop.f32.mrb[152].mxu0 }
0x2267   :  { %v16449_v42 = vadd.f32 %v6571_v14, %v16239_v13  ;;  %v11611_v29 = vpop.f32.mrb[153].mxu0 }
0x2268   :  { %v6574_v62 = vpop.f32.mrb[154].mxu0 }
0x2269   :  { %v16452_v61 = vadd.f32 %v6574_v62, %v16241_v12  ;;  %v11612_v55 = vpop.f32.mrb[155].mxu0 }
0x2270   :  { %v6742_v48 = vpop.xlane.xlu0 %6741  ;;  %v6579_v23 = vpop.f32.mrb[156].mxu0 }
0x2271   :  { %v6767_v24 = vsub.f32 %v6702_v44, %v6742_v48  ;;  %v16455_v56 = vadd.f32 %v6579_v23, %v16243_v27  ;;  %v11615_v1 = vpop.f32.mrb[157].mxu0 }
0x2272   :  { %v6745_v47 = vpop.xlane.xlu1 %6744  ;;  %v6582_v37 = vpop.f32.mrb[158].mxu0 }
0x2273   :  { %v6776_v43 = vmul.f32 1.442695, %v6767_v24  ;;  %v6768_v46 = vsub.f32 %v6705_v53, %v6745_v47  ;;  %v16458_v13 = vadd.f32 %v6582_v37, %v16245_v33  ;;  %v11616_v4 = vpop.f32.mrb[159].mxu0 }
0x2275   :  { %12714 = vpow2.f32 %v6776_v43  ;;  %v6778_v11 = vmul.f32 1.442695, %v6768_v46 }
0x2277   :  { %12716 = vpow2.f32 %v6778_v11 }
0x2278   :  { %v6748_v12 = vpop.xlane.xlu0 %6747 }
0x2279   :  { %v6769_v25 = vsub.f32 %v6710_v34, %v6748_v12  ;;  %v6849_v34 = vpop.permute.xlu1 %6848 }
0x227b   :  { %v6780_v45 = vmul.f32 1.442695, %v6769_v25 }
0x227c   :  { %v6751_v14 = vpop.xlane.xlu0 %6750 }
0x227d   :  { %12718 = vpow2.f32 %v6780_v45  ;;  %v6770_v44 = vsub.f32 %v6713_v22, %v6751_v14 }
0x227f   :  { %v16460_v27 = vpop.eup %12714  ;;  %v6782_v29 = vmul.f32 1.442695, %v6770_v44 }
0x2280   :  { %v6847_v62 = vpop.permute.xlu0 %6846  ;;  %v6794_v53 = vsel %vm792_vm5, %v16460_v27, 0.0 }
0x2281   :  { %v16464_v55 = vpop.eup %12716  ;;  %12720 = vpow2.f32 %v6782_v29  ;;  %6795 = vadd.xlane.f32.xlu1 %v6794_v53  ;;  %11662 = vmatpush3.bf16.msra.mxu0 %v6847_v62 }
0x2282   :  { %v6797_v33 = vsel %vm792_vm5, %v16464_v55, 0.0  ;;  %11663 = vmatprep.subr.bf16.mxu0 %v17814_v9 }
0x2283   :  { %6798 = vadd.xlane.f32.xlu0 %v6797_v33 }
0x2285   :  { %11664 = vmatpush3.bf16.msra.mxu0 %v6849_v34 }
0x2286   :  { %11665 = vmatprep.subr.bf16.mxu0 %v17814_v9 }
0x2287   :  { %v16470_v22 = vpop.eup %12718 }
0x2288   :  { %v6800_v48 = vsel %vm792_vm5, %v16470_v22, 0.0 }
0x2289   :  { %6801 = vadd.xlane.f32.xlu0 %v6800_v48 }
0x228b   :  { %v16474_v23 = vpop.eup %12720 }
0x228c   :  { %v6803_v24 = vsel %vm792_vm5, %v16474_v23, 0.0 }
0x228d   :  { %6804 = vadd.xlane.f32.xlu0 %v6803_v24 }
0x2292   :  { %7062 = vrot.lane.b32.xlu1 %v15866_v58, %s12972_s29 }
0x2299   :  { %v6587_v1 = vpop.f32.mrb[160].mxu0 }
0x229a   :  { %v16481_v47 = vadd.f32 %v6587_v1, %v16247_v10  ;;  %v11619_v37 = vpop.f32.mrb[161].mxu0 }
0x229b   :  { %v6590_v43 = vpop.f32.mrb[162].mxu0 }
0x229c   :  { %v16484_v46 = vadd.f32 %v6590_v43, %v16249_v41  ;;  %v11620_v4 = vpop.f32.mrb[163].mxu0 }
0x22a1   :  { %v6595_v11 = vpop.f32.mrb[164].mxu0 }
0x22a2   :  { %v16487_v12 = vadd.f32 %v6595_v11, %v16251_v51  ;;  %v11623_v25 = vpop.f32.mrb[165].mxu0 }
0x22a3   :  { %v6598_v45 = vpop.f32.mrb[166].mxu0 }
0x22a4   :  { %v16490_v14 = vadd.f32 %v6598_v45, %v16253_v18  ;;  %v11624_v44 = vpop.f32.mrb[167].mxu0 }
0x22a7   :  { %v6757_v29 = vpop.xlane.xlu1 %6756 }
0x22a8   :  { %v6772_v10 = vsub.f32 %v16422_v21, %v6757_v29 }
0x22aa   :  { %v6786_v62 = vmul.f32 1.442695, %v6772_v10 }
0x22ab   :  { %v6763_v53 = vpop.xlane.xlu1 %6762 }
0x22ac   :  { %12722 = vpow2.f32 %v6786_v62  ;;  %v6774_v41 = vsub.f32 %v16428_v63, %v6763_v53 }
0x22ae   :  { %v6790_v33 = vmul.f32 1.442695, %v6774_v41 }
0x22af   :  { %v6851_v34 = vpop.permute.xlu1 %6850  ;;  %v6603_v48 = vpop.f32.mrb[168].mxu0 }
0x22b0   :  { %12724 = vpow2.f32 %v6790_v33  ;;  %v16495_v51 = vadd.f32 %v6603_v48, %v16255_v59  ;;  %v11627_v24 = vpop.f32.mrb[169].mxu0  ;;  %11666 = vmatpush3.bf16.msra.mxu0 %v6851_v34 }
0x22b1   :  { %v6754_v18 = vpop.xlane.xlu0 %6753  ;;  %v6606_v1 = vpop.f32.mrb[170].mxu0  ;;  %11667 = vmatprep.subr.bf16.mxu0 %v17814_v9  ;;  %v16529_v24 = vpack.c.bf16 %v15890_v19, %v15890_v19 }
0x22b2   :  { %v6771_v21 = vsub.f32 %v16420_v15, %v6754_v18  ;;  %v11628_v37 = vpop.f32.mrb[171].mxu0 }
0x22b4   :  { %v6784_v43 = vmul.f32 1.442695, %v6771_v21 }
0x22b5   :  { %v6760_v4 = vpop.xlane.xlu0 %6759 }
0x22b6   :  { %v16499_v11 = vpop.eup %12722  ;;  %12726 = vpow2.f32 %v6784_v43  ;;  %v6773_v63 = vsub.f32 %v16426_v7, %v6760_v4 }
0x22b7   :  { %v6809_v59 = vsel %vm792_vm5, %v16499_v11, 0.0 }
0x22b8   :  { %v6788_v25 = vmul.f32 1.442695, %v6773_v63  ;;  %6810 = vadd.xlane.f32.xlu0 %v6809_v59 }
0x22b9   :  { %v6766_v45 = vpop.xlane.xlu0 %6765 }
0x22ba   :  { %v16504_v44 = vpop.eup %12724  ;;  %12728 = vpow2.f32 %v6788_v25  ;;  %v6775_v29 = vsub.f32 %v16430_v52, %v6766_v45 }
0x22bb   :  { %v6815_v15 = vsel %vm792_vm5, %v16504_v44, 0.0 }
0x22bc   :  { %v6792_v10 = vmul.f32 1.442695, %v6775_v29  ;;  %6816 = vadd.xlane.f32.xlu0 %v6815_v15 }
0x22bd   :  { %v6853_v62 = vpop.permute.xlu0 %6852 }
0x22be   :  { %12730 = vpow2.f32 %v6792_v10  ;;  %v6874_v7 = vand.u32 %v6853_v62, %v13600_v3 }
0x22c0   :  { %v16510_v53 = vpop.eup %12726  ;;  %11668 = vmatpush3.bf16.msra.mxu0 %v6874_v7 }
0x22c1   :  { %v6806_v41 = vsel %vm792_vm5, %v16510_v53, 0.0  ;;  %11711 = vmatprep.subr.bf16.mxu0 %v17814_v9 }
0x22c2   :  { %6807 = vadd.xlane.f32.xlu1 %v6806_v41 }
0x22c4   :  { %v16515_v33 = vpop.eup %12728 }
0x22c5   :  { %v6812_v52 = vsel %vm792_vm5, %v16515_v33, 0.0 }
0x22c6   :  { %6813 = vadd.xlane.f32.xlu1 %v6812_v52 }
0x22c8   :  { %v16519_v34 = vpop.eup %12730 }
0x22c9   :  { %v6818_v48 = vsel %vm792_vm5, %v16519_v34, 0.0 }
0x22ca   :  { %6819 = vadd.xlane.f32.xlu0 %v6818_v48 }
0x22d7   :  { %7066 = vrot.lane.b32.xlu1 %v15880_v57, %s12972_s29 }
0x22db   :  { %7068 = vrot.lane.b32.xlu1 %v15886_v60, %s12972_s29 }
0x22df   :  { %7070 = vrot.lane.b32.xlu1 %v16529_v24, %s12972_s29 }
0x22e0   :  { %7064 = vrot.lane.b32.xlu0 %v15874_v54, %s12972_s29 }
0x22e3   :  { %7397 = vrot.lane.b32.xlu1 %v15866_v58, %s12973_s30 }
0x22e4   :  { %7401 = vrot.lane.b32.xlu0 %v15880_v57, %s12973_s30 }
0x22e7   :  { %7399 = vrot.lane.b32.xlu1 %v15874_v54, %s12973_s30 }
0x22e8   :  { %7405 = vrot.lane.b32.xlu0 %v16529_v24, %s12973_s30 }
0x22eb   :  { %7403 = vrot.lane.b32.xlu1 %v15886_v60, %s12973_s30 }
0x22ec   :  { %7389 = vrot.lane.b32.xlu0 %v15874_v54, %s12974_s10 }
0x22ef   :  { %7387 = vrot.lane.b32.xlu1 %v15866_v58, %s12974_s10 }
0x22f0   :  { %7393 = vrot.lane.b32.xlu0 %v15886_v60, %s12974_s10 }
0x22f3   :  { %7391 = vrot.lane.b32.xlu1 %v15880_v57, %s12974_s10 }
0x22f4   :  { %7278 = vrot.lane.b32.xlu0 %v15866_v58, %s12975_s1 }
0x22f7   :  { %7395 = vrot.lane.b32.xlu1 %v16529_v24, %s12974_s10 }
0x22f8   :  { %7282 = vrot.lane.b32.xlu0 %v15880_v57, %s12975_s1 }
0x22fb   :  { %7280 = vrot.lane.b32.xlu1 %v15874_v54, %s12975_s1 }
0x22fc   :  { %7286 = vrot.lane.b32.xlu0 %v16529_v24, %s12975_s1 }
0x22ff   :  { %7284 = vrot.lane.b32.xlu1 %v15886_v60, %s12975_s1 }
0x230e   :  { %v6796_v19 = vpop.xlane.xlu1 %6795 }
0x230f   :  { %12732 = vrcp.f32 %v6796_v19 }
0x2310   :  { %v6799_v18 = vpop.xlane.xlu0 %6798 }
0x2311   :  { %12734 = vrcp.f32 %v6799_v18 }
0x2312   :  { %v7063_v59 = vpop.permute.xlu1 %7062 }
0x2313   :  { %v7088_v45 = vsel %vm689_vm4, %v7063_v59, 0 }
0x2316   :  { %v6802_v1 = vpop.xlane.xlu0 %6801 }
0x2317   :  { %12736 = vrcp.f32 %v6802_v1 }
0x2319   :  { %v12733_v21 = vpop.eup %12732 }
0x231a   :  { %v6805_v37 = vpop.xlane.xlu0 %6804  ;;  %v6830_v4 = vmul.f32 %v12733_v21, %v16460_v27 }
0x231b   :  { %v12735_v43 = vpop.eup %12734  ;;  %12738 = vrcp.f32 %v6805_v37 }
0x231c   :  { %v6831_v63 = vmul.f32 %v12735_v43, %v16464_v55 }
0x231e   :  { %v6839_v25 = vpack.c.bf16 %v6831_v63, %v6830_v4 }
0x2320   :  { %11670 = vmatmul.mubr.msk.bf16.vlgmr.msra.gmra.mrb[172].mxu0 %vm792_vm5, %v6839_v25 }
0x2321   :  { %11712 = vmatpush3.bf16.xpose.msra.mxu0 %v7088_v45  ;;  %11673 = vmatprep.mubr.msk.bf16.mxu0 %vm12971_vm1, %v17814_v9  ;;  %v12737_v29 = vpop.eup %12736 }
0x2322   :  { %11713 = vmatprep.subr.bf16.mxu0 %v17814_v9  ;;  %v6832_v10 = vmul.f32 %v12737_v29, %v16470_v22 }
0x2325   :  { %v12739_v15 = vpop.eup %12738 }
0x2326   :  { %v6833_v27 = vmul.f32 %v12739_v15, %v16474_v23 }
0x2328   :  { %v6840_v62 = vpack.c.bf16 %v6833_v27, %v6832_v10  ;;  %v9855_v27 = vld [vmem:[%s17789_s4 + $0x38] sm:$0xff] }
0x232a   :  { %11674 = vmatmul.mubr.msk.bf16.gmra.mrb[176].mxu0 %vm792_vm5, %v6840_v62  ;;  %v5333_v62 = vpack.c.bf16 %v9855_v27, %v9855_v27 }
0x232b   :  { %11677 = vmatprep.mubr.msk.bf16.mxu0 %vm12971_vm1, %v17814_v9 }
0x2345   :  { %v6811_v55 = vpop.xlane.xlu0 %6810 }
0x2346   :  { %12740 = vrcp.f32 %v6811_v55  ;;  %v16602_v55 = vsel %vm1359_vm7, %v5333_v62, 0 }
0x2347   :  { %11690 = vmatpush3.bf16.msra.mxu1 %v16602_v55 }
0x2348   :  { %11741 = vmatprep.subr.bf16.mxu1 %v17814_v9 }
0x2349   :  { %v6817_v41 = vpop.xlane.xlu0 %6816 }
0x234f   :  { %v6808_v7 = vpop.xlane.xlu1 %6807 }
0x2350   :  { %12742 = vrcp.f32 %v6808_v7  ;;  %v12741_v19 = vpop.eup %12740 }
0x2351   :  { %v6835_v22 = vmul.f32 %v12741_v19, %v16499_v11 }
0x2353   :  { %v6814_v52 = vpop.xlane.xlu1 %6813 }
0x2354   :  { %12744 = vrcp.f32 %v6814_v52 }
0x2355   :  { %12746 = vrcp.f32 %v6817_v41 }
0x2357   :  { %v6820_v48 = vpop.xlane.xlu0 %6819  ;;  %v7067_v11 = vpop.permute.xlu1 %7066 }
0x2358   :  { %12748 = vrcp.f32 %v6820_v48  ;;  %v7094_v59 = vsel %vm689_vm4, %v7067_v11, 0 }
0x235a   :  { %v12743_v18 = vpop.eup %12742 }
0x235b   :  { %v6834_v23 = vmul.f32 %v12743_v18, %v16510_v53  ;;  %v7065_v1 = vpop.permute.xlu0 %7064  ;;  %v7069_v15 = vpop.permute.xlu1 %7068 }
0x235c   :  { %v7091_v21 = vsel %vm689_vm4, %v7065_v1, 0 }
0x235d   :  { %v6841_v37 = vpack.c.bf16 %v6835_v22, %v6834_v23  ;;  %11714 = vmatpush3.bf16.xpose.msra.mxu0 %v7091_v21 }
0x235e   :  { %v12745_v43 = vpop.eup %12744  ;;  %11715 = vmatprep.subr.bf16.mxu0 %v17814_v9 }
0x235f   :  { %11678 = vmatmul.mubr.msk.bf16.gmra.mrb[180].mxu0 %vm792_vm5, %v6841_v37  ;;  %v12747_v4 = vpop.eup %12746  ;;  %v6836_v63 = vmul.f32 %v12745_v43, %v16515_v33  ;;  %v7097_v33 = vsel %vm689_vm4, %v7069_v15, 0  ;;  %v7402_v19 = vpop.permute.xlu0 %7401 }
0x2360   :  { %11681 = vmatprep.mubr.msk.bf16.mxu0 %vm12971_vm1, %v17814_v9  ;;  %v6837_v53 = vmul.f32 %v12747_v4, %v16504_v44  ;;  %v7071_v44 = vpop.permute.xlu1 %7070  ;;  %v7429_v18 = vsel %vm689_vm4, %v7402_v19, 0 }
0x2362   :  { %v6842_v25 = vpack.c.bf16 %v6837_v53, %v6836_v63  ;;  %v12749_v45 = vpop.eup %12748 }
0x2363   :  { %v6838_v29 = vmul.f32 %v12749_v45, %v16519_v34  ;;  %v7100_v34 = vsel %vm689_vm4, %v7071_v44, 0  ;;  %v7406_v1 = vpop.permute.xlu0 %7405 }
0x2364   :  { %v7398_v7 = vpop.permute.xlu1 %7397  ;;  %v7435_v21 = vsel %vm689_vm4, %v7406_v1, 0 }
0x2365   :  { %11716 = vmatpush3.bf16.xpose.msra.mxu0 %v7094_v59  ;;  %v6843_v10 = vpack.c.bf16 %v6838_v29, %v6838_v29  ;;  %v7423_v41 = vsel %vm689_vm4, %v7398_v7, 0 }
0x2366   :  { %11717 = vmatprep.subr.bf16.mxu0 %v17814_v9 }
0x2367   :  { %11682 = vmatmul.mubr.msk.bf16.gmra.mrb[184].mxu0 %vm792_vm5, %v6842_v25  ;;  %v7390_v43 = vpop.permute.xlu0 %7389 }
0x2368   :  { %11685 = vmatprep.mubr.msk.bf16.mxu0 %vm12971_vm1, %v17814_v9  ;;  %v7400_v52 = vpop.permute.xlu1 %7399 }
0x2369   :  { %v7426_v48 = vsel %vm689_vm4, %v7400_v52, 0 }
0x236b   :  { %v7394_v63 = vpop.permute.xlu0 %7393 }
0x236c   :  { %v7404_v22 = vpop.permute.xlu1 %7403 }
0x236d   :  { %11718 = vmatpush3.bf16.xpose.msra.mxu0 %v7097_v33  ;;  %v7432_v23 = vsel %vm689_vm4, %v7404_v22, 0 }
0x236e   :  { %11719 = vmatprep.subr.bf16.mxu0 %v17814_v9 }
0x236f   :  { %11686 = vmatmul.mubr.msk.bf16.gmra.mrb[188].mxu0 %vm792_vm5, %v6843_v10  ;;  %v7279_v29 = vpop.permute.xlu0 %7278 }
0x2370   :  { %11721 = vmatprep.mubr.msk.bf16.mxu0 %vm12971_vm1, %v17814_v9  ;;  %v7388_v37 = vpop.permute.xlu1 %7387 }
0x2373   :  { %v7283_v10 = vpop.permute.xlu0 %7282 }
0x2374   :  { %v7392_v4 = vpop.permute.xlu1 %7391 }
0x2375   :  { %11720 = vmatpush3.bf16.xpose.msra.mxu0 %v7100_v34 }
0x2376   :  { %11771 = vmatprep.subr.bf16.mxu0 %v17814_v9 }
0x2377   :  { %v7287_v7 = vpop.permute.xlu0 %7286 }
0x2378   :  { %v7308_v52 = vand.u32 %v7287_v7, %v13600_v3 }
0x237c   :  { %11722 = vmatmul.mubr.msk.bf16.vlgmr.msra.gmra.mrb[192].mxu0 %vm689_vm4, %v15866_v58 }
0x237d   :  { %11772 = vmatpush3.bf16.xpose.msra.mxu0 %v7423_v41  ;;  %11725 = vmatprep.mubr.msk.bf16.mxu0 %vm12971_vm1, %v17814_v9 }
0x237e   :  { %11773 = vmatprep.subr.bf16.mxu0 %v17814_v9 }
0x2384   :  { %11726 = vmatmul.mubr.msk.bf16.gmra.mrb[196].mxu0 %vm689_vm4, %v15874_v54 }
0x2385   :  { %11774 = vmatpush3.bf16.xpose.msra.mxu0 %v7426_v48  ;;  %11729 = vmatprep.mubr.msk.bf16.mxu0 %vm12971_vm1, %v17814_v9 }
0x2386   :  { %11775 = vmatprep.subr.bf16.mxu0 %v17814_v9 }
0x238c   :  { %11730 = vmatmul.mubr.msk.bf16.gmra.mrb[200].mxu0 %vm689_vm4, %v15880_v57 }
0x238d   :  { %11776 = vmatpush3.bf16.xpose.msra.mxu0 %v7429_v18  ;;  %11733 = vmatprep.mubr.msk.bf16.mxu0 %vm12971_vm1, %v17814_v9 }
0x238e   :  { %11777 = vmatprep.subr.bf16.mxu0 %v17814_v9 }
0x2394   :  { %11734 = vmatmul.mubr.msk.bf16.gmra.mrb[204].mxu0 %vm689_vm4, %v15886_v60 }
0x2395   :  { %11778 = vmatpush3.bf16.xpose.msra.mxu0 %v7432_v23  ;;  %11737 = vmatprep.mubr.msk.bf16.mxu0 %vm12971_vm1, %v17814_v9 }
0x2396   :  { %11779 = vmatprep.subr.bf16.mxu0 %v17814_v9 }
0x239c   :  { %11738 = vmatmul.mubr.msk.bf16.gmra.mrb[208].mxu0 %vm689_vm4, %v16529_v24 }
0x239d   :  { %11780 = vmatpush3.bf16.xpose.msra.mxu0 %v7435_v21  ;;  %11781 = vmatprep.mubr.msk.bf16.mxu0 %vm12971_vm1, %v17814_v9 }
0x239e   :  { %11831 = vmatprep.subr.bf16.mxu0 %v17814_v9 }
0x23a4   :  { %11782 = vmatmul.mubr.msk.bf16.vlgmr.msra.gmra.mrb[212].mxu0 %vm689_vm4, %v7388_v37 }
0x23a5   :  { %11785 = vmatprep.mubr.msk.bf16.mxu0 %vm12971_vm1, %v17814_v9  ;;  %11832 = vmatpush3.bf16.msra.mxu0 %v16150_v2  ;;  %v7396_v2 = vpop.permute.xlu1 %7395 }
0x23a6   :  { %11875 = vmatprep.subr.bf16.mxu0 %v17814_v9 }
0x23a9   :  { %v7281_v15 = vpop.permute.xlu1 %7280 }
0x23ac   :  { %11786 = vmatmul.mubr.msk.bf16.gmra.mrb[216].mxu0 %vm689_vm4, %v7390_v43 }
0x23ad   :  { %11789 = vmatprep.mubr.msk.bf16.mxu0 %vm12971_vm1, %v17814_v9  ;;  %v7285_v41 = vpop.permute.xlu1 %7284 }
0x23b4   :  { %11790 = vmatmul.mubr.msk.bf16.gmra.mrb[220].mxu0 %vm689_vm4, %v7392_v4 }
0x23b5   :  { %11793 = vmatprep.mubr.msk.bf16.mxu0 %vm12971_vm1, %v17814_v9 }
0x23bc   :  { %11794 = vmatmul.mubr.msk.bf16.gmra.mrb[224].mxu0 %vm689_vm4, %v7394_v63 }
0x23bd   :  { %11797 = vmatprep.mubr.msk.bf16.mxu0 %vm12971_vm1, %v17814_v9 }
0x23c4   :  { %11798 = vmatmul.mubr.msk.bf16.gmra.mrb[228].mxu0 %vm689_vm4, %v7396_v2 }
0x23c5   :  { %11833 = vmatprep.mubr.msk.bf16.mxu0 %vm12971_vm1, %v17814_v9 }
0x23f3   :  { %v6910_v11 = vpop.f32.mrb[172].mxu0 }
0x23f4   :  { %v11671_v53 = vpop.f32.mrb[173].mxu0 }
0x23f5   :  { %v6913_v59 = vpop.f32.mrb[174].mxu0 }
0x23f6   :  { %v6948_v25 = vpack.c.bf16 %v6913_v59, %v6910_v11  ;;  %v11672_v45 = vpop.f32.mrb[175].mxu0 }
0x23f8   :  { %11692 = vmatmul.mubr.msk.bf16.vlgmr.msra.gmra.mrb[176].mxu1 %vm689_vm4, %v6948_v25 }
0x23f9   :  { %11742 = vmatpush3.bf16.msra.mxu1 %v7279_v29  ;;  %11695 = vmatprep.mubr.msk.bf16.mxu1 %vm12971_vm1, %v17814_v9 }
0x23fa   :  { %11743 = vmatprep.subr.bf16.mxu1 %v17814_v9 }
0x23fd   :  { %11744 = vmatpush3.bf16.msra.mxu1 %v7281_v15  ;;  %v6918_v33 = vpop.f32.mrb[176].mxu0 }
0x23fe   :  { %v11675_v44 = vpop.f32.mrb[177].mxu0  ;;  %11745 = vmatprep.subr.bf16.mxu1 %v17814_v9 }
0x23ff   :  { %v6921_v27 = vpop.f32.mrb[178].mxu0 }
0x2400   :  { %v6949_v62 = vpack.c.bf16 %v6921_v27, %v6918_v33  ;;  %v11676_v34 = vpop.f32.mrb[179].mxu0 }
0x2401   :  { %11746 = vmatpush3.bf16.msra.mxu1 %v7283_v10 }
0x2402   :  { %11696 = vmatmul.mubr.msk.bf16.gmra.mrb[180].mxu1 %vm689_vm4, %v6949_v62  ;;  %11747 = vmatprep.subr.bf16.mxu1 %v17814_v9 }
0x2403   :  { %11699 = vmatprep.mubr.msk.bf16.mxu1 %vm12971_vm1, %v17814_v9 }
0x2405   :  { %11748 = vmatpush3.bf16.msra.mxu1 %v7285_v41 }
0x2406   :  { %11749 = vmatprep.subr.bf16.mxu1 %v17814_v9 }
0x2409   :  { %11750 = vmatpush3.bf16.msra.mxu1 %v7308_v52 }
0x240a   :  { %11801 = vmatprep.subr.bf16.mxu1 %v17814_v9 }
0x2432   :  { %v6926_v48 = vpop.f32.mrb[180].mxu0 }
0x2433   :  { %v11679_v19 = vpop.f32.mrb[181].mxu0 }
0x2434   :  { %v6929_v18 = vpop.f32.mrb[182].mxu0 }
0x2435   :  { %v6950_v22 = vpack.c.bf16 %v6929_v18, %v6926_v48  ;;  %v11680_v23 = vpop.f32.mrb[183].mxu0 }
0x2437   :  { %11700 = vmatmul.mubr.msk.bf16.gmra.mrb[184].mxu1 %vm689_vm4, %v6950_v22 }
0x2438   :  { %11703 = vmatprep.mubr.msk.bf16.mxu1 %vm12971_vm1, %v17814_v9 }
0x243a   :  { %v6934_v1 = vpop.f32.mrb[184].mxu0 }
0x243b   :  { %v11683_v21 = vpop.f32.mrb[185].mxu0 }
0x243c   :  { %v6937_v37 = vpop.f32.mrb[186].mxu0 }
0x243d   :  { %v6951_v43 = vpack.c.bf16 %v6937_v37, %v6934_v1  ;;  %v11684_v4 = vpop.f32.mrb[187].mxu0 }
0x243f   :  { %11704 = vmatmul.mubr.msk.bf16.gmra.mrb[188].mxu1 %vm689_vm4, %v6951_v43 }
0x2440   :  { %11707 = vmatprep.mubr.msk.bf16.mxu1 %vm12971_vm1, %v17814_v9 }
0x2442   :  { %v6942_v63 = vpop.f32.mrb[188].mxu0 }
0x2443   :  { %v11687_v2 = vpop.f32.mrb[189].mxu0  ;;  %v6952_v53 = vpack.c.bf16 %v6942_v63, %v6942_v63 }
0x2444   :  { %v6945_v11 = vpop.f32.mrb[190].mxu0 }
0x2445   :  { %v11688_v59 = vpop.f32.mrb[191].mxu0 }
0x2447   :  { %11708 = vmatmul.mubr.msk.bf16.gmra.mrb[192].mxu1 %vm689_vm4, %v6952_v53 }
0x2448   :  { %11751 = vmatprep.mubr.msk.bf16.mxu1 %vm12971_vm1, %v17814_v9 }
0x244f   :  { %v16675_v25 = vpop.f32.mrb[192].mxu0 }
0x2450   :  { %v11723_v45 = vpop.f32.mrb[193].mxu0  ;;  %v7174_v29 = vsel %vm792_vm5, %v16675_v25, -inf }
0x2451   :  { %7175 = vmax.xlane.f32.xlu0 %v7174_v29  ;;  %v16679_v15 = vpop.f32.mrb[194].mxu0 }
0x2452   :  { %v11724_v33 = vpop.f32.mrb[195].mxu0  ;;  %v7177_v10 = vsel %vm792_vm5, %v16679_v15, -inf }
0x2453   :  { %7178 = vmax.xlane.f32.xlu1 %v7177_v10 }
0x2457   :  { %v16683_v44 = vpop.f32.mrb[196].mxu0 }
0x2458   :  { %v11727_v27 = vpop.f32.mrb[197].mxu0  ;;  %v7180_v62 = vsel %vm792_vm5, %v16683_v44, -inf }
0x2459   :  { %7181 = vmax.xlane.f32.xlu0 %v7180_v62  ;;  %v16687_v34 = vpop.f32.mrb[198].mxu0 }
0x245a   :  { %v11728_v7 = vpop.f32.mrb[199].mxu0  ;;  %v7183_v41 = vsel %vm792_vm5, %v16687_v34, -inf }
0x245d   :  { %7184 = vmax.xlane.f32.xlu0 %v7183_v41 }
0x245f   :  { %v16691_v52 = vpop.f32.mrb[200].mxu0 }
0x2460   :  { %v11731_v48 = vpop.f32.mrb[201].mxu0  ;;  %v7186_v19 = vsel %vm792_vm5, %v16691_v52, -inf }
0x2461   :  { %7187 = vmax.xlane.f32.xlu0 %v7186_v19  ;;  %v16695_v18 = vpop.f32.mrb[202].mxu0 }
0x2462   :  { %v11732_v22 = vpop.f32.mrb[203].mxu0  ;;  %v7189_v23 = vsel %vm792_vm5, %v16695_v18, -inf }
0x2463   :  { %7190 = vmax.xlane.f32.xlu1 %v7189_v23 }
0x2467   :  { %v16699_v1 = vpop.f32.mrb[204].mxu0 }
0x2468   :  { %v11735_v21 = vpop.f32.mrb[205].mxu0  ;;  %v7192_v37 = vsel %vm792_vm5, %v16699_v1, -inf }
0x2469   :  { %7193 = vmax.xlane.f32.xlu0 %v7192_v37  ;;  %v16703_v43 = vpop.f32.mrb[206].mxu0 }
0x246a   :  { %v11736_v4 = vpop.f32.mrb[207].mxu0  ;;  %v7195_v63 = vsel %vm792_vm5, %v16703_v43, -inf }
0x246b   :  { %7196 = vmax.xlane.f32.xlu1 %v7195_v63 }
0x246f   :  { %v16707_v2 = vpop.f32.mrb[208].mxu0 }
0x2470   :  { %v11739_v11 = vpop.f32.mrb[209].mxu0  ;;  %v7198_v53 = vsel %vm792_vm5, %v16707_v2, -inf }
0x2471   :  { %7199 = vmax.xlane.f32.xlu0 %v7198_v53  ;;  %v7171_v59 = vpop.f32.mrb[210].mxu0 }
0x2472   :  { %v11740_v45 = vpop.f32.mrb[211].mxu0 }
0x2477   :  { %v16711_v29 = vpop.f32.mrb[212].mxu0 }
0x2478   :  { %v11783_v33 = vpop.f32.mrb[213].mxu0  ;;  %v7509_v10 = vsel %vm792_vm5, %v16711_v29, -inf }
0x2479   :  { %7510 = vmax.xlane.f32.xlu1 %v7509_v10  ;;  %v16715_v27 = vpop.f32.mrb[214].mxu0 }
0x247a   :  { %v11784_v62 = vpop.f32.mrb[215].mxu0 }
0x247b   :  { %v7512_v62 = vsel %vm792_vm5, %v16715_v27, -inf }
0x247f   :  { %v16717_v7 = vpop.f32.mrb[216].mxu0 }
0x2480   :  { %v11787_v41 = vpop.f32.mrb[217].mxu0 }
0x2481   :  { %v16719_v48 = vpop.f32.mrb[218].mxu0 }
0x2482   :  { %v11788_v19 = vpop.f32.mrb[219].mxu0  ;;  %v7518_v41 = vsel %vm792_vm5, %v16719_v48, -inf }
0x2483   :  { %v7515_v19 = vsel %vm792_vm5, %v16717_v7, -inf }
0x2487   :  { %7615 = vrot.lane.b32.xlu0 %v15874_v54, %s12976_s0  ;;  %v16723_v22 = vpop.f32.mrb[220].mxu0 }
0x2488   :  { %v11791_v23 = vpop.f32.mrb[221].mxu0 }
0x2489   :  { %v16725_v21 = vpop.f32.mrb[222].mxu0 }
0x248a   :  { %7613 = vrot.lane.b32.xlu1 %v15866_v58, %s12976_s0  ;;  %v11792_v37 = vpop.f32.mrb[223].mxu0  ;;  %v7524_v23 = vsel %vm792_vm5, %v16725_v21, -inf }
0x248b   :  { %v7521_v37 = vsel %vm792_vm5, %v16723_v22, -inf }
0x248f   :  { %v16729_v4 = vpop.f32.mrb[224].mxu0 }
0x2490   :  { %v11795_v63 = vpop.f32.mrb[225].mxu0 }
0x2491   :  { %v16731_v11 = vpop.f32.mrb[226].mxu0 }
0x2492   :  { %v11796_v53 = vpop.f32.mrb[227].mxu0  ;;  %v7530_v63 = vsel %vm792_vm5, %v16731_v11, -inf }
0x2493   :  { %v7527_v53 = vsel %vm792_vm5, %v16729_v4, -inf }
0x2497   :  { %v16733_v59 = vpop.f32.mrb[228].mxu0 }
0x2498   :  { %v11799_v45 = vpop.f32.mrb[229].mxu0 }
0x2499   :  { %v7506_v33 = vpop.f32.mrb[230].mxu0  ;;  %v7533_v45 = vsel %vm792_vm5, %v16733_v59, -inf }
0x249a   :  { %v11800_v10 = vpop.f32.mrb[231].mxu0 }
0x24a6   :  { %7513 = vmax.xlane.f32.xlu0 %v7512_v62 }
0x24aa   :  { %7519 = vmax.xlane.f32.xlu0 %v7518_v41 }
0x24ae   :  { %7516 = vmax.xlane.f32.xlu1 %v7515_v19  ;;  %7525 = vmax.xlane.f32.xlu0 %v7524_v23 }
0x24b2   :  { %7522 = vmax.xlane.f32.xlu1 %v7521_v37  ;;  %7531 = vmax.xlane.f32.xlu0 %v7530_v63 }
0x24b6   :  { %7528 = vmax.xlane.f32.xlu1 %v7527_v53 }
0x24ba   :  { %7534 = vmax.xlane.f32.xlu1 %v7533_v45 }
0x24cb   :  { %v7005_v33 = vpop.f32.mrb[176].mxu1 }
0x24cc   :  { %v16752_v10 = vadd.f32 %v7005_v33, %v16449_v42  ;;  %v11693_v62 = vpop.f32.mrb[177].mxu1 }
0x24cd   :  { %v7008_v41 = vpop.f32.mrb[178].mxu1 }
0x24ce   :  { %v16755_v19 = vadd.f32 %v7008_v41, %v16452_v61  ;;  %v11694_v23 = vpop.f32.mrb[179].mxu1 }
0x24d5   :  { %v7013_v37 = vpop.f32.mrb[180].mxu1 }
0x24d6   :  { %v16758_v63 = vadd.f32 %v7013_v37, %v16455_v56  ;;  %v11697_v26 = vpop.f32.mrb[181].mxu1 }
0x24d7   :  { %v7016_v53 = vpop.f32.mrb[182].mxu1 }
0x24d8   :  { %v16761_v35 = vadd.f32 %v7016_v53, %v16458_v13  ;;  %v11698_v45 = vpop.f32.mrb[183].mxu1 }
0x24de   :  { %v7176_v40 = vpop.xlane.xlu0 %7175 }
0x24df   :  { %v7201_v42 = vsub.f32 %v16675_v25, %v7176_v40 }
0x24e0   :  { %v7179_v33 = vpop.xlane.xlu1 %7178 }
0x24e1   :  { %v7210_v62 = vmul.f32 1.442695, %v7201_v42  ;;  %v7202_v8 = vsub.f32 %v16679_v15, %v7179_v33 }
0x24e3   :  { %12750 = vpow2.f32 %v7210_v62  ;;  %v7212_v61 = vmul.f32 1.442695, %v7202_v8 }
0x24e5   :  { %12752 = vpow2.f32 %v7212_v61 }
0x24e6   :  { %v7182_v41 = vpop.xlane.xlu0 %7181 }
0x24e7   :  { %v7203_v56 = vsub.f32 %v16683_v44, %v7182_v41 }
0x24e9   :  { %v7214_v23 = vmul.f32 1.442695, %v7203_v56 }
0x24ea   :  { %v7185_v26 = vpop.xlane.xlu0 %7184 }
0x24eb   :  { %12754 = vpow2.f32 %v7214_v23  ;;  %v7204_v13 = vsub.f32 %v16687_v34, %v7185_v26 }
0x24ed   :  { %v16767_v37 = vpop.eup %12750  ;;  %v7216_v53 = vmul.f32 1.442695, %v7204_v13 }
0x24ee   :  { %v7188_v45 = vpop.xlane.xlu0 %7187  ;;  %v7228_v40 = vsel %vm792_vm5, %v16767_v37, 0.0 }
0x24ef   :  { %v16771_v25 = vpop.eup %12752  ;;  %12756 = vpow2.f32 %v7216_v53  ;;  %v7205_v8 = vsub.f32 %v16691_v52, %v7188_v45  ;;  %7229 = vadd.xlane.f32.xlu0 %v7228_v40 }
0x24f0   :  { %v7191_v15 = vpop.xlane.xlu1 %7190  ;;  %v7231_v44 = vsel %vm792_vm5, %v16771_v25, 0.0 }
0x24f1   :  { %v7218_v42 = vmul.f32 1.442695, %v7205_v8  ;;  %v7206_v34 = vsub.f32 %v16695_v18, %v7191_v15  ;;  %7232 = vadd.xlane.f32.xlu1 %v7231_v44 }
0x24f3   :  { %12758 = vpow2.f32 %v7218_v42  ;;  %v7220_v33 = vmul.f32 1.442695, %v7206_v34 }
0x24f5   :  { %v16777_v62 = vpop.eup %12754  ;;  %12760 = vpow2.f32 %v7220_v33 }
0x24f6   :  { %v7194_v61 = vpop.xlane.xlu0 %7193  ;;  %v7234_v41 = vsel %vm792_vm5, %v16777_v62, 0.0 }
0x24f7   :  { %v7207_v52 = vsub.f32 %v16699_v1, %v7194_v61  ;;  %7235 = vadd.xlane.f32.xlu0 %v7234_v41 }
0x24f8   :  { %v7197_v56 = vpop.xlane.xlu1 %7196 }
0x24f9   :  { %v16782_v23 = vpop.eup %12756  ;;  %v7222_v26 = vmul.f32 1.442695, %v7207_v52  ;;  %v7208_v13 = vsub.f32 %v16703_v43, %v7197_v56 }
0x24fa   :  { %v7237_v18 = vsel %vm792_vm5, %v16782_v23, 0.0 }
0x24fb   :  { %12762 = vpow2.f32 %v7222_v26  ;;  %v7224_v53 = vmul.f32 1.442695, %v7208_v13  ;;  %7238 = vadd.xlane.f32.xlu1 %v7237_v18 }
0x24fd   :  { %v16787_v45 = vpop.eup %12758  ;;  %12764 = vpow2.f32 %v7224_v53 }
0x24fe   :  { %v7200_v40 = vpop.xlane.xlu0 %7199  ;;  %v7240_v1 = vsel %vm792_vm5, %v16787_v45, 0.0 }
0x24ff   :  { %v16791_v8 = vpop.eup %12760  ;;  %v7209_v15 = vsub.f32 %v16707_v2, %v7200_v40  ;;  %7241 = vadd.xlane.f32.xlu1 %v7240_v1 }
0x2500   :  { %v7243_v43 = vsel %vm792_vm5, %v16791_v8, 0.0 }
0x2501   :  { %v7226_v44 = vmul.f32 1.442695, %v7209_v15  ;;  %7244 = vadd.xlane.f32.xlu0 %v7243_v43 }
0x2503   :  { %12766 = vpow2.f32 %v7226_v44 }
0x2505   :  { %v16796_v42 = vpop.eup %12762 }
0x2506   :  { %v7511_v34 = vpop.xlane.xlu1 %7510  ;;  %v7246_v33 = vsel %vm792_vm5, %v16796_v42, 0.0 }
0x2507   :  { %v16800_v61 = vpop.eup %12764  ;;  %v7536_v41 = vsub.f32 %v16711_v29, %v7511_v34  ;;  %7247 = vadd.xlane.f32.xlu1 %v7246_v33 }
0x2508   :  { %v7249_v2 = vsel %vm792_vm5, %v16800_v61, 0.0 }
0x2509   :  { %v7545_v52 = vmul.f32 1.442695, %v7536_v41  ;;  %7250 = vadd.xlane.f32.xlu0 %v7249_v2 }
0x250a   :  { %v7021_v56 = vpop.f32.mrb[184].mxu1 }
0x250b   :  { %12768 = vpow2.f32 %v7545_v52  ;;  %v16806_v26 = vadd.f32 %v7021_v56, %v16481_v47  ;;  %v11701_v13 = vpop.f32.mrb[185].mxu1 }
0x250c   :  { %v7024_v18 = vpop.f32.mrb[186].mxu1 }
0x250d   :  { %v16808_v53 = vpop.eup %12766  ;;  %v16811_v40 = vadd.f32 %v7024_v18, %v16484_v46  ;;  %v11702_v1 = vpop.f32.mrb[187].mxu1 }
0x250e   :  { %v7252_v29 = vsel %vm792_vm5, %v16808_v53, 0.0  ;;  %v16830_v18 = vpop.permute.xlu0 %7615 }
0x250f   :  { %7253 = vadd.xlane.f32.xlu1 %v7252_v29 }
0x2512   :  { %v7029_v15 = vpop.f32.mrb[188].mxu1 }
0x2513   :  { %v16816_v43 = vadd.f32 %v7029_v15, %v16487_v12  ;;  %v11705_v44 = vpop.f32.mrb[189].mxu1  ;;  %v16833_v15 = vpop.permute.xlu1 %7613 }
0x2514   :  { %v7032_v34 = vpop.f32.mrb[190].mxu1 }
0x2515   :  { %v16818_v47 = vpop.eup %12768  ;;  %v16821_v33 = vadd.f32 %v7032_v34, %v16490_v14  ;;  %v11706_v41 = vpop.f32.mrb[191].mxu1 }
0x2516   :  { %v7563_v46 = vsel %vm792_vm5, %v16818_v47, 0.0 }
0x2517   :  { %7564 = vadd.xlane.f32.xlu1 %v7563_v46 }
0x251a   :  { %v7037_v2 = vpop.f32.mrb[192].mxu1 }
0x251b   :  { %v16826_v52 = vadd.f32 %v7037_v2, %v16495_v51  ;;  %v11709_v56 = vpop.f32.mrb[193].mxu1 }
0x251c   :  { %v7040_v13 = vpop.f32.mrb[194].mxu1 }
0x251d   :  { %v11710_v12 = vpop.f32.mrb[195].mxu1 }
0x251f   :  { %7617 = vrot.lane.b32.xlu0 %v15880_v57, %s12976_s0 }
0x2533   :  { %v7514_v1 = vpop.xlane.xlu0 %7513 }
0x2534   :  { %v7537_v14 = vsub.f32 %v16715_v27, %v7514_v1 }
0x2536   :  { %v7547_v29 = vmul.f32 1.442695, %v7537_v14 }
0x2537   :  { %v7520_v44 = vpop.xlane.xlu0 %7519 }
0x2538   :  { %12770 = vpow2.f32 %v7547_v29  ;;  %v7539_v34 = vsub.f32 %v16719_v48, %v7520_v44 }
0x253a   :  { %v7551_v2 = vmul.f32 1.442695, %v7539_v34 }
0x253b   :  { %v7517_v51 = vpop.xlane.xlu1 %7516  ;;  %v7526_v41 = vpop.xlane.xlu0 %7525 }
0x253c   :  { %v7538_v46 = vsub.f32 %v16717_v7, %v7517_v51  ;;  %v7541_v13 = vsub.f32 %v16725_v21, %v7526_v41 }
0x253e   :  { %v7549_v56 = vmul.f32 1.442695, %v7538_v46  ;;  %v7555_v1 = vmul.f32 1.442695, %v7541_v13 }
0x253f   :  { %v7523_v12 = vpop.xlane.xlu1 %7522  ;;  %v7532_v13 = vpop.xlane.xlu0 %7531 }
0x2540   :  { %12772 = vpow2.f32 %v7549_v56  ;;  %v7540_v28 = vsub.f32 %v16723_v22, %v7523_v12  ;;  %v7543_v12 = vsub.f32 %v16731_v11, %v7532_v13 }
0x2541   :  { %12774 = vpow2.f32 %v7551_v2 }
0x2542   :  { %v16839_v27 = vpop.eup %12770  ;;  %v7553_v14 = vmul.f32 1.442695, %v7540_v28 }
0x2543   :  { %v7529_v29 = vpop.xlane.xlu1 %7528  ;;  %v7566_v48 = vsel %vm792_vm5, %v16839_v27, 0.0 }
0x2544   :  { %12776 = vpow2.f32 %v7553_v14  ;;  %v7542_v7 = vsub.f32 %v16729_v4, %v7529_v29  ;;  %7567 = vadd.xlane.f32.xlu1 %v7566_v48  ;;  %v7559_v29 = vmul.f32 1.442695, %v7543_v12 }
0x2545   :  { %12778 = vpow2.f32 %v7555_v1 }
0x2546   :  { %v7557_v44 = vmul.f32 1.442695, %v7542_v7 }
0x2547   :  { %v7535_v1 = vpop.xlane.xlu1 %7534 }
0x2548   :  { %12780 = vpow2.f32 %v7557_v44  ;;  %v7544_v14 = vsub.f32 %v16733_v59, %v7535_v1 }
0x2549   :  { %12782 = vpow2.f32 %v7559_v29 }
0x254a   :  { %v16844_v21 = vpop.eup %12772  ;;  %v7561_v48 = vmul.f32 1.442695, %v7544_v14 }
0x254b   :  { %v7569_v22 = vsel %vm792_vm5, %v16844_v21, 0.0  ;;  %v16848_v34 = vpop.eup %12774 }
0x254c   :  { %7570 = vadd.xlane.f32.xlu1 %v7569_v22  ;;  %v7572_v4 = vsel %vm792_vm5, %v16848_v34, 0.0 }
0x254e   :  { %v16850_v28 = vpop.eup %12776 }
0x254f   :  { %v7575_v51 = vsel %vm792_vm5, %v16850_v28, 0.0  ;;  %v16856_v41 = vpop.eup %12778 }
0x2550   :  { %7576 = vadd.xlane.f32.xlu0 %v7575_v51  ;;  %7573 = vadd.xlane.f32.xlu1 %v7572_v4  ;;  %v7578_v56 = vsel %vm792_vm5, %v16856_v41, 0.0 }
0x2552   :  { %v16858_v46 = vpop.eup %12780 }
0x2553   :  { %v7581_v2 = vsel %vm792_vm5, %v16858_v46, 0.0  ;;  %v16882_v59 = vpop.eup %12782 }
0x2554   :  { %7582 = vadd.xlane.f32.xlu0 %v7581_v2  ;;  %7579 = vadd.xlane.f32.xlu1 %v7578_v56  ;;  %v7584_v2 = vsel %vm792_vm5, %v16882_v59, 0.0 }
0x2565   :  { %7619 = vrot.lane.b32.xlu1 %v15886_v60, %s12976_s0 }
0x256a   :  { %7621 = vrot.lane.b32.xlu0 %v16529_v24, %s12976_s0 }
0x256e   :  { %7908 = vrot.lane.b32.xlu0 %v15874_v54, %s12978_s26 }
0x2572   :  { %7910 = vrot.lane.b32.xlu0 %v15880_v57, %s12978_s26 }
0x2576   :  { %7912 = vrot.lane.b32.xlu0 %v15886_v60, %s12978_s26 }
0x257a   :  { %7914 = vrot.lane.b32.xlu0 %v16529_v24, %s12978_s26 }
0x257c   :  { %v7230_v7 = vpop.xlane.xlu0 %7229 }
0x257d   :  { %12784 = vrcp.f32 %v7230_v7 }
0x257e   :  { %12786 = vpow2.f32 %v7561_v48  ;;  %7898 = vrot.lane.b32.xlu0 %v15874_v54, %s12979_s27  ;;  %v7233_v44 = vpop.xlane.xlu1 %7232 }
0x257f   :  { %12788 = vrcp.f32 %v7233_v44 }
0x2582   :  { %7902 = vrot.lane.b32.xlu0 %v15886_v60, %s12979_s27 }
0x2584   :  { %v7236_v11 = vpop.xlane.xlu0 %7235 }
0x2585   :  { %12790 = vrcp.f32 %v7236_v11 }
0x2587   :  { %v12785_v22 = vpop.eup %12784 }
0x2588   :  { %v16884_v51 = vpop.eup %12786  ;;  %v7239_v4 = vpop.xlane.xlu1 %7238  ;;  %v7264_v13 = vmul.f32 %v12785_v22, %v16767_v37 }
0x2589   :  { %v12789_v56 = vpop.eup %12788  ;;  %12792 = vrcp.f32 %v7239_v4  ;;  %7585 = vadd.xlane.f32.xlu1 %v7584_v2  ;;  %v7587_v29 = vsel %vm792_vm5, %v16884_v51, 0.0 }
0x258a   :  { %v7265_v12 = vmul.f32 %v12789_v56, %v16771_v25 }
0x258c   :  { %v7273_v1 = vpack.c.bf16 %v7265_v12, %v7264_v13  ;;  %v7242_v14 = vpop.xlane.xlu1 %7241 }
0x258d   :  { %7588 = vadd.xlane.f32.xlu1 %v7587_v29  ;;  %12794 = vrcp.f32 %v7242_v14 }
0x258e   :  { %v7245_v48 = vpop.xlane.xlu0 %7244  ;;  %11752 = vmatmul.mubr.msk.bf16.vlgmr.msra.gmra.mrb[196].mxu1 %vm792_vm5, %v7273_v1 }
0x258f   :  { %12796 = vrcp.f32 %v7245_v48  ;;  %11802 = vmatpush3.bf16.msra.mxu1 %v16833_v15  ;;  %11755 = vmatprep.mubr.msk.bf16.mxu1 %vm12971_vm1, %v17814_v9  ;;  %v12791_v37 = vpop.eup %12790 }
0x2590   :  { %11803 = vmatprep.subr.bf16.mxu1 %v17814_v9  ;;  %v7266_v7 = vmul.f32 %v12791_v37, %v16777_v62 }
0x2593   :  { %v12793_v25 = vpop.eup %12792  ;;  %11804 = vmatpush3.bf16.msra.mxu1 %v16830_v18 }
0x2594   :  { %v7267_v44 = vmul.f32 %v12793_v25, %v16782_v23  ;;  %v7248_v11 = vpop.xlane.xlu1 %7247  ;;  %11805 = vmatprep.subr.bf16.mxu1 %v17814_v9 }
0x2595   :  { %12798 = vrcp.f32 %v7248_v11 }
0x2596   :  { %v7274_v22 = vpack.c.bf16 %v7267_v44, %v7266_v7  ;;  %v7251_v4 = vpop.xlane.xlu0 %7250 }
0x2597   :  { %12800 = vrcp.f32 %v7251_v4  ;;  %v12795_v15 = vpop.eup %12794 }
0x2598   :  { %11756 = vmatmul.mubr.msk.bf16.gmra.mrb[200].mxu1 %vm792_vm5, %v7274_v22  ;;  %v7268_v62 = vmul.f32 %v12795_v15, %v16787_v45 }
0x2599   :  { %v12797_v2 = vpop.eup %12796  ;;  %11759 = vmatprep.mubr.msk.bf16.mxu1 %vm12971_vm1, %v17814_v9 }
0x259a   :  { %v7269_v18 = vmul.f32 %v12797_v2, %v16791_v8  ;;  %v7618_v56 = vpop.permute.xlu0 %7617 }
0x259b   :  { %11806 = vmatpush3.bf16.msra.mxu1 %v7618_v56 }
0x259c   :  { %v7254_v23 = vpop.xlane.xlu1 %7253  ;;  %11807 = vmatprep.subr.bf16.mxu1 %v17814_v9  ;;  %v7275_v13 = vpack.c.bf16 %v7269_v18, %v7268_v62 }
0x259d   :  { %12802 = vrcp.f32 %v7254_v23 }
0x259e   :  { %7906 = vrot.lane.b32.xlu1 %v15866_v58, %s12978_s26 }
0x259f   :  { %v12799_v12 = vpop.eup %12798 }
0x25a0   :  { %11760 = vmatmul.mubr.msk.bf16.gmra.mrb[204].mxu1 %vm792_vm5, %v7275_v13  ;;  %v7270_v45 = vmul.f32 %v12799_v12, %v16796_v42 }
0x25a1   :  { %v12801_v1 = vpop.eup %12800  ;;  %11763 = vmatprep.mubr.msk.bf16.mxu1 %vm12971_vm1, %v17814_v9 }
0x25a2   :  { %v7271_v8 = vmul.f32 %v12801_v1, %v16800_v61  ;;  %7896 = vrot.lane.b32.xlu1 %v15866_v58, %s12979_s27 }
0x25a4   :  { %v7276_v14 = vpack.c.bf16 %v7271_v8, %v7270_v45  ;;  %v7565_v42 = vpop.xlane.xlu1 %7564 }
0x25a6   :  { %7900 = vrot.lane.b32.xlu1 %v15880_v57, %s12979_s27 }
0x25a7   :  { %v12803_v29 = vpop.eup %12802 }
0x25a8   :  { %11764 = vmatmul.mubr.msk.bf16.gmra.mrb[208].mxu1 %vm792_vm5, %v7276_v14  ;;  %v7272_v48 = vmul.f32 %v12803_v29, %v16808_v53 }
0x25a9   :  { %11767 = vmatprep.mubr.msk.bf16.mxu1 %vm12971_vm1, %v17814_v9 }
0x25aa   :  { %7904 = vrot.lane.b32.xlu1 %v16529_v24, %s12979_s27  ;;  %v7277_v61 = vpack.c.bf16 %v7272_v48, %v7272_v48 }
0x25ae   :  { %8122 = vrot.lane.b32.xlu1 %v15866_v58, %s12980_s28 }
0x25b0   :  { %11768 = vmatmul.mubr.msk.bf16.gmra.mrb[212].mxu1 %vm792_vm5, %v7277_v61 }
0x25b1   :  { %11811 = vmatprep.mubr.msk.bf16.mxu1 %vm12971_vm1, %v17814_v9 }
0x25d1   :  { %v7568_v37 = vpop.xlane.xlu1 %7567 }
0x25d2   :  { %12804 = vrcp.f32 %v7568_v37 }
0x25d3   :  { %12806 = vrcp.f32 %v7565_v42 }
0x25d9   :  { %v7571_v25 = vpop.xlane.xlu1 %7570 }
0x25dc   :  { %v12805_v22 = vpop.eup %12804 }
0x25dd   :  { %v7577_v7 = vpop.xlane.xlu0 %7576  ;;  %v7574_v44 = vpop.xlane.xlu1 %7573  ;;  %v7600_v18 = vmul.f32 %v12805_v22, %v16839_v27 }
0x25de   :  { %12808 = vrcp.f32 %v7574_v44  ;;  %v12807_v2 = vpop.eup %12806 }
0x25df   :  { %12810 = vrcp.f32 %v7571_v25  ;;  %v7599_v62 = vmul.f32 %v12807_v2, %v16818_v47 }
0x25e1   :  { %v7583_v53 = vpop.xlane.xlu0 %7582  ;;  %v7580_v11 = vpop.xlane.xlu1 %7579  ;;  %v7608_v23 = vpack.c.bf16 %v7600_v18, %v7599_v62 }
0x25e2   :  { %12812 = vrcp.f32 %v7580_v11 }
0x25e3   :  { %12814 = vrcp.f32 %v7577_v7 }
0x25e4   :  { %12816 = vrcp.f32 %v7583_v53 }
0x25e5   :  { %v7622_v4 = vpop.permute.xlu0 %7621  ;;  %v7620_v15 = vpop.permute.xlu1 %7619 }
0x25e6   :  { %11808 = vmatpush3.bf16.msra.mxu1 %v7620_v15  ;;  %v7643_v56 = vand.u32 %v7622_v4, %v13600_v3 }
0x25e7   :  { %11809 = vmatprep.subr.bf16.mxu1 %v17814_v9 }
0x25e8   :  { %v12809_v13 = vpop.eup %12808 }
0x25e9   :  { %v12811_v12 = vpop.eup %12810  ;;  %v7602_v27 = vmul.f32 %v12809_v13, %v16848_v34 }
0x25ea   :  { %11810 = vmatpush3.bf16.msra.mxu1 %v7643_v56  ;;  %v7601_v47 = vmul.f32 %v12811_v12, %v16844_v21 }
0x25eb   :  { %11853 = vmatprep.subr.bf16.mxu1 %v17814_v9 }
0x25ec   :  { %v7609_v1 = vpack.c.bf16 %v7602_v27, %v7601_v47  ;;  %v12813_v8 = vpop.eup %12812 }
0x25ed   :  { %11812 = vmatmul.mubr.msk.bf16.vlgmr.msra.gmra.mrb[216].mxu1 %vm792_vm5, %v7608_v23  ;;  %v12815_v45 = vpop.eup %12814  ;;  %v7604_v14 = vmul.f32 %v12813_v8, %v16856_v41 }
0x25ee   :  { %11815 = vmatprep.mubr.msk.bf16.mxu1 %vm12971_vm1, %v17814_v9  ;;  %11854 = vmatpush3.bf16.msra.mxu1 %v16140_v6  ;;  %v7603_v29 = vmul.f32 %v12815_v45, %v16850_v28  ;;  %v12817_v34 = vpop.eup %12816 }
0x25ef   :  { %11905 = vmatprep.subr.bf16.mxu1 %v17814_v9  ;;  %v7605_v42 = vmul.f32 %v12817_v34, %v16858_v46 }
0x25f0   :  { %v7610_v48 = vpack.c.bf16 %v7604_v14, %v7603_v29 }
0x25f5   :  { %11816 = vmatmul.mubr.msk.bf16.gmra.mrb[220].mxu1 %vm792_vm5, %v7609_v1 }
0x25f6   :  { %11819 = vmatprep.mubr.msk.bf16.mxu1 %vm12971_vm1, %v17814_v9 }
0x25fd   :  { %11820 = vmatmul.mubr.msk.bf16.gmra.mrb[224].mxu1 %vm792_vm5, %v7610_v48 }
0x25fe   :  { %11823 = vmatprep.mubr.msk.bf16.mxu1 %vm12971_vm1, %v17814_v9 }
0x2616   :  { %v7586_v6 = vpop.xlane.xlu1 %7585 }
0x2617   :  { %12818 = vrcp.f32 %v7586_v6 }
0x261a   :  { %v7589_v21 = vpop.xlane.xlu1 %7588 }
0x261b   :  { %12820 = vrcp.f32 %v7589_v21 }
0x261e   :  { %v7907_v44 = vpop.permute.xlu1 %7906 }
0x2621   :  { %v12819_v61 = vpop.eup %12818 }
0x2622   :  { %v7606_v37 = vmul.f32 %v12819_v61, %v16882_v59  ;;  %v16958_v53 = vpop.permute.xlu1 %7896 }
0x2624   :  { %v7611_v41 = vpack.c.bf16 %v7606_v37, %v7605_v42 }
0x2625   :  { %v12821_v25 = vpop.eup %12820 }
0x2626   :  { %11824 = vmatmul.mubr.msk.bf16.gmra.mrb[228].mxu1 %vm792_vm5, %v7611_v41  ;;  %v7607_v28 = vmul.f32 %v12821_v25, %v16884_v51  ;;  %v16960_v46 = vpop.permute.xlu1 %7900 }
0x2627   :  { %11827 = vmatprep.mubr.msk.bf16.mxu1 %vm12971_vm1, %v17814_v9 }
0x2628   :  { %v7612_v7 = vpack.c.bf16 %v7607_v28, %v7607_v28 }
0x262a   :  { %v16962_v59 = vpop.permute.xlu1 %7904 }
0x262e   :  { %11828 = vmatmul.mubr.msk.bf16.gmra.mrb[232].mxu1 %vm792_vm5, %v7612_v7  ;;  %v8123_v18 = vpop.permute.xlu1 %8122 }
0x262f   :  { %11855 = vmatprep.mubr.msk.bf16.mxu1 %vm12971_vm1, %v17814_v9 }
0x2661   :  { %v7344_v11 = vpop.f32.mrb[196].mxu1 }
0x2662   :  { %v11753_v22 = vpop.f32.mrb[197].mxu1 }
0x2663   :  { %v7347_v4 = vpop.f32.mrb[198].mxu1  ;;  %v7932_v22 = vsel %vm689_vm4, %v7907_v44, 0 }
0x2664   :  { %v7382_v15 = vpack.c.bf16 %v7347_v4, %v7344_v11  ;;  %v11754_v2 = vpop.f32.mrb[199].mxu1 }
0x2665   :  { %v7909_v2 = vpop.permute.xlu0 %7908 }
0x2666   :  { %11856 = vmatmul.mubr.msk.bf16.vlgmr.msra.gmra.mrb[236].mxu1 %vm689_vm4, %v7382_v15 }
0x2667   :  { %11906 = vmatpush3.bf16.msra.mxu1 %v8123_v18  ;;  %11859 = vmatprep.mubr.msk.bf16.mxu1 %vm12971_vm1, %v17814_v9 }
0x2668   :  { %11907 = vmatprep.subr.bf16.mxu1 %v17814_v9 }
0x266b   :  { %v7352_v51 = vpop.f32.mrb[200].mxu1 }
0x266c   :  { %v11757_v56 = vpop.f32.mrb[201].mxu1 }
0x266d   :  { %v7355_v62 = vpop.f32.mrb[202].mxu1 }
0x266e   :  { %v7383_v23 = vpack.c.bf16 %v7355_v62, %v7352_v51  ;;  %v11758_v13 = vpop.f32.mrb[203].mxu1  ;;  %v7935_v62 = vsel %vm689_vm4, %v7909_v2, 0 }
0x266f   :  { %v7911_v13 = vpop.permute.xlu0 %7910 }
0x2670   :  { %11860 = vmatmul.mubr.msk.bf16.gmra.mrb[240].mxu1 %vm689_vm4, %v7383_v23 }
0x2671   :  { %11863 = vmatprep.mubr.msk.bf16.mxu1 %vm12971_vm1, %v17814_v9 }
0x2673   :  { %v7360_v12 = vpop.f32.mrb[204].mxu1 }
0x2674   :  { %v11761_v27 = vpop.f32.mrb[205].mxu1 }
0x2675   :  { %v7363_v47 = vpop.f32.mrb[206].mxu1 }
0x2676   :  { %v7384_v1 = vpack.c.bf16 %v7363_v47, %v7360_v12  ;;  %v11762_v8 = vpop.f32.mrb[207].mxu1 }
0x2677   :  { %v7913_v8 = vpop.permute.xlu0 %7912 }
0x2678   :  { %11864 = vmatmul.mubr.msk.bf16.gmra.mrb[244].mxu1 %vm689_vm4, %v7384_v1  ;;  %v7938_v1 = vsel %vm689_vm4, %v7911_v13, 0 }
0x2679   :  { %11867 = vmatprep.mubr.msk.bf16.mxu1 %vm12971_vm1, %v17814_v9 }
0x267b   :  { %v7368_v45 = vpop.f32.mrb[208].mxu1 }
0x267c   :  { %v11765_v14 = vpop.f32.mrb[209].mxu1 }
0x267d   :  { %v7371_v29 = vpop.f32.mrb[210].mxu1  ;;  %v7915_v14 = vpop.permute.xlu0 %7914 }
0x267e   :  { %v7385_v48 = vpack.c.bf16 %v7371_v29, %v7368_v45  ;;  %v11766_v6 = vpop.f32.mrb[211].mxu1  ;;  %v7941_v45 = vsel %vm689_vm4, %v7913_v8, 0  ;;  %v7944_v29 = vsel %vm689_vm4, %v7915_v14, 0 }
0x2680   :  { %11868 = vmatmul.mubr.msk.bf16.gmra.mrb[248].mxu1 %vm689_vm4, %v7385_v48 }
0x2681   :  { %11871 = vmatprep.mubr.msk.bf16.mxu1 %vm12971_vm1, %v17814_v9 }
0x2683   :  { %v7376_v21 = vpop.f32.mrb[212].mxu1 }
0x2684   :  { %v11769_v34 = vpop.f32.mrb[213].mxu1  ;;  %v7386_v42 = vpack.c.bf16 %v7376_v21, %v7376_v21 }
0x2685   :  { %v7379_v61 = vpop.f32.mrb[214].mxu1 }
0x2686   :  { %v11770_v37 = vpop.f32.mrb[215].mxu1 }
0x2688   :  { %11872 = vmatmul.mubr.msk.bf16.gmra.mrb[252].mxu1 %vm689_vm4, %v7386_v42 }
0x2689   :  { %11915 = vmatprep.mubr.msk.bf16.mxu1 %vm12971_vm1, %v17814_v9 }
0x26c0   :  { %v7679_v41 = vpop.f32.mrb[216].mxu1 }
0x26c1   :  { %v11813_v25 = vpop.f32.mrb[217].mxu1 }
0x26c2   :  { %v7682_v28 = vpop.f32.mrb[218].mxu1 }
0x26c3   :  { %v7717_v7 = vpack.c.bf16 %v7682_v28, %v7679_v41  ;;  %v11814_v11 = vpop.f32.mrb[219].mxu1 }
0x26c5   :  { %11834 = vmatmul.mubr.msk.bf16.vlgmr.msra.gmra.mrb[232].mxu0 %vm689_vm4, %v7717_v7  ;;  %v7899_v7 = vpop.permute.xlu0 %7898 }
0x26c6   :  { %11876 = vmatpush3.bf16.xpose.msra.mxu0 %v7932_v22  ;;  %11837 = vmatprep.mubr.msk.bf16.mxu0 %vm12971_vm1, %v17814_v9 }
0x26c7   :  { %11877 = vmatprep.subr.bf16.mxu0 %v17814_v9 }
0x26c8   :  { %v7687_v4 = vpop.f32.mrb[220].mxu1 }
0x26c9   :  { %v11817_v15 = vpop.f32.mrb[221].mxu1 }
0x26ca   :  { %v7690_v18 = vpop.f32.mrb[222].mxu1 }
0x26cb   :  { %v7718_v51 = vpack.c.bf16 %v7690_v18, %v7687_v4  ;;  %v11818_v56 = vpop.f32.mrb[223].mxu1 }
0x26cd   :  { %11838 = vmatmul.mubr.msk.bf16.gmra.mrb[236].mxu0 %vm689_vm4, %v7718_v51 }
0x26ce   :  { %11878 = vmatpush3.bf16.xpose.msra.mxu0 %v7935_v62  ;;  %11841 = vmatprep.mubr.msk.bf16.mxu0 %vm12971_vm1, %v17814_v9 }
0x26cf   :  { %11879 = vmatprep.subr.bf16.mxu0 %v17814_v9 }
0x26d0   :  { %v7695_v44 = vpop.f32.mrb[224].mxu1 }
0x26d1   :  { %v11821_v23 = vpop.f32.mrb[225].mxu1 }
0x26d2   :  { %v7698_v12 = vpop.f32.mrb[226].mxu1 }
0x26d3   :  { %v7719_v27 = vpack.c.bf16 %v7698_v12, %v7695_v44  ;;  %v11822_v47 = vpop.f32.mrb[227].mxu1 }
0x26d5   :  { %11842 = vmatmul.mubr.msk.bf16.gmra.mrb[240].mxu0 %vm689_vm4, %v7719_v27 }
0x26d6   :  { %11880 = vmatpush3.bf16.xpose.msra.mxu0 %v7938_v1  ;;  %11845 = vmatprep.mubr.msk.bf16.mxu0 %vm12971_vm1, %v17814_v9 }
0x26d7   :  { %11881 = vmatprep.subr.bf16.mxu0 %v17814_v9 }
0x26de   :  { %11882 = vmatpush3.bf16.xpose.msra.mxu0 %v7941_v45 }
0x26df   :  { %11883 = vmatprep.subr.bf16.mxu0 %v17814_v9 }
0x26e6   :  { %11884 = vmatpush3.bf16.xpose.msra.mxu0 %v7944_v29 }
0x26e7   :  { %11935 = vmatprep.subr.bf16.mxu0 %v17814_v9 }
0x26f9   :  { %v7703_v48 = vpop.f32.mrb[228].mxu1 }
0x26fa   :  { %v11825_v6 = vpop.f32.mrb[229].mxu1 }
0x26fb   :  { %v7706_v21 = vpop.f32.mrb[230].mxu1 }
0x26fc   :  { %v7720_v34 = vpack.c.bf16 %v7706_v21, %v7703_v48  ;;  %v11826_v61 = vpop.f32.mrb[231].mxu1 }
0x26fe   :  { %11846 = vmatmul.mubr.msk.bf16.gmra.mrb[244].mxu0 %vm689_vm4, %v7720_v34 }
0x26ff   :  { %11849 = vmatprep.mubr.msk.bf16.mxu0 %vm12971_vm1, %v17814_v9 }
0x2701   :  { %v7711_v42 = vpop.f32.mrb[232].mxu1 }
0x2702   :  { %v11829_v37 = vpop.f32.mrb[233].mxu1  ;;  %v7721_v25 = vpack.c.bf16 %v7711_v42, %v7711_v42 }
0x2703   :  { %v7714_v41 = vpop.f32.mrb[234].mxu1 }
0x2704   :  { %v11830_v28 = vpop.f32.mrb[235].mxu1 }
0x2706   :  { %11850 = vmatmul.mubr.msk.bf16.gmra.mrb[248].mxu0 %vm689_vm4, %v7721_v25 }
0x2707   :  { %11885 = vmatprep.mubr.msk.bf16.mxu0 %vm12971_vm1, %v17814_v9 }
0x270e   :  { %11886 = vmatmul.mubr.msk.bf16.vlgmr.msra.gmra.mrb[252].mxu0 %vm689_vm4, %v16958_v53  ;;  %v7903_v53 = vpop.permute.xlu0 %7902 }
0x270f   :  { %11889 = vmatprep.mubr.msk.bf16.mxu0 %vm12971_vm1, %v17814_v9  ;;  %11936 = vmatpush3.bf16.msra.mxu0 %v16384_v39 }
0x2710   :  { %11987 = vmatprep.subr.bf16.mxu0 %v17814_v9 }
0x2716   :  { %11890 = vmatmul.mubr.msk.bf16.gmra.mrb[0].mxu0 %vm689_vm4, %v7899_v7 }
0x2717   :  { %11893 = vmatprep.mubr.msk.bf16.mxu0 %vm12971_vm1, %v17814_v9 }
0x271e   :  { %11894 = vmatmul.mubr.msk.bf16.gmra.mrb[4].mxu0 %vm689_vm4, %v16960_v46 }
0x271f   :  { %11897 = vmatprep.mubr.msk.bf16.mxu0 %vm12971_vm1, %v17814_v9 }
0x2726   :  { %11898 = vmatmul.mubr.msk.bf16.gmra.mrb[8].mxu0 %vm689_vm4, %v7903_v53 }
0x2727   :  { %11901 = vmatprep.mubr.msk.bf16.mxu0 %vm12971_vm1, %v17814_v9 }
0x272e   :  { %11902 = vmatmul.mubr.msk.bf16.gmra.mrb[12].mxu0 %vm689_vm4, %v16962_v59 }
0x272f   :  { %11937 = vmatprep.mubr.msk.bf16.mxu0 %vm12971_vm1, %v17814_v9 }
0x2739   :  { %v7858_v39 = vpop.f32.mrb[236].mxu1 }
0x273a   :  { %v11857_v11 = vpop.f32.mrb[237].mxu1 }
0x273b   :  { %v7861_v22 = vpop.f32.mrb[238].mxu1 }
0x273c   :  { %v11858_v4 = vpop.f32.mrb[239].mxu1 }
0x2743   :  { %v7866_v46 = vpop.f32.mrb[240].mxu1 }
0x2744   :  { %v11861_v15 = vpop.f32.mrb[241].mxu1 }
0x2745   :  { %v7869_v2 = vpop.f32.mrb[242].mxu1 }
0x2746   :  { %v11862_v18 = vpop.f32.mrb[243].mxu1 }
0x274b   :  { %v7874_v51 = vpop.f32.mrb[244].mxu1 }
0x274c   :  { %v11865_v56 = vpop.f32.mrb[245].mxu1 }
0x274d   :  { %v7877_v62 = vpop.f32.mrb[246].mxu1 }
0x274e   :  { %v11866_v44 = vpop.f32.mrb[247].mxu1 }
0x2753   :  { %v7882_v23 = vpop.f32.mrb[248].mxu1 }
0x2754   :  { %v11869_v13 = vpop.f32.mrb[249].mxu1 }
0x2755   :  { %v7885_v12 = vpop.f32.mrb[250].mxu1 }
0x2756   :  { %v11870_v27 = vpop.f32.mrb[251].mxu1 }
0x275b   :  { %v7890_v59 = vpop.f32.mrb[252].mxu1 }
0x275c   :  { %v11873_v47 = vpop.f32.mrb[253].mxu1 }
0x275d   :  { %v7893_v1 = vpop.f32.mrb[254].mxu1 }
0x275e   :  { %v11874_v8 = vpop.f32.mrb[255].mxu1 }
0x2798   :  { %v7771_v45 = vpop.f32.mrb[232].mxu0 }
0x2799   :  { %v17025_v14 = vadd.f32 %v7858_v39, %v7771_v45  ;;  %v11835_v29 = vpop.f32.mrb[233].mxu0 }
0x279a   :  { %v7774_v48 = vpop.f32.mrb[234].mxu0 }
0x279b   :  { %v17027_v6 = vadd.f32 %v7861_v22, %v7774_v48  ;;  %v11836_v21 = vpop.f32.mrb[235].mxu0 }
0x27a0   :  { %v7779_v34 = vpop.f32.mrb[236].mxu0 }
0x27a1   :  { %v17029_v61 = vadd.f32 %v7866_v46, %v7779_v34  ;;  %v11839_v42 = vpop.f32.mrb[237].mxu0 }
0x27a2   :  { %v7782_v37 = vpop.f32.mrb[238].mxu0 }
0x27a3   :  { %v17031_v41 = vadd.f32 %v7869_v2, %v7782_v37  ;;  %v11840_v25 = vpop.f32.mrb[239].mxu0 }
0x27a8   :  { %v7787_v28 = vpop.f32.mrb[240].mxu0 }
0x27a9   :  { %v17033_v7 = vadd.f32 %v7874_v51, %v7787_v28  ;;  %v11843_v53 = vpop.f32.mrb[241].mxu0 }
0x27aa   :  { %v7790_v11 = vpop.f32.mrb[242].mxu0 }
0x27ab   :  { %v17035_v39 = vadd.f32 %v7877_v62, %v7790_v11  ;;  %v11844_v4 = vpop.f32.mrb[243].mxu0 }
0x27d1   :  { %v7795_v15 = vpop.f32.mrb[244].mxu0 }
0x27d2   :  { %v17037_v22 = vadd.f32 %v7882_v23, %v7795_v15  ;;  %v11847_v18 = vpop.f32.mrb[245].mxu0 }
0x27d3   :  { %v7798_v56 = vpop.f32.mrb[246].mxu0 }
0x27d4   :  { %v17039_v46 = vadd.f32 %v7885_v12, %v7798_v56  ;;  %v11848_v44 = vpop.f32.mrb[247].mxu0 }
0x27d9   :  { %v7803_v13 = vpop.f32.mrb[248].mxu0 }
0x27da   :  { %v17041_v2 = vadd.f32 %v7890_v59, %v7803_v13  ;;  %v11851_v27 = vpop.f32.mrb[249].mxu0 }
0x27db   :  { %v7806_v47 = vpop.f32.mrb[250].mxu0 }
0x27dc   :  { %v11852_v51 = vpop.f32.mrb[251].mxu0 }
0x27e1   :  { %v7980_v1 = vpop.f32.mrb[252].mxu0 }
0x27e2   :  { %v11887_v8 = vpop.f32.mrb[253].mxu0  ;;  %v8018_v62 = vsel %vm792_vm5, %v7980_v1, -inf }
0x27e3   :  { %8019 = vmax.xlane.f32.xlu0 %v8018_v62  ;;  %v7983_v45 = vpop.f32.mrb[254].mxu0 }
0x27e4   :  { %v11888_v29 = vpop.f32.mrb[255].mxu0  ;;  %v8021_v23 = vsel %vm792_vm5, %v7983_v45, -inf }
0x27e5   :  { %8022 = vmax.xlane.f32.xlu1 %v8021_v23 }
0x27e9   :  { %v7988_v48 = vpop.f32.mrb[0].mxu0 }
0x27ea   :  { %v11891_v12 = vpop.f32.mrb[1].mxu0  ;;  %v8024_v21 = vsel %vm792_vm5, %v7988_v48, -inf }
0x27eb   :  { %8025 = vmax.xlane.f32.xlu0 %v8024_v21  ;;  %v7991_v59 = vpop.f32.mrb[2].mxu0 }
0x27ec   :  { %v11892_v34 = vpop.f32.mrb[3].mxu0  ;;  %v8027_v42 = vsel %vm792_vm5, %v7991_v59, -inf }
0x27ef   :  { %8028 = vmax.xlane.f32.xlu0 %v8027_v42 }
0x27f1   :  { %v17047_v37 = vpop.f32.mrb[4].mxu0 }
0x27f2   :  { %v11895_v25 = vpop.f32.mrb[5].mxu0  ;;  %v8030_v8 = vsel %vm792_vm5, %v17047_v37, -inf }
0x27f3   :  { %v7999_v28 = vpop.f32.mrb[6].mxu0 }
0x27f4   :  { %v11896_v53 = vpop.f32.mrb[7].mxu0  ;;  %v8033_v47 = vsel %vm792_vm5, %v7999_v28, -inf }
0x27f6   :  { %8126 = vrot.lane.b32.xlu1 %v15880_v57, %s12980_s28 }
0x27f9   :  { %v17051_v11 = vpop.f32.mrb[8].mxu0 }
0x27fa   :  { %v11899_v4 = vpop.f32.mrb[9].mxu0  ;;  %v8036_v62 = vsel %vm792_vm5, %v17051_v11, -inf }
0x27fb   :  { %v8007_v15 = vpop.f32.mrb[10].mxu0 }
0x27fc   :  { %v11900_v18 = vpop.f32.mrb[11].mxu0  ;;  %v8039_v51 = vsel %vm792_vm5, %v8007_v15, -inf }
0x2801   :  { %v17053_v56 = vpop.f32.mrb[12].mxu0 }
0x2802   :  { %v11903_v44 = vpop.f32.mrb[13].mxu0  ;;  %v8042_v29 = vsel %vm792_vm5, %v17053_v56, -inf }
0x2803   :  { %v8015_v13 = vpop.f32.mrb[14].mxu0 }
0x2804   :  { %v11904_v27 = vpop.f32.mrb[15].mxu0 }
0x2805   :  { %8124 = vrot.lane.b32.xlu0 %v15874_v54, %s12980_s28 }
0x281a   :  { %8034 = vmax.xlane.f32.xlu1 %v8033_v47 }
0x281e   :  { %8040 = vmax.xlane.f32.xlu1 %v8039_v51 }
0x2824   :  { %8031 = vmax.xlane.f32.xlu0 %v8030_v8 }
0x2828   :  { %8037 = vmax.xlane.f32.xlu0 %v8036_v62 }
0x282c   :  { %8043 = vmax.xlane.f32.xlu0 %v8042_v29 }
0x282f   :  { %8128 = vrot.lane.b32.xlu1 %v15886_v60, %s12980_s28 }
0x2842   :  { %8130 = vrot.lane.b32.xlu0 %v16529_v24, %s12980_s28 }
0x2870   :  { %v8020_v23 = vpop.xlane.xlu0 %8019 }
0x2871   :  { %v8045_v12 = vsub.f32 %v7980_v1, %v8020_v23 }
0x2872   :  { %v8023_v21 = vpop.xlane.xlu1 %8022 }
0x2873   :  { %v8054_v34 = vmul.f32 1.442695, %v8045_v12  ;;  %v8046_v42 = vsub.f32 %v7983_v45, %v8023_v21 }
0x2875   :  { %12822 = vpow2.f32 %v8054_v34  ;;  %v8056_v25 = vmul.f32 1.442695, %v8046_v42 }
0x2877   :  { %12824 = vpow2.f32 %v8056_v25 }
0x2878   :  { %v8026_v53 = vpop.xlane.xlu0 %8025 }
0x2879   :  { %v8047_v4 = vsub.f32 %v7988_v48, %v8026_v53  ;;  %v8127_v48 = vpop.permute.xlu1 %8126 }
0x287b   :  { %v8058_v18 = vmul.f32 1.442695, %v8047_v4 }
0x287c   :  { %v8029_v44 = vpop.xlane.xlu0 %8028 }
0x287d   :  { %12826 = vpow2.f32 %v8058_v18  ;;  %v8048_v13 = vsub.f32 %v7991_v59, %v8029_v44 }
0x287f   :  { %v17069_v27 = vpop.eup %12822  ;;  %v8060_v47 = vmul.f32 1.442695, %v8048_v13 }
0x2880   :  { %v8125_v51 = vpop.permute.xlu0 %8124  ;;  %v8072_v8 = vsel %vm792_vm5, %v17069_v27, 0.0 }
0x2881   :  { %v17073_v1 = vpop.eup %12824  ;;  %12828 = vpow2.f32 %v8060_v47  ;;  %11908 = vmatpush3.bf16.msra.mxu1 %v8125_v51  ;;  %8073 = vadd.xlane.f32.xlu1 %v8072_v8 }
0x2882   :  { %v8075_v45 = vsel %vm792_vm5, %v17073_v1, 0.0  ;;  %11909 = vmatprep.subr.bf16.mxu1 %v17814_v9 }
0x2883   :  { %8076 = vadd.xlane.f32.xlu0 %v8075_v45 }
0x2885   :  { %11910 = vmatpush3.bf16.msra.mxu1 %v8127_v48 }
0x2886   :  { %11911 = vmatprep.subr.bf16.mxu1 %v17814_v9 }
0x2887   :  { %v17079_v59 = vpop.eup %12826 }
0x2888   :  { %v8078_v62 = vsel %vm792_vm5, %v17079_v59, 0.0 }
0x2889   :  { %8079 = vadd.xlane.f32.xlu0 %v8078_v62 }
0x288b   :  { %v17083_v29 = vpop.eup %12828 }
0x288c   :  { %v8081_v23 = vsel %vm792_vm5, %v17083_v29, 0.0 }
0x288d   :  { %8082 = vadd.xlane.f32.xlu0 %v8081_v23 }
0x2892   :  { %8337 = vrot.lane.b32.xlu1 %v15866_v58, %s12981_s2 }
0x28a7   :  { %v8035_v12 = vpop.xlane.xlu1 %8034 }
0x28a8   :  { %v8050_v21 = vsub.f32 %v7999_v28, %v8035_v12 }
0x28aa   :  { %v8064_v34 = vmul.f32 1.442695, %v8050_v21 }
0x28ab   :  { %v8041_v42 = vpop.xlane.xlu1 %8040 }
0x28ac   :  { %12830 = vpow2.f32 %v8064_v34  ;;  %v8052_v25 = vsub.f32 %v8007_v15, %v8041_v42 }
0x28ae   :  { %v8068_v53 = vmul.f32 1.442695, %v8052_v25 }
0x28af   :  { %v8129_v4 = vpop.permute.xlu1 %8128 }
0x28b0   :  { %12832 = vpow2.f32 %v8068_v53  ;;  %11912 = vmatpush3.bf16.msra.mxu1 %v8129_v4 }
0x28b1   :  { %v8032_v18 = vpop.xlane.xlu0 %8031  ;;  %11913 = vmatprep.subr.bf16.mxu1 %v17814_v9 }
0x28b2   :  { %v8049_v44 = vsub.f32 %v17047_v37, %v8032_v18 }
0x28b4   :  { %v8062_v13 = vmul.f32 1.442695, %v8049_v44 }
0x28b5   :  { %v8038_v47 = vpop.xlane.xlu0 %8037 }
0x28b6   :  { %v17091_v51 = vpop.eup %12830  ;;  %12834 = vpow2.f32 %v8062_v13  ;;  %v8051_v28 = vsub.f32 %v17051_v11, %v8038_v47 }
0x28b7   :  { %v8087_v8 = vsel %vm792_vm5, %v17091_v51, 0.0 }
0x28b8   :  { %v8066_v15 = vmul.f32 1.442695, %v8051_v28  ;;  %8088 = vadd.xlane.f32.xlu0 %v8087_v8 }
0x28b9   :  { %v8044_v45 = vpop.xlane.xlu0 %8043 }
0x28ba   :  { %v17096_v48 = vpop.eup %12832  ;;  %12836 = vpow2.f32 %v8066_v15  ;;  %v8053_v62 = vsub.f32 %v17053_v56, %v8044_v45 }
0x28bb   :  { %v8093_v37 = vsel %vm792_vm5, %v17096_v48, 0.0 }
0x28bc   :  { %v8070_v23 = vmul.f32 1.442695, %v8053_v62  ;;  %8094 = vadd.xlane.f32.xlu0 %v8093_v37 }
0x28bd   :  { %v8131_v12 = vpop.permute.xlu0 %8130 }
0x28be   :  { %12838 = vpow2.f32 %v8070_v23  ;;  %v8152_v11 = vand.u32 %v8131_v12, %v13600_v3 }
0x28c0   :  { %v12835_v21 = vpop.eup %12834  ;;  %11914 = vmatpush3.bf16.msra.mxu1 %v8152_v11 }
0x28c1   :  { %v8084_v34 = vsel %vm792_vm5, %v12835_v21, 0.0  ;;  %11957 = vmatprep.subr.bf16.mxu1 %v17814_v9 }
0x28c2   :  { %8085 = vadd.xlane.f32.xlu1 %v8084_v34 }
0x28c4   :  { %v12837_v42 = vpop.eup %12836 }
0x28c5   :  { %v8090_v25 = vsel %vm792_vm5, %v12837_v42, 0.0 }
0x28c6   :  { %8091 = vadd.xlane.f32.xlu1 %v8090_v25 }
0x28c8   :  { %v17105_v56 = vpop.eup %12838 }
0x28c9   :  { %v8096_v53 = vsel %vm792_vm5, %v17105_v56, 0.0 }
0x28ca   :  { %8097 = vadd.xlane.f32.xlu0 %v8096_v53 }
0x28d7   :  { %8341 = vrot.lane.b32.xlu1 %v15880_v57, %s12981_s2 }
0x28db   :  { %8343 = vrot.lane.b32.xlu1 %v15886_v60, %s12981_s2 }
0x28df   :  { %8345 = vrot.lane.b32.xlu1 %v16529_v24, %s12981_s2 }
0x28e0   :  { %8339 = vrot.lane.b32.xlu0 %v15874_v54, %s12981_s2 }
0x28e3   :  { %8327 = vrot.lane.b32.xlu1 %v15866_v58, %s12982_s15 }
0x290e   :  { %v8074_v4 = vpop.xlane.xlu1 %8073 }
0x290f   :  { %12840 = vrcp.f32 %v8074_v4 }
0x2910   :  { %v8077_v18 = vpop.xlane.xlu0 %8076 }
0x2911   :  { %12842 = vrcp.f32 %v8077_v18 }
0x2912   :  { %v8338_v45 = vpop.permute.xlu1 %8337 }
0x2913   :  { %v8363_v37 = vsel %vm689_vm4, %v8338_v45, 0 }
0x2916   :  { %v8080_v44 = vpop.xlane.xlu0 %8079 }
0x2917   :  { %12844 = vrcp.f32 %v8080_v44 }
0x2919   :  { %v12841_v13 = vpop.eup %12840 }
0x291a   :  { %v8083_v47 = vpop.xlane.xlu0 %8082  ;;  %v8108_v8 = vmul.f32 %v12841_v13, %v17069_v27 }
0x291b   :  { %v12843_v28 = vpop.eup %12842  ;;  %12846 = vrcp.f32 %v8083_v47 }
0x291c   :  { %v8109_v15 = vmul.f32 %v12843_v28, %v17073_v1 }
0x291e   :  { %v8117_v62 = vpack.c.bf16 %v8109_v15, %v8108_v8 }
0x2920   :  { %11916 = vmatmul.mubr.msk.bf16.vlgmr.msra.gmra.mrb[0].mxu1 %vm792_vm5, %v8117_v62 }
0x2921   :  { %11958 = vmatpush3.bf16.xpose.msra.mxu1 %v8363_v37  ;;  %11919 = vmatprep.mubr.msk.bf16.mxu1 %vm12971_vm1, %v17814_v9  ;;  %v12845_v23 = vpop.eup %12844 }
0x2922   :  { %11959 = vmatprep.subr.bf16.mxu1 %v17814_v9  ;;  %v8110_v11 = vmul.f32 %v12845_v23, %v17079_v59 }
0x2925   :  { %v12847_v12 = vpop.eup %12846 }
0x2926   :  { %v8111_v27 = vmul.f32 %v12847_v12, %v17083_v29 }
0x2928   :  { %v8118_v34 = vpack.c.bf16 %v8111_v27, %v8110_v11 }
0x292a   :  { %11920 = vmatmul.mubr.msk.bf16.gmra.mrb[4].mxu1 %vm792_vm5, %v8118_v34 }
0x292b   :  { %11923 = vmatprep.mubr.msk.bf16.mxu1 %vm12971_vm1, %v17814_v9 }
0x2945   :  { %v8089_v1 = vpop.xlane.xlu0 %8088 }
0x2946   :  { %12848 = vrcp.f32 %v8089_v1 }
0x2949   :  { %v8095_v53 = vpop.xlane.xlu0 %8094 }
0x294f   :  { %v8086_v25 = vpop.xlane.xlu1 %8085 }
0x2950   :  { %12850 = vrcp.f32 %v8086_v25  ;;  %v12849_v44 = vpop.eup %12848 }
0x2951   :  { %v8113_v59 = vmul.f32 %v12849_v44, %v17091_v51 }
0x2953   :  { %v8092_v4 = vpop.xlane.xlu1 %8091 }
0x2954   :  { %12852 = vrcp.f32 %v8092_v4 }
0x2955   :  { %12854 = vrcp.f32 %v8095_v53 }
0x2957   :  { %v8098_v18 = vpop.xlane.xlu0 %8097  ;;  %v8342_v37 = vpop.permute.xlu1 %8341 }
0x2958   :  { %12856 = vrcp.f32 %v8098_v18 }
0x295a   :  { %v12851_v13 = vpop.eup %12850 }
0x295b   :  { %v8112_v29 = vmul.f32 %v12851_v13, %v12835_v21  ;;  %v8340_v47 = vpop.permute.xlu0 %8339  ;;  %v8369_v21 = vsel %vm689_vm4, %v8342_v37, 0  ;;  %v8344_v27 = vpop.permute.xlu1 %8343 }
0x295c   :  { %v8366_v28 = vsel %vm689_vm4, %v8340_v47, 0 }
0x295d   :  { %v8119_v8 = vpack.c.bf16 %v8113_v59, %v8112_v29  ;;  %11960 = vmatpush3.bf16.xpose.msra.mxu1 %v8366_v28 }
0x295e   :  { %v12853_v15 = vpop.eup %12852  ;;  %11961 = vmatprep.subr.bf16.mxu1 %v17814_v9 }
0x295f   :  { %11924 = vmatmul.mubr.msk.bf16.gmra.mrb[8].mxu1 %vm792_vm5, %v8119_v8  ;;  %v12855_v45 = vpop.eup %12854  ;;  %v8114_v62 = vmul.f32 %v12853_v15, %v12837_v42  ;;  %v8372_v42 = vsel %vm689_vm4, %v8344_v27, 0 }
0x2960   :  { %11927 = vmatprep.mubr.msk.bf16.mxu1 %vm12971_vm1, %v17814_v9  ;;  %v8115_v51 = vmul.f32 %v12855_v45, %v17096_v48  ;;  %v8346_v48 = vpop.permute.xlu1 %8345 }
0x2961   :  { %v8375_v1 = vsel %vm689_vm4, %v8346_v48, 0 }
0x2962   :  { %v8120_v23 = vpack.c.bf16 %v8115_v51, %v8114_v62  ;;  %v12857_v12 = vpop.eup %12856 }
0x2963   :  { %v8116_v11 = vmul.f32 %v12857_v12, %v17105_v56 }
0x2964   :  { %v8328_v25 = vpop.permute.xlu1 %8327 }
0x2965   :  { %11962 = vmatpush3.bf16.xpose.msra.mxu1 %v8369_v21  ;;  %v8121_v34 = vpack.c.bf16 %v8116_v11, %v8116_v11 }
0x2966   :  { %11963 = vmatprep.subr.bf16.mxu1 %v17814_v9 }
0x2967   :  { %11928 = vmatmul.mubr.msk.bf16.gmra.mrb[12].mxu1 %vm792_vm5, %v8120_v23 }
0x2968   :  { %11931 = vmatprep.mubr.msk.bf16.mxu1 %vm12971_vm1, %v17814_v9 }
0x296d   :  { %11964 = vmatpush3.bf16.xpose.msra.mxu1 %v8372_v42 }
0x296e   :  { %11965 = vmatprep.subr.bf16.mxu1 %v17814_v9 }
0x296f   :  { %11932 = vmatmul.mubr.msk.bf16.gmra.mrb[16].mxu1 %vm792_vm5, %v8121_v34 }
0x2970   :  { %11967 = vmatprep.mubr.msk.bf16.mxu1 %vm12971_vm1, %v17814_v9 }
0x2975   :  { %11966 = vmatpush3.bf16.xpose.msra.mxu1 %v8375_v1 }
0x2976   :  { %12017 = vmatprep.subr.bf16.mxu1 %v17814_v9 }
0x297c   :  { %11968 = vmatmul.mubr.msk.bf16.vlgmr.msra.gmra.mrb[20].mxu1 %vm689_vm4, %v8328_v25 }
0x297d   :  { %11971 = vmatprep.mubr.msk.bf16.mxu1 %vm12971_vm1, %v17814_v9  ;;  %12018 = vmatpush3.bf16.msra.mxu1 %v16602_v55 }
0x297e   :  { %12079 = vmatprep.subr.bf16.mxu1 %v17814_v9 }
0x29f3   :  { %v8188_v56 = vpop.f32.mrb[0].mxu1 }
0x29f4   :  { %v11917_v53 = vpop.f32.mrb[1].mxu1 }
0x29f5   :  { %v8191_v4 = vpop.f32.mrb[2].mxu1 }
0x29f6   :  { %v8226_v18 = vpack.c.bf16 %v8191_v4, %v8188_v56  ;;  %v11918_v44 = vpop.f32.mrb[3].mxu1 }
0x29f8   :  { %11938 = vmatmul.mubr.msk.bf16.vlgmr.msra.gmra.mrb[16].mxu0 %vm689_vm4, %v8226_v18 }
0x29f9   :  { %11941 = vmatprep.mubr.msk.bf16.mxu0 %vm12971_vm1, %v17814_v9 }
0x29fd   :  { %v8196_v13 = vpop.f32.mrb[4].mxu1 }
0x29fe   :  { %v11921_v59 = vpop.f32.mrb[5].mxu1 }
0x29ff   :  { %v8199_v29 = vpop.f32.mrb[6].mxu1 }
0x2a00   :  { %v8227_v47 = vpack.c.bf16 %v8199_v29, %v8196_v13  ;;  %v11922_v28 = vpop.f32.mrb[7].mxu1 }
0x2a02   :  { %11942 = vmatmul.mubr.msk.bf16.gmra.mrb[20].mxu0 %vm689_vm4, %v8227_v47 }
0x2a03   :  { %11945 = vmatprep.mubr.msk.bf16.mxu0 %vm12971_vm1, %v17814_v9 }
0x2a32   :  { %v8204_v55 = vpop.f32.mrb[8].mxu1 }
0x2a33   :  { %v11925_v8 = vpop.f32.mrb[9].mxu1 }
0x2a34   :  { %v8207_v15 = vpop.f32.mrb[10].mxu1 }
0x2a35   :  { %v8228_v45 = vpack.c.bf16 %v8207_v15, %v8204_v55  ;;  %v11926_v62 = vpop.f32.mrb[11].mxu1 }
0x2a37   :  { %11946 = vmatmul.mubr.msk.bf16.gmra.mrb[24].mxu0 %vm689_vm4, %v8228_v45 }
0x2a38   :  { %11949 = vmatprep.mubr.msk.bf16.mxu0 %vm12971_vm1, %v17814_v9 }
0x2a3a   :  { %v8212_v37 = vpop.f32.mrb[12].mxu1 }
0x2a3b   :  { %v11929_v51 = vpop.f32.mrb[13].mxu1 }
0x2a3c   :  { %v8215_v21 = vpop.f32.mrb[14].mxu1 }
0x2a3d   :  { %v8229_v23 = vpack.c.bf16 %v8215_v21, %v8212_v37  ;;  %v11930_v12 = vpop.f32.mrb[15].mxu1 }
0x2a3f   :  { %11950 = vmatmul.mubr.msk.bf16.gmra.mrb[28].mxu0 %vm689_vm4, %v8229_v23 }
0x2a40   :  { %11953 = vmatprep.mubr.msk.bf16.mxu0 %vm12971_vm1, %v17814_v9 }
0x2a42   :  { %v8220_v11 = vpop.f32.mrb[16].mxu1 }
0x2a43   :  { %v11933_v27 = vpop.f32.mrb[17].mxu1  ;;  %v8230_v34 = vpack.c.bf16 %v8220_v11, %v8220_v11 }
0x2a44   :  { %v8223_v42 = vpop.f32.mrb[18].mxu1 }
0x2a45   :  { %v11934_v48 = vpop.f32.mrb[19].mxu1 }
0x2a47   :  { %11954 = vmatmul.mubr.msk.bf16.gmra.mrb[32].mxu0 %vm689_vm4, %v8230_v34 }
0x2a48   :  { %11997 = vmatprep.mubr.msk.bf16.mxu0 %vm12971_vm1, %v17814_v9 }
0x2a4f   :  { %v8411_v1 = vpop.f32.mrb[20].mxu1 }
0x2a50   :  { %v11969_v25 = vpop.f32.mrb[21].mxu1  ;;  %v8449_v56 = vsel %vm792_vm5, %v8411_v1, -inf }
0x2a51   :  { %8450 = vmax.xlane.f32.xlu1 %v8449_v56  ;;  %v8414_v53 = vpop.f32.mrb[22].mxu1 }
0x2a52   :  { %v11970_v4 = vpop.f32.mrb[23].mxu1  ;;  %v8452_v18 = vsel %vm792_vm5, %v8414_v53, -inf }
0x2a53   :  { %8453 = vmax.xlane.f32.xlu0 %v8452_v18 }
0x2a62   :  { %8329 = vrot.lane.b32.xlu1 %v15874_v54, %s12982_s15 }
0x2a66   :  { %8555 = vrot.lane.b32.xlu1 %v15874_v54, %s12983_s16 }
0x2a69   :  { %8553 = vrot.lane.b32.xlu0 %v15866_v58, %s12983_s16 }
0x2a6a   :  { %8331 = vrot.lane.b32.xlu1 %v15880_v57, %s12982_s15 }
0x2a6d   :  { %8559 = vrot.lane.b32.xlu0 %v15886_v60, %s12983_s16 }
0x2a6e   :  { %8557 = vrot.lane.b32.xlu1 %v15880_v57, %s12983_s16 }
0x2a72   :  { %8333 = vrot.lane.b32.xlu1 %v15886_v60, %s12982_s15 }
0x2a76   :  { %8335 = vrot.lane.b32.xlu1 %v16529_v24, %s12982_s15 }
0x2acb   :  { %v8280_v44 = vpop.f32.mrb[16].mxu0 }
0x2acc   :  { %v17190_v54 = vadd.f32 %v8280_v44, %v17025_v14  ;;  %v11939_v58 = vpop.f32.mrb[17].mxu0 }
0x2acd   :  { %v8283_v13 = vpop.f32.mrb[18].mxu0 }
0x2ace   :  { %v17193_v59 = vadd.f32 %v8283_v13, %v17027_v6  ;;  %v11940_v29 = vpop.f32.mrb[19].mxu0 }
0x2ad5   :  { %v8288_v47 = vpop.f32.mrb[20].mxu0 }
0x2ad6   :  { %v17196_v28 = vadd.f32 %v8288_v47, %v17029_v61  ;;  %v11943_v57 = vpop.f32.mrb[21].mxu0 }
0x2ad7   :  { %v8291_v55 = vpop.f32.mrb[22].mxu0 }
0x2ad8   :  { %v17199_v60 = vadd.f32 %v8291_v55, %v17031_v41  ;;  %v11944_v8 = vpop.f32.mrb[23].mxu0 }
0x2ade   :  { %v8451_v15 = vpop.xlane.xlu1 %8450 }
0x2adf   :  { %v8476_v45 = vsub.f32 %v8411_v1, %v8451_v15 }
0x2ae0   :  { %v8454_v14 = vpop.xlane.xlu0 %8453 }
0x2ae1   :  { %v8485_v62 = vmul.f32 1.442695, %v8476_v45  ;;  %v8477_v37 = vsub.f32 %v8414_v53, %v8454_v14 }
0x2ae2   :  { %v8330_v51 = vpop.permute.xlu1 %8329 }
0x2ae3   :  { %12858 = vpow2.f32 %v8485_v62  ;;  %v8487_v6 = vmul.f32 1.442695, %v8477_v37  ;;  %11972 = vmatmul.mubr.msk.bf16.gmra.mrb[24].mxu1 %vm689_vm4, %v8330_v51 }
0x2ae4   :  { %v8554_v21 = vpop.permute.xlu0 %8553  ;;  %11975 = vmatprep.mubr.msk.bf16.mxu1 %vm12971_vm1, %v17814_v9 }
0x2ae5   :  { %12860 = vpow2.f32 %v8487_v6  ;;  %11988 = vmatpush3.bf16.msra.mxu0 %v8554_v21 }
0x2ae6   :  { %v8556_v61 = vpop.permute.xlu1 %8555  ;;  %11989 = vmatprep.subr.bf16.mxu0 %v17814_v9 }
0x2ae8   :  { %v8560_v48 = vpop.permute.xlu0 %8559 }
0x2ae9   :  { %11990 = vmatpush3.bf16.msra.mxu0 %v8556_v61 }
0x2aea   :  { %v8332_v41 = vpop.permute.xlu1 %8331  ;;  %11991 = vmatprep.subr.bf16.mxu0 %v17814_v9 }
0x2aeb   :  { %11976 = vmatmul.mubr.msk.bf16.gmra.mrb[28].mxu1 %vm689_vm4, %v8332_v41 }
0x2aec   :  { %11979 = vmatprep.mubr.msk.bf16.mxu1 %vm12971_vm1, %v17814_v9 }
0x2aed   :  { %v12859_v23 = vpop.eup %12858 }
0x2aee   :  { %v8558_v12 = vpop.permute.xlu1 %8557  ;;  %v8503_v11 = vsel %vm792_vm5, %v12859_v23, 0.0 }
0x2aef   :  { %v12861_v27 = vpop.eup %12860  ;;  %8504 = vadd.xlane.f32.xlu0 %v8503_v11  ;;  %11992 = vmatpush3.bf16.msra.mxu0 %v8558_v12 }
0x2af0   :  { %11993 = vmatprep.subr.bf16.mxu0 %v17814_v9  ;;  %v8506_v34 = vsel %vm792_vm5, %v12861_v27, 0.0 }
0x2af2   :  { %v8334_v42 = vpop.permute.xlu1 %8333 }
0x2af3   :  { %11980 = vmatmul.mubr.msk.bf16.gmra.mrb[32].mxu1 %vm689_vm4, %v8334_v42  ;;  %8507 = vadd.xlane.f32.xlu0 %v8506_v34 }
0x2af4   :  { %11994 = vmatpush3.bf16.msra.mxu0 %v8560_v48  ;;  %11983 = vmatprep.mubr.msk.bf16.mxu1 %vm12971_vm1, %v17814_v9 }
0x2af5   :  { %11995 = vmatprep.subr.bf16.mxu0 %v17814_v9 }
0x2af6   :  { %v8336_v1 = vpop.permute.xlu1 %8335 }
0x2afb   :  { %11984 = vmatmul.mubr.msk.bf16.gmra.mrb[36].mxu1 %vm689_vm4, %v8336_v1 }
0x2afc   :  { %12019 = vmatprep.mubr.msk.bf16.mxu1 %vm12971_vm1, %v17814_v9 }
0x2b09   :  { %8561 = vrot.lane.b32.xlu0 %v16529_v24, %s12983_s16 }
0x2b0a   :  { %v8296_v25 = vpop.f32.mrb[24].mxu0 }
0x2b0b   :  { %v17222_v56 = vadd.f32 %v8296_v25, %v17033_v7  ;;  %v11947_v53 = vpop.f32.mrb[25].mxu0 }
0x2b0c   :  { %v8299_v4 = vpop.f32.mrb[26].mxu0 }
0x2b0d   :  { %v17225_v18 = vadd.f32 %v8299_v4, %v17035_v39  ;;  %v11948_v44 = vpop.f32.mrb[27].mxu0 }
0x2b12   :  { %v8304_v58 = vpop.f32.mrb[28].mxu0 }
0x2b13   :  { %v17228_v13 = vadd.f32 %v8304_v58, %v17037_v22  ;;  %v11951_v29 = vpop.f32.mrb[29].mxu0 }
0x2b14   :  { %v8307_v47 = vpop.f32.mrb[30].mxu0 }
0x2b15   :  { %v17231_v57 = vadd.f32 %v8307_v47, %v17039_v46  ;;  %v11952_v24 = vpop.f32.mrb[31].mxu0 }
0x2b1a   :  { %v8312_v55 = vpop.f32.mrb[32].mxu0 }
0x2b1b   :  { %v17234_v7 = vadd.f32 %v8312_v55, %v17041_v2  ;;  %v11955_v8 = vpop.f32.mrb[33].mxu0 }
0x2b1c   :  { %v8315_v15 = vpop.f32.mrb[34].mxu0 }
0x2b1d   :  { %v11956_v45 = vpop.f32.mrb[35].mxu0 }
0x2b7c   :  { %v8505_v39 = vpop.xlane.xlu0 %8504 }
0x2b7d   :  { %12862 = vrcp.f32 %v8505_v39 }
0x2b80   :  { %v8508_v14 = vpop.xlane.xlu0 %8507 }
0x2b81   :  { %12864 = vrcp.f32 %v8508_v14 }
0x2b84   :  { %v8562_v62 = vpop.permute.xlu0 %8561 }
0x2b85   :  { %v8583_v22 = vand.u32 %v8562_v62, %v13600_v3 }
0x2b87   :  { %11996 = vmatpush3.bf16.msra.mxu0 %v8583_v22  ;;  %v12863_v46 = vpop.eup %12862 }
0x2b88   :  { %12039 = vmatprep.subr.bf16.mxu0 %v17814_v9  ;;  %v8539_v51 = vmul.f32 %v12863_v46, %v12859_v23 }
0x2b8b   :  { %v12865_v37 = vpop.eup %12864 }
0x2b8c   :  { %v8540_v6 = vmul.f32 %v12865_v37, %v12861_v27 }
0x2b8e   :  { %v8548_v21 = vpack.c.bf16 %v8540_v6, %v8539_v51 }
0x2b90   :  { %11998 = vmatmul.mubr.msk.bf16.vlgmr.msra.gmra.mrb[36].mxu0 %vm792_vm5, %v8548_v21 }
0x2b91   :  { %12001 = vmatprep.mubr.msk.bf16.mxu0 %vm12971_vm1, %v17814_v9 }
0x2bb6   :  { %v8419_v2 = vpop.f32.mrb[24].mxu1 }
0x2bb7   :  { %v11973_v61 = vpop.f32.mrb[25].mxu1  ;;  %v8455_v41 = vsel %vm792_vm5, %v8419_v2, -inf }
0x2bb8   :  { %8456 = vmax.xlane.f32.xlu0 %v8455_v41  ;;  %v8422_v12 = vpop.f32.mrb[26].mxu1 }
0x2bb9   :  { %v11974_v3 = vpop.f32.mrb[27].mxu1  ;;  %v8458_v11 = vsel %vm792_vm5, %v8422_v12, -inf }
0x2bba   :  { %8459 = vmax.xlane.f32.xlu1 %v8458_v11 }
0x2bbe   :  { %v8427_v42 = vpop.f32.mrb[28].mxu1 }
0x2bbf   :  { %v11977_v34 = vpop.f32.mrb[29].mxu1  ;;  %v8461_v23 = vsel %vm792_vm5, %v8427_v42, -inf }
0x2bc0   :  { %8462 = vmax.xlane.f32.xlu0 %v8461_v23  ;;  %v8430_v27 = vpop.f32.mrb[30].mxu1 }
0x2bc1   :  { %v11978_v48 = vpop.f32.mrb[31].mxu1  ;;  %v8464_v1 = vsel %vm792_vm5, %v8430_v27, -inf }
0x2bc4   :  { %8465 = vmax.xlane.f32.xlu0 %v8464_v1 }
0x2bc6   :  { %v8435_v25 = vpop.f32.mrb[32].mxu1 }
0x2bc7   :  { %v11981_v53 = vpop.f32.mrb[33].mxu1  ;;  %v8467_v4 = vsel %vm792_vm5, %v8435_v25, -inf }
0x2bc8   :  { %8468 = vmax.xlane.f32.xlu0 %v8467_v4  ;;  %v8438_v44 = vpop.f32.mrb[34].mxu1 }
0x2bc9   :  { %v11982_v58 = vpop.f32.mrb[35].mxu1  ;;  %v8470_v29 = vsel %vm792_vm5, %v8438_v44, -inf }
0x2bca   :  { %8471 = vmax.xlane.f32.xlu1 %v8470_v29 }
0x2bce   :  { %v8443_v47 = vpop.f32.mrb[36].mxu1 }
0x2bcf   :  { %v11985_v24 = vpop.f32.mrb[37].mxu1  ;;  %v8473_v55 = vsel %vm792_vm5, %v8443_v47, -inf }
0x2bd0   :  { %8474 = vmax.xlane.f32.xlu0 %v8473_v55  ;;  %v8446_v8 = vpop.f32.mrb[38].mxu1 }
0x2bd1   :  { %v11986_v15 = vpop.f32.mrb[39].mxu1 }
0x2c45   :  { %v8457_v45 = vpop.xlane.xlu0 %8456 }
0x2c46   :  { %v8478_v39 = vsub.f32 %v8419_v2, %v8457_v45  ;;  %v17271_v45 = vld [vmem:[%s17788_s8 + $0x9] ss:$0 sm:$0xff] }
0x2c47   :  { %v8460_v14 = vpop.xlane.xlu1 %8459 }
0x2c48   :  { %v8489_v62 = vmul.f32 1.442695, %v8478_v39  ;;  %v8479_v22 = vsub.f32 %v8422_v12, %v8460_v14 }
0x2c4a   :  { %12866 = vpow2.f32 %v8489_v62  ;;  %v8491_v46 = vmul.f32 1.442695, %v8479_v22 }
0x2c4c   :  { %12868 = vpow2.f32 %v8491_v46 }
0x2c4d   :  { %v8463_v37 = vpop.xlane.xlu0 %8462 }
0x2c4e   :  { %v8480_v51 = vsub.f32 %v8427_v42, %v8463_v37 }
0x2c50   :  { %v8493_v6 = vmul.f32 1.442695, %v8480_v51  ;;  %v8759_v51 = vadd.f32 %v16755_v19, %v15385_v49 }
0x2c51   :  { %v8466_v21 = vpop.xlane.xlu0 %8465 }
0x2c52   :  { %12870 = vpow2.f32 %v8493_v6  ;;  %v8481_v61 = vsub.f32 %v8430_v27, %v8466_v21  ;;  %v8762_v6 = vadd.f32 %v16806_v26, %v15405_v0  ;;  %v17303_v19 = vadd.f32 %v17271_v45, %v8759_v51 }
0x2c53   :  { %v8764_v0 = vadd.f32 %v16816_v43, %v15417_v38  ;;  %v8766_v38 = vadd.f32 %v16826_v52, %v15465_v16 }
0x2c54   :  { %v17248_v41 = vpop.eup %12866  ;;  %v8495_v3 = vmul.f32 1.442695, %v8481_v61  ;;  %v8761_v61 = vadd.f32 %v16761_v35, %v15397_v5  ;;  %v8763_v5 = vadd.f32 %v16811_v40, %v15409_v30  ;;  %v8804_v35 = vsel %vm224_vm3, %v17303_v19, 0.0 }
0x2c55   :  { %v8469_v11 = vpop.xlane.xlu0 %8468  ;;  %v8509_v34 = vsel %vm792_vm5, %v17248_v41, 0.0  ;;  %v8765_v30 = vadd.f32 %v16821_v33, %v15421_v17  ;;  %v17336_v52 = vadd.f32 %v17271_v45, %v8766_v38 }
0x2c56   :  { %v17252_v2 = vpop.eup %12868  ;;  %12872 = vpow2.f32 %v8495_v3  ;;  %v8482_v12 = vsub.f32 %v8435_v25, %v8469_v11  ;;  %8510 = vadd.xlane.f32.xlu1 %v8509_v34  ;;  %v17310_v3 = vadd.f32 %v17271_v45, %v8762_v6  ;;  %v17317_v11 = vadd.f32 %v17271_v45, %v8761_v61 }
0x2c57   :  { %v8472_v23 = vpop.xlane.xlu1 %8471  ;;  %v8512_v42 = vsel %vm792_vm5, %v17252_v2, 0.0  ;;  %v17324_v34 = vadd.f32 %v17271_v45, %v8764_v0  ;;  %v8825_v17 = vsel %vm224_vm3, %v17336_v52, 0.0 }
0x2c58   :  { %v8497_v48 = vmul.f32 1.442695, %v8482_v12  ;;  %v8483_v1 = vsub.f32 %v8438_v44, %v8472_v23  ;;  %8513 = vadd.xlane.f32.xlu0 %v8512_v42  ;;  %v8758_v44 = vadd.f32 %v16752_v10, %v15381_v20  ;;  %v8760_v10 = vadd.f32 %v16758_v63, %v15393_v50 }
0x2c59   :  { %v8813_v43 = vsel %vm224_vm3, %v17310_v3, 0.0  ;;  %v8810_v40 = vsel %vm224_vm3, %v17317_v11, 0.0  ;;  %v17331_v12 = vadd.f32 %v17271_v45, %v8763_v5  ;;  %v8819_v16 = vsel %vm224_vm3, %v17324_v34, 0.0 }
0x2c5a   :  { %12874 = vpow2.f32 %v8497_v48  ;;  %v8499_v27 = vmul.f32 1.442695, %v8483_v1  ;;  %v17278_v20 = vadd.f32 %v17271_v45, %v8758_v44  ;;  %v17294_v50 = vadd.f32 %v17271_v45, %v8760_v10 }
0x2c5b   :  { %v8816_v23 = vsel %vm224_vm3, %v17331_v12, 0.0  ;;  %v17341_v42 = vadd.f32 %v17271_v45, %v8765_v30 }
0x2c5c   :  { %v17256_v53 = vpop.eup %12870  ;;  %12876 = vpow2.f32 %v8499_v27  ;;  %v8801_v21 = vsel %vm224_vm3, %v17278_v20, 0.0  ;;  %v8807_v26 = vsel %vm224_vm3, %v17294_v50, 0.0 }
0x2c5d   :  { %v8475_v4 = vpop.xlane.xlu0 %8474  ;;  %v8515_v58 = vsel %vm792_vm5, %v17256_v53, 0.0  ;;  %v8822_v33 = vsel %vm224_vm3, %v17341_v42, 0.0 }
0x2c5e   :  { %v8484_v29 = vsub.f32 %v8443_v47, %v8475_v4  ;;  %8516 = vadd.xlane.f32.xlu1 %v8515_v58 }
0x2c60   :  { %v17260_v25 = vpop.eup %12872  ;;  %v8501_v24 = vmul.f32 1.442695, %v8484_v29 }
0x2c61   :  { %v8518_v55 = vsel %vm792_vm5, %v17260_v25, 0.0 }
0x2c62   :  { %12878 = vpow2.f32 %v8501_v24  ;;  %8519 = vadd.xlane.f32.xlu0 %v8518_v55 }
0x2c63   :  { %v8619_v8 = vpop.f32.mrb[36].mxu0 }
0x2c64   :  { %v17266_v15 = vpop.eup %12874  ;;  %v11999_v47 = vpop.f32.mrb[37].mxu0 }
0x2c65   :  { %v8622_v39 = vpop.f32.mrb[38].mxu0  ;;  %v8521_v14 = vsel %vm792_vm5, %v17266_v15, 0.0 }
0x2c66   :  { %v17275_v62 = vpop.eup %12876  ;;  %v8657_v22 = vpack.c.bf16 %v8622_v39, %v8619_v8  ;;  %8522 = vadd.xlane.f32.xlu1 %v8521_v14  ;;  %v12000_v46 = vpop.f32.mrb[39].mxu0 }
0x2c67   :  { %v8524_v37 = vsel %vm792_vm5, %v17275_v62, 0.0 }
0x2c68   :  { %8525 = vadd.xlane.f32.xlu0 %v8524_v37  ;;  %12020 = vmatmul.mubr.msk.bf16.vlgmr.msra.gmra.mrb[40].mxu1 %vm689_vm4, %v8657_v22 }
0x2c69   :  { %12023 = vmatprep.mubr.msk.bf16.mxu1 %vm12971_vm1, %v17814_v9 }
0x2c6c   :  { %v17296_v63 = vpop.eup %12878  ;;  %8802 = vadd.xlane.f32.xlu0 %v8801_v21 }
0x2c6d   :  { %v8527_v49 = vsel %vm792_vm5, %v17296_v63, 0.0 }
0x2c6e   :  { %8528 = vadd.xlane.f32.xlu1 %v8527_v49 }
0x2c70   :  { %8808 = vadd.xlane.f32.xlu0 %v8807_v26 }
0x2c72   :  { %8805 = vadd.xlane.f32.xlu1 %v8804_v35 }
0x2c74   :  { %8814 = vadd.xlane.f32.xlu0 %v8813_v43 }
0x2c76   :  { %8811 = vadd.xlane.f32.xlu1 %v8810_v40 }
0x2c78   :  { %8820 = vadd.xlane.f32.xlu0 %v8819_v16 }
0x2c7a   :  { %8817 = vadd.xlane.f32.xlu1 %v8816_v23 }
0x2c7c   :  { %8826 = vadd.xlane.f32.xlu0 %v8825_v17 }
0x2c7e   :  { %8823 = vadd.xlane.f32.xlu1 %v8822_v33 }
0x2ce3   :  { %v8511_v48 = vpop.xlane.xlu1 %8510 }
0x2ce4   :  { %12880 = vrcp.f32 %v8511_v48 }
0x2ce5   :  { %v8514_v1 = vpop.xlane.xlu0 %8513 }
0x2ce6   :  { %12882 = vrcp.f32 %v8514_v1 }
0x2ceb   :  { %v8517_v27 = vpop.xlane.xlu1 %8516 }
0x2cec   :  { %12884 = vrcp.f32 %v8517_v27 }
0x2cee   :  { %v12881_v4 = vpop.eup %12880 }
0x2cef   :  { %v8520_v58 = vpop.xlane.xlu0 %8519  ;;  %v8541_v24 = vmul.f32 %v12881_v4, %v17248_v41 }
0x2cf0   :  { %v12883_v29 = vpop.eup %12882  ;;  %12886 = vrcp.f32 %v8520_v58 }
0x2cf1   :  { %v8542_v55 = vmul.f32 %v12883_v29, %v17252_v2 }
0x2cf3   :  { %v8549_v44 = vpack.c.bf16 %v8542_v55, %v8541_v24  ;;  %v8523_v8 = vpop.xlane.xlu1 %8522 }
0x2cf4   :  { %12888 = vrcp.f32 %v8523_v8 }
0x2cf5   :  { %12002 = vmatmul.mubr.msk.bf16.gmra.mrb[40].mxu0 %vm792_vm5, %v8549_v44  ;;  %v8526_v47 = vpop.xlane.xlu0 %8525 }
0x2cf6   :  { %12890 = vrcp.f32 %v8526_v47  ;;  %12005 = vmatprep.mubr.msk.bf16.mxu0 %vm12971_vm1, %v17814_v9  ;;  %v12885_v39 = vpop.eup %12884 }
0x2cf7   :  { %v8543_v10 = vmul.f32 %v12885_v39, %v17256_v53 }
0x2cf9   :  { %v8803_v14 = vpop.xlane.xlu0 %8802 }
0x2cfa   :  { %v12887_v22 = vpop.eup %12886  ;;  %v8855_v46 = vmul.f32 0.03125, %v8803_v14 }
0x2cfb   :  { %v8544_v41 = vmul.f32 %v12887_v22, %v17260_v25  ;;  %v8529_v37 = vpop.xlane.xlu1 %8528 }
0x2cfc   :  { %v17355_v2 = vsub.f32 %v17278_v20, %v8855_v46  ;;  %12892 = vrcp.f32 %v8529_v37 }
0x2cfd   :  { %v8550_v51 = vpack.c.bf16 %v8544_v41, %v8543_v10  ;;  %v8809_v6 = vpop.xlane.xlu0 %8808 }
0x2cfe   :  { %v8857_v21 = vmul.f32 0.03125, %v8809_v6  ;;  %v8891_v61 = vmul.f32 %v17355_v2, %v17355_v2  ;;  %v12889_v49 = vpop.eup %12888 }
0x2cff   :  { %12006 = vmatmul.mubr.msk.bf16.gmra.mrb[44].mxu0 %vm792_vm5, %v8550_v51  ;;  %v8545_v43 = vmul.f32 %v12889_v49, %v17266_v15  ;;  %v8806_v24 = vpop.xlane.xlu1 %8805 }
0x2d00   :  { %v12891_v0 = vpop.eup %12890  ;;  %v17361_v26 = vsub.f32 %v17294_v50, %v8857_v21  ;;  %v8909_v53 = vsel %vm224_vm3, %v8891_v61, 0.0  ;;  %12009 = vmatprep.mubr.msk.bf16.mxu0 %vm12971_vm1, %v17814_v9  ;;  %v8856_v44 = vmul.f32 0.03125, %v8806_v24 }
0x2d01   :  { %v8546_v25 = vmul.f32 %v12891_v0, %v17275_v62  ;;  %8910 = vadd.xlane.f32.xlu0 %v8909_v53  ;;  %v8815_v5 = vpop.xlane.xlu0 %8814 }
0x2d02   :  { %v8859_v35 = vmul.f32 0.03125, %v8815_v5  ;;  %v8893_v38 = vmul.f32 %v17361_v26, %v17361_v26  ;;  %v17398_v39 = vsub.f32 %v17303_v19, %v8856_v44 }
0x2d03   :  { %v8551_v40 = vpack.c.bf16 %v8546_v25, %v8545_v43  ;;  %v8812_v55 = vpop.xlane.xlu1 %8811 }
0x2d04   :  { %v17371_v30 = vsub.f32 %v17310_v3, %v8859_v35  ;;  %v8915_v50 = vsel %vm224_vm3, %v8893_v38, 0.0  ;;  %v8858_v46 = vmul.f32 0.03125, %v8812_v55 }
0x2d05   :  { %8916 = vadd.xlane.f32.xlu0 %v8915_v50  ;;  %v8821_v16 = vpop.xlane.xlu0 %8820  ;;  %v12165_v50 = vld [vmem:[%s17790_s5 + $0x18] sm:$0xff]  }
0x2d06   :  { %v12893_v23 = vpop.eup %12892  ;;  %v8861_v17 = vmul.f32 0.03125, %v8821_v16  ;;  %v8895_v62 = vmul.f32 %v17371_v30, %v17371_v30  ;;  %v17409_v21 = vsub.f32 %v17317_v11, %v8858_v46 }
0x2d07   :  { %12010 = vmatmul.mubr.msk.bf16.gmra.mrb[48].mxu0 %vm792_vm5, %v8551_v40  ;;  %v8547_v3 = vmul.f32 %v12893_v23, %v17296_v63  ;;  %v8818_v14 = vpop.xlane.xlu1 %8817 }
0x2d08   :  { %v17378_v33 = vsub.f32 %v17324_v34, %v8861_v17  ;;  %v8921_v15 = vsel %vm224_vm3, %v8895_v62, 0.0  ;;  %12013 = vmatprep.mubr.msk.bf16.mxu0 %vm12971_vm1, %v17814_v9  ;;  %v8860_v19 = vmul.f32 0.03125, %v8818_v14  ;;  %v8894_v53 = vmul.f32 %v17409_v21, %v17409_v21 }
0x2d09   :  { %8922 = vadd.xlane.f32.xlu0 %v8921_v15  ;;  %v8827_v48 = vpop.xlane.xlu0 %8826  ;;  %v8552_v34 = vpack.c.bf16 %v8547_v3, %v8547_v3 }
0x2d0a   :  { %v8863_v1 = vmul.f32 0.03125, %v8827_v48  ;;  %v8897_v27 = vmul.f32 %v17378_v33, %v17378_v33  ;;  %v8918_v5 = vsel %vm224_vm3, %v8894_v53, 0.0 }
0x2d0c   :  { %v17387_v4 = vsub.f32 %v17336_v52, %v8863_v1  ;;  %v8927_v58 = vsel %vm224_vm3, %v8897_v27, 0.0 }
0x2d0d   :  { %8928 = vadd.xlane.f32.xlu0 %v8927_v58 }
0x2d0e   :  { %v8899_v29 = vmul.f32 %v17387_v4, %v17387_v4 }
0x2d0f   :  { %12014 = vmatmul.mubr.msk.bf16.gmra.mrb[52].mxu0 %vm792_vm5, %v8552_v34 }
0x2d10   :  { %v8933_v63 = vsel %vm224_vm3, %v8899_v29, 0.0  ;;  %12043 = vmatprep.mubr.msk.bf16.mxu0 %vm12971_vm1, %v17814_v9 }
0x2d11   :  { %8934 = vadd.xlane.f32.xlu0 %v8933_v63 }
0x2d3b   :  { %v8711_v52 = vpop.f32.mrb[40].mxu1 }
0x2d3c   :  { %v8749_v8 = vadd.f32 %v8711_v52, %v17190_v54  ;;  %v12021_v47 = vpop.f32.mrb[41].mxu1  ;;  %v8892_v54 = vmul.f32 %v17398_v39, %v17398_v39 }
0x2d3d   :  { %v8714_v22 = vpop.f32.mrb[42].mxu1 }
0x2d3e   :  { %v8767_v10 = vadd.f32 %v8749_v8, %v15472_v31  ;;  %v8750_v41 = vadd.f32 %v8714_v22, %v17193_v59  ;;  %v12022_v37 = vpop.f32.mrb[43].mxu1  ;;  %v8824_v59 = vpop.xlane.xlu1 %8823  ;;  %v8912_v11 = vsel %vm224_vm3, %v8892_v54, 0.0 }
0x2d3f   :  { %v8862_v0 = vmul.f32 0.03125, %v8824_v59 }
0x2d40   :  { %v17403_v51 = vadd.f32 %v17271_v45, %v8767_v10  ;;  %v8768_v6 = vadd.f32 %v8750_v41, %v15620_v36  ;;  %v17419_v36 = vsub.f32 %v17331_v12, %v8860_v19 }
0x2d41   :  { %v17425_v25 = vsub.f32 %v17341_v42, %v8862_v0  ;;  %v12164_v42 = vld [vmem:[%s17790_s5 + $0x10] sm:$0xff]  }
0x2d42   :  { %v8828_v61 = vsel %vm224_vm3, %v17403_v51, 0.0  ;;  %v17414_v31 = vadd.f32 %v17271_v45, %v8768_v6  ;;  %v8896_v35 = vmul.f32 %v17419_v36, %v17419_v36  ;;  %12040 = vmatpush3.bf16.msra.mxu0 %v12164_v42 }
0x2d43   :  { %8829 = vadd.xlane.f32.xlu1 %v8828_v61  ;;  %v8898_v12 = vmul.f32 %v17425_v25, %v17425_v25  ;;  %12041 = vmatprep.subr.bf16.mxu0 %v17814_v9 }
0x2d44   :  { %v8831_v49 = vsel %vm224_vm3, %v17414_v31, 0.0  ;;  %v8924_v38 = vsel %vm224_vm3, %v8896_v35, 0.0 }
0x2d45   :  { %8832 = vadd.xlane.f32.xlu0 %v8831_v49  ;;  %v8930_v43 = vsel %vm224_vm3, %v8898_v12, 0.0 }
0x2d46   :  { %12042 = vmatpush3.bf16.msra.mxu0 %v12165_v50 }
0x2d47   :  { %8913 = vadd.xlane.f32.xlu1 %v8912_v11  ;;  %12123 = vmatprep.subr.bf16.mxu0 %v17814_v9 }
0x2d4b   :  { %8919 = vadd.xlane.f32.xlu1 %v8918_v5 }
0x2d4f   :  { %8925 = vadd.xlane.f32.xlu1 %v8924_v38 }
0x2d53   :  { %8931 = vadd.xlane.f32.xlu1 %v8930_v43 }
0x2d8e   :  { %v8911_v40 = vpop.xlane.xlu0 %8910 }
0x2d8f   :  { %v8963_v62 = vmul.f32 0.03125, %v8911_v40  ;;  %v17461_v40 = vld [vmem:[%s17788_s8 + $0xa] ss:$0 sm:$0xff] }
0x2d91   :  { %v8981_v48 = vadd.f32 1e-05, %v8963_v62 }
0x2d92   :  { %v8917_v1 = vpop.xlane.xlu0 %8916 }
0x2d93   :  { %12894 = vrsqrt.f32 %v8981_v48  ;;  %v8965_v29 = vmul.f32 0.03125, %v8917_v1 }
0x2d95   :  { %v8983_v22 = vadd.f32 1e-05, %v8965_v29 }
0x2d96   :  { %v8923_v41 = vpop.xlane.xlu0 %8922 }
0x2d97   :  { %v8967_v19 = vmul.f32 0.03125, %v8923_v41 }
0x2d99   :  { %v8985_v38 = vadd.f32 1e-05, %v8967_v19 }
0x2d9a   :  { %v8929_v42 = vpop.xlane.xlu0 %8928 }
0x2d9b   :  { %v8969_v62 = vmul.f32 0.03125, %v8929_v42  ;;  %v12168_v42 = vld [vmem:[%s17791_s6 + $0x30] sm:$0xff]  }
0x2d9d   :  { %v12895_v11 = vpop.eup %12894 }
0x2d9e   :  { %v9017_v43 = vmul.f32 %v12895_v11, %v17355_v2 }
0x2dc8   :  { %v8627_v16 = vpop.f32.mrb[40].mxu0 }
0x2dc9   :  { %v12003_v23 = vpop.f32.mrb[41].mxu0 }
0x2dca   :  { %v8630_v17 = vpop.f32.mrb[42].mxu0 }
0x2dcb   :  { %v8658_v15 = vpack.c.bf16 %v8630_v17, %v8627_v16  ;;  %v12004_v3 = vpop.f32.mrb[43].mxu0 }
0x2dcc   :  { %v9039_v3 = vmul.f32 %v17461_v40, %v9017_v43 }
0x2dcd   :  { %12024 = vmatmul.mubr.msk.bf16.gmra.mrb[44].mxu1 %vm689_vm4, %v8658_v15 }
0x2dce   :  { %12027 = vmatprep.mubr.msk.bf16.mxu1 %vm12971_vm1, %v17814_v9 }
0x2dd0   :  { %v8830_v27 = vpop.xlane.xlu1 %8829 }
0x2dd1   :  { %v8864_v58 = vmul.f32 0.03125, %v8830_v27  ;;  %v17468_v27 = vld [vmem:[%s17788_s8 + $0xb] ss:$0 sm:$0xff] }
0x2dd2   :  { %v8635_v34 = vpop.f32.mrb[44].mxu0 }
0x2dd3   :  { %v17446_v63 = vsub.f32 %v17403_v51, %v8864_v58  ;;  %v12007_v24 = vpop.f32.mrb[45].mxu0 }
0x2dd4   :  { %v8914_v55 = vpop.xlane.xlu1 %8913  ;;  %v8638_v44 = vpop.f32.mrb[46].mxu0 }
0x2dd5   :  { %v8964_v52 = vmul.f32 0.03125, %v8914_v55  ;;  %v8659_v8 = vpack.c.bf16 %v8638_v44, %v8635_v34  ;;  %v12008_v47 = vpop.f32.mrb[47].mxu0  ;;  %v8900_v14 = vmul.f32 %v17446_v63, %v17446_v63  ;;  %v8987_v44 = vadd.f32 1e-05, %v8969_v62 }
0x2dd7   :  { %v8982_v46 = vadd.f32 1e-05, %v8964_v52  ;;  %12028 = vmatmul.mubr.msk.bf16.gmra.mrb[48].mxu1 %vm689_vm4, %v8659_v8  ;;  %v8936_v10 = vsel %vm224_vm3, %v8900_v14, 0.0  ;;  %v9061_v52 = vadd.f32 %v17468_v27, %v9039_v3 }
0x2dd8   :  { %8937 = vadd.xlane.f32.xlu1 %v8936_v10  ;;  %v8920_v37 = vpop.xlane.xlu1 %8919  ;;  %12031 = vmatprep.mubr.msk.bf16.mxu1 %vm12971_vm1, %v17814_v9 }
0x2dd9   :  { %12896 = vrsqrt.f32 %v8982_v46  ;;  %v8966_v6 = vmul.f32 0.03125, %v8920_v37 }
0x2dda   :  { %v8643_v54 = vpop.f32.mrb[48].mxu0  ;;  %12898 = vrsqrt.f32 %v8983_v22 }
0x2ddb   :  { %v8984_v61 = vadd.f32 1e-05, %v8966_v6  ;;  %v12011_v59 = vpop.f32.mrb[49].mxu0 }
0x2ddc   :  { %v8926_v49 = vpop.xlane.xlu1 %8925  ;;  %v8646_v0 = vpop.f32.mrb[50].mxu0 }
0x2ddd   :  { %12900 = vrsqrt.f32 %v8984_v61  ;;  %v8968_v53 = vmul.f32 0.03125, %v8926_v49  ;;  %v8660_v5 = vpack.c.bf16 %v8646_v0, %v8643_v54  ;;  %v12012_v35 = vpop.f32.mrb[51].mxu0 }
0x2ddf   :  { %v8986_v12 = vadd.f32 1e-05, %v8968_v53  ;;  %12032 = vmatmul.mubr.msk.bf16.gmra.mrb[52].mxu1 %vm689_vm4, %v8660_v5 }
0x2de0   :  { %v8932_v50 = vpop.xlane.xlu1 %8931  ;;  %12035 = vmatprep.mubr.msk.bf16.mxu1 %vm12971_vm1, %v17814_v9 }
0x2de1   :  { %12902 = vrsqrt.f32 %v8986_v12  ;;  %v8970_v16 = vmul.f32 0.03125, %v8932_v50  ;;  %v12169_v50 = vld [vmem:[%s17791_s6 + $0x38] sm:$0xff]  }
0x2de2   :  { %v8651_v23 = vpop.f32.mrb[52].mxu0  ;;  %12904 = vrsqrt.f32 %v8985_v38 }
0x2de3   :  { %v12897_v17 = vpop.eup %12896  ;;  %v12015_v15 = vpop.f32.mrb[53].mxu0  ;;  %v8988_v58 = vadd.f32 1e-05, %v8970_v16  ;;  %v8661_v34 = vpack.c.bf16 %v8651_v23, %v8651_v23 }
0x2de4   :  { %v9018_v2 = vmul.f32 %v12897_v17, %v17398_v39  ;;  %v8654_v48 = vpop.f32.mrb[54].mxu0  ;;  %v12899_v1 = vpop.eup %12898 }
0x2de5   :  { %v12016_v29 = vpop.f32.mrb[55].mxu0  ;;  %v9019_v39 = vmul.f32 %v12899_v1, %v17361_v26  ;;  %12906 = vrsqrt.f32 %v8988_v58  ;;  %v8935_v16 = vpop.xlane.xlu0 %8934 }
0x2de6   :  { %v9040_v24 = vmul.f32 %v17461_v40, %v9018_v2  ;;  %12908 = vrsqrt.f32 %v8987_v44  ;;  %v8971_v23 = vmul.f32 0.03125, %v8935_v16 }
0x2de7   :  { %v12901_v55 = vpop.eup %12900  ;;  %12036 = vmatmul.mubr.msk.bf16.gmra.mrb[56].mxu1 %vm689_vm4, %v8661_v34  ;;  %v9041_v10 = vmul.f32 %v17461_v40, %v9019_v39 }
0x2de8   :  { %v9062_v8 = vadd.f32 %v17468_v27, %v9040_v24  ;;  %v9020_v47 = vmul.f32 %v12901_v55, %v17409_v21  ;;  %12087 = vmatprep.mubr.msk.bf16.mxu1 %vm12971_vm1, %v17814_v9  ;;  %v8989_v17 = vadd.f32 1e-05, %v8971_v23 }
0x2de9   :  { %v9063_v37 = vadd.f32 %v17468_v27, %v9041_v10 }
0x2dea   :  { %v9084_v14 = vpack.c.bf16 %v9062_v8, %v9061_v52  ;;  %v9042_v22 = vmul.f32 %v17461_v40, %v9020_v47  ;;  %12910 = vrsqrt.f32 %v8989_v17 }
0x2deb   :  { %v12903_v46 = vpop.eup %12902 }
0x2dec   :  { %12044 = vmatmul.mubr.msk.bf16.vlgmr.msra.gmra.mrb[56].mxu0 %vm224_vm3, %v9084_v14  ;;  %v12905_v41 = vpop.eup %12904  ;;  %v9064_v26 = vadd.f32 %v17468_v27, %v9042_v22  ;;  %v9022_v21 = vmul.f32 %v12903_v46, %v17419_v36  ;;  %v17827_v22 = vld [vmem:[#allocation3_spill] sm:$0xff] }
0x2ded   :  { %12047 = vmatprep.mubr.msk.bf16.mxu0 %vm12971_vm1, %v17814_v9  ;;  %v9021_v6 = vmul.f32 %v12905_v41, %v17371_v30 }
0x2dee   :  { %v9085_v54 = vpack.c.bf16 %v9064_v26, %v9063_v37  ;;  %v9044_v19 = vmul.f32 %v17461_v40, %v9022_v21 }
0x2def   :  { %v12907_v61 = vpop.eup %12906  ;;  %v9043_v59 = vmul.f32 %v17461_v40, %v9021_v6  ;;  %v17828_v6 = vld [vmem:[#allocation5_spill] sm:$0xff] }
0x2df0   :  { %v12909_v49 = vpop.eup %12908  ;;  %v9066_v0 = vadd.f32 %v17468_v27, %v9044_v19  ;;  %v9024_v36 = vmul.f32 %v12907_v61, %v17425_v25  ;;  %v12167_v25 = vld [vmem:[%s17791_s6 + $0x28] sm:$0xff]  }
0x2df1   :  { %v9065_v11 = vadd.f32 %v17468_v27, %v9043_v59  ;;  %v9023_v30 = vmul.f32 %v12909_v49, %v17378_v33  ;;  %v12166_v33 = vld [vmem:[%s17791_s6 + $0x20] sm:$0xff]  }
0x2df2   :  { %v9046_v5 = vmul.f32 %v17461_v40, %v9024_v36  ;;  %12080 = vmatpush3.bf16.msra.mxu1 %v12166_v33  ;;  %v17829_v59 = vld [vmem:[#allocation2_spill] sm:$0xff]  ;;  %v8833_v36 = vpop.xlane.xlu0 %8832 }
0x2df3   :  { %v9086_v53 = vpack.c.bf16 %v9066_v0, %v9065_v11  ;;  %v9045_v35 = vmul.f32 %v17461_v40, %v9023_v30  ;;  %12081 = vmatprep.subr.bf16.mxu1 %v17814_v9 }
0x2df4   :  { %12048 = vmatmul.mubr.msk.bf16.gmra.mrb[60].mxu0 %vm224_vm3, %v9085_v54  ;;  %v9068_v38 = vadd.f32 %v17468_v27, %v9046_v5  ;;  %v12911_v2 = vpop.eup %12910 }
0x2df5   :  { %12051 = vmatprep.mubr.msk.bf16.mxu0 %vm12971_vm1, %v17814_v9  ;;  %v9067_v12 = vadd.f32 %v17468_v27, %v9045_v35  ;;  %v9025_v48 = vmul.f32 %v12911_v2, %v17387_v4 }
0x2df6   :  { %12082 = vmatpush3.bf16.msra.mxu1 %v12167_v25 }
0x2df7   :  { %v9087_v43 = vpack.c.bf16 %v9068_v38, %v9067_v12  ;;  %12083 = vmatprep.subr.bf16.mxu1 %v17814_v9  ;;  %v9047_v58 = vmul.f32 %v17461_v40, %v9025_v48  ;;  %v17830_v12 = vld [vmem:[#allocation6_spill] sm:$0xff]  ;;  %v17832_v48 = vld [vmem:[#allocation7_spill] sm:$0xff] }
0x2df9   :  { %v9069_v24 = vadd.f32 %v17468_v27, %v9047_v58 }
0x2dfa   :  { %12084 = vmatpush3.bf16.msra.mxu1 %v12168_v42 }
0x2dfb   :  { %12085 = vmatprep.subr.bf16.mxu1 %v17814_v9 }
0x2dfc   :  { %12052 = vmatmul.mubr.msk.bf16.gmra.mrb[64].mxu0 %vm224_vm3, %v9086_v53  ;;  %v8865_v53 = vmul.f32 0.03125, %v8833_v36 }
0x2dfd   :  { %12055 = vmatprep.mubr.msk.bf16.mxu0 %vm12971_vm1, %v17814_v9 }
0x2dfe   :  { %12086 = vmatpush3.bf16.msra.mxu1 %v12169_v50  ;;  %v17562_v42 = vsub.f32 %v17414_v31, %v8865_v53  ;;  %v17831_v50 = vld [vmem:[#allocation4_spill] sm:$0xff] }
0x2e04   :  { %12056 = vmatmul.mubr.msk.bf16.gmra.mrb[68].mxu0 %vm224_vm3, %v9087_v43 }
0x2e05   :  { %12059 = vmatprep.mubr.msk.bf16.mxu0 %vm12971_vm1, %v17814_v9 }
0x2e65   :  { %v8938_v62 = vpop.xlane.xlu1 %8937 }
0x2e66   :  { %v8972_v15 = vmul.f32 0.03125, %v8938_v62 }
0x2e68   :  { %v8990_v3 = vadd.f32 1e-05, %v8972_v15 }
0x2e6a   :  { %12912 = vrsqrt.f32 %v8990_v3  ;;  %v8901_v3 = vmul.f32 %v17562_v42, %v17562_v42 }
0x2e74   :  { %v12913_v1 = vpop.eup %12912 }
0x2e75   :  { %v9026_v34 = vmul.f32 %v12913_v1, %v17446_v63 }
0x2e77   :  { %v9048_v29 = vmul.f32 %v17461_v40, %v9026_v34  ;;  %v17582_v34 = vld [vmem:[%s17788_s8 + $0xc] ss:$0 sm:$0xff] }
0x2e79   :  { %v9070_v55 = vadd.f32 %v17468_v27, %v9048_v29 }
0x2e7b   :  { %v9088_v44 = vpack.c.bf16 %v9070_v55, %v9069_v24 }
0x2e7d   :  { %12060 = vmatmul.mubr.msk.bf16.gmra.mrb[72].mxu0 %vm224_vm3, %v9088_v44 }
0x2e7e   :  { %12063 = vmatprep.mubr.msk.bf16.mxu0 %vm12971_vm1, %v17814_v9 }
0x2ea0   :  { %v8719_v52 = vpop.f32.mrb[44].mxu1 }
0x2ea1   :  { %v8751_v4 = vadd.f32 %v8719_v52, %v17196_v28  ;;  %v12025_v39 = vpop.f32.mrb[45].mxu1 }
0x2ea2   :  { %v8722_v8 = vpop.f32.mrb[46].mxu1 }
0x2ea3   :  { %v8769_v47 = vadd.f32 %v8751_v4, %v15624_v32  ;;  %v8752_v63 = vadd.f32 %v8722_v8, %v17199_v60  ;;  %v12026_v14 = vpop.f32.mrb[47].mxu1 }
0x2ea5   :  { %v8770_v46 = vadd.f32 %v8752_v63, %v17827_v22  ;;  %v17535_v10 = vadd.f32 %v17271_v45, %v8769_v47 }
0x2ea7   :  { %v8834_v41 = vsel %vm224_vm3, %v17535_v10, 0.0  ;;  %v17540_v26 = vadd.f32 %v17271_v45, %v8770_v46 }
0x2ea8   :  { %8835 = vadd.xlane.f32.xlu1 %v8834_v41 }
0x2ea9   :  { %v8837_v28 = vsel %vm224_vm3, %v17540_v26, 0.0 }
0x2eaa   :  { %8838 = vadd.xlane.f32.xlu0 %v8837_v28  ;;  %v8727_v32 = vpop.f32.mrb[48].mxu1 }
0x2eab   :  { %v8753_v60 = vadd.f32 %v8727_v32, %v17222_v56  ;;  %v12029_v21 = vpop.f32.mrb[49].mxu1 }
0x2eac   :  { %v8730_v37 = vpop.f32.mrb[50].mxu1 }
0x2ead   :  { %v8771_v54 = vadd.f32 %v8753_v60, %v17828_v6  ;;  %v8754_v19 = vadd.f32 %v8730_v37, %v17225_v18  ;;  %v12030_v61 = vpop.f32.mrb[51].mxu1 }
0x2eaf   :  { %v8772_v49 = vadd.f32 %v8754_v19, %v17829_v59  ;;  %v17549_v0 = vadd.f32 %v17271_v45, %v8771_v54 }
0x2eb1   :  { %v8840_v11 = vsel %vm224_vm3, %v17549_v0, 0.0  ;;  %v17554_v30 = vadd.f32 %v17271_v45, %v8772_v49 }
0x2eb2   :  { %8841 = vadd.xlane.f32.xlu1 %v8840_v11  ;;  %v8735_v56 = vpop.f32.mrb[52].mxu1 }
0x2eb3   :  { %v8755_v5 = vadd.f32 %v8735_v56, %v17228_v13  ;;  %v12033_v35 = vpop.f32.mrb[53].mxu1  ;;  %v8843_v18 = vsel %vm224_vm3, %v17554_v30, 0.0 }
0x2eb4   :  { %8844 = vadd.xlane.f32.xlu0 %v8843_v18  ;;  %v8738_v38 = vpop.f32.mrb[54].mxu1 }
0x2eb5   :  { %v8773_v43 = vadd.f32 %v8755_v5, %v17830_v12  ;;  %v8756_v33 = vadd.f32 %v8738_v38, %v17231_v57  ;;  %v12034_v25 = vpop.f32.mrb[55].mxu1 }
0x2eb7   :  { %v8774_v16 = vadd.f32 %v8756_v33, %v17831_v50  ;;  %v17566_v23 = vadd.f32 %v17271_v45, %v8773_v43 }
0x2eb9   :  { %v8846_v13 = vsel %vm224_vm3, %v17566_v23, 0.0  ;;  %v17571_v17 = vadd.f32 %v17271_v45, %v8774_v16 }
0x2eba   :  { %8847 = vadd.xlane.f32.xlu1 %v8846_v13  ;;  %v8743_v62 = vpop.f32.mrb[56].mxu1 }
0x2ebb   :  { %v8757_v15 = vadd.f32 %v8743_v62, %v17234_v7  ;;  %v12037_v57 = vpop.f32.mrb[57].mxu1  ;;  %v8849_v31 = vsel %vm224_vm3, %v17571_v17, 0.0  ;;  %v8939_v7 = vsel %vm224_vm3, %v8901_v3, 0.0 }
0x2ebc   :  { %8850 = vadd.xlane.f32.xlu0 %v8849_v31  ;;  %v8746_v2 = vpop.f32.mrb[58].mxu1 }
0x2ebd   :  { %v8775_v1 = vadd.f32 %v8757_v15, %v17832_v48  ;;  %v12038_v58 = vpop.f32.mrb[59].mxu1 }
0x2ebf   :  { %v9171_v29 = vpop.f32.mrb[56].mxu0  ;;  %v17586_v24 = vadd.f32 %v17271_v45, %v8775_v1 }
0x2ec0   :  { %v9172_v55 = vadd.f32 %v17582_v34, %v9171_v29  ;;  %8940 = vadd.xlane.f32.xlu0 %v8939_v7  ;;  %v12045_v44 = vpop.f32.mrb[57].mxu0 }
0x2ec1   :  { %v9174_v52 = vpop.f32.mrb[58].mxu0  ;;  %v8852_v4 = vsel %vm224_vm3, %v17586_v24, 0.0 }
0x2ec2   :  { %v9260_v39 = vmul.f32 0.70710677, %v9172_v55  ;;  %v9175_v8 = vadd.f32 %v17582_v34, %v9174_v52  ;;  %8853 = vadd.xlane.f32.xlu1 %v8852_v4  ;;  %v12046_v47 = vpop.f32.mrb[59].mxu0  ;;  %v9242_v59 = vmul.f32 0.5, %v9172_v55 }
0x2ec4   :  { %12914 = verf.f32 %v9260_v39  ;;  %v9261_v63 = vmul.f32 0.70710677, %v9175_v8  ;;  %v9243_v49 = vmul.f32 0.5, %v9175_v8 }
0x2ec6   :  { %12916 = verf.f32 %v9261_v63 }
0x2ec7   :  { %v9179_v14 = vpop.f32.mrb[60].mxu0 }
0x2ec8   :  { %v9180_v45 = vadd.f32 %v17582_v34, %v9179_v14  ;;  %v12049_v22 = vpop.f32.mrb[61].mxu0 }
0x2ec9   :  { %v9182_v46 = vpop.f32.mrb[62].mxu0 }
0x2eca   :  { %v9262_v41 = vmul.f32 0.70710677, %v9180_v45  ;;  %v9183_v28 = vadd.f32 %v17582_v34, %v9182_v46  ;;  %v12050_v32 = vpop.f32.mrb[63].mxu0  ;;  %v9244_v62 = vmul.f32 0.5, %v9180_v45 }
0x2ecc   :  { %12918 = verf.f32 %v9262_v41  ;;  %v9263_v60 = vmul.f32 0.70710677, %v9183_v28  ;;  %v9245_v15 = vmul.f32 0.5, %v9183_v28 }
0x2ece   :  { %v12915_v21 = vpop.eup %12914  ;;  %12920 = verf.f32 %v9263_v60 }
0x2ecf   :  { %v9296_v37 = vadd.f32 1.0, %v12915_v21  ;;  %v9187_v6 = vpop.f32.mrb[64].mxu0 }
0x2ed0   :  { %v12917_v54 = vpop.eup %12916  ;;  %v9188_v19 = vadd.f32 %v17582_v34, %v9187_v6  ;;  %v12053_v61 = vpop.f32.mrb[65].mxu0 }
0x2ed1   :  { %v9297_v36 = vadd.f32 1.0, %v12917_v54  ;;  %v9190_v11 = vpop.f32.mrb[66].mxu0  ;;  %v9314_v35 = vmul.f32 %v9296_v37, %v9242_v59 }
0x2ed2   :  { %v9264_v56 = vmul.f32 0.70710677, %v9188_v19  ;;  %v9191_v53 = vadd.f32 %v17582_v34, %v9190_v11  ;;  %v12054_v5 = vpop.f32.mrb[67].mxu0  ;;  %v9246_v4 = vmul.f32 0.5, %v9188_v19 }
0x2ed3   :  { %v9315_v18 = vmul.f32 %v9297_v36, %v9243_v49 }
0x2ed4   :  { %12922 = verf.f32 %v9264_v56  ;;  %v9265_v38 = vmul.f32 0.70710677, %v9191_v53  ;;  %v9247_v39 = vmul.f32 0.5, %v9191_v53 }
0x2ed5   :  { %v9341_v12 = vpack.c.bf16 %v9315_v18, %v9314_v35 }
0x2ed6   :  { %v12919_v43 = vpop.eup %12918  ;;  %12924 = verf.f32 %v9265_v38 }
0x2ed7   :  { %v9298_v33 = vadd.f32 1.0, %v12919_v43  ;;  %v9195_v25 = vpop.f32.mrb[68].mxu0  ;;  %12088 = vmatmul.mubr.msk.bf16.vlgmr.msra.gmra.mrb[60].mxu1 %vm4713_vm8, %v9341_v12 }
0x2ed8   :  { %v12921_v50 = vpop.eup %12920  ;;  %v9196_v16 = vadd.f32 %v17582_v34, %v9195_v25  ;;  %v12057_v13 = vpop.f32.mrb[69].mxu0  ;;  %12091 = vmatprep.mubr.msk.bf16.mxu1 %vm12971_vm1, %v17814_v9 }
0x2ed9   :  { %v9299_v57 = vadd.f32 1.0, %v12921_v50  ;;  %v9198_v31 = vpop.f32.mrb[70].mxu0  ;;  %v9316_v1 = vmul.f32 %v9298_v33, %v9244_v62 }
0x2eda   :  { %v9266_v3 = vmul.f32 0.70710677, %v9196_v16  ;;  %v9199_v2 = vadd.f32 %v17582_v34, %v9198_v31  ;;  %v12058_v48 = vpop.f32.mrb[71].mxu0  ;;  %v9248_v41 = vmul.f32 0.5, %v9196_v16 }
0x2edb   :  { %v9317_v58 = vmul.f32 %v9299_v57, %v9245_v15 }
0x2edc   :  { %12926 = verf.f32 %v9266_v3  ;;  %v9267_v29 = vmul.f32 0.70710677, %v9199_v2  ;;  %v9249_v28 = vmul.f32 0.5, %v9199_v2 }
0x2edd   :  { %v9342_v7 = vpack.c.bf16 %v9317_v58, %v9316_v1 }
0x2ede   :  { %v12923_v55 = vpop.eup %12922  ;;  %12928 = verf.f32 %v9267_v29 }
0x2edf   :  { %v9300_v44 = vadd.f32 1.0, %v12923_v55  ;;  %12092 = vmatmul.mubr.msk.bf16.gmra.mrb[64].mxu1 %vm4713_vm8, %v9342_v7 }
0x2ee0   :  { %v12925_v52 = vpop.eup %12924  ;;  %12095 = vmatprep.mubr.msk.bf16.mxu1 %vm12971_vm1, %v17814_v9 }
0x2ee1   :  { %v9301_v8 = vadd.f32 1.0, %v12925_v52  ;;  %v9318_v47 = vmul.f32 %v9300_v44, %v9246_v4 }
0x2ee3   :  { %v9319_v63 = vmul.f32 %v9301_v8, %v9247_v39 }
0x2ee5   :  { %v9343_v14 = vpack.c.bf16 %v9319_v63, %v9318_v47 }
0x2ee6   :  { %v12927_v45 = vpop.eup %12926 }
0x2ee7   :  { %v9302_v22 = vadd.f32 1.0, %v12927_v45  ;;  %12096 = vmatmul.mubr.msk.bf16.gmra.mrb[68].mxu1 %vm4713_vm8, %v9343_v14 }
0x2ee8   :  { %v12929_v46 = vpop.eup %12928  ;;  %12099 = vmatprep.mubr.msk.bf16.mxu1 %vm12971_vm1, %v17814_v9 }
0x2ee9   :  { %v9303_v32 = vadd.f32 1.0, %v12929_v46  ;;  %v9320_v60 = vmul.f32 %v9302_v22, %v9248_v41 }
0x2eeb   :  { %v9321_v21 = vmul.f32 %v9303_v32, %v9249_v28  ;;  %v17660_v32 = vld [vmem:[%s17788_s8 + $0xd] ss:$0 sm:$0xff] }
0x2eed   :  { %v9344_v37 = vpack.c.bf16 %v9321_v21, %v9320_v60 }
0x2eef   :  { %12100 = vmatmul.mubr.msk.bf16.gmra.mrb[72].mxu1 %vm4713_vm8, %v9344_v37 }
0x2ef0   :  { %12103 = vmatprep.mubr.msk.bf16.mxu1 %vm12971_vm1, %v17814_v9 }
0x2f35   :  { %v8836_v6 = vpop.xlane.xlu1 %8835 }
0x2f36   :  { %v8866_v54 = vmul.f32 0.03125, %v8836_v6 }
0x2f37   :  { %v8839_v19 = vpop.xlane.xlu0 %8838 }
0x2f38   :  { %v17611_v61 = vsub.f32 %v17535_v10, %v8866_v54  ;;  %v8867_v59 = vmul.f32 0.03125, %v8839_v19 }
0x2f3a   :  { %v17614_v49 = vsub.f32 %v17540_v26, %v8867_v59  ;;  %v8902_v36 = vmul.f32 %v17611_v61, %v17611_v61 }
0x2f3c   :  { %v8942_v11 = vsel %vm224_vm3, %v8902_v36, 0.0  ;;  %v8903_v56 = vmul.f32 %v17614_v49, %v17614_v49 }
0x2f3d   :  { %8943 = vadd.xlane.f32.xlu1 %v8942_v11 }
0x2f3e   :  { %v8945_v53 = vsel %vm224_vm3, %v8903_v56, 0.0 }
0x2f3f   :  { %v8842_v5 = vpop.xlane.xlu1 %8841  ;;  %8946 = vadd.xlane.f32.xlu0 %v8945_v53 }
0x2f40   :  { %v8868_v35 = vmul.f32 0.03125, %v8842_v5 }
0x2f41   :  { %v8845_v10 = vpop.xlane.xlu0 %8844 }
0x2f42   :  { %v17623_v18 = vsub.f32 %v17549_v0, %v8868_v35  ;;  %v8869_v26 = vmul.f32 0.03125, %v8845_v10 }
0x2f44   :  { %v17626_v38 = vsub.f32 %v17554_v30, %v8869_v26  ;;  %v8904_v12 = vmul.f32 %v17623_v18, %v17623_v18 }
0x2f46   :  { %v8948_v43 = vsel %vm224_vm3, %v8904_v12, 0.0  ;;  %v8905_v33 = vmul.f32 %v17626_v38, %v17626_v38 }
0x2f47   :  { %v8848_v25 = vpop.xlane.xlu1 %8847  ;;  %8949 = vadd.xlane.f32.xlu1 %v8948_v43 }
0x2f48   :  { %v8870_v50 = vmul.f32 0.03125, %v8848_v25  ;;  %v8951_v16 = vsel %vm224_vm3, %v8905_v33, 0.0 }
0x2f49   :  { %8952 = vadd.xlane.f32.xlu0 %v8951_v16  ;;  %v8851_v0 = vpop.xlane.xlu0 %8850 }
0x2f4a   :  { %v17635_v13 = vsub.f32 %v17566_v23, %v8870_v50  ;;  %v8871_v30 = vmul.f32 0.03125, %v8851_v0 }
0x2f4c   :  { %v17638_v62 = vsub.f32 %v17571_v17, %v8871_v30  ;;  %v8906_v15 = vmul.f32 %v17635_v13, %v17635_v13 }
0x2f4e   :  { %v8954_v57 = vsel %vm224_vm3, %v8906_v15, 0.0  ;;  %v8907_v31 = vmul.f32 %v17638_v62, %v17638_v62 }
0x2f4f   :  { %8955 = vadd.xlane.f32.xlu1 %v8954_v57  ;;  %v8854_v3 = vpop.xlane.xlu1 %8853 }
0x2f50   :  { %v8872_v2 = vmul.f32 0.03125, %v8854_v3  ;;  %v9203_v48 = vpop.f32.mrb[72].mxu0  ;;  %v8957_v1 = vsel %vm224_vm3, %v8907_v31, 0.0 }
0x2f51   :  { %v9204_v23 = vadd.f32 %v17582_v34, %v9203_v48  ;;  %8958 = vadd.xlane.f32.xlu0 %v8957_v1  ;;  %v12061_v58 = vpop.f32.mrb[73].mxu0 }
0x2f52   :  { %v17648_v17 = vsub.f32 %v17586_v24, %v8872_v2  ;;  %v9206_v29 = vpop.f32.mrb[74].mxu0 }
0x2f53   :  { %v9268_v7 = vmul.f32 0.70710677, %v9204_v23  ;;  %v9207_v55 = vadd.f32 %v17582_v34, %v9206_v29  ;;  %v12062_v44 = vpop.f32.mrb[75].mxu0  ;;  %v9250_v14 = vmul.f32 0.5, %v9204_v23 }
0x2f54   :  { %v8908_v52 = vmul.f32 %v17648_v17, %v17648_v17 }
0x2f55   :  { %12930 = verf.f32 %v9268_v7  ;;  %v9269_v4 = vmul.f32 0.70710677, %v9207_v55  ;;  %v9251_v24 = vmul.f32 0.5, %v9207_v55 }
0x2f56   :  { %v8960_v39 = vsel %vm224_vm3, %v8908_v52, 0.0 }
0x2f57   :  { %12932 = verf.f32 %v9269_v4  ;;  %8961 = vadd.xlane.f32.xlu1 %v8960_v39 }
0x2f5f   :  { %v12931_v8 = vpop.eup %12930 }
0x2f60   :  { %v9304_v47 = vadd.f32 1.0, %v12931_v8 }
0x2f61   :  { %v12933_v63 = vpop.eup %12932 }
0x2f62   :  { %v9305_v45 = vadd.f32 1.0, %v12933_v63  ;;  %v9322_v22 = vmul.f32 %v9304_v47, %v9250_v14 }
0x2f64   :  { %v9323_v46 = vmul.f32 %v9305_v45, %v9251_v24 }
0x2f66   :  { %v9345_v41 = vpack.c.bf16 %v9323_v46, %v9322_v22 }
0x2f68   :  { %12104 = vmatmul.mubr.msk.bf16.gmra.mrb[76].mxu1 %vm4713_vm8, %v9345_v41 }
0x2f69   :  { %12107 = vmatprep.mubr.msk.bf16.mxu1 %vm12971_vm1, %v17814_v9 }
0x2faa   :  { %v9435_v28 = vpop.f32.mrb[60].mxu1 }
0x2fab   :  { %v9490_v60 = vadd.f32 %v9435_v28, %v17278_v20  ;;  %v12089_v21 = vpop.f32.mrb[61].mxu1  ;;  %v8941_v20 = vpop.xlane.xlu0 %8940 }
0x2fac   :  { %v9438_v37 = vpop.f32.mrb[62].mxu1  ;;  %v8973_v26 = vmul.f32 0.03125, %v8941_v20 }
0x2fad   :  { %v17664_v6 = vadd.f32 %v17660_v32, %v9490_v60  ;;  %v12090_v54 = vpop.f32.mrb[63].mxu1 }
0x2fae   :  { %v8991_v25 = vadd.f32 1e-05, %v8973_v26 }
0x2faf   :  { %v9503_v19 = vsel %vm9502_vm9, %v17664_v6, 0.0 }
0x2fb0   :  { %9504 = vadd.xlane.f32.xlu0 %v9503_v19  ;;  %12934 = vrsqrt.f32 %v8991_v25 }
0x2fb2   :  { %v9442_v59 = vpop.f32.mrb[64].mxu1 }
0x2fb3   :  { %v12093_v36 = vpop.f32.mrb[65].mxu1 }
0x2fb4   :  { %v9444_v11 = vpop.f32.mrb[66].mxu1 }
0x2fb5   :  { %v12094_v56 = vpop.f32.mrb[67].mxu1 }
0x2fba   :  { %v9448_v53 = vpop.f32.mrb[68].mxu1  ;;  %v12935_v3 = vpop.eup %12934 }
0x2fbb   :  { %v12097_v5 = vpop.f32.mrb[69].mxu1  ;;  %v9027_v1 = vmul.f32 %v12935_v3, %v17562_v42 }
0x2fbc   :  { %v9450_v35 = vpop.f32.mrb[70].mxu1 }
0x2fbd   :  { %v12098_v10 = vpop.f32.mrb[71].mxu1  ;;  %v9049_v44 = vmul.f32 %v17461_v40, %v9027_v1 }
0x2fbf   :  { %v9071_v63 = vadd.f32 %v17468_v27, %v9049_v44 }
0x2fc2   :  { %v9454_v12 = vpop.f32.mrb[72].mxu1 }
0x2fc3   :  { %v12101_v43 = vpop.f32.mrb[73].mxu1 }
0x2fc4   :  { %v9456_v33 = vpop.f32.mrb[74].mxu1 }
0x2fc5   :  { %v12102_v50 = vpop.f32.mrb[75].mxu1 }
0x2fca   :  { %v8944_v16 = vpop.xlane.xlu1 %8943 }
0x2fcb   :  { %v8974_v0 = vmul.f32 0.03125, %v8944_v16 }
0x2fcc   :  { %v8947_v30 = vpop.xlane.xlu0 %8946 }
0x2fcd   :  { %v8992_v15 = vadd.f32 1e-05, %v8974_v0  ;;  %v8975_v57 = vmul.f32 0.03125, %v8947_v30 }
0x2fcf   :  { %12936 = vrsqrt.f32 %v8992_v15  ;;  %v8993_v31 = vadd.f32 1e-05, %v8975_v57 }
0x2fd1   :  { %12938 = vrsqrt.f32 %v8993_v31 }
0x2fd4   :  { %v8950_v2 = vpop.xlane.xlu1 %8949 }
0x2fd5   :  { %v8976_v48 = vmul.f32 0.03125, %v8950_v2 }
0x2fd6   :  { %v8953_v23 = vpop.xlane.xlu0 %8952 }
0x2fd7   :  { %v8994_v58 = vadd.f32 1e-05, %v8976_v48  ;;  %v8977_v29 = vmul.f32 0.03125, %v8953_v23 }
0x2fd9   :  { %v12937_v7 = vpop.eup %12936  ;;  %12940 = vrsqrt.f32 %v8994_v58  ;;  %v8995_v55 = vadd.f32 1e-05, %v8977_v29 }
0x2fda   :  { %v9028_v52 = vmul.f32 %v12937_v7, %v17611_v61 }
0x2fdb   :  { %12942 = vrsqrt.f32 %v8995_v55  ;;  %v12939_v8 = vpop.eup %12938 }
0x2fdc   :  { %v9050_v4 = vmul.f32 %v17461_v40, %v9028_v52  ;;  %v8956_v39 = vpop.xlane.xlu1 %8955  ;;  %v9029_v46 = vmul.f32 %v12939_v8, %v17614_v49 }
0x2fdd   :  { %v8978_v47 = vmul.f32 0.03125, %v8956_v39 }
0x2fde   :  { %v9072_v42 = vadd.f32 %v17468_v27, %v9050_v4  ;;  %v8959_v14 = vpop.xlane.xlu0 %8958  ;;  %v9051_v28 = vmul.f32 %v17461_v40, %v9029_v46 }
0x2fdf   :  { %v8996_v24 = vadd.f32 1e-05, %v8978_v47  ;;  %v8979_v45 = vmul.f32 0.03125, %v8959_v14 }
0x2fe0   :  { %v9089_v22 = vpack.c.bf16 %v9072_v42, %v9071_v63  ;;  %v9073_v49 = vadd.f32 %v17468_v27, %v9051_v28 }
0x2fe1   :  { %12944 = vrsqrt.f32 %v8996_v24  ;;  %v8997_v41 = vadd.f32 1e-05, %v8979_v45 }
0x2fe2   :  { %12064 = vmatmul.mubr.msk.bf16.gmra.mrb[76].mxu0 %vm224_vm3, %v9089_v22 }
0x2fe3   :  { %v12941_v61 = vpop.eup %12940  ;;  %12946 = vrsqrt.f32 %v8997_v41  ;;  %12067 = vmatprep.mubr.msk.bf16.mxu0 %vm12971_vm1, %v17814_v9 }
0x2fe4   :  { %v9030_v60 = vmul.f32 %v12941_v61, %v17623_v18  ;;  %v8962_v21 = vpop.xlane.xlu1 %8961 }
0x2fe5   :  { %v12943_v37 = vpop.eup %12942  ;;  %v8980_v54 = vmul.f32 0.03125, %v8962_v21 }
0x2fe6   :  { %v9052_v19 = vmul.f32 %v17461_v40, %v9030_v60  ;;  %v9031_v11 = vmul.f32 %v12943_v37, %v17626_v38 }
0x2fe7   :  { %v8998_v59 = vadd.f32 1e-05, %v8980_v54 }
0x2fe8   :  { %v9074_v36 = vadd.f32 %v17468_v27, %v9052_v19  ;;  %v9053_v5 = vmul.f32 %v17461_v40, %v9031_v11 }
0x2fe9   :  { %12948 = vrsqrt.f32 %v8998_v59 }
0x2fea   :  { %v9090_v56 = vpack.c.bf16 %v9074_v36, %v9073_v49  ;;  %v9075_v20 = vadd.f32 %v17468_v27, %v9053_v5 }
0x2feb   :  { %v12945_v53 = vpop.eup %12944 }
0x2fec   :  { %v9032_v35 = vmul.f32 %v12945_v53, %v17635_v13  ;;  %12068 = vmatmul.mubr.msk.bf16.gmra.mrb[80].mxu0 %vm224_vm3, %v9090_v56 }
0x2fed   :  { %v12947_v18 = vpop.eup %12946  ;;  %12071 = vmatprep.mubr.msk.bf16.mxu0 %vm12971_vm1, %v17814_v9 }
0x2fee   :  { %v9054_v10 = vmul.f32 %v17461_v40, %v9032_v35  ;;  %v9033_v38 = vmul.f32 %v12947_v18, %v17638_v62 }
0x2ff0   :  { %v9076_v26 = vadd.f32 %v17468_v27, %v9054_v10  ;;  %v9055_v33 = vmul.f32 %v17461_v40, %v9033_v38 }
0x2ff2   :  { %v9091_v12 = vpack.c.bf16 %v9076_v26, %v9075_v20  ;;  %v9077_v50 = vadd.f32 %v17468_v27, %v9055_v33 }
0x2ff3   :  { %v12949_v43 = vpop.eup %12948 }
0x2ff4   :  { %v9034_v13 = vmul.f32 %v12949_v43, %v17648_v17  ;;  %12072 = vmatmul.mubr.msk.bf16.gmra.mrb[84].mxu0 %vm224_vm3, %v9091_v12 }
0x2ff5   :  { %12075 = vmatprep.mubr.msk.bf16.mxu0 %vm12971_vm1, %v17814_v9 }
0x2ff6   :  { %v9056_v25 = vmul.f32 %v17461_v40, %v9034_v13 }
0x2ff8   :  { %v9078_v16 = vadd.f32 %v17468_v27, %v9056_v25 }
0x2ffa   :  { %v9092_v0 = vpack.c.bf16 %v9078_v16, %v9077_v50 }
0x2ffc   :  { %12076 = vmatmul.mubr.msk.bf16.gmra.mrb[88].mxu0 %vm224_vm3, %v9092_v0 }
0x2ffd   :  { %12127 = vmatprep.mubr.msk.bf16.mxu0 %vm12971_vm1, %v17814_v9 }
0x303b   :  { %v9460_v62 = vpop.f32.mrb[76].mxu1 }
0x303c   :  { %v12105_v30 = vpop.f32.mrb[77].mxu1 }
0x303d   :  { %v9505_v17 = vpop.xlane.xlu0 %9504  ;;  %v9462_v15 = vpop.f32.mrb[78].mxu1 }
0x303e   :  { %v9506_v57 = vmul.f32 0.03125, %v9505_v17  ;;  %v9491_v31 = vadd.f32 %v9462_v15, %v17403_v51  ;;  %v12106_v3 = vpop.f32.mrb[79].mxu1  ;;  %v12170_v51 = vld [vmem:[%s17792_s7] sm:$0xff]  }
0x303f   :  { %12124 = vmatpush3.bf16.msra.mxu0 %v12170_v51 }
0x3040   :  { %v17706_v40 = vsub.f32 %v17664_v6, %v9506_v57  ;;  %v17709_v2 = vadd.f32 %v17660_v32, %v9491_v31  ;;  %12125 = vmatprep.subr.bf16.mxu0 %v17814_v9  ;;  %v12171_v32 = vld [vmem:[%s17792_s7 + $0x8] sm:$0xff]  }
0x3042   :  { %v9582_v27 = vsel %vm9502_vm9, %v17709_v2, 0.0  ;;  %v9508_v48 = vmul.f32 %v17706_v40, %v17706_v40 }
0x3043   :  { %9583 = vadd.xlane.f32.xlu1 %v9582_v27  ;;  %12126 = vmatpush3.bf16.msra.mxu0 %v12171_v32 }
0x3044   :  { %v9509_v1 = vsel %vm9502_vm9, %v9508_v48, 0.0  ;;  %12131 = vmatprep.subr.bf16.mxu0 %v17814_v9 }
0x3045   :  { %9510 = vadd.xlane.f32.xlu0 %v9509_v1 }
0x30b5   :  { %v9211_v6 = vpop.f32.mrb[76].mxu0 }
0x30b6   :  { %v9212_v23 = vadd.f32 %v17582_v34, %v9211_v6  ;;  %v12065_v58 = vpop.f32.mrb[77].mxu0 }
0x30b7   :  { %v9214_v29 = vpop.f32.mrb[78].mxu0 }
0x30b8   :  { %v9270_v7 = vmul.f32 0.70710677, %v9212_v23  ;;  %v9215_v55 = vadd.f32 %v17582_v34, %v9214_v29  ;;  %v12066_v44 = vpop.f32.mrb[79].mxu0  ;;  %v9252_v41 = vmul.f32 0.5, %v9212_v23 }
0x30ba   :  { %12950 = verf.f32 %v9270_v7  ;;  %v9271_v52 = vmul.f32 0.70710677, %v9215_v55  ;;  %v9253_v61 = vmul.f32 0.5, %v9215_v55 }
0x30bc   :  { %12952 = verf.f32 %v9271_v52 }
0x30bf   :  { %v9219_v4 = vpop.f32.mrb[80].mxu0 }
0x30c0   :  { %v9220_v39 = vadd.f32 %v17582_v34, %v9219_v4  ;;  %v12069_v8 = vpop.f32.mrb[81].mxu0 }
0x30c1   :  { %v9222_v47 = vpop.f32.mrb[82].mxu0 }
0x30c2   :  { %v9272_v63 = vmul.f32 0.70710677, %v9220_v39  ;;  %v9223_v42 = vadd.f32 %v17582_v34, %v9222_v47  ;;  %v12070_v14 = vpop.f32.mrb[83].mxu0  ;;  %v9254_v12 = vmul.f32 0.5, %v9220_v39 }
0x30c4   :  { %v12951_v24 = vpop.eup %12950  ;;  %12954 = verf.f32 %v9272_v63  ;;  %v9273_v45 = vmul.f32 0.70710677, %v9223_v42  ;;  %v9255_v43 = vmul.f32 0.5, %v9223_v42  ;;  %v9500_v63 = vld [vmem:[%s17788_s8 + $0xe] sm:$0x1] }
0x30c5   :  { %v9306_v22 = vadd.f32 1.0, %v12951_v24 }
0x30c6   :  { %v12953_v46 = vpop.eup %12952  ;;  %12956 = verf.f32 %v9273_v45  ;;  %v9501_v45 = vld [vmem:[%s17788_s8 + $0xf] sm:$0x1] }
0x30c7   :  { %v9307_v28 = vadd.f32 1.0, %v12953_v46  ;;  %v9227_v60 = vpop.f32.mrb[84].mxu0  ;;  %v9324_v54 = vmul.f32 %v9306_v22, %v9252_v41 }
0x30c8   :  { %v9228_v21 = vadd.f32 %v17582_v34, %v9227_v60  ;;  %v12073_v37 = vpop.f32.mrb[85].mxu0 }
0x30c9   :  { %v9325_v19 = vmul.f32 %v9307_v28, %v9253_v61  ;;  %v9230_v59 = vpop.f32.mrb[86].mxu0  ;;  %v12173_v28 = vld [vmem:[%s17792_s7 + $0x8] sm:$0xff]  }
0x30ca   :  { %v9274_v49 = vmul.f32 0.70710677, %v9228_v21  ;;  %v9231_v36 = vadd.f32 %v17582_v34, %v9230_v59  ;;  %v12074_v11 = vpop.f32.mrb[87].mxu0 }
0x30cb   :  { %v9346_v56 = vpack.c.bf16 %v9325_v19, %v9324_v54  ;;  %v9580_v19 = vld [vmem:[%s17788_s8 + $0xe] sm:$0x1] }
0x30cc   :  { %12958 = verf.f32 %v9274_v49  ;;  %v9275_v53 = vmul.f32 0.70710677, %v9231_v36  ;;  %v9257_v6 = vmul.f32 0.5, %v9231_v36  ;;  %v9581_v49 = vld [vmem:[%s17788_s8 + $0xf] sm:$0x1] }
0x30cd   :  { %12108 = vmatmul.mubr.msk.bf16.gmra.mrb[80].mxu1 %vm4713_vm8, %v9346_v56 }
0x30ce   :  { %v12955_v5 = vpop.eup %12954  ;;  %12960 = verf.f32 %v9275_v53  ;;  %12111 = vmatprep.mubr.msk.bf16.mxu1 %vm12971_vm1, %v17814_v9 }
0x30cf   :  { %v9308_v35 = vadd.f32 1.0, %v12955_v5  ;;  %v9235_v18 = vpop.f32.mrb[88].mxu0 }
0x30d0   :  { %v12957_v10 = vpop.eup %12956  ;;  %v9236_v20 = vadd.f32 %v17582_v34, %v9235_v18  ;;  %v9584_v26 = vpop.xlane.xlu1 %9583 }
0x30d1   :  { %v12077_v38 = vpop.f32.mrb[89].mxu0  ;;  %v9309_v33 = vadd.f32 1.0, %v12957_v10  ;;  %v9585_v13 = vmul.f32 0.03125, %v9584_v26  ;;  %v9326_v30 = vmul.f32 %v9308_v35, %v9254_v12 }
0x30d2   :  { %v9238_v25 = vpop.f32.mrb[90].mxu0  ;;  %v9276_v50 = vmul.f32 0.70710677, %v9236_v20  ;;  %v9511_v0 = vpop.xlane.xlu0 %9510  ;;  %v9258_v39 = vmul.f32 0.5, %v9236_v20 }
0x30d3   :  { %v9239_v16 = vadd.f32 %v17582_v34, %v9238_v25  ;;  %v12078_v62 = vpop.f32.mrb[91].mxu0  ;;  %v9327_v17 = vmul.f32 %v9309_v33, %v9255_v43  ;;  %v9586_v15 = vsub.f32 %v17709_v2, %v9585_v13  ;;  %v9512_v57 = vmul.f32 0.03125, %v9511_v0 }
0x30d4   :  { %12962 = verf.f32 %v9276_v50  ;;  %v9256_v2 = vmul.f32 0.5, %v9228_v21  ;;  %v9523_v50 = vld [vmem:[%s17788_s8 + $0x10] sm:$0x1] }
0x30d5   :  { %v9277_v31 = vmul.f32 0.70710677, %v9239_v16  ;;  %v9347_v3 = vpack.c.bf16 %v9327_v17, %v9326_v30  ;;  %v9513_v27 = vadd.f32 1e-05, %v9512_v57  ;;  %v9587_v48 = vmul.f32 %v9586_v15, %v9586_v15 }
0x30d6   :  { %v12959_v1 = vpop.eup %12958  ;;  %v9259_v8 = vmul.f32 0.5, %v9239_v16 }
0x30d7   :  { %12964 = verf.f32 %v9277_v31  ;;  %v9310_v51 = vadd.f32 1.0, %v12959_v1  ;;  %12112 = vmatmul.mubr.msk.bf16.gmra.mrb[84].mxu1 %vm4713_vm8, %v9347_v3  ;;  %v9588_v34 = vsel %vm9502_vm9, %v9587_v48, 0.0  ;;  %v9602_v31 = vld [vmem:[%s17788_s8 + $0x10] sm:$0x1] }
0x30d8   :  { %12966 = vrsqrt.f32 %v9513_v27  ;;  %v12961_v32 = vpop.eup %12960  ;;  %9589 = vadd.xlane.f32.xlu1 %v9588_v34  ;;  %12115 = vmatprep.mubr.msk.bf16.mxu1 %vm12971_vm1, %v17814_v9 }
0x30d9   :  { %v9311_v23 = vadd.f32 1.0, %v12961_v32  ;;  %v9328_v58 = vmul.f32 %v9310_v51, %v9256_v2 }
0x30db   :  { %v9329_v29 = vmul.f32 %v9311_v23, %v9257_v6 }
0x30dd   :  { %v9348_v7 = vpack.c.bf16 %v9329_v29, %v9328_v58 }
0x30de   :  { %v12963_v55 = vpop.eup %12962 }
0x30df   :  { %v9312_v44 = vadd.f32 1.0, %v12963_v55  ;;  %12116 = vmatmul.mubr.msk.bf16.gmra.mrb[88].mxu1 %vm4713_vm8, %v9348_v7 }
0x30e0   :  { %12119 = vmatprep.mubr.msk.bf16.mxu1 %vm12971_vm1, %v17814_v9 }
0x30e1   :  { %v12965_v52 = vpop.eup %12964  ;;  %v9330_v14 = vmul.f32 %v9312_v44, %v9258_v39 }
0x30e2   :  { %v12967_v4 = vpop.eup %12966  ;;  %v9313_v47 = vadd.f32 1.0, %v12965_v52 }
0x30e3   :  { %v9515_v42 = vmul.f32 %v12967_v4, %v17706_v40  ;;  %v12172_v40 = vld [vmem:[%s17792_s7] sm:$0xff]  }
0x30e4   :  { %v9331_v24 = vmul.f32 %v9313_v47, %v9259_v8 }
0x30e5   :  { %v9516_v22 = vmul.f32 %v9515_v42, %v9500_v63 }
0x30e6   :  { %v9349_v46 = vpack.c.bf16 %v9331_v24, %v9330_v14 }
0x30e7   :  { %v9517_v41 = vadd.f32 %v9516_v22, %v9501_v45 }
0x30e8   :  { %12120 = vmatmul.mubr.msk.bf16.gmra.mrb[92].mxu1 %vm4713_vm8, %v9349_v46 }
0x30e9   :  { %v9522_v61 = vpack.c.bf16 %v9517_v41, %v9517_v41 }
0x30eb   :  { %12128 = vmatmul.mubr.msk.bf16.vlgmr.msra.gmra.mrb[92].mxu0 %vm224_vm3, %v9522_v61 }
0x30ec   :  { %12135 = vmatprep.mubr.msk.bf16.mxu0 %vm12971_vm1, %v17814_v9  ;;  %12132 = vmatpush3.bf16.msra.mxu0 %v12172_v40 }
0x30ed   :  { %12133 = vmatprep.subr.bf16.mxu0 %v17814_v9 }
0x30f0   :  { %12134 = vmatpush3.bf16.msra.mxu0 %v12173_v28 }
0x3165   :  { %v9590_v60 = vpop.xlane.xlu1 %9589 }
0x3166   :  { %v9591_v21 = vmul.f32 0.03125, %v9590_v60 }
0x3168   :  { %v9592_v37 = vadd.f32 1e-05, %v9591_v21 }
0x316a   :  { %12968 = vrsqrt.f32 %v9592_v37 }
0x3174   :  { %v12969_v54 = vpop.eup %12968 }
0x3175   :  { %v9594_v59 = vmul.f32 %v12969_v54, %v9586_v15 }
0x3177   :  { %v9595_v36 = vmul.f32 %v9594_v59, %v9580_v19 }
0x3179   :  { %v9596_v11 = vadd.f32 %v9595_v36, %v9581_v49 }
0x317b   :  { %v9601_v56 = vpack.c.bf16 %v9596_v11, %v9596_v11 }
0x317d   :  { %12136 = vmatmul.mubr.msk.bf16.vlgmr.msra.gmra.mrb[96].mxu0 %vm224_vm3, %v9601_v56 }
0x31a0   :  { %v9467_v9 = vpop.f32.mrb[80].mxu1 }
0x31a1   :  { %v12109_v53 = vpop.f32.mrb[81].mxu1 }
0x31a2   :  { %v9469_v5 = vpop.f32.mrb[82].mxu1 }
0x31a3   :  { %v12110_v35 = vpop.f32.mrb[83].mxu1 }
0x31aa   :  { %v9473_v18 = vpop.f32.mrb[84].mxu1 }
0x31ab   :  { %v12113_v10 = vpop.f32.mrb[85].mxu1 }
0x31ac   :  { %v9475_v20 = vpop.f32.mrb[86].mxu1 }
0x31ad   :  { %v12114_v26 = vpop.f32.mrb[87].mxu1 }
0x31b2   :  { %v9479_v38 = vpop.f32.mrb[88].mxu1 }
0x31b3   :  { %v12117_v12 = vpop.f32.mrb[89].mxu1 }
0x31b4   :  { %v9481_v43 = vpop.f32.mrb[90].mxu1 }
0x31b5   :  { %v12118_v33 = vpop.f32.mrb[91].mxu1 }
0x31bb   :  { %v9485_v13 = vpop.f32.mrb[92].mxu1 }
0x31bc   :  { %v12121_v25 = vpop.f32.mrb[93].mxu1 }
0x31bd   :  { %v9487_v16 = vpop.f32.mrb[94].mxu1 }
0x31be   :  { %v12122_v0 = vpop.f32.mrb[95].mxu1  ;;  %v9573_v62 = vpop.f32.mrb[92].mxu0 }
0x31bf   :  { %v9574_v30 = vadd.f32 %v9573_v62, %v9523_v50  ;;  %v12129_v17 = vpop.f32.mrb[93].mxu0 }
0x31c0   :  { %v9576_v15 = vpop.f32.mrb[94].mxu0 }
0x31c1   :  { %9579 = vst [vmem:[%s17793_s9] sm:$0x1] %v9574_v30  ;;  %v12130_v57 = vpop.f32.mrb[95].mxu0 }
0x3250   :  { %v9652_v3 = vpop.f32.mrb[96].mxu0 }
0x3251   :  { %v9653_v27 = vadd.f32 %v9652_v3, %v9602_v31  ;;  %v12137_v48 = vpop.f32.mrb[97].mxu0 }
0x3252   :  { %v9655_v1 = vpop.f32.mrb[98].mxu0 }
0x3253   :  { %9658 = vst [vmem:[%s17793_s9 + $0x1] sm:$0x1] %v9653_v27  ;;  %v12138_v51 = vpop.f32.mrb[99].mxu0 }

</bundles_post_ra>
